<compile_context>
chip_gen: v7x
topology: tpu7x:2x2x1
jax: 0.10.0
libtpu: 0.0.40
codegen_flags: <defaults>
</compile_context>

<pallas_src>
import functools

import jax
import jax.numpy as jnp
from jax.experimental import pallas as pl
from jax.experimental.pallas import tpu as pltpu


# -----------------------------------------------------------------------------
# Tiled GEMM + bias (+ReLU):  y = x @ w + b      (bf16 in, f32 accumulate)
# -----------------------------------------------------------------------------
def _matmul_bias_kernel(x_ref, w_ref, b_ref, o_ref, acc_ref, *, relu):
    k = pl.program_id(2)

    @pl.when(k == 0)
    def _init():
        acc_ref[...] = jnp.zeros_like(acc_ref)

    acc_ref[...] += jnp.dot(x_ref[...], w_ref[...],
                            preferred_element_type=jnp.float32)

    @pl.when(k == pl.num_programs(2) - 1)
    def _epilogue():
        out = acc_ref[...] + b_ref[...]
        if relu:
            out = jnp.maximum(out, 0.0)
        o_ref[...] = out.astype(o_ref.dtype)


def matmul_bias(x, w, b, *, relu, out_dtype=jnp.bfloat16, tm=256, tn=512):
    M, K = x.shape
    K2, N = w.shape
    assert K == K2 and b.shape == (N,)
    tm = min(tm, M)   # block == full M for small M (legal even when M % 8 != 0)
    tn = min(tn, N)   # N is 32/64/128/1024 here -> tn is full-N or a multiple of 128
    tk = K            # 3136 has no multiple-of-128 divisor; a full-K slab is < 8 MiB in bf16
    grid = (pl.cdiv(M, tm), pl.cdiv(N, tn), pl.cdiv(K, tk))
    kernel = functools.partial(_matmul_bias_kernel, relu=relu)
    return pl.pallas_call(
        kernel,
        grid_spec=pltpu.PrefetchScalarGridSpec(
            num_scalar_prefetch=0,
            grid=grid,
            in_specs=[
                pl.BlockSpec((tm, tk), lambda i, j, k: (i, k)),
                pl.BlockSpec((tk, tn), lambda i, j, k: (k, j)),
                pl.BlockSpec((1, tn), lambda i, j, k: (0, j)),
            ],
            out_specs=pl.BlockSpec((tm, tn), lambda i, j, k: (i, j)),
            scratch_shapes=[pltpu.VMEM((tm, tn), jnp.float32)],
        ),
        out_shape=jax.ShapeDtypeStruct((M, N), out_dtype),
        compiler_params=pltpu.CompilerParams(
            dimension_semantics=("parallel", "parallel", "arbitrary"),
            vmem_limit_bytes=32 * 1024 * 1024,
        ),
    )(x.astype(jnp.bfloat16), w.astype(jnp.bfloat16),
      b.astype(jnp.float32).reshape(1, N))


# -----------------------------------------------------------------------------
# Fused second head layer (block-diagonal [aw2|vw2], N padded to 128) + dueling
# combine in the epilogue:  Q = V + A - mean(A)   (global mean over batch+actions)
# -----------------------------------------------------------------------------
def _head2_dueling_kernel(h_ref, w_ref, b_ref, q_ref, *, num_actions):
    av = jnp.dot(h_ref[...], w_ref[...], preferred_element_type=jnp.float32)
    av = av + b_ref[...]
    a = av[:, :num_actions]
    v = av[:, num_actions:num_actions + 1]
    # PyTorch `.mean()` with no dim => global mean over (batch, actions).
    mean_a = jnp.sum(a) / (a.shape[0] * a.shape[1])
    q_ref[...] = (v + a - mean_a).astype(q_ref.dtype)


def head2_dueling(h, w2, b2, *, num_actions):
    B, K = h.shape
    K2, N = w2.shape
    assert K == K2 and b2.shape == (N,)
    # Whole batch in one block: the dueling mean is global over (batch, actions), and even a
    # large DQN batch is only a few MiB of bf16 activations here.
    kernel = functools.partial(_head2_dueling_kernel, num_actions=num_actions)
    return pl.pallas_call(
        kernel,
        grid=(1,),
        out_shape=jax.ShapeDtypeStruct((B, num_actions), jnp.float32),
        in_specs=[
            pl.BlockSpec((B, K), lambda i: (0, 0)),
            pl.BlockSpec((K, N), lambda i: (0, 0)),
            pl.BlockSpec((1, N), lambda i: (0, 0)),
        ],
        out_specs=pl.BlockSpec((B, num_actions), lambda i: (0, 0)),
        compiler_params=pltpu.CompilerParams(vmem_limit_bytes=32 * 1024 * 1024),
    )(h.astype(jnp.bfloat16), w2.astype(jnp.bfloat16),
      b2.astype(jnp.float32).reshape(1, N))


# -----------------------------------------------------------------------------
# Convs = im2col (JAX glue) + Pallas GEMM
# -----------------------------------------------------------------------------
def im2col(x_nhwc, k, stride):
    """Extract (k,k) patches -> (B*Ho*Wo, k*k*C), column order (kh, kw, cin)."""
    # TODO(synk): patch extraction stays as XLA strided-slice glue; an in-kernel im2col
    # (strided VMEM gathers) would remove the 4-9x HBM im2col blow-up at large batch.
    B, H, W, C = x_nhwc.shape
    Ho = (H - k) // stride + 1
    Wo = (W - k) // stride + 1
    patches = []
    for i in range(k):
        for j in range(k):
            patches.append(
                x_nhwc[:, i:i + Ho * stride:stride, j:j + Wo * stride:stride, :])
    p = jnp.stack(patches, axis=3)            # (B, Ho, Wo, k*k, C)
    return p.reshape(B * Ho * Wo, k * k * C), Ho, Wo


def conv2d_relu(x_nhwc, w_mat, b, k, stride):
    """Conv(+bias+ReLU) as im2col + tiled Pallas GEMM. w_mat is (k*k*cin, cout)."""
    B = x_nhwc.shape[0]
    cols, Ho, Wo = im2col(x_nhwc, k, stride)
    out = matmul_bias(cols, w_mat, b, relu=True, out_dtype=jnp.bfloat16)
    return out.reshape(B, Ho, Wo, w_mat.shape[1])


# -----------------------------------------------------------------------------
# Parameters: canonical f32 PyTorch layouts + one-time bf16 packing for the kernels
# -----------------------------------------------------------------------------
def init_params(key, in_channels, num_actions):
    ks = jax.random.split(key, 7)

    def kaiming(k, shape, fan_in):
        # nn.init.kaiming_normal_ default: gain=sqrt(2), std=gain/sqrt(fan_in)
        std = (2.0 / fan_in) ** 0.5
        return jax.random.normal(k, shape, jnp.float32) * std

    return {
        # conv weights in PyTorch OIHW layout
        "w1": kaiming(ks[0], (32, in_channels, 8, 8), in_channels * 64),
        "b1": jnp.zeros((32,), jnp.float32),
        "w2": kaiming(ks[1], (64, 32, 4, 4), 32 * 16),
        "b2": jnp.zeros((64,), jnp.float32),
        "w3": kaiming(ks[2], (64, 64, 3, 3), 64 * 9),
        "b3": jnp.zeros((64,), jnp.float32),
        # linear weights in PyTorch (out, in) layout
        "aw1": kaiming(ks[3], (512, 3136), 3136),
        "ab1": jnp.zeros((512,), jnp.float32),
        "aw2": kaiming(ks[4], (num_actions, 512), 512),
        "ab2": jnp.zeros((num_actions,), jnp.float32),
        "vw1": kaiming(ks[5], (512, 3136), 3136),
        "vb1": jnp.zeros((512,), jnp.float32),
        "vw2": kaiming(ks[6], (1, 512), 512),
        "vb2": jnp.zeros((1,), jnp.float32),
    }


def pack_params(p, num_actions, conv_hw=(7, 7), conv_c=64):
    """One-time host-side repack: bf16 cast, head fusion, NCHW->NHWC row permutation."""
    def conv_mat(w_oihw):
        cout, cin, kh, kw = w_oihw.shape
        # column order of im2col is (kh, kw, cin) -> rows of the GEMM weight match it
        return jnp.transpose(w_oihw, (2, 3, 1, 0)).reshape(kh * kw * cin, cout).astype(jnp.bfloat16)

    Hc, Wc = conv_hw

    def head1_mat(w_out_in):
        # (out, 3136) with input features in PyTorch NCHW-flatten order (c, h, w);
        # permute rows to NHWC-flatten order (h, w, c) so no transpose is needed at runtime.
        out_dim = w_out_in.shape[0]
        w = w_out_in.reshape(out_dim, conv_c, Hc, Wc)      # (out, c, h, w)
        w = jnp.transpose(w, (2, 3, 1, 0))                 # (h, w, c, out)
        return w.reshape(conv_c * Hc * Wc, out_dim)

    hw1 = jnp.concatenate([head1_mat(p["aw1"]), head1_mat(p["vw1"])],
                          axis=1).astype(jnp.bfloat16)     # (3136, 1024)
    hb1 = jnp.concatenate([p["ab1"], p["vb1"]], axis=0)    # (1024,)

    na = num_actions
    n_pad = 128                                            # lane-dense second-head output
    assert na + 1 <= n_pad
    hw2 = jnp.zeros((1024, n_pad), jnp.float32)
    hw2 = hw2.at[:512, :na].set(p["aw2"].T)                # A head uses first 512 hidden units
    hw2 = hw2.at[512:, na:na + 1].set(p["vw2"].T)          # V head uses last 512 hidden units
    hb2 = jnp.zeros((n_pad,), jnp.float32)
    hb2 = hb2.at[:na].set(p["ab2"])
    hb2 = hb2.at[na].set(p["vb2"][0])

    return {
        "w1": conv_mat(p["w1"]), "b1": p["b1"],
        "w2": conv_mat(p["w2"]), "b2": p["b2"],
        "w3": conv_mat(p["w3"]), "b3": p["b3"],
        "hw1": hw1, "hb1": hb1,
        "hw2": hw2.astype(jnp.bfloat16), "hb2": hb2,
    }


# -----------------------------------------------------------------------------
# Forward pass
# -----------------------------------------------------------------------------
def dqn_forward(packed, x_nchw, *, num_actions):
    B = x_nchw.shape[0]
    # NCHW -> NHWC once at the input; conv activations stay NHWC/bf16 throughout.
    x = jnp.transpose(x_nchw, (0, 2, 3, 1)).astype(jnp.bfloat16)
    x = conv2d_relu(x, packed["w1"], packed["b1"], 8, 4)   # (B, 20, 20, 32)
    x = conv2d_relu(x, packed["w2"], packed["b2"], 4, 2)   # (B, 9, 9, 64)
    x = conv2d_relu(x, packed["w3"], packed["b3"], 3, 1)   # (B, 7, 7, 64)
    # Free NHWC flatten: fc1 weight rows were permuted at pack time, so this matches
    # PyTorch's x.reshape(B, -1) on NCHW tensors without a transpose copy in HBM.
    feats = x.reshape(B, -1)                               # (B, 3136)
    # Fused A/V fc1: one lane-dense (3136 -> 1024) GEMM + ReLU.
    h = matmul_bias(feats, packed["hw1"], packed["hb1"], relu=True,
                    out_dtype=jnp.bfloat16)                # (B, 1024)
    # Fused A/V fc2 (block-diagonal, N padded to 128) + dueling combine epilogue.
    return head2_dueling(h, packed["hw2"], packed["hb2"], num_actions=num_actions)


# -----------------------------------------------------------------------------
# Pure-JAX f32 reference (mirrors the PyTorch module exactly) for validation
# -----------------------------------------------------------------------------
def dqn_reference(p, x):
    y = x
    for w, b, s in ((p["w1"], p["b1"], 4), (p["w2"], p["b2"], 2), (p["w3"], p["b3"], 1)):
        y = jax.lax.conv_general_dilated(
            y, w, (s, s), "VALID", dimension_numbers=("NCHW", "OIHW", "NCHW"))
        y = jnp.maximum(y + b[None, :, None, None], 0.0)
    f = y.reshape(y.shape[0], -1)
    a = jnp.maximum(f @ p["aw1"].T + p["ab1"], 0.0) @ p["aw2"].T + p["ab2"]
    v = jnp.maximum(f @ p["vw1"].T + p["vb1"], 0.0) @ p["vw2"].T + p["vb2"]
    return v + a - a.mean()


if __name__ == "__main__":
    key = jax.random.PRNGKey(0)
    k_params, k_x = jax.random.split(key)

    # 84x84 spatial is forced by the hard-coded 3136 (= 64*7*7) linear input.
    B, C, H, W = 2, 4, 84, 84
    num_actions = 6

    params = init_params(k_params, C, num_actions)
    packed = pack_params(params, num_actions)
    x = jax.random.normal(k_x, (B, C, H, W), jnp.float32)

    fwd = jax.jit(functools.partial(dqn_forward, num_actions=num_actions))
    q = fwd(packed, x)
    jax.block_until_ready(q)
    assert q.shape == (B, num_actions)
    assert q.dtype == jnp.float32

    # Tolerance check vs the f32 reference (bf16 operands / f32 accumulation in the kernels).
    q_ref = dqn_reference(params, x)
    max_err = float(jnp.max(jnp.abs(q - q_ref)))
    assert max_err < 0.5, f"max |q - q_ref| = {max_err}"

    print("KERNEL_OK")
</pallas_src>

<mosaic_0001>
module attributes {stable_mosaic.version = 11 : i64} {
  func.func @_matmul_bias_kernel(%arg0: i32, %arg1: i32, %arg2: i32, %arg3: memref<256x256xbf16, #tpu.memory_space<vmem>>, %arg4: memref<256x32xbf16, #tpu.memory_space<vmem>>, %arg5: memref<1x32xf32, #tpu.memory_space<vmem>>, %arg6: memref<256x32xbf16, #tpu.memory_space<vmem>>, %arg7: memref<256x32xf32, #tpu.memory_space<vmem>>) attributes {dimension_semantics = [#tpu.dimension_semantics<parallel>, #tpu.dimension_semantics<parallel>, #tpu.dimension_semantics<arbitrary>], iteration_bounds = array<i64: 4, 1, 1>, scalar_prefetch = 0 : i64, scratch_operands = 1 : i64, tpu.core_type = #tpu.core_type<tc>, window_params = [{transform_indices = @transform_0, window_bounds = array<i64: 256, 256>}, {transform_indices = @transform_1, window_bounds = array<i64: 256, 32>}, {transform_indices = @transform_2, window_bounds = array<i64: 1, 32>}, {transform_indices = @transform_3, window_bounds = array<i64: 256, 32>}]} {
    %c0_i32 = arith.constant 0 : i32
    %0 = arith.cmpi eq, %arg2, %c0_i32 : i32
    %1 = arith.extui %0 : i1 to i32
    %c0_i32_0 = arith.constant 0 : i32
    %2 = arith.cmpi ne, %1, %c0_i32_0 : i32
    scf.if %2 {
      %cst_10 = arith.constant 0.000000e+00 : f32
      %12 = vector.broadcast %cst_10 : f32 to vector<256x32xf32>
      %c0_11 = arith.constant 0 : index
      %c0_12 = arith.constant 0 : index
      %13 = vector.load %arg7[%c0_11, %c0_12] : memref<256x32xf32, #tpu.memory_space<vmem>>, vector<256x32xf32>
      tpu.vector_store %arg7[%c0_11, %c0_12], %12 {strides = array<i32>} : memref<256x32xf32, #tpu.memory_space<vmem>>, vector<256x32xf32>,
    } else {
    }
    %c0 = arith.constant 0 : index
    %c0_1 = arith.constant 0 : index
    %3 = vector.load %arg7[%c0, %c0_1] : memref<256x32xf32, #tpu.memory_space<vmem>>, vector<256x32xf32>
    %c0_2 = arith.constant 0 : index
    %c0_3 = arith.constant 0 : index
    %4 = vector.load %arg3[%c0_2, %c0_3] : memref<256x256xbf16, #tpu.memory_space<vmem>>, vector<256x256xbf16>
    %c0_4 = arith.constant 0 : index
    %c0_5 = arith.constant 0 : index
    %5 = vector.load %arg4[%c0_4, %c0_5] : memref<256x32xbf16, #tpu.memory_space<vmem>>, vector<256x32xbf16>
    %cst = arith.constant dense<0.000000e+00> : vector<256x32xf32>
    %6 = tpu.matmul %4, %5, %cst {dimension_numbers = #tpu.dot_dimension_numbers<[1], [0], [0], [1], [0, 0, 1, 1], [], []>} : vector<256x256xbf16>, vector<256x32xbf16>, vector<256x32xf32> -> vector<256x32xf32>
    %7 = arith.addf %3, %6 : vector<256x32xf32>
    %c0_6 = arith.constant 0 : index
    %c0_7 = arith.constant 0 : index
    %8 = vector.load %arg7[%c0_6, %c0_7] : memref<256x32xf32, #tpu.memory_space<vmem>>, vector<256x32xf32>
    tpu.vector_store %arg7[%c0_6, %c0_7], %7 {strides = array<i32>} : memref<256x32xf32, #tpu.memory_space<vmem>>, vector<256x32xf32>,
    %c0_i32_8 = arith.constant 0 : i32
    %9 = arith.cmpi eq, %arg2, %c0_i32_8 : i32
    %10 = arith.extui %9 : i1 to i32
    %c0_i32_9 = arith.constant 0 : i32
    %11 = arith.cmpi ne, %10, %c0_i32_9 : i32
    scf.if %11 {
      %c0_10 = arith.constant 0 : index
      %c0_11 = arith.constant 0 : index
      %12 = vector.load %arg7[%c0_10, %c0_11] : memref<256x32xf32, #tpu.memory_space<vmem>>, vector<256x32xf32>
      %c0_12 = arith.constant 0 : index
      %c0_13 = arith.constant 0 : index
      %13 = vector.load %arg5[%c0_12, %c0_13] : memref<1x32xf32, #tpu.memory_space<vmem>>, vector<1x32xf32>
      %14 = vector.broadcast %13 : vector<1x32xf32> to vector<256x32xf32>
      %15 = arith.addf %12, %14 : vector<256x32xf32>
      %cst_14 = arith.constant 0.000000e+00 : f32
      %16 = vector.broadcast %cst_14 : f32 to vector<256x32xf32>
      %17 = arith.maximumf %15, %16 : vector<256x32xf32>
      %18 = arith.truncf %17 : vector<256x32xf32> to vector<256x32xbf16>
      %c0_15 = arith.constant 0 : index
      %c0_16 = arith.constant 0 : index
      %19 = vector.load %arg6[%c0_15, %c0_16] : memref<256x32xbf16, #tpu.memory_space<vmem>>, vector<256x32xbf16>
      tpu.vector_store %arg6[%c0_15, %c0_16], %18 {strides = array<i32>} : memref<256x32xbf16, #tpu.memory_space<vmem>>, vector<256x32xbf16>,
    } else {
    }
    return
  }
  func.func @transform_0(%arg0: i32, %arg1: i32, %arg2: i32) -> (i32, i32) {
    %c0_i32 = arith.constant 0 : i32
    return %arg0, %arg2 : i32, i32
  }
  func.func @transform_1(%arg0: i32, %arg1: i32, %arg2: i32) -> (i32, i32) {
    %c0_i32 = arith.constant 0 : i32
    return %arg2, %arg1 : i32, i32
  }
  func.func @transform_2(%arg0: i32, %arg1: i32, %arg2: i32) -> (i32, i32) {
    %c0_i32 = arith.constant 0 : i32
    %c0_i32_0 = arith.constant 0 : i32
    return %c0_i32, %arg1 : i32, i32
  }
  func.func @transform_3(%arg0: i32, %arg1: i32, %arg2: i32) -> (i32, i32) {
    %c0_i32 = arith.constant 0 : i32
    return %arg0, %arg1 : i32, i32
  }
}

module attributes {stable_mosaic.version = 11 : i64} {
  func.func @_matmul_bias_kernel(%arg0: i32, %arg1: i32, %arg2: i32, %arg3: memref<162x512xbf16, #tpu.memory_space<vmem>>, %arg4: memref<512x64xbf16, #tpu.memory_space<vmem>>, %arg5: memref<1x64xf32, #tpu.memory_space<vmem>>, %arg6: memref<162x64xbf16, #tpu.memory_space<vmem>>, %arg7: memref<162x64xf32, #tpu.memory_space<vmem>>) attributes {dimension_semantics = [#tpu.dimension_semantics<parallel>, #tpu.dimension_semantics<parallel>, #tpu.dimension_semantics<arbitrary>], iteration_bounds = array<i64: 1, 1, 1>, scalar_prefetch = 0 : i64, scratch_operands = 1 : i64, tpu.core_type = #tpu.core_type<tc>, window_params = [{transform_indices = @transform_0, window_bounds = array<i64: 162, 512>}, {transform_indices = @transform_1, window_bounds = array<i64: 512, 64>}, {transform_indices = @transform_2, window_bounds = array<i64: 1, 64>}, {transform_indices = @transform_3, window_bounds = array<i64: 162, 64>}]} {
    %c0_i32 = arith.constant 0 : i32
    %0 = arith.cmpi eq, %arg2, %c0_i32 : i32
    %1 = arith.extui %0 : i1 to i32
    %c0_i32_0 = arith.constant 0 : i32
    %2 = arith.cmpi ne, %1, %c0_i32_0 : i32
    scf.if %2 {
      %cst_10 = arith.constant 0.000000e+00 : f32
      %12 = vector.broadcast %cst_10 : f32 to vector<162x64xf32>
      %c0_11 = arith.constant 0 : index
      %c0_12 = arith.constant 0 : index
      %13 = vector.load %arg7[%c0_11, %c0_12] : memref<162x64xf32, #tpu.memory_space<vmem>>, vector<162x64xf32>
      tpu.vector_store %arg7[%c0_11, %c0_12], %12 {strides = array<i32>} : memref<162x64xf32, #tpu.memory_space<vmem>>, vector<162x64xf32>,
    } else {
    }
    %c0 = arith.constant 0 : index
    %c0_1 = arith.constant 0 : index
    %3 = vector.load %arg7[%c0, %c0_1] : memref<162x64xf32, #tpu.memory_space<vmem>>, vector<162x64xf32>
    %c0_2 = arith.constant 0 : index
    %c0_3 = arith.constant 0 : index
    %4 = vector.load %arg3[%c0_2, %c0_3] : memref<162x512xbf16, #tpu.memory_space<vmem>>, vector<162x512xbf16>
    %c0_4 = arith.constant 0 : index
    %c0_5 = arith.constant 0 : index
    %5 = vector.load %arg4[%c0_4, %c0_5] : memref<512x64xbf16, #tpu.memory_space<vmem>>, vector<512x64xbf16>
    %cst = arith.constant dense<0.000000e+00> : vector<162x64xf32>
    %6 = tpu.matmul %4, %5, %cst {dimension_numbers = #tpu.dot_dimension_numbers<[1], [0], [0], [1], [0, 0, 1, 1], [], []>} : vector<162x512xbf16>, vector<512x64xbf16>, vector<162x64xf32> -> vector<162x64xf32>
    %7 = arith.addf %3, %6 : vector<162x64xf32>
    %c0_6 = arith.constant 0 : index
    %c0_7 = arith.constant 0 : index
    %8 = vector.load %arg7[%c0_6, %c0_7] : memref<162x64xf32, #tpu.memory_space<vmem>>, vector<162x64xf32>
    tpu.vector_store %arg7[%c0_6, %c0_7], %7 {strides = array<i32>} : memref<162x64xf32, #tpu.memory_space<vmem>>, vector<162x64xf32>,
    %c0_i32_8 = arith.constant 0 : i32
    %9 = arith.cmpi eq, %arg2, %c0_i32_8 : i32
    %10 = arith.extui %9 : i1 to i32
    %c0_i32_9 = arith.constant 0 : i32
    %11 = arith.cmpi ne, %10, %c0_i32_9 : i32
    scf.if %11 {
      %c0_10 = arith.constant 0 : index
      %c0_11 = arith.constant 0 : index
      %12 = vector.load %arg7[%c0_10, %c0_11] : memref<162x64xf32, #tpu.memory_space<vmem>>, vector<162x64xf32>
      %c0_12 = arith.constant 0 : index
      %c0_13 = arith.constant 0 : index
      %13 = vector.load %arg5[%c0_12, %c0_13] : memref<1x64xf32, #tpu.memory_space<vmem>>, vector<1x64xf32>
      %14 = vector.broadcast %13 : vector<1x64xf32> to vector<162x64xf32>
      %15 = arith.addf %12, %14 : vector<162x64xf32>
      %cst_14 = arith.constant 0.000000e+00 : f32
      %16 = vector.broadcast %cst_14 : f32 to vector<162x64xf32>
      %17 = arith.maximumf %15, %16 : vector<162x64xf32>
      %18 = arith.truncf %17 : vector<162x64xf32> to vector<162x64xbf16>
      %c0_15 = arith.constant 0 : index
      %c0_16 = arith.constant 0 : index
      %19 = vector.load %arg6[%c0_15, %c0_16] : memref<162x64xbf16, #tpu.memory_space<vmem>>, vector<162x64xbf16>
      tpu.vector_store %arg6[%c0_15, %c0_16], %18 {strides = array<i32>} : memref<162x64xbf16, #tpu.memory_space<vmem>>, vector<162x64xbf16>,
    } else {
    }
    return
  }
  func.func @transform_0(%arg0: i32, %arg1: i32, %arg2: i32) -> (i32, i32) {
    %c0_i32 = arith.constant 0 : i32
    return %arg0, %arg2 : i32, i32
  }
  func.func @transform_1(%arg0: i32, %arg1: i32, %arg2: i32) -> (i32, i32) {
    %c0_i32 = arith.constant 0 : i32
    return %arg2, %arg1 : i32, i32
  }
  func.func @transform_2(%arg0: i32, %arg1: i32, %arg2: i32) -> (i32, i32) {
    %c0_i32 = arith.constant 0 : i32
    %c0_i32_0 = arith.constant 0 : i32
    return %c0_i32, %arg1 : i32, i32
  }
  func.func @transform_3(%arg0: i32, %arg1: i32, %arg2: i32) -> (i32, i32) {
    %c0_i32 = arith.constant 0 : i32
    return %arg0, %arg1 : i32, i32
  }
}

module attributes {stable_mosaic.version = 11 : i64} {
  func.func @_matmul_bias_kernel(%arg0: i32, %arg1: i32, %arg2: i32, %arg3: memref<98x576xbf16, #tpu.memory_space<vmem>>, %arg4: memref<576x64xbf16, #tpu.memory_space<vmem>>, %arg5: memref<1x64xf32, #tpu.memory_space<vmem>>, %arg6: memref<98x64xbf16, #tpu.memory_space<vmem>>, %arg7: memref<98x64xf32, #tpu.memory_space<vmem>>) attributes {dimension_semantics = [#tpu.dimension_semantics<parallel>, #tpu.dimension_semantics<parallel>, #tpu.dimension_semantics<arbitrary>], iteration_bounds = array<i64: 1, 1, 1>, scalar_prefetch = 0 : i64, scratch_operands = 1 : i64, tpu.core_type = #tpu.core_type<tc>, window_params = [{transform_indices = @transform_0, window_bounds = array<i64: 98, 576>}, {transform_indices = @transform_1, window_bounds = array<i64: 576, 64>}, {transform_indices = @transform_2, window_bounds = array<i64: 1, 64>}, {transform_indices = @transform_3, window_bounds = array<i64: 98, 64>}]} {
    %c0_i32 = arith.constant 0 : i32
    %0 = arith.cmpi eq, %arg2, %c0_i32 : i32
    %1 = arith.extui %0 : i1 to i32
    %c0_i32_0 = arith.constant 0 : i32
    %2 = arith.cmpi ne, %1, %c0_i32_0 : i32
    scf.if %2 {
      %cst_10 = arith.constant 0.000000e+00 : f32
      %12 = vector.broadcast %cst_10 : f32 to vector<98x64xf32>
      %c0_11 = arith.constant 0 : index
      %c0_12 = arith.constant 0 : index
      %13 = vector.load %arg7[%c0_11, %c0_12] : memref<98x64xf32, #tpu.memory_space<vmem>>, vector<98x64xf32>
      tpu.vector_store %arg7[%c0_11, %c0_12], %12 {strides = array<i32>} : memref<98x64xf32, #tpu.memory_space<vmem>>, vector<98x64xf32>,
    } else {
    }
    %c0 = arith.constant 0 : index
    %c0_1 = arith.constant 0 : index
    %3 = vector.load %arg7[%c0, %c0_1] : memref<98x64xf32, #tpu.memory_space<vmem>>, vector<98x64xf32>
    %c0_2 = arith.constant 0 : index
    %c0_3 = arith.constant 0 : index
    %4 = vector.load %arg3[%c0_2, %c0_3] : memref<98x576xbf16, #tpu.memory_space<vmem>>, vector<98x576xbf16>
    %c0_4 = arith.constant 0 : index
    %c0_5 = arith.constant 0 : index
    %5 = vector.load %arg4[%c0_4, %c0_5] : memref<576x64xbf16, #tpu.memory_space<vmem>>, vector<576x64xbf16>
    %cst = arith.constant dense<0.000000e+00> : vector<98x64xf32>
    %6 = tpu.matmul %4, %5, %cst {dimension_numbers = #tpu.dot_dimension_numbers<[1], [0], [0], [1], [0, 0, 1, 1], [], []>} : vector<98x576xbf16>, vector<576x64xbf16>, vector<98x64xf32> -> vector<98x64xf32>
    %7 = arith.addf %3, %6 : vector<98x64xf32>
    %c0_6 = arith.constant 0 : index
    %c0_7 = arith.constant 0 : index
    %8 = vector.load %arg7[%c0_6, %c0_7] : memref<98x64xf32, #tpu.memory_space<vmem>>, vector<98x64xf32>
    tpu.vector_store %arg7[%c0_6, %c0_7], %7 {strides = array<i32>} : memref<98x64xf32, #tpu.memory_space<vmem>>, vector<98x64xf32>,
    %c0_i32_8 = arith.constant 0 : i32
    %9 = arith.cmpi eq, %arg2, %c0_i32_8 : i32
    %10 = arith.extui %9 : i1 to i32
    %c0_i32_9 = arith.constant 0 : i32
    %11 = arith.cmpi ne, %10, %c0_i32_9 : i32
    scf.if %11 {
      %c0_10 = arith.constant 0 : index
      %c0_11 = arith.constant 0 : index
      %12 = vector.load %arg7[%c0_10, %c0_11] : memref<98x64xf32, #tpu.memory_space<vmem>>, vector<98x64xf32>
      %c0_12 = arith.constant 0 : index
      %c0_13 = arith.constant 0 : index
      %13 = vector.load %arg5[%c0_12, %c0_13] : memref<1x64xf32, #tpu.memory_space<vmem>>, vector<1x64xf32>
      %14 = vector.broadcast %13 : vector<1x64xf32> to vector<98x64xf32>
      %15 = arith.addf %12, %14 : vector<98x64xf32>
      %cst_14 = arith.constant 0.000000e+00 : f32
      %16 = vector.broadcast %cst_14 : f32 to vector<98x64xf32>
      %17 = arith.maximumf %15, %16 : vector<98x64xf32>
      %18 = arith.truncf %17 : vector<98x64xf32> to vector<98x64xbf16>
      %c0_15 = arith.constant 0 : index
      %c0_16 = arith.constant 0 : index
      %19 = vector.load %arg6[%c0_15, %c0_16] : memref<98x64xbf16, #tpu.memory_space<vmem>>, vector<98x64xbf16>
      tpu.vector_store %arg6[%c0_15, %c0_16], %18 {strides = array<i32>} : memref<98x64xbf16, #tpu.memory_space<vmem>>, vector<98x64xbf16>,
    } else {
    }
    return
  }
  func.func @transform_0(%arg0: i32, %arg1: i32, %arg2: i32) -> (i32, i32) {
    %c0_i32 = arith.constant 0 : i32
    return %arg0, %arg2 : i32, i32
  }
  func.func @transform_1(%arg0: i32, %arg1: i32, %arg2: i32) -> (i32, i32) {
    %c0_i32 = arith.constant 0 : i32
    return %arg2, %arg1 : i32, i32
  }
  func.func @transform_2(%arg0: i32, %arg1: i32, %arg2: i32) -> (i32, i32) {
    %c0_i32 = arith.constant 0 : i32
    %c0_i32_0 = arith.constant 0 : i32
    return %c0_i32, %arg1 : i32, i32
  }
  func.func @transform_3(%arg0: i32, %arg1: i32, %arg2: i32) -> (i32, i32) {
    %c0_i32 = arith.constant 0 : i32
    return %arg0, %arg1 : i32, i32
  }
}

module attributes {stable_mosaic.version = 11 : i64} {
  func.func @_matmul_bias_kernel(%arg0: i32, %arg1: i32, %arg2: i32, %arg3: memref<2x3136xbf16, #tpu.memory_space<vmem>>, %arg4: memref<3136x512xbf16, #tpu.memory_space<vmem>>, %arg5: memref<1x512xf32, #tpu.memory_space<vmem>>, %arg6: memref<2x512xbf16, #tpu.memory_space<vmem>>, %arg7: memref<2x512xf32, #tpu.memory_space<vmem>>) attributes {dimension_semantics = [#tpu.dimension_semantics<parallel>, #tpu.dimension_semantics<parallel>, #tpu.dimension_semantics<arbitrary>], iteration_bounds = array<i64: 1, 2, 1>, scalar_prefetch = 0 : i64, scratch_operands = 1 : i64, tpu.core_type = #tpu.core_type<tc>, window_params = [{transform_indices = @transform_0, window_bounds = array<i64: 2, 3136>}, {transform_indices = @transform_1, window_bounds = array<i64: 3136, 512>}, {transform_indices = @transform_2, window_bounds = array<i64: 1, 512>}, {transform_indices = @transform_3, window_bounds = array<i64: 2, 512>}]} {
    %c0_i32 = arith.constant 0 : i32
    %0 = arith.cmpi eq, %arg2, %c0_i32 : i32
    %1 = arith.extui %0 : i1 to i32
    %c0_i32_0 = arith.constant 0 : i32
    %2 = arith.cmpi ne, %1, %c0_i32_0 : i32
    scf.if %2 {
      %cst_10 = arith.constant 0.000000e+00 : f32
      %12 = vector.broadcast %cst_10 : f32 to vector<2x512xf32>
      %c0_11 = arith.constant 0 : index
      %c0_12 = arith.constant 0 : index
      %13 = vector.load %arg7[%c0_11, %c0_12] : memref<2x512xf32, #tpu.memory_space<vmem>>, vector<2x512xf32>
      tpu.vector_store %arg7[%c0_11, %c0_12], %12 {strides = array<i32>} : memref<2x512xf32, #tpu.memory_space<vmem>>, vector<2x512xf32>,
    } else {
    }
    %c0 = arith.constant 0 : index
    %c0_1 = arith.constant 0 : index
    %3 = vector.load %arg7[%c0, %c0_1] : memref<2x512xf32, #tpu.memory_space<vmem>>, vector<2x512xf32>
    %c0_2 = arith.constant 0 : index
    %c0_3 = arith.constant 0 : index
    %4 = vector.load %arg3[%c0_2, %c0_3] : memref<2x3136xbf16, #tpu.memory_space<vmem>>, vector<2x3136xbf16>
    %c0_4 = arith.constant 0 : index
    %c0_5 = arith.constant 0 : index
    %5 = vector.load %arg4[%c0_4, %c0_5] : memref<3136x512xbf16, #tpu.memory_space<vmem>>, vector<3136x512xbf16>
    %cst = arith.constant dense<0.000000e+00> : vector<2x512xf32>
    %6 = tpu.matmul %4, %5, %cst {dimension_numbers = #tpu.dot_dimension_numbers<[1], [0], [0], [1], [0, 0, 1, 1], [], []>} : vector<2x3136xbf16>, vector<3136x512xbf16>, vector<2x512xf32> -> vector<2x512xf32>
    %7 = arith.addf %3, %6 : vector<2x512xf32>
    %c0_6 = arith.constant 0 : index
    %c0_7 = arith.constant 0 : index
    %8 = vector.load %arg7[%c0_6, %c0_7] : memref<2x512xf32, #tpu.memory_space<vmem>>, vector<2x512xf32>
    tpu.vector_store %arg7[%c0_6, %c0_7], %7 {strides = array<i32>} : memref<2x512xf32, #tpu.memory_space<vmem>>, vector<2x512xf32>,
    %c0_i32_8 = arith.constant 0 : i32
    %9 = arith.cmpi eq, %arg2, %c0_i32_8 : i32
    %10 = arith.extui %9 : i1 to i32
    %c0_i32_9 = arith.constant 0 : i32
    %11 = arith.cmpi ne, %10, %c0_i32_9 : i32
    scf.if %11 {
      %c0_10 = arith.constant 0 : index
      %c0_11 = arith.constant 0 : index
      %12 = vector.load %arg7[%c0_10, %c0_11] : memref<2x512xf32, #tpu.memory_space<vmem>>, vector<2x512xf32>
      %c0_12 = arith.constant 0 : index
      %c0_13 = arith.constant 0 : index
      %13 = vector.load %arg5[%c0_12, %c0_13] : memref<1x512xf32, #tpu.memory_space<vmem>>, vector<1x512xf32>
      %14 = vector.broadcast %13 : vector<1x512xf32> to vector<2x512xf32>
      %15 = arith.addf %12, %14 : vector<2x512xf32>
      %cst_14 = arith.constant 0.000000e+00 : f32
      %16 = vector.broadcast %cst_14 : f32 to vector<2x512xf32>
      %17 = arith.maximumf %15, %16 : vector<2x512xf32>
      %18 = arith.truncf %17 : vector<2x512xf32> to vector<2x512xbf16>
      %c0_15 = arith.constant 0 : index
      %c0_16 = arith.constant 0 : index
      %19 = vector.load %arg6[%c0_15, %c0_16] : memref<2x512xbf16, #tpu.memory_space<vmem>>, vector<2x512xbf16>
      tpu.vector_store %arg6[%c0_15, %c0_16], %18 {strides = array<i32>} : memref<2x512xbf16, #tpu.memory_space<vmem>>, vector<2x512xbf16>,
    } else {
    }
    return
  }
  func.func @transform_0(%arg0: i32, %arg1: i32, %arg2: i32) -> (i32, i32) {
    %c0_i32 = arith.constant 0 : i32
    return %arg0, %arg2 : i32, i32
  }
  func.func @transform_1(%arg0: i32, %arg1: i32, %arg2: i32) -> (i32, i32) {
    %c0_i32 = arith.constant 0 : i32
    return %arg2, %arg1 : i32, i32
  }
  func.func @transform_2(%arg0: i32, %arg1: i32, %arg2: i32) -> (i32, i32) {
    %c0_i32 = arith.constant 0 : i32
    %c0_i32_0 = arith.constant 0 : i32
    return %c0_i32, %arg1 : i32, i32
  }
  func.func @transform_3(%arg0: i32, %arg1: i32, %arg2: i32) -> (i32, i32) {
    %c0_i32 = arith.constant 0 : i32
    return %arg0, %arg1 : i32, i32
  }
}

module attributes {stable_mosaic.version = 11 : i64} {
  func.func @_head2_dueling_kernel(%arg0: i32, %arg1: memref<2x1024xbf16, #tpu.memory_space<vmem>>, %arg2: memref<1024x128xbf16, #tpu.memory_space<vmem>>, %arg3: memref<1x128xf32, #tpu.memory_space<vmem>>, %arg4: memref<2x6xf32, #tpu.memory_space<vmem>>) attributes {dimension_semantics = [#tpu.dimension_semantics<arbitrary>], iteration_bounds = array<i64: 1>, scalar_prefetch = 0 : i64, scratch_operands = 0 : i64, tpu.core_type = #tpu.core_type<tc>, window_params = [{pipeline_mode = #tpu.pipeline_mode<synchronous>, transform_indices = @transform_0, window_bounds = array<i64: 2, 1024>}, {pipeline_mode = #tpu.pipeline_mode<synchronous>, transform_indices = @transform_1, window_bounds = array<i64: 1024, 128>}, {pipeline_mode = #tpu.pipeline_mode<synchronous>, transform_indices = @transform_2, window_bounds = array<i64: 1, 128>}, {pipeline_mode = #tpu.pipeline_mode<synchronous>, transform_indices = @transform_3, window_bounds = array<i64: 2, 6>}]} {
    %c0 = arith.constant 0 : index
    %c0_0 = arith.constant 0 : index
    %0 = vector.load %arg1[%c0, %c0_0] : memref<2x1024xbf16, #tpu.memory_space<vmem>>, vector<2x1024xbf16>
    %c0_1 = arith.constant 0 : index
    %c0_2 = arith.constant 0 : index
    %1 = vector.load %arg2[%c0_1, %c0_2] : memref<1024x128xbf16, #tpu.memory_space<vmem>>, vector<1024x128xbf16>
    %cst = arith.constant dense<0.000000e+00> : vector<2x128xf32>
    %2 = tpu.matmul %0, %1, %cst {dimension_numbers = #tpu.dot_dimension_numbers<[1], [0], [0], [1], [0, 0, 1, 1], [], []>} : vector<2x1024xbf16>, vector<1024x128xbf16>, vector<2x128xf32> -> vector<2x128xf32>
    %c0_3 = arith.constant 0 : index
    %c0_4 = arith.constant 0 : index
    %3 = vector.load %arg3[%c0_3, %c0_4] : memref<1x128xf32, #tpu.memory_space<vmem>>, vector<1x128xf32>
    %4 = vector.broadcast %3 : vector<1x128xf32> to vector<2x128xf32>
    %5 = arith.addf %2, %4 : vector<2x128xf32>
    %6 = vector.extract_strided_slice %5 {offsets = [0, 0], sizes = [2, 6], strides = [1, 1]} : vector<2x128xf32> to vector<2x6xf32>
    %7 = vector.extract_strided_slice %5 {offsets = [0, 6], sizes = [2, 1], strides = [1, 1]} : vector<2x128xf32> to vector<2x1xf32>
    %8 = vector.shape_cast %6 : vector<2x6xf32> to vector<1x2x6xf32>
    %cst_5 = arith.constant dense<0.000000e+00> : vector<1xf32>
    %9 = vector.multi_reduction <add>, %8, %cst_5 [1, 2] : vector<1x2x6xf32> to vector<1xf32>
    %10 = vector.shape_cast %9 : vector<1xf32> to vector<1x1x1xf32>
    %11 = vector.extract %10[0, 0, 0] : f32 from vector<1x1x1xf32>
    %cst_6 = arith.constant 1.200000e+01 : f32
    %12 = arith.divf %11, %cst_6 : f32
    %13 = vector.broadcast %7 : vector<2x1xf32> to vector<2x6xf32>
    %14 = arith.addf %13, %6 : vector<2x6xf32>
    %15 = vector.broadcast %12 : f32 to vector<2x6xf32>
    %16 = arith.subf %14, %15 : vector<2x6xf32>
    %c0_7 = arith.constant 0 : index
    %c0_8 = arith.constant 0 : index
    %17 = vector.load %arg4[%c0_7, %c0_8] : memref<2x6xf32, #tpu.memory_space<vmem>>, vector<2x6xf32>
    tpu.vector_store %arg4[%c0_7, %c0_8], %16 {strides = array<i32>} : memref<2x6xf32, #tpu.memory_space<vmem>>, vector<2x6xf32>,
    return
  }
  func.func @transform_0(%arg0: i32) -> (i32, i32) {
    %c0_i32 = arith.constant 0 : i32
    %c0_i32_0 = arith.constant 0 : i32
    %c0_i32_1 = arith.constant 0 : i32
    return %c0_i32, %c0_i32_0 : i32, i32
  }
  func.func @transform_1(%arg0: i32) -> (i32, i32) {
    %c0_i32 = arith.constant 0 : i32
    %c0_i32_0 = arith.constant 0 : i32
    %c0_i32_1 = arith.constant 0 : i32
    return %c0_i32, %c0_i32_0 : i32, i32
  }
  func.func @transform_2(%arg0: i32) -> (i32, i32) {
    %c0_i32 = arith.constant 0 : i32
    %c0_i32_0 = arith.constant 0 : i32
    %c0_i32_1 = arith.constant 0 : i32
    return %c0_i32, %c0_i32_0 : i32, i32
  }
  func.func @transform_3(%arg0: i32) -> (i32, i32) {
    %c0_i32 = arith.constant 0 : i32
    %c0_i32_0 = arith.constant 0 : i32
    %c0_i32_1 = arith.constant 0 : i32
    return %c0_i32, %c0_i32_0 : i32, i32
  }
}

</mosaic_0001>

<bundles_post_ra>
// kernel: dqn_forward.5
= control target key start
LH: loop header
LB: loop body
LE: loop exit
PB: predicated region body
PF: predicated region fallthrough
CT: control target
= control target key end

     0   :  { %s2122_s12 = smov 0   ;;  %s2124_s13 = smov 0   ;;  %s2566_s0 = inlined_call_operand.vmem [shape: bf16[800,256], index: 0, kind: input, shape index: {}]   ;;  %s2567_s1 = inlined_call_operand.vmem [shape: bf16[256,32], index: 1, kind: input, shape index: {}]   ;;  %s2568_s2 = inlined_call_operand.vmem [shape: f32[1,32], index: 2, kind: input, shape index: {}]   ;;  %s2569_s3 = inlined_call_operand.vmem [shape: bf16[800,32], index: 3, kind: output, shape index: {}]  }
   0x1   :  { %s2126_s14 = smov 0   ;;  %s2128_s15 = smov 0  }
   0x2   :  { %s2130_s16 = smov 0  }
   0x3 LB: > { %s1555_s17 = sadd.s32 4294967295, %s2067_s16   ;;  %s32_s18 = sadd.s32 1, %s2063_s15  ;;  %s2067_s16 = sphi %s2130_s16, %s13_s16   ;;  %s2063_s15 = sphi %s2128_s15, %s2577_s15   ;;  %s2059_s14 = sphi %s2126_s14, %s2576_s14   ;;  %s2055_s13 = sphi %s2124_s13, %s2575_s13   ;;  %s2051_s12 = sphi %s2122_s12, %s2574_s12  }
   0x4   : > { %p34_p0 = scmp.ge.s32.totalorder %s32_s18, 4  ;;  %s123_s19 = sadd.s32 1, %s2055_s13 }
   0x5   : > { %p133_p1 = scmp.ne.s32.totalorder %s2055_s13, %s2051_s12  ;;  %p134_p2 = scmp.eq.s32.totalorder %s1555_s17, 3 }
   0x6   : > { %s2579_s18 = smov (%p34_p0, %s32_s18), 0  ;;  %p1561_p4 = scmp.ge.s32.totalorder %s2067_s16, 1 }
   0x7   : > { %p2154_p3 = por %p134_p2, %p133_p1  ;;  %s118_s21 = ssub.s32 %s2063_s15, %s2579_s18 }
   0x8   : > { %p201_p5 = scmp.lt.s32.totalorder %s2067_s16, 5  ;;  %p121_p6 = scmp.eq.s32.totalorder %s118_s21, 0 }
   0xa   : > { %p202_p7 = pnand %p1561_p4, %p201_p5 }
   0xb   : > { %s2163_s22 = scalar_select %p121_p6, %s2055_s13, %s123_s19  }
   0xc   : > { %205 = sbr.rel (%p202_p7) target bundleno = 408 (0x198), region = 32  ;;  %v1933_v0 = vld [vmem:[%s2567_s1 + $0x40] sm:$0xff] (!%p202_p7)   ;;  %s2169_s25 = sshll.u32 (!%p202_p7), %s2059_s14, 5  ;;  %v1935_v2 = vld [vmem:[%s2567_s1 + $0x48] sm:$0xff] (!%p202_p7)   ;;  %v1937_v4 = vld [vmem:[%s2567_s1 + $0x50] sm:$0xff] (!%p202_p7)   ;;  %vm289_vm0 = vcmask (!%p202_p7), 261120  }
   0xd   : > { %v1934_v1 = vld [vmem:[%s2567_s1] sm:$0xff] (!%p202_p7)   ;;  %1700 = vmatprep.subr.bf16.mxu0 (!%p202_p7), %v1933_v0  ;;  %1812 = vmatprep.subr.bf16.mxu1 (!%p202_p7), %v1933_v0  ;;  %v1936_v3 = vld [vmem:[%s2567_s1 + $0x8] sm:$0xff] (!%p202_p7)   ;;  %p252_p8 = scmp.lt.s32.totalorder (!%p202_p7), %s2169_s25, 99  ;;  %v1938_v5 = vld [vmem:[%s2567_s1 + $0x10] sm:$0xff] (!%p202_p7)   ;;  %v2101_v48 = vmov (!%p202_p7), 0.0   ;;  %s242_s24 = sand.u32 (!%p202_p7), 1, %s2051_s12  }
   0xe   : > { %1701 = vmatpush3.bf16.msra.mxu0 (!%p202_p7), %v1934_v1  ;;  %1820 = vmatpush3.bf16.msra.mxu1 (!%p202_p7), %v1934_v1  ;;  %v1939_v6 = vld [vmem:[%s2567_s1 + $0x58] sm:$0xff] (!%p202_p7)   ;;  %v1941_v8 = vld [vmem:[%s2567_s1 + $0x60] sm:$0xff] (!%p202_p7)   ;;  %v1943_v10 = vld [vmem:[%s2567_s1 + $0x68] sm:$0xff] (!%p202_p7)   ;;  %290 = vst.msk [vmem:[#allocation2] sm:$0xff] (!%p202_p7), %vm289_vm0, %v2101_v48  ;;  %s2297_s12 = sshll.u32 (!%p202_p7), %s242_s24, 7  ;;  %vm1134_vm1 = vcmask (!%p202_p7), 257024  }
   0xf   : > { %1702 = vmatprep.subr.bf16.mxu0 (!%p202_p7), %v1935_v2  ;;  %1813 = vmatprep.subr.bf16.mxu1 (!%p202_p7), %v1935_v2  ;;  %v1940_v7 = vld [vmem:[%s2567_s1 + $0x18] sm:$0xff] (!%p202_p7)   ;;  %v1942_v9 = vld [vmem:[%s2567_s1 + $0x20] sm:$0xff] (!%p202_p7)   ;;  %v1944_v13 = vld [vmem:[%s2567_s1 + $0x28] sm:$0xff] (!%p202_p7)   ;;  %291 = vst.msk [vmem:[#allocation2 + $0x8] sm:$0xff] (!%p202_p7), %vm289_vm0, %v2101_v48 }
  0x10   : > { %v1945_v14 = vld [vmem:[%s2567_s1 + $0x70] sm:$0xff] (!%p202_p7)   ;;  %v1947_v16 = vld [vmem:[%s2567_s1 + $0x78] sm:$0xff] (!%p202_p7)   ;;  %292 = vst.msk [vmem:[#allocation2 + $0x10] sm:$0xff] (!%p202_p7), %vm289_vm0, %v2101_v48  ;;  %293 = vst.msk [vmem:[#allocation2 + $0x18] sm:$0xff] (!%p202_p7), %vm289_vm0, %v2101_v48 }
  0x11   : > { %v1946_v15 = vld [vmem:[%s2567_s1 + $0x30] sm:$0xff] (!%p202_p7)   ;;  %v1948_v17 = vld [vmem:[%s2567_s1 + $0x38] sm:$0xff] (!%p202_p7)   ;;  %294 = vst.msk [vmem:[#allocation2 + $0x20] sm:$0xff] (!%p202_p7), %vm289_vm0, %v2101_v48  ;;  %295 = vst.msk [vmem:[#allocation2 + $0x28] sm:$0xff] (!%p202_p7), %vm289_vm0, %v2101_v48 }
  0x12   : > { %1703 = vmatpush3.bf16.msra.mxu0 (!%p202_p7), %v1936_v3  ;;  %1821 = vmatpush3.bf16.msra.mxu1 (!%p202_p7), %v1936_v3  ;;  %296 = vst.msk [vmem:[#allocation2 + $0x30] sm:$0xff] (!%p202_p7), %vm289_vm0, %v2101_v48  ;;  %297 = vst.msk [vmem:[#allocation2 + $0x38] sm:$0xff] (!%p202_p7), %vm289_vm0, %v2101_v48 }
  0x13   : > { %s253_s9 = scalar_select %p252_p8, %s2169_s25, 99  ;;  %1704 = vmatprep.subr.bf16.mxu0 %v1937_v4  ;;  %1814 = vmatprep.subr.bf16.mxu1 %v1937_v4  ;;  %298 = vst.msk [vmem:[#allocation2 + $0x40] sm:$0xff] %vm289_vm0, %v2101_v48  ;;  %299 = vst.msk [vmem:[#allocation2 + $0x48] sm:$0xff] %vm289_vm0, %v2101_v48 }
  0x14   : > { %300 = vst.msk [vmem:[#allocation2 + $0x50] sm:$0xff] %vm289_vm0, %v2101_v48  ;;  %301 = vst.msk [vmem:[#allocation2 + $0x58] sm:$0xff] %vm289_vm0, %v2101_v48  ;;  %s1175_s29 = ssub.s32 (%p2154_p3), 100, %s2169_s25  ;;  %s1697_s30 = sshll.u32 (%p2154_p3), %s2059_s14, 7 }
  0x15   : > { %s1664_s21 = sshll.u32 %s253_s9, 3  ;;  %302 = vst.msk [vmem:[#allocation2 + $0x60] sm:$0xff] %vm289_vm0, %v2101_v48  ;;  %303 = vst.msk [vmem:[#allocation2 + $0x68] sm:$0xff] %vm289_vm0, %v2101_v48  ;;  %v322_v51 = vld [vmem:[#allocation2] sm:$0xff]  ;;  %p1176_p9 = scmp.lt.s32.totalorder (%p2154_p3), %s1175_s29, 32 }
  0x16   : > { %1705 = vmatpush3.bf16.msra.mxu0 %v1938_v5  ;;  %1822 = vmatpush3.bf16.msra.mxu1 %v1938_v5  ;;  %s2200_s28 = scalar_lea.vmem %s2566_s0, %s1664_s21  ;;  %304 = vst.msk [vmem:[#allocation2 + $0x70] sm:$0xff] %vm289_vm0, %v2101_v48  ;;  %305 = vst.msk [vmem:[#allocation2 + $0x78] sm:$0xff] %vm289_vm0, %v2101_v48  ;;  %v323_v59 = vld [vmem:[#allocation2 + $0x8] sm:$0xff]  ;;  %s2433_s6 = scalar_lea.vmem (%p2154_p3), %s2569_s3, %s1697_s30  }
  0x17   : > { %1706 = vmatprep.subr.bf16.mxu0 %v1939_v6  ;;  %1815 = vmatprep.subr.bf16.mxu1 %v1939_v6  ;;  %v1951_v11 = vld [vmem:[%s2200_s28 + $0x4] ss:$8 sps:$4 sm:$0xff]   ;;  %v1949_v18 = vld [vmem:[%s2200_s28] ss:$8 sps:$4 sm:$0xff]   ;;  %v1955_v20 = vld [vmem:[%s2200_s28 + $0x14] ss:$8 sps:$4 sm:$0xff]  }
  0x18   : > { %v1954_v12 = vld [vmem:[%s2200_s28 + $0x84] ss:$8 sps:$4 sm:$0xff]   ;;  %706 = vmatprep.mubr.bf16.mxu0 %v1951_v11  ;;  %v1952_v19 = vld [vmem:[%s2200_s28 + $0x80] ss:$8 sps:$4 sm:$0xff]   ;;  %v1957_v21 = vld [vmem:[%s2200_s28 + $0x94] ss:$8 sps:$4 sm:$0xff]  }
  0x19   : > { %770 = vmatprep.mubr.bf16.mxu1 %v1954_v12  ;;  %v1959_v22 = vld [vmem:[%s2200_s28 + $0x10] ss:$8 sps:$4 sm:$0xff]   ;;  %v1961_v24 = vld [vmem:[%s2200_s28 + $0x24] ss:$8 sps:$4 sm:$0xff]   ;;  %v1965_v26 = vld [vmem:[%s2200_s28 + $0x20] ss:$8 sps:$4 sm:$0xff]  }
  0x1a   : > { %1707 = vmatpush3.bf16.msra.mxu0 %v1940_v7  ;;  %1823 = vmatpush3.bf16.msra.mxu1 %v1940_v7  ;;  %v1960_v23 = vld [vmem:[%s2200_s28 + $0x90] ss:$8 sps:$4 sm:$0xff]   ;;  %v1963_v25 = vld [vmem:[%s2200_s28 + $0xa4] ss:$8 sps:$4 sm:$0xff]   ;;  %v1966_v27 = vld [vmem:[%s2200_s28 + $0xa0] ss:$8 sps:$4 sm:$0xff]  }
  0x1b   : > { %1708 = vmatprep.subr.bf16.mxu0 %v1941_v8  ;;  %1816 = vmatprep.subr.bf16.mxu1 %v1941_v8  ;;  %v1967_v28 = vld [vmem:[%s2200_s28 + $0x34] ss:$8 sps:$4 sm:$0xff]   ;;  %v1971_v30 = vld [vmem:[%s2200_s28 + $0x30] ss:$8 sps:$4 sm:$0xff]   ;;  %v1973_v32 = vld [vmem:[%s2200_s28 + $0x44] ss:$8 sps:$4 sm:$0xff]  }
  0x1c   : > { %v1969_v29 = vld [vmem:[%s2200_s28 + $0xb4] ss:$8 sps:$4 sm:$0xff]   ;;  %v1972_v31 = vld [vmem:[%s2200_s28 + $0xb0] ss:$8 sps:$4 sm:$0xff]   ;;  %v1975_v33 = vld [vmem:[%s2200_s28 + $0xc4] ss:$8 sps:$4 sm:$0xff]  }
  0x1d   : > { %v1977_v34 = vld [vmem:[%s2200_s28 + $0x40] ss:$8 sps:$4 sm:$0xff]   ;;  %v1979_v36 = vld [vmem:[%s2200_s28 + $0x54] ss:$8 sps:$4 sm:$0xff]   ;;  %v1983_v38 = vld [vmem:[%s2200_s28 + $0x50] ss:$8 sps:$4 sm:$0xff]  }
  0x1e   : > { %1709 = vmatpush3.bf16.msra.mxu0 %v1942_v9  ;;  %1824 = vmatpush3.bf16.msra.mxu1 %v1942_v9  ;;  %v1978_v35 = vld [vmem:[%s2200_s28 + $0xc0] ss:$8 sps:$4 sm:$0xff]   ;;  %v1981_v37 = vld [vmem:[%s2200_s28 + $0xd4] ss:$8 sps:$4 sm:$0xff]   ;;  %v1984_v39 = vld [vmem:[%s2200_s28 + $0xd0] ss:$8 sps:$4 sm:$0xff]  }
  0x1f   : > { %1710 = vmatprep.subr.bf16.mxu0 %v1943_v10  ;;  %1817 = vmatprep.subr.bf16.mxu1 %v1943_v10  ;;  %v1985_v40 = vld [vmem:[%s2200_s28 + $0x64] ss:$8 sps:$4 sm:$0xff]   ;;  %v1989_v42 = vld [vmem:[%s2200_s28 + $0x60] ss:$8 sps:$4 sm:$0xff]   ;;  %v1991_v44 = vld [vmem:[%s2200_s28 + $0x74] ss:$8 sps:$4 sm:$0xff]  }
  0x20   : > { %v1987_v41 = vld [vmem:[%s2200_s28 + $0xe4] ss:$8 sps:$4 sm:$0xff]   ;;  %v1990_v43 = vld [vmem:[%s2200_s28 + $0xe0] ss:$8 sps:$4 sm:$0xff]   ;;  %v1993_v45 = vld [vmem:[%s2200_s28 + $0xf4] ss:$8 sps:$4 sm:$0xff]  }
  0x21   : > { %v1995_v46 = vld [vmem:[%s2200_s28 + $0x70] ss:$8 sps:$4 sm:$0xff]   ;;  %306 = vst.msk [vmem:[#allocation2 + $0x80] sm:$0xff] %vm289_vm0, %v2101_v48  ;;  %307 = vst.msk [vmem:[#allocation2 + $0x88] sm:$0xff] %vm289_vm0, %v2101_v48 }
  0x22   : > { %1711 = vmatpush3.bf16.msra.mxu0 %v1944_v13  ;;  %1825 = vmatpush3.bf16.msra.mxu1 %v1944_v13  ;;  %v1996_v47 = vld [vmem:[%s2200_s28 + $0xf0] ss:$8 sps:$4 sm:$0xff]   ;;  %308 = vst.msk [vmem:[#allocation2 + $0x90] sm:$0xff] %vm289_vm0, %v2101_v48  ;;  %309 = vst.msk [vmem:[#allocation2 + $0x98] sm:$0xff] %vm289_vm0, %v2101_v48  ;;  %s2308_s28 = scalar_lea.vmem [#allocation3], %s2297_s12  }
  0x23   : > { %1712 = vmatprep.subr.bf16.mxu0 %v1945_v14  ;;  %1818 = vmatprep.subr.bf16.mxu1 %v1945_v14  ;;  %310 = vst.msk [vmem:[#allocation2 + $0xa0] sm:$0xff] %vm289_vm0, %v2101_v48  ;;  %311 = vst.msk [vmem:[#allocation2 + $0xa8] sm:$0xff] %vm289_vm0, %v2101_v48  ;;  %v324_v7 = vld [vmem:[#allocation2 + $0x10] sm:$0xff] }
  0x24   : > { %312 = vst.msk [vmem:[#allocation2 + $0xb0] sm:$0xff] %vm289_vm0, %v2101_v48  ;;  %313 = vst.msk [vmem:[#allocation2 + $0xb8] sm:$0xff] %vm289_vm0, %v2101_v48 }
  0x25   : > { %314 = vst.msk [vmem:[#allocation2 + $0xc0] sm:$0xff] %vm289_vm0, %v2101_v48  ;;  %315 = vst.msk [vmem:[#allocation2 + $0xc8] sm:$0xff] %vm289_vm0, %v2101_v48 }
  0x26   : > { %1713 = vmatpush3.bf16.msra.mxu0 %v1946_v15  ;;  %1826 = vmatpush3.bf16.msra.mxu1 %v1946_v15  ;;  %316 = vst.msk [vmem:[#allocation2 + $0xd0] sm:$0xff] %vm289_vm0, %v2101_v48  ;;  %317 = vst.msk [vmem:[#allocation2 + $0xd8] sm:$0xff] %vm289_vm0, %v2101_v48  ;;  %v2295_v15 = vld [vmem:[%s2568_s2] ss:$0 sm:$0xff] }
  0x27   : > { %1714 = vmatprep.subr.bf16.mxu0 %v1947_v16  ;;  %1819 = vmatprep.subr.bf16.mxu1 %v1947_v16  ;;  %318 = vst.msk [vmem:[#allocation2 + $0xe0] sm:$0xff] %vm289_vm0, %v2101_v48  ;;  %319 = vst.msk [vmem:[#allocation2 + $0xe8] sm:$0xff] %vm289_vm0, %v2101_v48  ;;  %v325_v16 = vld [vmem:[#allocation2 + $0x18] sm:$0xff] }
  0x28   : > { %320 = vst.msk [vmem:[#allocation2 + $0xf0] sm:$0xff] %vm289_vm0, %v2101_v48  ;;  %321 = vst.msk [vmem:[#allocation2 + $0xf8] sm:$0xff] %vm289_vm0, %v2101_v48  ;;  %v338_v53 = vld [vmem:[#allocation2 + $0x80] sm:$0xff]  ;;  %v339_v61 = vld [vmem:[#allocation2 + $0x88] sm:$0xff] }
  0x29   : > { %v340_v9 = vld [vmem:[#allocation2 + $0x90] sm:$0xff] }
  0x2a   : > { %1715 = vmatpush3.bf16.msra.mxu0 %v1948_v17  ;;  %1827 = vmatpush3.bf16.msra.mxu1 %v1948_v17 }
  0x2d   : > { %707 = vmatmul.mubr.bf16.vlgmr.msra.gmra.mrb[0].mxu0 %v1949_v18  ;;  %771 = vmatmul.mubr.bf16.vlgmr.msra.gmra.mrb[0].mxu1 %v1952_v19  ;;  %v341_v18 = vld [vmem:[#allocation2 + $0x98] sm:$0xff] }
  0x2e   : > { %714 = vmatprep.mubr.bf16.mxu0 %v1955_v20  ;;  %778 = vmatprep.mubr.bf16.mxu1 %v1957_v21 }
  0x35   : > { %715 = vmatmul.mubr.bf16.gmra.mrb[4].mxu0 %v1959_v22  ;;  %779 = vmatmul.mubr.bf16.gmra.mrb[4].mxu1 %v1960_v23 }
  0x36   : > { %722 = vmatprep.mubr.bf16.mxu0 %v1961_v24  ;;  %786 = vmatprep.mubr.bf16.mxu1 %v1963_v25 }
  0x3d   : > { %723 = vmatmul.mubr.bf16.gmra.mrb[8].mxu0 %v1965_v26  ;;  %787 = vmatmul.mubr.bf16.gmra.mrb[8].mxu1 %v1966_v27 }
  0x3e   : > { %730 = vmatprep.mubr.bf16.mxu0 %v1967_v28  ;;  %794 = vmatprep.mubr.bf16.mxu1 %v1969_v29 }
  0x45   : > { %731 = vmatmul.mubr.bf16.gmra.mrb[12].mxu0 %v1971_v30  ;;  %795 = vmatmul.mubr.bf16.gmra.mrb[12].mxu1 %v1972_v31 }
  0x46   : > { %738 = vmatprep.mubr.bf16.mxu0 %v1973_v32  ;;  %802 = vmatprep.mubr.bf16.mxu1 %v1975_v33 }
  0x4d   : > { %739 = vmatmul.mubr.bf16.gmra.mrb[16].mxu0 %v1977_v34  ;;  %803 = vmatmul.mubr.bf16.gmra.mrb[16].mxu1 %v1978_v35 }
  0x4e   : > { %746 = vmatprep.mubr.bf16.mxu0 %v1979_v36  ;;  %810 = vmatprep.mubr.bf16.mxu1 %v1981_v37 }
  0x55   : > { %747 = vmatmul.mubr.bf16.gmra.mrb[20].mxu0 %v1983_v38  ;;  %811 = vmatmul.mubr.bf16.gmra.mrb[20].mxu1 %v1984_v39 }
  0x56   : > { %754 = vmatprep.mubr.bf16.mxu0 %v1985_v40  ;;  %818 = vmatprep.mubr.bf16.mxu1 %v1987_v41 }
  0x5d   : > { %755 = vmatmul.mubr.bf16.gmra.mrb[24].mxu0 %v1989_v42  ;;  %819 = vmatmul.mubr.bf16.gmra.mrb[24].mxu1 %v1990_v43 }
  0x5e   : > { %762 = vmatprep.mubr.bf16.mxu0 %v1991_v44  ;;  %826 = vmatprep.mubr.bf16.mxu1 %v1993_v45  ;;  %v326_v44 = vld [vmem:[#allocation2 + $0x20] sm:$0xff] }
  0x5f   : > { %v342_v45 = vld [vmem:[#allocation2 + $0xa0] sm:$0xff] }
  0x65   : > { %763 = vmatmul.mubr.bf16.gmra.mrb[28].mxu0 %v1995_v46  ;;  %827 = vmatmul.mubr.bf16.gmra.mrb[28].mxu1 %v1996_v47 }
 0x100   : > { %v1716_v49 = vpop.f32.mrb[0].mxu0  ;;  %v1764_v50 = vpop.f32.mrb[0].mxu1 }
 0x101   : > { %v1717_v52 = vpop.f32.mrb[1].mxu0  ;;  %v1765_v54 = vpop.f32.mrb[1].mxu1 }
 0x102   : > { %v1718_v55 = vadd.f32 %v1717_v52, %v1716_v49  ;;  %v1766_v56 = vadd.f32 %v1765_v54, %v1764_v50  ;;  %v1719_v57 = vpop.f32.mrb[2].mxu0  ;;  %v1767_v58 = vpop.f32.mrb[2].mxu1  ;;  %v327_v50 = vld [vmem:[#allocation2 + $0x28] sm:$0xff] }
 0x103   : > { %v1720_v60 = vpop.f32.mrb[3].mxu0  ;;  %v1768_v62 = vpop.f32.mrb[3].mxu1  ;;  %v343_v52 = vld [vmem:[#allocation2 + $0xa8] sm:$0xff] }
 0x104   : > { %v835_v63 = vadd.f32 %v1718_v55, %v322_v51  ;;  %v851_v0 = vadd.f32 %v1766_v56, %v338_v53  ;;  %v1721_v1 = vadd.f32 %v1720_v60, %v1719_v57  ;;  %v1769_v2 = vadd.f32 %v1768_v62, %v1767_v58 }
 0x106   : > { %868 = vst.msk [vmem:[#allocation2] sm:$0xff] %vm289_vm0, %v835_v63  ;;  %884 = vst.msk [vmem:[#allocation2 + $0x80] sm:$0xff] %vm289_vm0, %v851_v0  ;;  %v836_v3 = vadd.f32 %v1721_v1, %v323_v59  ;;  %v852_v4 = vadd.f32 %v1769_v2, %v339_v61 }
 0x108   : > { %869 = vst.msk [vmem:[#allocation2 + $0x8] sm:$0xff] %vm289_vm0, %v836_v3  ;;  %885 = vst.msk [vmem:[#allocation2 + $0x88] sm:$0xff] %vm289_vm0, %v852_v4  ;;  %v1722_v5 = vpop.f32.mrb[4].mxu0  ;;  %v1770_v6 = vpop.f32.mrb[4].mxu1 }
 0x109   : > { %v1723_v8 = vpop.f32.mrb[5].mxu0  ;;  %v1771_v10 = vpop.f32.mrb[5].mxu1 }
 0x10a   : > { %v1724_v11 = vadd.f32 %v1723_v8, %v1722_v5  ;;  %v1772_v12 = vadd.f32 %v1771_v10, %v1770_v6  ;;  %v1725_v13 = vpop.f32.mrb[6].mxu0  ;;  %v1773_v14 = vpop.f32.mrb[6].mxu1 }
 0x10b   : > { %v1726_v17 = vpop.f32.mrb[7].mxu0  ;;  %v1774_v19 = vpop.f32.mrb[7].mxu1 }
 0x10c   : > { %v837_v20 = vadd.f32 %v1724_v11, %v324_v7  ;;  %v853_v21 = vadd.f32 %v1772_v12, %v340_v9  ;;  %v1727_v22 = vadd.f32 %v1726_v17, %v1725_v13  ;;  %v1775_v23 = vadd.f32 %v1774_v19, %v1773_v14  ;;  %v328_v17 = vld [vmem:[#allocation2 + $0x30] sm:$0xff] }
 0x10d   : > { %v903_v24 = vld [vmem:[#allocation2] sm:$0xff] }
 0x10e   : > { %v919_v25 = vld [vmem:[#allocation2 + $0x80] sm:$0xff]  ;;  %v942_v26 = vadd.f32 %v2295_v15, %v903_v24  ;;  %870 = vst.msk [vmem:[#allocation2 + $0x10] sm:$0xff] %vm289_vm0, %v837_v20  ;;  %886 = vst.msk [vmem:[#allocation2 + $0x90] sm:$0xff] %vm289_vm0, %v853_v21  ;;  %v838_v28 = vadd.f32 %v1727_v22, %v325_v16  ;;  %v854_v29 = vadd.f32 %v1775_v23, %v341_v18  ;;  %v344_v18 = vld [vmem:[#allocation2 + $0xb0] sm:$0xff] }
 0x10f   : > { %v958_v27 = vadd.f32 %v2295_v15, %v919_v25  ;;  %v904_v30 = vld [vmem:[#allocation2 + $0x8] sm:$0xff]  ;;  %v329_v23 = vld [vmem:[#allocation2 + $0x38] sm:$0xff] }
 0x110   : > { %v920_v31 = vld [vmem:[#allocation2 + $0x88] sm:$0xff]  ;;  %v974_v32 = vmax.f32 %v942_v26, 0.0  ;;  %v943_v34 = vadd.f32 %v2295_v15, %v904_v30  ;;  %871 = vst.msk [vmem:[#allocation2 + $0x18] sm:$0xff] %vm289_vm0, %v838_v28  ;;  %887 = vst.msk [vmem:[#allocation2 + $0x98] sm:$0xff] %vm289_vm0, %v854_v29  ;;  %v1728_v36 = vpop.f32.mrb[8].mxu0  ;;  %v1776_v37 = vpop.f32.mrb[8].mxu1 }
 0x111   : > { %v990_v33 = vmax.f32 %v958_v27, 0.0  ;;  %v959_v35 = vadd.f32 %v2295_v15, %v920_v31  ;;  %v1729_v38 = vpop.f32.mrb[9].mxu0  ;;  %v1777_v39 = vpop.f32.mrb[9].mxu1  ;;  %v345_v25 = vld [vmem:[#allocation2 + $0xb8] sm:$0xff] }
 0x112   : > { %v1665_v40 = vpack.c.bf16 %v974_v32, %v974_v32  ;;  %v975_v42 = vmax.f32 %v943_v34, 0.0  ;;  %v1731_v46 = vpop.f32.mrb[10].mxu0  ;;  %v1779_v47 = vpop.f32.mrb[10].mxu1  ;;  %v1730_v48 = vadd.f32 %v1729_v38, %v1728_v36  ;;  %v1778_v49 = vadd.f32 %v1777_v39, %v1776_v37 }
 0x113   : > { %v1681_v41 = vpack.c.bf16 %v990_v33, %v990_v33  ;;  %v991_v43 = vmax.f32 %v959_v35, 0.0  ;;  %v1732_v51 = vpop.f32.mrb[11].mxu0  ;;  %v1780_v53 = vpop.f32.mrb[11].mxu1 }
 0x114   : > { %1135 = vst.msk [vmem:[%s2308_s28] sm:$0xf] %vm1134_vm1, %v1665_v40  ;;  %v1666_v54 = vpack.c.bf16 %v975_v42, %v975_v42  ;;  %v1733_v56 = vadd.f32 %v1732_v51, %v1731_v46  ;;  %v1781_v57 = vadd.f32 %v1780_v53, %v1779_v47  ;;  %v839_v60 = vadd.f32 %v1730_v48, %v326_v44  ;;  %v330_v47 = vld [vmem:[#allocation2 + $0x40] sm:$0xff] }
 0x115   : > { %1151 = vst.msk [vmem:[%s2308_s28 + $0x40] sm:$0xf] %vm1134_vm1, %v1681_v41  ;;  %v1682_v55 = vpack.c.bf16 %v991_v43, %v991_v43  ;;  %v905_v58 = vld [vmem:[#allocation2 + $0x10] sm:$0xff]  ;;  %v855_v61 = vadd.f32 %v1778_v49, %v342_v45  ;;  %v346_v49 = vld [vmem:[#allocation2 + $0xc0] sm:$0xff] }
 0x116   : > { %v921_v59 = vld [vmem:[#allocation2 + $0x90] sm:$0xff]  ;;  %1136 = vst.msk [vmem:[%s2308_s28 + $0x4] sm:$0xf] %vm1134_vm1, %v1666_v54  ;;  %v944_v62 = vadd.f32 %v2295_v15, %v905_v58  ;;  %v840_v0 = vadd.f32 %v1733_v56, %v327_v50  ;;  %v856_v1 = vadd.f32 %v1781_v57, %v343_v52 }
 0x117   : > { %1152 = vst.msk [vmem:[%s2308_s28 + $0x44] sm:$0xf] %vm1134_vm1, %v1682_v55  ;;  %v960_v63 = vadd.f32 %v2295_v15, %v921_v59  ;;  %v906_v2 = vld [vmem:[#allocation2 + $0x18] sm:$0xff] }
 0x118   : > { %v922_v3 = vld [vmem:[#allocation2 + $0x98] sm:$0xff]  ;;  %872 = vst.msk [vmem:[#allocation2 + $0x20] sm:$0xff] %vm289_vm0, %v839_v60  ;;  %888 = vst.msk [vmem:[#allocation2 + $0xa0] sm:$0xff] %vm289_vm0, %v855_v61  ;;  %v976_v4 = vmax.f32 %v944_v62, 0.0  ;;  %v945_v6 = vadd.f32 %v2295_v15, %v906_v2  ;;  %v1734_v8 = vpop.f32.mrb[12].mxu0  ;;  %v1782_v9 = vpop.f32.mrb[12].mxu1 }
 0x119   : > { %v992_v5 = vmax.f32 %v960_v63, 0.0  ;;  %v961_v7 = vadd.f32 %v2295_v15, %v922_v3  ;;  %873 = vst.msk [vmem:[#allocation2 + $0x28] sm:$0xff] %vm289_vm0, %v840_v0  ;;  %889 = vst.msk [vmem:[#allocation2 + $0xa8] sm:$0xff] %vm289_vm0, %v856_v1  ;;  %v1735_v10 = vpop.f32.mrb[13].mxu0  ;;  %v1783_v11 = vpop.f32.mrb[13].mxu1  ;;  %v331_v1 = vld [vmem:[#allocation2 + $0x48] sm:$0xff] }
 0x11a   : > { %v1667_v12 = vpack.c.bf16 %v976_v4, %v976_v4  ;;  %v977_v14 = vmax.f32 %v945_v6, 0.0  ;;  %v1737_v19 = vpop.f32.mrb[14].mxu0  ;;  %v1785_v20 = vpop.f32.mrb[14].mxu1  ;;  %v1736_v21 = vadd.f32 %v1735_v10, %v1734_v8  ;;  %v1784_v22 = vadd.f32 %v1783_v11, %v1782_v9  ;;  %v347_v2 = vld [vmem:[#allocation2 + $0xc8] sm:$0xff] }
 0x11b   : > { %v1683_v13 = vpack.c.bf16 %v992_v5, %v992_v5  ;;  %v993_v16 = vmax.f32 %v961_v7, 0.0  ;;  %v1738_v24 = vpop.f32.mrb[15].mxu0  ;;  %v1786_v26 = vpop.f32.mrb[15].mxu1 }
 0x11c   : > { %1137 = vst.msk [vmem:[%s2308_s28 + $0x8] sm:$0xf] %vm1134_vm1, %v1667_v12  ;;  %v1668_v27 = vpack.c.bf16 %v977_v14, %v977_v14  ;;  %v1739_v29 = vadd.f32 %v1738_v24, %v1737_v19  ;;  %v1787_v30 = vadd.f32 %v1786_v26, %v1785_v20  ;;  %v841_v31 = vadd.f32 %v1736_v21, %v328_v17  ;;  %v332_v20 = vld [vmem:[#allocation2 + $0x50] sm:$0xff] }
 0x11d   : > { %1153 = vst.msk [vmem:[%s2308_s28 + $0x48] sm:$0xf] %vm1134_vm1, %v1683_v13  ;;  %v1684_v28 = vpack.c.bf16 %v993_v16, %v993_v16  ;;  %v857_v32 = vadd.f32 %v1784_v22, %v344_v18  ;;  %v348_v22 = vld [vmem:[#allocation2 + $0xd0] sm:$0xff] }
 0x11e   : > { %1138 = vst.msk [vmem:[%s2308_s28 + $0xc] sm:$0xf] %vm1134_vm1, %v1668_v27  ;;  %v842_v35 = vadd.f32 %v1739_v29, %v329_v23  ;;  %v858_v36 = vadd.f32 %v1787_v30, %v345_v25 }
 0x11f   : > { %1154 = vst.msk [vmem:[%s2308_s28 + $0x4c] sm:$0xf] %vm1134_vm1, %v1684_v28  ;;  %v907_v33 = vld [vmem:[#allocation2 + $0x20] sm:$0xff] }
 0x120   : > { %v923_v34 = vld [vmem:[#allocation2 + $0xa0] sm:$0xff]  ;;  %v946_v37 = vadd.f32 %v2295_v15, %v907_v33  ;;  %v908_v39 = vld [vmem:[#allocation2 + $0x28] sm:$0xff]  ;;  %874 = vst.msk [vmem:[#allocation2 + $0x30] sm:$0xff] %vm289_vm0, %v841_v31  ;;  %890 = vst.msk [vmem:[#allocation2 + $0xb0] sm:$0xff] %vm289_vm0, %v857_v32  ;;  %v1740_v43 = vpop.f32.mrb[16].mxu0  ;;  %v1788_v44 = vpop.f32.mrb[16].mxu1 }
 0x121   : > { %v962_v38 = vadd.f32 %v2295_v15, %v923_v34  ;;  %v924_v40 = vld [vmem:[#allocation2 + $0xa8] sm:$0xff]  ;;  %v947_v41 = vadd.f32 %v2295_v15, %v908_v39  ;;  %875 = vst.msk [vmem:[#allocation2 + $0x38] sm:$0xff] %vm289_vm0, %v842_v35  ;;  %891 = vst.msk [vmem:[#allocation2 + $0xb8] sm:$0xff] %vm289_vm0, %v858_v36  ;;  %v1741_v48 = vpop.f32.mrb[17].mxu0  ;;  %v1789_v50 = vpop.f32.mrb[17].mxu1  ;;  %v349_v39 = vld [vmem:[#allocation2 + $0xd8] sm:$0xff] }
 0x122   : > { %v963_v42 = vadd.f32 %v2295_v15, %v924_v40  ;;  %v978_v45 = vmax.f32 %v946_v37, 0.0  ;;  %v1742_v53 = vadd.f32 %v1741_v48, %v1740_v43  ;;  %v1790_v54 = vadd.f32 %v1789_v50, %v1788_v44  ;;  %v1743_v55 = vpop.f32.mrb[18].mxu0  ;;  %v1791_v56 = vpop.f32.mrb[18].mxu1 }
 0x123   : > { %v994_v46 = vmax.f32 %v962_v38, 0.0  ;;  %v979_v51 = vmax.f32 %v947_v41, 0.0  ;;  %v1744_v59 = vpop.f32.mrb[19].mxu0  ;;  %v1792_v60 = vpop.f32.mrb[19].mxu1  ;;  %v333_v38 = vld [vmem:[#allocation2 + $0x58] sm:$0xff] }
 0x124   : > { %v995_v52 = vmax.f32 %v963_v42, 0.0  ;;  %v1669_v57 = vpack.c.bf16 %v978_v45, %v978_v45  ;;  %v843_v63 = vadd.f32 %v1742_v53, %v330_v47  ;;  %v859_v0 = vadd.f32 %v1790_v54, %v346_v49 }
 0x125   : > { %v1685_v58 = vpack.c.bf16 %v994_v46, %v994_v46  ;;  %v1670_v61 = vpack.c.bf16 %v979_v51, %v979_v51  ;;  %v1745_v3 = vadd.f32 %v1744_v59, %v1743_v55  ;;  %v1793_v4 = vadd.f32 %v1792_v60, %v1791_v56  ;;  %v334_v56 = vld [vmem:[#allocation2 + $0x60] sm:$0xff] }
 0x126   : > { %v1686_v62 = vpack.c.bf16 %v995_v52, %v995_v52  ;;  %1139 = vst.msk [vmem:[%s2308_s28 + $0x10] sm:$0xf] %vm1134_vm1, %v1669_v57 }
 0x127   : > { %1155 = vst.msk [vmem:[%s2308_s28 + $0x50] sm:$0xf] %vm1134_vm1, %v1685_v58  ;;  %1140 = vst.msk [vmem:[%s2308_s28 + $0x14] sm:$0xf] %vm1134_vm1, %v1670_v61  ;;  %v909_v5 = vld [vmem:[#allocation2 + $0x30] sm:$0xff]  ;;  %v844_v11 = vadd.f32 %v1745_v3, %v331_v1  ;;  %v860_v12 = vadd.f32 %v1793_v4, %v347_v2  ;;  %v350_v58 = vld [vmem:[#allocation2 + $0xe0] sm:$0xff] }
 0x128   : > { %1156 = vst.msk [vmem:[%s2308_s28 + $0x54] sm:$0xf] %vm1134_vm1, %v1686_v62  ;;  %v925_v6 = vld [vmem:[#allocation2 + $0xb0] sm:$0xff]  ;;  %v948_v7 = vadd.f32 %v2295_v15, %v909_v5  ;;  %v910_v9 = vld [vmem:[#allocation2 + $0x38] sm:$0xff]  ;;  %v1746_v16 = vpop.f32.mrb[20].mxu0  ;;  %v1794_v17 = vpop.f32.mrb[20].mxu1 }
 0x129   : > { %876 = vst.msk [vmem:[#allocation2 + $0x40] sm:$0xff] %vm289_vm0, %v843_v63  ;;  %892 = vst.msk [vmem:[#allocation2 + $0xc0] sm:$0xff] %vm289_vm0, %v859_v0  ;;  %v964_v8 = vadd.f32 %v2295_v15, %v925_v6  ;;  %v926_v10 = vld [vmem:[#allocation2 + $0xb8] sm:$0xff]  ;;  %v949_v13 = vadd.f32 %v2295_v15, %v910_v9  ;;  %v1747_v21 = vpop.f32.mrb[21].mxu0  ;;  %v1795_v23 = vpop.f32.mrb[21].mxu1  ;;  %v335_v4 = vld [vmem:[#allocation2 + $0x68] sm:$0xff] }
 0x12a   : > { %v965_v14 = vadd.f32 %v2295_v15, %v926_v10  ;;  %v980_v18 = vmax.f32 %v948_v7, 0.0  ;;  %877 = vst.msk [vmem:[#allocation2 + $0x48] sm:$0xff] %vm289_vm0, %v844_v11  ;;  %893 = vst.msk [vmem:[#allocation2 + $0xc8] sm:$0xff] %vm289_vm0, %v860_v12  ;;  %v1748_v26 = vadd.f32 %v1747_v21, %v1746_v16  ;;  %v1796_v27 = vadd.f32 %v1795_v23, %v1794_v17  ;;  %v1749_v28 = vpop.f32.mrb[22].mxu0  ;;  %v1797_v29 = vpop.f32.mrb[22].mxu1  ;;  %v351_v6 = vld [vmem:[#allocation2 + $0xe8] sm:$0xff] }
 0x12b   : > { %v996_v19 = vmax.f32 %v964_v8, 0.0  ;;  %v981_v24 = vmax.f32 %v949_v13, 0.0  ;;  %v1750_v32 = vpop.f32.mrb[23].mxu0  ;;  %v1798_v33 = vpop.f32.mrb[23].mxu1 }
 0x12c   : > { %v997_v25 = vmax.f32 %v965_v14, 0.0  ;;  %v1671_v30 = vpack.c.bf16 %v980_v18, %v980_v18  ;;  %v845_v36 = vadd.f32 %v1748_v26, %v332_v20  ;;  %v861_v37 = vadd.f32 %v1796_v27, %v348_v22 }
 0x12d   : > { %v1687_v31 = vpack.c.bf16 %v996_v19, %v996_v19  ;;  %v1672_v34 = vpack.c.bf16 %v981_v24, %v981_v24  ;;  %v1751_v42 = vadd.f32 %v1750_v32, %v1749_v28  ;;  %v1799_v43 = vadd.f32 %v1798_v33, %v1797_v29  ;;  %v336_v29 = vld [vmem:[#allocation2 + $0x70] sm:$0xff] }
 0x12e   : > { %v1688_v35 = vpack.c.bf16 %v997_v25, %v997_v25  ;;  %1141 = vst.msk [vmem:[%s2308_s28 + $0x18] sm:$0xf] %vm1134_vm1, %v1671_v30 }
 0x12f   : > { %1157 = vst.msk [vmem:[%s2308_s28 + $0x58] sm:$0xf] %vm1134_vm1, %v1687_v31  ;;  %1142 = vst.msk [vmem:[%s2308_s28 + $0x1c] sm:$0xf] %vm1134_vm1, %v1672_v34  ;;  %v846_v46 = vadd.f32 %v1751_v42, %v333_v38  ;;  %v862_v47 = vadd.f32 %v1799_v43, %v349_v39  ;;  %v352_v31 = vld [vmem:[#allocation2 + $0xf0] sm:$0xff]  ;;  %v353_v43 = vld [vmem:[#allocation2 + $0xf8] sm:$0xff] }
 0x130   : > { %v911_v40 = vld [vmem:[#allocation2 + $0x40] sm:$0xff]  ;;  %1158 = vst.msk [vmem:[%s2308_s28 + $0x5c] sm:$0xf] %vm1134_vm1, %v1688_v35  ;;  %v1752_v52 = vpop.f32.mrb[24].mxu0  ;;  %v1800_v53 = vpop.f32.mrb[24].mxu1 }
 0x131   : > { %v927_v41 = vld [vmem:[#allocation2 + $0xc0] sm:$0xff]  ;;  %v950_v44 = vadd.f32 %v2295_v15, %v911_v40  ;;  %878 = vst.msk [vmem:[#allocation2 + $0x50] sm:$0xff] %vm289_vm0, %v845_v36  ;;  %894 = vst.msk [vmem:[#allocation2 + $0xd0] sm:$0xff] %vm289_vm0, %v861_v37  ;;  %v912_v50 = vld [vmem:[#allocation2 + $0x48] sm:$0xff]  ;;  %v1753_v57 = vpop.f32.mrb[25].mxu0  ;;  %v1801_v59 = vpop.f32.mrb[25].mxu1 }
 0x132   : > { %v966_v45 = vadd.f32 %v2295_v15, %v927_v41  ;;  %v928_v51 = vld [vmem:[#allocation2 + $0xc8] sm:$0xff]  ;;  %v951_v54 = vadd.f32 %v2295_v15, %v912_v50  ;;  %879 = vst.msk [vmem:[#allocation2 + $0x58] sm:$0xff] %vm289_vm0, %v846_v46  ;;  %895 = vst.msk [vmem:[#allocation2 + $0xd8] sm:$0xff] %vm289_vm0, %v862_v47  ;;  %v1754_v62 = vadd.f32 %v1753_v57, %v1752_v52  ;;  %v1755_v0 = vpop.f32.mrb[26].mxu0  ;;  %v1803_v1 = vpop.f32.mrb[26].mxu1  ;;  %v337_v41 = vld [vmem:[#allocation2 + $0x78] sm:$0xff] }
 0x133   : > { %v982_v48 = vmax.f32 %v950_v44, 0.0  ;;  %v967_v55 = vadd.f32 %v2295_v15, %v928_v51  ;;  %v1802_v63 = vadd.f32 %v1801_v59, %v1800_v53  ;;  %v1756_v5 = vpop.f32.mrb[27].mxu0  ;;  %v1804_v7 = vpop.f32.mrb[27].mxu1 }
 0x134   : > { %v998_v49 = vmax.f32 %v966_v45, 0.0  ;;  %v983_v2 = vmax.f32 %v951_v54, 0.0  ;;  %v847_v8 = vadd.f32 %v1754_v62, %v334_v56  ;;  %v1757_v10 = vadd.f32 %v1756_v5, %v1755_v0 }
 0x135   : > { %v1673_v60 = vpack.c.bf16 %v982_v48, %v982_v48  ;;  %v999_v3 = vmax.f32 %v967_v55, 0.0  ;;  %v863_v9 = vadd.f32 %v1802_v63, %v350_v58  ;;  %v1805_v11 = vadd.f32 %v1804_v7, %v1803_v1 }
 0x136   : > { %v1689_v61 = vpack.c.bf16 %v998_v49, %v998_v49  ;;  %v1674_v12 = vpack.c.bf16 %v983_v2, %v983_v2  ;;  %880 = vst.msk [vmem:[#allocation2 + $0x60] sm:$0xff] %vm289_vm0, %v847_v8  ;;  %v848_v19 = vadd.f32 %v1757_v10, %v335_v4 }
 0x137   : > { %1143 = vst.msk [vmem:[%s2308_s28 + $0x20] sm:$0xf] %vm1134_vm1, %v1673_v60  ;;  %v1690_v13 = vpack.c.bf16 %v999_v3, %v999_v3  ;;  %v864_v20 = vadd.f32 %v1805_v11, %v351_v6 }
 0x138   : > { %1159 = vst.msk [vmem:[%s2308_s28 + $0x60] sm:$0xf] %vm1134_vm1, %v1689_v61  ;;  %v913_v14 = vld [vmem:[#allocation2 + $0x50] sm:$0xff]  ;;  %1144 = vst.msk [vmem:[%s2308_s28 + $0x24] sm:$0xf] %vm1134_vm1, %v1674_v12  ;;  %v1758_v25 = vpop.f32.mrb[28].mxu0 }
 0x139   : > { %v929_v16 = vld [vmem:[#allocation2 + $0xd0] sm:$0xff]  ;;  %v952_v17 = vadd.f32 %v2295_v15, %v913_v14  ;;  %896 = vst.msk [vmem:[#allocation2 + $0xe0] sm:$0xff] %vm289_vm0, %v863_v9  ;;  %v914_v23 = vld [vmem:[#allocation2 + $0x58] sm:$0xff]  ;;  %881 = vst.msk [vmem:[#allocation2 + $0x68] sm:$0xff] %vm289_vm0, %v848_v19  ;;  %v1806_v26 = vpop.f32.mrb[28].mxu1  ;;  %v1759_v30 = vpop.f32.mrb[29].mxu0 }
 0x13a   : > { %v968_v18 = vadd.f32 %v2295_v15, %v929_v16  ;;  %1160 = vst.msk [vmem:[%s2308_s28 + $0x64] sm:$0xf] %vm1134_vm1, %v1690_v13  ;;  %v930_v24 = vld [vmem:[#allocation2 + $0xd8] sm:$0xff]  ;;  %v953_v27 = vadd.f32 %v2295_v15, %v914_v23  ;;  %v1807_v32 = vpop.f32.mrb[29].mxu1  ;;  %v1760_v35 = vadd.f32 %v1759_v30, %v1758_v25  ;;  %v1761_v37 = vpop.f32.mrb[30].mxu0 }
 0x13b   : > { %v984_v21 = vmax.f32 %v952_v17, 0.0  ;;  %897 = vst.msk [vmem:[#allocation2 + $0xe8] sm:$0xff] %vm289_vm0, %v864_v20  ;;  %v969_v28 = vadd.f32 %v2295_v15, %v930_v24  ;;  %v1808_v36 = vadd.f32 %v1807_v32, %v1806_v26  ;;  %v1809_v38 = vpop.f32.mrb[30].mxu1  ;;  %v1762_v42 = vpop.f32.mrb[31].mxu0 }
 0x13c   : > { %v1000_v22 = vmax.f32 %v968_v18, 0.0  ;;  %v985_v39 = vmax.f32 %v953_v27, 0.0  ;;  %v1810_v44 = vpop.f32.mrb[31].mxu1  ;;  %v849_v45 = vadd.f32 %v1760_v35, %v336_v29  ;;  %v1763_v47 = vadd.f32 %v1762_v42, %v1761_v37 }
 0x13d   : > { %v1675_v33 = vpack.c.bf16 %v984_v21, %v984_v21  ;;  %v1001_v40 = vmax.f32 %v969_v28, 0.0  ;;  %v865_v46 = vadd.f32 %v1808_v36, %v352_v31  ;;  %v1811_v48 = vadd.f32 %v1810_v44, %v1809_v38  ;;  %v915_v51 = vld [vmem:[#allocation2 + $0x60] sm:$0xff] }
 0x13e   : > { %v1691_v34 = vpack.c.bf16 %v1000_v22, %v1000_v22  ;;  %v1676_v49 = vpack.c.bf16 %v985_v39, %v985_v39  ;;  %v954_v53 = vadd.f32 %v2295_v15, %v915_v51  ;;  %882 = vst.msk [vmem:[#allocation2 + $0x70] sm:$0xff] %vm289_vm0, %v849_v45  ;;  %v850_v55 = vadd.f32 %v1763_v47, %v337_v41 }
 0x13f   : > { %1145 = vst.msk [vmem:[%s2308_s28 + $0x28] sm:$0xf] %vm1134_vm1, %v1675_v33  ;;  %v1692_v50 = vpack.c.bf16 %v1001_v40, %v1001_v40  ;;  %v866_v56 = vadd.f32 %v1811_v48, %v353_v43 }
 0x140   : > { %1161 = vst.msk [vmem:[%s2308_s28 + $0x68] sm:$0xf] %vm1134_vm1, %v1691_v34  ;;  %v931_v52 = vld [vmem:[#allocation2 + $0xe0] sm:$0xff]  ;;  %1146 = vst.msk [vmem:[%s2308_s28 + $0x2c] sm:$0xf] %vm1134_vm1, %v1676_v49  ;;  %v916_v57 = vld [vmem:[#allocation2 + $0x68] sm:$0xff] }
 0x141   : > { %v970_v54 = vadd.f32 %v2295_v15, %v931_v52  ;;  %898 = vst.msk [vmem:[#allocation2 + $0xf0] sm:$0xff] %vm289_vm0, %v865_v46  ;;  %v986_v59 = vmax.f32 %v954_v53, 0.0  ;;  %v955_v61 = vadd.f32 %v2295_v15, %v916_v57  ;;  %883 = vst.msk [vmem:[#allocation2 + $0x78] sm:$0xff] %vm289_vm0, %v850_v55 }
 0x142   : > { %1162 = vst.msk [vmem:[%s2308_s28 + $0x6c] sm:$0xf] %vm1134_vm1, %v1692_v50  ;;  %v932_v58 = vld [vmem:[#allocation2 + $0xe8] sm:$0xff] }
 0x143   : > { %v1002_v60 = vmax.f32 %v970_v54, 0.0  ;;  %v971_v62 = vadd.f32 %v2295_v15, %v932_v58  ;;  %899 = vst.msk [vmem:[#allocation2 + $0xf8] sm:$0xff] %vm289_vm0, %v866_v56  ;;  %v1677_v63 = vpack.c.bf16 %v986_v59, %v986_v59  ;;  %v987_v1 = vmax.f32 %v955_v61, 0.0 }
 0x145   : > { %v1693_v0 = vpack.c.bf16 %v1002_v60, %v1002_v60  ;;  %v1003_v2 = vmax.f32 %v971_v62, 0.0  ;;  %1147 = vst.msk [vmem:[%s2308_s28 + $0x30] sm:$0xf] %vm1134_vm1, %v1677_v63  ;;  %v1678_v3 = vpack.c.bf16 %v987_v1, %v987_v1  ;;  %v917_v5 = vld [vmem:[#allocation2 + $0x70] sm:$0xff] }
 0x146   : > { %v956_v7 = vadd.f32 %v2295_v15, %v917_v5 }
 0x147   : > { %1163 = vst.msk [vmem:[%s2308_s28 + $0x70] sm:$0xf] %vm1134_vm1, %v1693_v0  ;;  %v1694_v4 = vpack.c.bf16 %v1003_v2, %v1003_v2  ;;  %1148 = vst.msk [vmem:[%s2308_s28 + $0x34] sm:$0xf] %vm1134_vm1, %v1678_v3 }
 0x148   : > { %v933_v6 = vld [vmem:[#allocation2 + $0xf0] sm:$0xff]  ;;  %v918_v9 = vld [vmem:[#allocation2 + $0x78] sm:$0xff]  ;;  %v988_v11 = vmax.f32 %v956_v7, 0.0 }
 0x149   : > { %1164 = vst.msk [vmem:[%s2308_s28 + $0x74] sm:$0xf] %vm1134_vm1, %v1694_v4  ;;  %v972_v8 = vadd.f32 %v2295_v15, %v933_v6  ;;  %v957_v13 = vadd.f32 %v2295_v15, %v918_v9 }
 0x14a   : > { %v934_v10 = vld [vmem:[#allocation2 + $0xf8] sm:$0xff]  ;;  %v1679_v16 = vpack.c.bf16 %v988_v11, %v988_v11 }
 0x14b   : > { %v1004_v12 = vmax.f32 %v972_v8, 0.0  ;;  %v973_v14 = vadd.f32 %v2295_v15, %v934_v10  ;;  %v989_v18 = vmax.f32 %v957_v13, 0.0  ;;  %1173 = sbr.rel (!%p2154_p3) target bundleno = 408 (0x198), region = 44 }
 0x14c   : > { %1149 = vst.msk [vmem:[%s2308_s28 + $0x38] sm:$0xf] %vm1134_vm1, %v1679_v16 }
 0x14d   : > { %v1695_v17 = vpack.c.bf16 %v1004_v12, %v1004_v12  ;;  %v1005_v19 = vmax.f32 %v973_v14, 0.0  ;;  %v1680_v20 = vpack.c.bf16 %v989_v18, %v989_v18 }
 0x14f   : > { %1165 = vst.msk [vmem:[%s2308_s28 + $0x78] sm:$0xf] %vm1134_vm1, %v1695_v17  ;;  %v1696_v21 = vpack.c.bf16 %v1005_v19, %v1005_v19  ;;  %1150 = vst.msk [vmem:[%s2308_s28 + $0x3c] sm:$0xf] %vm1134_vm1, %v1680_v20 }
 0x151   : > { %1166 = vst.msk [vmem:[%s2308_s28 + $0x7c] sm:$0xf] %vm1134_vm1, %v1696_v21 }
 0x152   : > { %s2581_s29 = smov (!%p1176_p9, %s1175_s29), 32 }
 0x153   : > { %s1649_s7 = sshll.u32 %s2581_s29, 6 }
 0x154   : > { %p1652_p10 = scmp.eq.s32.totalorder %s1649_s7, 0 }
 0x155   : > { %s2439_s8 = sshrl.u32 (!%p1652_p10), %s2581_s29, 5 }
 0x156   : > { %1185 = sbr.rel (%p1652_p10) target bundleno = 408 (0x198), region = 48  ;;  %p1653_p11 = scmp.le.s32.totalorder (!%p1652_p10), %s2439_s8, 0 }
 0x15d   : > { %1482 = sbr.rel (%p1653_p11) target bundleno = 387 (0x183), region = 126  ;;  %s2571_s14 = smov (!%p1653_p11), %s2433_s6 }
 0x15e   : > { %s2572_s20 = smov (!%p1653_p11), %s2308_s28  ;;  %s2448_s25 = smov (!%p1653_p11), 0  }
 0x15f   : > { %s2450_s9 = smov (!%p1653_p11), 0  }
 0x164 LB: >> { %v1201_v15 = vld [vmem:[%s2075_s20] sm:$0xf]  ;;  %v1203_v22 = vld [vmem:[%s2075_s20 + $0x4] sm:$0xf]  ;;  %v1205_v23 = vld [vmem:[%s2075_s20 + $0x8] sm:$0xf]  ;;  %s2083_s9 = sphi %s2450_s9, %s1195_s9   ;;  %s2079_s25 = sphi %s2448_s25, %s2573_s25   ;;  %s2075_s20 = sphi %s2572_s20, %s1270_s20   ;;  %s2071_s14 = sphi %s2571_s14, %s1271_s14  }
 0x165   : >> { %1202 = vst [vmem:[%s2071_s14] sm:$0xf] %v1201_v15  ;;  %1204 = vst [vmem:[%s2071_s14 + $0x4] sm:$0xf] %v1203_v22  ;;  %v1207_v24 = vld [vmem:[%s2075_s20 + $0xc] sm:$0xf]  ;;  %s1265_s10 = sadd.s32 1, %s2079_s25 }
 0x166   : >> { %1206 = vst [vmem:[%s2071_s14 + $0x8] sm:$0xf] %v1205_v23  ;;  %v1209_v25 = vld [vmem:[%s2075_s20 + $0x10] sm:$0xf]  ;;  %v1211_v26 = vld [vmem:[%s2075_s20 + $0x14] sm:$0xf]  ;;  %p1266_p12 = scmp.ge.s32.totalorder %s1265_s10, %s2439_s8 }
 0x167   : >> { %1208 = vst [vmem:[%s2071_s14 + $0xc] sm:$0xf] %v1207_v24  ;;  %1210 = vst [vmem:[%s2071_s14 + $0x10] sm:$0xf] %v1209_v25  ;;  %v1213_v27 = vld [vmem:[%s2075_s20 + $0x18] sm:$0xf] }
 0x168   : >> { %1212 = vst [vmem:[%s2071_s14 + $0x14] sm:$0xf] %v1211_v26  ;;  %v1215_v28 = vld [vmem:[%s2075_s20 + $0x1c] sm:$0xf]  ;;  %v1217_v29 = vld [vmem:[%s2075_s20 + $0x20] sm:$0xf] }
 0x169   : >> { %1214 = vst [vmem:[%s2071_s14 + $0x18] sm:$0xf] %v1213_v27  ;;  %1216 = vst [vmem:[%s2071_s14 + $0x1c] sm:$0xf] %v1215_v28  ;;  %v1219_v30 = vld [vmem:[%s2075_s20 + $0x24] sm:$0xf] }
 0x16a   : >> { %1218 = vst [vmem:[%s2071_s14 + $0x20] sm:$0xf] %v1217_v29  ;;  %v1221_v31 = vld [vmem:[%s2075_s20 + $0x28] sm:$0xf]  ;;  %v1223_v32 = vld [vmem:[%s2075_s20 + $0x2c] sm:$0xf] }
 0x16b   : >> { %1220 = vst [vmem:[%s2071_s14 + $0x24] sm:$0xf] %v1219_v30  ;;  %1222 = vst [vmem:[%s2071_s14 + $0x28] sm:$0xf] %v1221_v31  ;;  %v1225_v33 = vld [vmem:[%s2075_s20 + $0x30] sm:$0xf] }
 0x16c   : >> { %1224 = vst [vmem:[%s2071_s14 + $0x2c] sm:$0xf] %v1223_v32  ;;  %v1227_v34 = vld [vmem:[%s2075_s20 + $0x34] sm:$0xf]  ;;  %v1229_v35 = vld [vmem:[%s2075_s20 + $0x38] sm:$0xf] }
 0x16d   : >> { %1226 = vst [vmem:[%s2071_s14 + $0x30] sm:$0xf] %v1225_v33  ;;  %1228 = vst [vmem:[%s2071_s14 + $0x34] sm:$0xf] %v1227_v34  ;;  %v1231_v36 = vld [vmem:[%s2075_s20 + $0x3c] sm:$0xf] }
 0x16e   : >> { %1230 = vst [vmem:[%s2071_s14 + $0x38] sm:$0xf] %v1229_v35  ;;  %v1233_v37 = vld [vmem:[%s2075_s20 + $0x40] sm:$0xf]  ;;  %v1235_v38 = vld [vmem:[%s2075_s20 + $0x44] sm:$0xf] }
 0x16f   : >> { %1232 = vst [vmem:[%s2071_s14 + $0x3c] sm:$0xf] %v1231_v36  ;;  %1234 = vst [vmem:[%s2071_s14 + $0x40] sm:$0xf] %v1233_v37  ;;  %v1237_v39 = vld [vmem:[%s2075_s20 + $0x48] sm:$0xf] }
 0x170   : >> { %1236 = vst [vmem:[%s2071_s14 + $0x44] sm:$0xf] %v1235_v38  ;;  %v1239_v40 = vld [vmem:[%s2075_s20 + $0x4c] sm:$0xf]  ;;  %v1241_v41 = vld [vmem:[%s2075_s20 + $0x50] sm:$0xf] }
 0x171   : >> { %1238 = vst [vmem:[%s2071_s14 + $0x48] sm:$0xf] %v1237_v39  ;;  %1240 = vst [vmem:[%s2071_s14 + $0x4c] sm:$0xf] %v1239_v40  ;;  %v1243_v42 = vld [vmem:[%s2075_s20 + $0x54] sm:$0xf] }
 0x172   : >> { %1242 = vst [vmem:[%s2071_s14 + $0x50] sm:$0xf] %v1241_v41  ;;  %v1245_v43 = vld [vmem:[%s2075_s20 + $0x58] sm:$0xf]  ;;  %v1247_v44 = vld [vmem:[%s2075_s20 + $0x5c] sm:$0xf] }
 0x173   : >> { %1244 = vst [vmem:[%s2071_s14 + $0x54] sm:$0xf] %v1243_v42  ;;  %1246 = vst [vmem:[%s2071_s14 + $0x58] sm:$0xf] %v1245_v43  ;;  %v1249_v45 = vld [vmem:[%s2075_s20 + $0x60] sm:$0xf] }
 0x174   : >> { %1248 = vst [vmem:[%s2071_s14 + $0x5c] sm:$0xf] %v1247_v44  ;;  %v1251_v46 = vld [vmem:[%s2075_s20 + $0x64] sm:$0xf]  ;;  %v1253_v47 = vld [vmem:[%s2075_s20 + $0x68] sm:$0xf] }
 0x175   : >> { %1250 = vst [vmem:[%s2071_s14 + $0x60] sm:$0xf] %v1249_v45  ;;  %1252 = vst [vmem:[%s2071_s14 + $0x64] sm:$0xf] %v1251_v46  ;;  %v1255_v48 = vld [vmem:[%s2075_s20 + $0x6c] sm:$0xf] }
 0x176   : >> { %1254 = vst [vmem:[%s2071_s14 + $0x68] sm:$0xf] %v1253_v47  ;;  %v1257_v49 = vld [vmem:[%s2075_s20 + $0x70] sm:$0xf]  ;;  %v1259_v50 = vld [vmem:[%s2075_s20 + $0x74] sm:$0xf] }
 0x177   : >> { %1256 = vst [vmem:[%s2071_s14 + $0x6c] sm:$0xf] %v1255_v48  ;;  %1258 = vst [vmem:[%s2071_s14 + $0x70] sm:$0xf] %v1257_v49  ;;  %v1261_v51 = vld [vmem:[%s2075_s20 + $0x78] sm:$0xf] }
 0x178   : >> { %1260 = vst [vmem:[%s2071_s14 + $0x74] sm:$0xf] %v1259_v50  ;;  %v1263_v52 = vld [vmem:[%s2075_s20 + $0x7c] sm:$0xf]  ;;  %1262 = vst [vmem:[%s2071_s14 + $0x78] sm:$0xf] %v1261_v51 }
 0x179   : >> { %1264 = vst [vmem:[%s2071_s14 + $0x7c] sm:$0xf] %v1263_v52  ;;  %s2583_s10 = smov (%p1266_p12, %s1265_s10), 0  ;;  %s1195_s9 = sadd.s32 1, %s2083_s9  }
 0x17a   : >> { %s1654_s11 = sshll.u32 %s2583_s10, 7  ;;  %p1194_p13 = scmp.ge.s32.totalorder %s1195_s9, %s2439_s8 }
 0x17b   : >> { %s1270_s20 = scalar_lea.vmem %s2308_s28, %s1654_s11 [#allocation3]   ;;  %s1271_s14 = scalar_lea.vmem %s2433_s6, %s1654_s11  }
 0x17c   : >> { %s2573_s25 = smov %s2583_s10  ;;  %1197 = sbr.rel (!%p1194_p13) target bundleno = 356 (0x164), region = 132 }
 0x183 PF: > { %s2543_s17 = sand.u32 31, %s2581_s29   ;;  %s1698_s19 = sshll.u32 %s2439_s8, 7 }
 0x184   : > { %s1276_s21 = scalar_lea.vmem %s2308_s28, %s1698_s19 [#allocation3]   ;;  %s1278_s23 = scalar_lea.vmem %s2433_s6, %s1698_s19  }
 0x185   : > { %p1659_p0 = scmp.le.s32.totalorder %s2543_s17, 0 }
 0x186   : > { %s2085_s24 = smov (!%p1659_p0), %s1278_s23   ;;  %s2089_s26 = smov (!%p1659_p0), %s1276_s21  }
 0x187   : > { %1496 = sbr.rel (%p1659_p0) target bundleno = 408 (0x198), region = 137  ;;  %s2093_s27 = smov (!%p1659_p0), 0  }
 0x188   : > { %s2097_s12 = smov (!%p1659_p0), 0  }
 0x18e LB: >> { %v1288_v53 = vld [vmem:[%s2091_s26] sm:$0xf]  ;;  %s1290_s29 = sadd.s32 1, %s2095_s27  ;;  %s1282_s12 = sadd.s32 1, %s2099_s12   ;;  %s2099_s12 = sphi %s2097_s12, %s1282_s12   ;;  %s2095_s27 = sphi %s2093_s27, %s2094_s27   ;;  %s2091_s26 = sphi %s2089_s26, %s1295_s26   ;;  %s2087_s24 = sphi %s2085_s24, %s1296_s24  }
 0x18f   : >> { %1289 = vst [vmem:[%s2087_s24] sm:$0xf] %v1288_v53  ;;  %p1291_p1 = scmp.ge.s32.totalorder %s1290_s29, %s2543_s17  ;;  %p1281_p2 = scmp.ge.s32.totalorder %s1282_s12, %s2543_s17 }
 0x191   : >> { %s2585_s29 = smov (%p1291_p1, %s1290_s29), 0  ;;  %1284 = sbr.rel (!%p1281_p2) target bundleno = 398 (0x18e), region = 143 }
 0x192   : >> { %s1660_s28 = sshll.u32 %s2585_s29, 2  ;;  %s2094_s27 = smov %s2585_s29  }
 0x193   : >> { %s1295_s26 = scalar_lea.vmem %s1276_s21, %s1660_s28 [#allocation3]   ;;  %s1296_s24 = scalar_lea.vmem %s1278_s23, %s1660_s28  }
 0x198 PF: > { %s13_s16 = sadd.s32 1, %s2067_s16   ;;  %s2574_s12 = smov %s2055_s13 }
 0x199   : > { %p10_p3 = scmp.ge.s32.totalorder %s13_s16, 6   ;;  %s2575_s13 = smov %s2163_s22 }
 0x19a   : > { %s2576_s14 = smov %s2063_s15  ;;  %s2577_s15 = smov %s2579_s18 }
 0x19b   :  { %12 = sbr.rel (!%p10_p3) target bundleno = 3 (0x3), region = 154 }

// kernel: dqn_forward.6
= control target key start
LH: loop header
LB: loop body
LE: loop exit
PB: predicated region body
PF: predicated region fallthrough
CT: control target
= control target key end

     0   :  { %vm19_vm0 = vcmask 523264   ;;  %vm40_vm1 = vcmask 517120   ;;  %vm1017_vm2 = vcmask 519168   ;;  %vm1038_vm3 = vcmask 516096   ;;  %s1818_s1 = inlined_call_operand.vmem [shape: bf16[512,64], index: 1, kind: input, shape index: {}]   ;;  %s1819_s0 = inlined_call_operand.vmem [shape: bf16[162,512], index: 0, kind: input, shape index: {}]   ;;  %s1820_s2 = inlined_call_operand.vmem [shape: f32[1,64], index: 2, kind: input, shape index: {}]   ;;  %s1821_s3 = inlined_call_operand.vmem [shape: bf16[162,64], index: 3, kind: output, shape index: {}]  }
   0x1   :  { %v1328_v0 = vld [vmem:[%s1818_s1 + $0x40] sm:$0xff]   ;;  %v1332_v4 = vld [vmem:[%s1818_s1 + $0x48] sm:$0xff]   ;;  %v1336_v8 = vld [vmem:[%s1818_s1 + $0x50] sm:$0xff]  }
   0x2   :  { %v1329_v1 = vld [vmem:[%s1818_s1 + $0xc0] sm:$0xff]   ;;  %1163 = vmatprep.subr.bf16.mxu0 %v1328_v0  ;;  %v1333_v5 = vld [vmem:[%s1818_s1 + $0xc8] sm:$0xff]   ;;  %v1337_v9 = vld [vmem:[%s1818_s1 + $0xd0] sm:$0xff]  }
   0x3   :  { %v1330_v2 = vld [vmem:[%s1818_s1] sm:$0xff]   ;;  %1245 = vmatprep.subr.bf16.mxu1 %v1329_v1  ;;  %v1334_v6 = vld [vmem:[%s1818_s1 + $0x8] sm:$0xff]   ;;  %v1338_v10 = vld [vmem:[%s1818_s1 + $0x10] sm:$0xff]  }
   0x4   :  { %v1331_v3 = vld [vmem:[%s1818_s1 + $0x80] sm:$0xff]   ;;  %1164 = vmatpush3.bf16.msra.mxu0 %v1330_v2  ;;  %v1335_v7 = vld [vmem:[%s1818_s1 + $0x88] sm:$0xff]   ;;  %v1339_v11 = vld [vmem:[%s1818_s1 + $0x90] sm:$0xff]  }
   0x5   :  { %1246 = vmatpush3.bf16.msra.mxu1 %v1331_v3  ;;  %1165 = vmatprep.subr.bf16.mxu0 %v1332_v4  ;;  %v1340_v12 = vld [vmem:[%s1818_s1 + $0x58] sm:$0xff]   ;;  %v1344_v16 = vld [vmem:[%s1818_s1 + $0x60] sm:$0xff]   ;;  %v1348_v20 = vld [vmem:[%s1818_s1 + $0x68] sm:$0xff]  }
   0x6   :  { %1247 = vmatprep.subr.bf16.mxu1 %v1333_v5  ;;  %v1341_v13 = vld [vmem:[%s1818_s1 + $0xd8] sm:$0xff]   ;;  %v1345_v17 = vld [vmem:[%s1818_s1 + $0xe0] sm:$0xff]   ;;  %v1349_v21 = vld [vmem:[%s1818_s1 + $0xe8] sm:$0xff]  }
   0x7   :  { %v1342_v14 = vld [vmem:[%s1818_s1 + $0x18] sm:$0xff]   ;;  %v1346_v18 = vld [vmem:[%s1818_s1 + $0x20] sm:$0xff]   ;;  %v1350_v22 = vld [vmem:[%s1818_s1 + $0x28] sm:$0xff]  }
   0x8   :  { %1166 = vmatpush3.bf16.msra.mxu0 %v1334_v6  ;;  %v1343_v15 = vld [vmem:[%s1818_s1 + $0x98] sm:$0xff]   ;;  %v1347_v19 = vld [vmem:[%s1818_s1 + $0xa0] sm:$0xff]   ;;  %v1351_v23 = vld [vmem:[%s1818_s1 + $0xa8] sm:$0xff]  }
   0x9   :  { %1248 = vmatpush3.bf16.msra.mxu1 %v1335_v7  ;;  %1167 = vmatprep.subr.bf16.mxu0 %v1336_v8  ;;  %v1352_v24 = vld [vmem:[%s1818_s1 + $0x70] sm:$0xff]   ;;  %v1356_v28 = vld [vmem:[%s1818_s1 + $0x78] sm:$0xff]   ;;  %v103_v6 = vld [vmem:[%s1819_s0 + $0x140] sm:$0x11] }
   0xa   :  { %1249 = vmatprep.subr.bf16.mxu1 %v1337_v9  ;;  %v1353_v25 = vld [vmem:[%s1818_s1 + $0xf0] sm:$0xff]   ;;  %v1357_v29 = vld [vmem:[%s1818_s1 + $0xf8] sm:$0xff]   ;;  %v104_v7 = vld [vmem:[%s1819_s0 + $0x148] sm:$0x11] }
   0xb   :  { %v1354_v26 = vld [vmem:[%s1818_s1 + $0x30] sm:$0xff]   ;;  %v1358_v30 = vld [vmem:[%s1818_s1 + $0x38] sm:$0xff]  }
   0xc   :  { %1168 = vmatpush3.bf16.msra.mxu0 %v1338_v10  ;;  %v1355_v27 = vld [vmem:[%s1818_s1 + $0xb0] sm:$0xff]   ;;  %v1359_v31 = vld [vmem:[%s1818_s1 + $0xb8] sm:$0xff]   ;;  %v1085_v10 = vcombine.high %v103_v6, %v103_v6 }
   0xd   :  { %1250 = vmatpush3.bf16.msra.mxu1 %v1339_v11  ;;  %1169 = vmatprep.subr.bf16.mxu0 %v1340_v12  ;;  %v1360_v32 = vld [vmem:[%s1819_s0] ss:$16 sps:$4 sm:$0xff]   ;;  %v1362_v33 = vld [vmem:[%s1819_s0 + $0x4] ss:$16 sps:$4 sm:$0xff]   ;;  %v1363_v34 = vld [vmem:[%s1819_s0 + $0x8] ss:$16 sps:$4 sm:$0xff]   ;;  %v1087_v11 = vcombine.high %v104_v7, %v104_v7  ;;  %v1084_v12 = vcombine.low %v103_v6, %v103_v6 }
   0xe   :  { %1251 = vmatprep.subr.bf16.mxu1 %v1341_v13  ;;  %v1365_v35 = vld [vmem:[%s1819_s0 + $0xc] ss:$16 sps:$4 sm:$0xff]   ;;  %607 = vmatprep.mubr.bf16.mxu0 %v1362_v33  ;;  %v1366_v36 = vld [vmem:[%s1819_s0 + $0x24] ss:$16 sps:$4 sm:$0xff]   ;;  %v1370_v38 = vld [vmem:[%s1819_s0 + $0x20] ss:$16 sps:$4 sm:$0xff]   ;;  %v1086_v13 = vcombine.low %v104_v7, %v104_v7 }
   0xf   :  { %727 = vmatprep.mubr.bf16.mxu1 %v1365_v35  ;;  %v1368_v37 = vld [vmem:[%s1819_s0 + $0x2c] ss:$16 sps:$4 sm:$0xff]   ;;  %v1371_v39 = vld [vmem:[%s1819_s0 + $0x28] ss:$16 sps:$4 sm:$0xff]   ;;  %v1372_v40 = vld [vmem:[%s1819_s0 + $0x44] ss:$16 sps:$4 sm:$0xff]  }
  0x10   :  { %1170 = vmatpush3.bf16.msra.mxu0 %v1342_v14  ;;  %v1374_v41 = vld [vmem:[%s1819_s0 + $0x4c] ss:$16 sps:$4 sm:$0xff]   ;;  %v1376_v42 = vld [vmem:[%s1819_s0 + $0x40] ss:$16 sps:$4 sm:$0xff]   ;;  %v1377_v43 = vld [vmem:[%s1819_s0 + $0x48] ss:$16 sps:$4 sm:$0xff]  }
  0x11   :  { %1252 = vmatpush3.bf16.msra.mxu1 %v1343_v15  ;;  %1171 = vmatprep.subr.bf16.mxu0 %v1344_v16  ;;  %v1378_v44 = vld [vmem:[%s1819_s0 + $0x64] ss:$16 sps:$4 sm:$0xff]   ;;  %v1380_v45 = vld [vmem:[%s1819_s0 + $0x6c] ss:$16 sps:$4 sm:$0xff]   ;;  %v1382_v46 = vld [vmem:[%s1819_s0 + $0x60] ss:$16 sps:$4 sm:$0xff]  }
  0x12   :  { %1253 = vmatprep.subr.bf16.mxu1 %v1345_v17  ;;  %v1383_v47 = vld [vmem:[%s1819_s0 + $0x68] ss:$16 sps:$4 sm:$0xff]   ;;  %v1384_v48 = vld [vmem:[%s1819_s0 + $0x84] ss:$16 sps:$4 sm:$0xff]   ;;  %v1386_v49 = vld [vmem:[%s1819_s0 + $0x8c] ss:$16 sps:$4 sm:$0xff]  }
  0x13   :  { %v1388_v50 = vld [vmem:[%s1819_s0 + $0x80] ss:$16 sps:$4 sm:$0xff]   ;;  %v1389_v51 = vld [vmem:[%s1819_s0 + $0x88] ss:$16 sps:$4 sm:$0xff]   ;;  %v1390_v52 = vld [vmem:[%s1819_s0 + $0xa4] ss:$16 sps:$4 sm:$0xff]  }
  0x14   :  { %1172 = vmatpush3.bf16.msra.mxu0 %v1346_v18  ;;  %v1392_v53 = vld [vmem:[%s1819_s0 + $0xac] ss:$16 sps:$4 sm:$0xff]   ;;  %v1394_v54 = vld [vmem:[%s1819_s0 + $0xa0] ss:$16 sps:$4 sm:$0xff]   ;;  %v1395_v55 = vld [vmem:[%s1819_s0 + $0xa8] ss:$16 sps:$4 sm:$0xff]  }
  0x15   :  { %1254 = vmatpush3.bf16.msra.mxu1 %v1347_v19  ;;  %1173 = vmatprep.subr.bf16.mxu0 %v1348_v20  ;;  %v1396_v56 = vld [vmem:[%s1819_s0 + $0xc4] ss:$16 sps:$4 sm:$0xff]   ;;  %v1398_v57 = vld [vmem:[%s1819_s0 + $0xcc] ss:$16 sps:$4 sm:$0xff]   ;;  %v1400_v58 = vld [vmem:[%s1819_s0 + $0xc0] ss:$16 sps:$4 sm:$0xff]  }
  0x16   :  { %1255 = vmatprep.subr.bf16.mxu1 %v1349_v21  ;;  %v1401_v59 = vld [vmem:[%s1819_s0 + $0xc8] ss:$16 sps:$4 sm:$0xff]   ;;  %v1402_v60 = vld [vmem:[%s1819_s0 + $0xe4] ss:$16 sps:$4 sm:$0xff]   ;;  %v1404_v61 = vld [vmem:[%s1819_s0 + $0xec] ss:$16 sps:$4 sm:$0xff]  }
  0x17   :  { %v1406_v62 = vld [vmem:[%s1819_s0 + $0xe0] ss:$16 sps:$4 sm:$0xff]   ;;  %v1407_v63 = vld [vmem:[%s1819_s0 + $0xe8] ss:$16 sps:$4 sm:$0xff]   ;;  %v1408_v0 = vld [vmem:[%s1819_s0 + $0x104] ss:$16 sps:$4 sm:$0xff]  }
  0x18   :  { %1174 = vmatpush3.bf16.msra.mxu0 %v1350_v22  ;;  %v1410_v1 = vld [vmem:[%s1819_s0 + $0x10c] ss:$16 sps:$4 sm:$0xff]   ;;  %v1412_v2 = vld [vmem:[%s1819_s0 + $0x100] ss:$16 sps:$4 sm:$0xff]   ;;  %v1413_v3 = vld [vmem:[%s1819_s0 + $0x108] ss:$16 sps:$4 sm:$0xff]  }
  0x19   :  { %1256 = vmatpush3.bf16.msra.mxu1 %v1351_v23  ;;  %1175 = vmatprep.subr.bf16.mxu0 %v1352_v24  ;;  %v1414_v4 = vld [vmem:[%s1819_s0 + $0x124] ss:$16 sps:$4 sm:$0xff]   ;;  %v1416_v5 = vld [vmem:[%s1819_s0 + $0x12c] ss:$16 sps:$4 sm:$0xff]   ;;  %v1418_v8 = vld [vmem:[%s1819_s0 + $0x120] ss:$16 sps:$4 sm:$0xff]  }
  0x1a   :  { %1257 = vmatprep.subr.bf16.mxu1 %v1353_v25  ;;  %v1419_v9 = vld [vmem:[%s1819_s0 + $0x128] ss:$16 sps:$4 sm:$0xff]   ;;  %v1424_v14 = vmov 0.0  }
  0x1b   :  { %20 = vst.msk [vmem:[#allocation2] sm:$0xff] %vm19_vm0, %v1424_v14  ;;  %21 = vst.msk [vmem:[#allocation2 + $0x8] sm:$0xff] %vm19_vm0, %v1424_v14 }
  0x1c   :  { %1176 = vmatpush3.bf16.msra.mxu0 %v1354_v26  ;;  %22 = vst.msk [vmem:[#allocation2 + $0x10] sm:$0xff] %vm19_vm0, %v1424_v14  ;;  %23 = vst.msk [vmem:[#allocation2 + $0x18] sm:$0xff] %vm19_vm0, %v1424_v14 }
  0x1d   :  { %1258 = vmatpush3.bf16.msra.mxu1 %v1355_v27  ;;  %1177 = vmatprep.subr.bf16.mxu0 %v1356_v28  ;;  %24 = vst.msk [vmem:[#allocation2 + $0x20] sm:$0xff] %vm19_vm0, %v1424_v14  ;;  %25 = vst.msk [vmem:[#allocation2 + $0x28] sm:$0xff] %vm19_vm0, %v1424_v14 }
  0x1e   :  { %1259 = vmatprep.subr.bf16.mxu1 %v1357_v29  ;;  %26 = vst.msk [vmem:[#allocation2 + $0x30] sm:$0xff] %vm19_vm0, %v1424_v14  ;;  %27 = vst.msk [vmem:[#allocation2 + $0x38] sm:$0xff] %vm19_vm0, %v1424_v14 }
  0x1f   :  { %28 = vst.msk [vmem:[#allocation2 + $0x40] sm:$0xff] %vm19_vm0, %v1424_v14  ;;  %29 = vst.msk [vmem:[#allocation2 + $0x48] sm:$0xff] %vm19_vm0, %v1424_v14 }
  0x20   :  { %1178 = vmatpush3.bf16.msra.mxu0 %v1358_v30  ;;  %30 = vst.msk [vmem:[#allocation2 + $0x50] sm:$0xff] %vm19_vm0, %v1424_v14  ;;  %31 = vst.msk [vmem:[#allocation2 + $0x58] sm:$0xff] %vm19_vm0, %v1424_v14 }
  0x21   :  { %1260 = vmatpush3.bf16.msra.mxu1 %v1359_v31  ;;  %32 = vst.msk [vmem:[#allocation2 + $0x60] sm:$0xff] %vm19_vm0, %v1424_v14  ;;  %33 = vst.msk [vmem:[#allocation2 + $0x68] sm:$0xff] %vm19_vm0, %v1424_v14 }
  0x22   :  { %34 = vst.msk [vmem:[#allocation2 + $0x70] sm:$0xff] %vm19_vm0, %v1424_v14  ;;  %35 = vst.msk [vmem:[#allocation2 + $0x78] sm:$0xff] %vm19_vm0, %v1424_v14  ;;  %v42_v24 = vld [vmem:[#allocation2] sm:$0xff]  ;;  %v43_v29 = vld [vmem:[#allocation2 + $0x8] sm:$0xff] }
  0x23   :  { %608 = vmatmul.mubr.bf16.vlgmr.msra.gmra.mrb[0].mxu0 %v1360_v32  ;;  %36 = vst.msk [vmem:[#allocation2 + $0x80] sm:$0xff] %vm19_vm0, %v1424_v14  ;;  %37 = vst.msk [vmem:[#allocation2 + $0x88] sm:$0xff] %vm19_vm0, %v1424_v14 }
  0x24   :  { %728 = vmatmul.mubr.bf16.vlgmr.msra.gmra.mrb[0].mxu1 %v1363_v34  ;;  %615 = vmatprep.mubr.bf16.mxu0 %v1366_v36  ;;  %38 = vst.msk [vmem:[#allocation2 + $0x90] sm:$0xff] %vm19_vm0, %v1424_v14  ;;  %39 = vst.msk [vmem:[#allocation2 + $0x98] sm:$0xff] %vm19_vm0, %v1424_v14 }
  0x25   :  { %735 = vmatprep.mubr.bf16.mxu1 %v1368_v37  ;;  %41 = vst.msk [vmem:[#allocation2 + $0xa0] sm:$0x3] %vm40_vm1, %v1424_v14 }
  0x2b   :  { %616 = vmatmul.mubr.bf16.gmra.mrb[4].mxu0 %v1370_v38 }
  0x2c   :  { %736 = vmatmul.mubr.bf16.gmra.mrb[4].mxu1 %v1371_v39  ;;  %623 = vmatprep.mubr.bf16.mxu0 %v1372_v40 }
  0x2d   :  { %743 = vmatprep.mubr.bf16.mxu1 %v1374_v41 }
  0x33   :  { %624 = vmatmul.mubr.bf16.gmra.mrb[8].mxu0 %v1376_v42  ;;  %v44_v42 = vld [vmem:[#allocation2 + $0x10] sm:$0xff] }
  0x34   :  { %744 = vmatmul.mubr.bf16.gmra.mrb[8].mxu1 %v1377_v43  ;;  %631 = vmatprep.mubr.bf16.mxu0 %v1378_v44 }
  0x35   :  { %751 = vmatprep.mubr.bf16.mxu1 %v1380_v45 }
  0x3b   :  { %632 = vmatmul.mubr.bf16.gmra.mrb[12].mxu0 %v1382_v46 }
  0x3c   :  { %752 = vmatmul.mubr.bf16.gmra.mrb[12].mxu1 %v1383_v47  ;;  %639 = vmatprep.mubr.bf16.mxu0 %v1384_v48  ;;  %v1693_v47 = vld [vmem:[%s1820_s2] ss:$0 sm:$0xff]  ;;  %v45_v48 = vld [vmem:[#allocation2 + $0x18] sm:$0xff] }
  0x3d   :  { %759 = vmatprep.mubr.bf16.mxu1 %v1386_v49 }
  0x43   :  { %640 = vmatmul.mubr.bf16.gmra.mrb[16].mxu0 %v1388_v50 }
  0x44   :  { %760 = vmatmul.mubr.bf16.gmra.mrb[16].mxu1 %v1389_v51  ;;  %647 = vmatprep.mubr.bf16.mxu0 %v1390_v52 }
  0x45   :  { %767 = vmatprep.mubr.bf16.mxu1 %v1392_v53 }
  0x4b   :  { %648 = vmatmul.mubr.bf16.gmra.mrb[20].mxu0 %v1394_v54 }
  0x4c   :  { %768 = vmatmul.mubr.bf16.gmra.mrb[20].mxu1 %v1395_v55  ;;  %655 = vmatprep.mubr.bf16.mxu0 %v1396_v56 }
  0x4d   :  { %775 = vmatprep.mubr.bf16.mxu1 %v1398_v57 }
  0x53   :  { %656 = vmatmul.mubr.bf16.gmra.mrb[24].mxu0 %v1400_v58 }
  0x54   :  { %776 = vmatmul.mubr.bf16.gmra.mrb[24].mxu1 %v1401_v59  ;;  %663 = vmatprep.mubr.bf16.mxu0 %v1402_v60 }
  0x55   :  { %783 = vmatprep.mubr.bf16.mxu1 %v1404_v61 }
  0x5b   :  { %664 = vmatmul.mubr.bf16.gmra.mrb[28].mxu0 %v1406_v62 }
  0x5c   :  { %784 = vmatmul.mubr.bf16.gmra.mrb[28].mxu1 %v1407_v63  ;;  %671 = vmatprep.mubr.bf16.mxu0 %v1408_v0 }
  0x5d   :  { %791 = vmatprep.mubr.bf16.mxu1 %v1410_v1 }
  0x63   :  { %672 = vmatmul.mubr.bf16.gmra.mrb[32].mxu0 %v1412_v2  ;;  %v46_v2 = vld [vmem:[#allocation2 + $0x20] sm:$0xff] }
  0x64   :  { %792 = vmatmul.mubr.bf16.gmra.mrb[32].mxu1 %v1413_v3  ;;  %679 = vmatprep.mubr.bf16.mxu0 %v1414_v4 }
  0x65   :  { %799 = vmatprep.mubr.bf16.mxu1 %v1416_v5 }
  0x6b   :  { %680 = vmatmul.mubr.bf16.gmra.mrb[36].mxu0 %v1418_v8 }
  0x6c   :  { %800 = vmatmul.mubr.bf16.gmra.mrb[36].mxu1 %v1419_v9  ;;  %687 = vmatprep.mubr.bf16.mxu0 %v1085_v10  ;;  %v47_v9 = vld [vmem:[#allocation2 + $0x28] sm:$0xff] }
  0x6d   :  { %807 = vmatprep.mubr.bf16.mxu1 %v1087_v11 }
  0x73   :  { %688 = vmatmul.mubr.bf16.gmra.mrb[40].mxu0 %v1084_v12 }
  0x74   :  { %808 = vmatmul.mubr.bf16.gmra.mrb[40].mxu1 %v1086_v13 }
  0xf6   :  { %v1179_v15 = vpop.f32.mrb[0].mxu0 }
  0xf7   :  { %v1261_v16 = vpop.f32.mrb[0].mxu1  ;;  %v1180_v17 = vpop.f32.mrb[1].mxu0 }
  0xf8   :  { %v1181_v18 = vadd.f32 %v1180_v17, %v1179_v15  ;;  %v1262_v19 = vpop.f32.mrb[1].mxu1  ;;  %v1182_v20 = vpop.f32.mrb[2].mxu0 }
  0xf9   :  { %v1263_v21 = vadd.f32 %v1262_v19, %v1261_v16  ;;  %v1264_v22 = vpop.f32.mrb[2].mxu1  ;;  %v1183_v23 = vpop.f32.mrb[3].mxu0 }
  0xfa   :  { %v1184_v25 = vadd.f32 %v1183_v23, %v1182_v20  ;;  %v1265_v26 = vpop.f32.mrb[3].mxu1 }
  0xfb   :  { %v730_v27 = vadd.f32 %v1263_v21, %v1181_v18  ;;  %v1266_v28 = vadd.f32 %v1265_v26, %v1264_v22 }
  0xfd   :  { %v815_v30 = vadd.f32 %v730_v27, %v42_v24  ;;  %v733_v31 = vadd.f32 %v1266_v28, %v1184_v25  ;;  %v48_v28 = vld [vmem:[#allocation2 + $0x30] sm:$0xff] }
  0xfe   :  { %v1185_v32 = vpop.f32.mrb[4].mxu0 }
  0xff   :  { %837 = vst.msk [vmem:[#allocation2] sm:$0xff] %vm19_vm0, %v815_v30  ;;  %v816_v33 = vadd.f32 %v733_v31, %v43_v29  ;;  %v1267_v34 = vpop.f32.mrb[4].mxu1  ;;  %v1186_v35 = vpop.f32.mrb[5].mxu0 }
 0x100   :  { %v1187_v36 = vadd.f32 %v1186_v35, %v1185_v32  ;;  %v1268_v37 = vpop.f32.mrb[5].mxu1  ;;  %v1188_v38 = vpop.f32.mrb[6].mxu0  ;;  %v49_v35 = vld [vmem:[#allocation2 + $0x38] sm:$0xff] }
 0x101   :  { %838 = vst.msk [vmem:[#allocation2 + $0x8] sm:$0xff] %vm19_vm0, %v816_v33  ;;  %v1269_v39 = vadd.f32 %v1268_v37, %v1267_v34  ;;  %v1270_v40 = vpop.f32.mrb[6].mxu1  ;;  %v1189_v41 = vpop.f32.mrb[7].mxu0 }
 0x102   :  { %v1190_v43 = vadd.f32 %v1189_v41, %v1188_v38  ;;  %v1271_v44 = vpop.f32.mrb[7].mxu1 }
 0x103   :  { %v738_v45 = vadd.f32 %v1269_v39, %v1187_v36  ;;  %v1272_v46 = vadd.f32 %v1271_v44, %v1270_v40 }
 0x105   :  { %v817_v49 = vadd.f32 %v738_v45, %v44_v42  ;;  %v741_v50 = vadd.f32 %v1272_v46, %v1190_v43 }
 0x106   :  { %v862_v51 = vld [vmem:[#allocation2] sm:$0xff]  ;;  %v1191_v52 = vpop.f32.mrb[8].mxu0 }
 0x107   :  { %v890_v53 = vadd.f32 %v1693_v47, %v862_v51  ;;  %839 = vst.msk [vmem:[#allocation2 + $0x10] sm:$0xff] %vm19_vm0, %v817_v49  ;;  %v818_v54 = vadd.f32 %v741_v50, %v45_v48  ;;  %v1273_v55 = vpop.f32.mrb[8].mxu1  ;;  %v1192_v56 = vpop.f32.mrb[9].mxu0 }
 0x108   :  { %v863_v57 = vld [vmem:[#allocation2 + $0x8] sm:$0xff]  ;;  %v1193_v58 = vadd.f32 %v1192_v56, %v1191_v52  ;;  %v1274_v59 = vpop.f32.mrb[9].mxu1  ;;  %v1194_v60 = vpop.f32.mrb[10].mxu0 }
 0x109   :  { %v911_v61 = vmax.f32 %v890_v53, 0.0  ;;  %v891_v62 = vadd.f32 %v1693_v47, %v863_v57  ;;  %840 = vst.msk [vmem:[#allocation2 + $0x18] sm:$0xff] %vm19_vm0, %v818_v54  ;;  %v1275_v63 = vadd.f32 %v1274_v59, %v1273_v55  ;;  %v1276_v0 = vpop.f32.mrb[10].mxu1  ;;  %v1195_v1 = vpop.f32.mrb[11].mxu0  ;;  %v50_v55 = vld [vmem:[#allocation2 + $0x40] sm:$0xff] }
 0x10a   :  { %v1196_v3 = vadd.f32 %v1195_v1, %v1194_v60  ;;  %v1277_v4 = vpop.f32.mrb[11].mxu1 }
 0x10b   :  { %v1142_v5 = vpack.c.bf16 %v911_v61, %v911_v61  ;;  %v912_v6 = vmax.f32 %v891_v62, 0.0  ;;  %v746_v7 = vadd.f32 %v1275_v63, %v1193_v58  ;;  %v1278_v8 = vadd.f32 %v1277_v4, %v1276_v0  ;;  %v51_v62 = vld [vmem:[#allocation2 + $0x48] sm:$0xff] }
 0x10d   :  { %1018 = vst.msk [vmem:[%s1821_s3] sm:$0xf] %vm1017_vm2, %v1142_v5  ;;  %v1143_v10 = vpack.c.bf16 %v912_v6, %v912_v6  ;;  %v819_v11 = vadd.f32 %v746_v7, %v46_v2  ;;  %v749_v12 = vadd.f32 %v1278_v8, %v1196_v3 }
 0x10e   :  { %v864_v13 = vld [vmem:[#allocation2 + $0x10] sm:$0xff]  ;;  %v1197_v14 = vpop.f32.mrb[12].mxu0 }
 0x10f   :  { %1019 = vst.msk [vmem:[%s1821_s3 + $0x4] sm:$0xf] %vm1017_vm2, %v1143_v10  ;;  %v892_v15 = vadd.f32 %v1693_v47, %v864_v13  ;;  %v820_v16 = vadd.f32 %v749_v12, %v47_v9  ;;  %v1279_v17 = vpop.f32.mrb[12].mxu1  ;;  %v1198_v18 = vpop.f32.mrb[13].mxu0 }
 0x110   :  { %841 = vst.msk [vmem:[#allocation2 + $0x20] sm:$0xff] %vm19_vm0, %v819_v11  ;;  %v865_v19 = vld [vmem:[#allocation2 + $0x18] sm:$0xff]  ;;  %v1199_v20 = vadd.f32 %v1198_v18, %v1197_v14  ;;  %v1280_v21 = vpop.f32.mrb[13].mxu1  ;;  %v1200_v22 = vpop.f32.mrb[14].mxu0 }
 0x111   :  { %v913_v23 = vmax.f32 %v892_v15, 0.0  ;;  %v893_v24 = vadd.f32 %v1693_v47, %v865_v19  ;;  %842 = vst.msk [vmem:[#allocation2 + $0x28] sm:$0xff] %vm19_vm0, %v820_v16  ;;  %v1281_v25 = vadd.f32 %v1280_v21, %v1279_v17  ;;  %v1282_v26 = vpop.f32.mrb[14].mxu1  ;;  %v1201_v27 = vpop.f32.mrb[15].mxu0  ;;  %v52_v17 = vld [vmem:[#allocation2 + $0x50] sm:$0xff] }
 0x112   :  { %v1202_v29 = vadd.f32 %v1201_v27, %v1200_v22  ;;  %v1283_v30 = vpop.f32.mrb[15].mxu1 }
 0x113   :  { %v1144_v31 = vpack.c.bf16 %v913_v23, %v913_v23  ;;  %v914_v32 = vmax.f32 %v893_v24, 0.0  ;;  %v754_v33 = vadd.f32 %v1281_v25, %v1199_v20  ;;  %v1284_v34 = vadd.f32 %v1283_v30, %v1282_v26  ;;  %v53_v24 = vld [vmem:[#allocation2 + $0x58] sm:$0xff] }
 0x115   :  { %1020 = vst.msk [vmem:[%s1821_s3 + $0x8] sm:$0xf] %vm1017_vm2, %v1144_v31  ;;  %v1145_v36 = vpack.c.bf16 %v914_v32, %v914_v32  ;;  %v821_v37 = vadd.f32 %v754_v33, %v48_v28  ;;  %v757_v38 = vadd.f32 %v1284_v34, %v1202_v29 }
 0x116   :  { %v1203_v40 = vpop.f32.mrb[16].mxu0 }
 0x117   :  { %v866_v39 = vld [vmem:[#allocation2 + $0x20] sm:$0xff]  ;;  %1021 = vst.msk [vmem:[%s1821_s3 + $0xc] sm:$0xf] %vm1017_vm2, %v1145_v36  ;;  %v822_v42 = vadd.f32 %v757_v38, %v49_v35  ;;  %v1285_v43 = vpop.f32.mrb[16].mxu1  ;;  %v1204_v44 = vpop.f32.mrb[17].mxu0 }
 0x118   :  { %v894_v41 = vadd.f32 %v1693_v47, %v866_v39  ;;  %843 = vst.msk [vmem:[#allocation2 + $0x30] sm:$0xff] %vm19_vm0, %v821_v37  ;;  %v867_v45 = vld [vmem:[#allocation2 + $0x28] sm:$0xff]  ;;  %v1205_v46 = vadd.f32 %v1204_v44, %v1203_v40  ;;  %v1286_v48 = vpop.f32.mrb[17].mxu1  ;;  %v1206_v49 = vpop.f32.mrb[18].mxu0 }
 0x119   :  { %v895_v51 = vadd.f32 %v1693_v47, %v867_v45  ;;  %844 = vst.msk [vmem:[#allocation2 + $0x38] sm:$0xff] %vm19_vm0, %v822_v42  ;;  %v1287_v52 = vadd.f32 %v1286_v48, %v1285_v43  ;;  %v1288_v53 = vpop.f32.mrb[18].mxu1  ;;  %v1207_v54 = vpop.f32.mrb[19].mxu0  ;;  %v54_v43 = vld [vmem:[#allocation2 + $0x60] sm:$0xff] }
 0x11a   :  { %v915_v50 = vmax.f32 %v894_v41, 0.0  ;;  %v1208_v56 = vadd.f32 %v1207_v54, %v1206_v49  ;;  %v1289_v57 = vpop.f32.mrb[19].mxu1 }
 0x11b   :  { %v916_v59 = vmax.f32 %v895_v51, 0.0  ;;  %v762_v60 = vadd.f32 %v1287_v52, %v1205_v46  ;;  %v1290_v61 = vadd.f32 %v1289_v57, %v1288_v53  ;;  %v55_v51 = vld [vmem:[#allocation2 + $0x68] sm:$0xff] }
 0x11c   :  { %v1146_v58 = vpack.c.bf16 %v915_v50, %v915_v50 }
 0x11d   :  { %v1147_v63 = vpack.c.bf16 %v916_v59, %v916_v59  ;;  %v823_v0 = vadd.f32 %v762_v60, %v50_v55  ;;  %v765_v1 = vadd.f32 %v1290_v61, %v1208_v56 }
 0x11e   :  { %1022 = vst.msk [vmem:[%s1821_s3 + $0x10] sm:$0xf] %vm1017_vm2, %v1146_v58  ;;  %v1209_v3 = vpop.f32.mrb[20].mxu0 }
 0x11f   :  { %v868_v2 = vld [vmem:[#allocation2 + $0x30] sm:$0xff]  ;;  %1023 = vst.msk [vmem:[%s1821_s3 + $0x14] sm:$0xf] %vm1017_vm2, %v1147_v63  ;;  %v824_v5 = vadd.f32 %v765_v1, %v51_v62  ;;  %v1291_v6 = vpop.f32.mrb[20].mxu1  ;;  %v1210_v7 = vpop.f32.mrb[21].mxu0 }
 0x120   :  { %v896_v4 = vadd.f32 %v1693_v47, %v868_v2  ;;  %845 = vst.msk [vmem:[#allocation2 + $0x40] sm:$0xff] %vm19_vm0, %v823_v0  ;;  %v869_v8 = vld [vmem:[#allocation2 + $0x38] sm:$0xff]  ;;  %v1211_v9 = vadd.f32 %v1210_v7, %v1209_v3  ;;  %v1292_v10 = vpop.f32.mrb[21].mxu1  ;;  %v1212_v11 = vpop.f32.mrb[22].mxu0 }
 0x121   :  { %v897_v13 = vadd.f32 %v1693_v47, %v869_v8  ;;  %846 = vst.msk [vmem:[#allocation2 + $0x48] sm:$0xff] %vm19_vm0, %v824_v5  ;;  %v1293_v14 = vadd.f32 %v1292_v10, %v1291_v6  ;;  %v1294_v15 = vpop.f32.mrb[22].mxu1  ;;  %v1213_v16 = vpop.f32.mrb[23].mxu0  ;;  %v56_v6 = vld [vmem:[#allocation2 + $0x70] sm:$0xff] }
 0x122   :  { %v917_v12 = vmax.f32 %v896_v4, 0.0  ;;  %v1214_v18 = vadd.f32 %v1213_v16, %v1212_v11  ;;  %v1295_v19 = vpop.f32.mrb[23].mxu1 }
 0x123   :  { %v918_v21 = vmax.f32 %v897_v13, 0.0  ;;  %v770_v22 = vadd.f32 %v1293_v14, %v1211_v9  ;;  %v1296_v23 = vadd.f32 %v1295_v19, %v1294_v15  ;;  %v57_v13 = vld [vmem:[#allocation2 + $0x78] sm:$0xff] }
 0x124   :  { %v1148_v20 = vpack.c.bf16 %v917_v12, %v917_v12 }
 0x125   :  { %v1149_v25 = vpack.c.bf16 %v918_v21, %v918_v21  ;;  %v825_v26 = vadd.f32 %v770_v22, %v52_v17  ;;  %v773_v27 = vadd.f32 %v1296_v23, %v1214_v18 }
 0x126   :  { %1024 = vst.msk [vmem:[%s1821_s3 + $0x18] sm:$0xf] %vm1017_vm2, %v1148_v20  ;;  %v1215_v29 = vpop.f32.mrb[24].mxu0 }
 0x127   :  { %v870_v28 = vld [vmem:[#allocation2 + $0x40] sm:$0xff]  ;;  %1025 = vst.msk [vmem:[%s1821_s3 + $0x1c] sm:$0xf] %vm1017_vm2, %v1149_v25  ;;  %v826_v31 = vadd.f32 %v773_v27, %v53_v24  ;;  %v1297_v32 = vpop.f32.mrb[24].mxu1  ;;  %v1216_v33 = vpop.f32.mrb[25].mxu0 }
 0x128   :  { %v898_v30 = vadd.f32 %v1693_v47, %v870_v28  ;;  %847 = vst.msk [vmem:[#allocation2 + $0x50] sm:$0xff] %vm19_vm0, %v825_v26  ;;  %v871_v34 = vld [vmem:[#allocation2 + $0x48] sm:$0xff]  ;;  %v1217_v35 = vadd.f32 %v1216_v33, %v1215_v29  ;;  %v1298_v36 = vpop.f32.mrb[25].mxu1  ;;  %v1218_v37 = vpop.f32.mrb[26].mxu0 }
 0x129   :  { %v899_v39 = vadd.f32 %v1693_v47, %v871_v34  ;;  %848 = vst.msk [vmem:[#allocation2 + $0x58] sm:$0xff] %vm19_vm0, %v826_v31  ;;  %v1299_v40 = vadd.f32 %v1298_v36, %v1297_v32  ;;  %v1300_v41 = vpop.f32.mrb[26].mxu1  ;;  %v1219_v42 = vpop.f32.mrb[27].mxu0  ;;  %v58_v32 = vld [vmem:[#allocation2 + $0x80] sm:$0xff] }
 0x12a   :  { %v919_v38 = vmax.f32 %v898_v30, 0.0  ;;  %v1220_v44 = vadd.f32 %v1219_v42, %v1218_v37  ;;  %v1301_v45 = vpop.f32.mrb[27].mxu1 }
 0x12b   :  { %v920_v48 = vmax.f32 %v899_v39, 0.0  ;;  %v778_v49 = vadd.f32 %v1299_v40, %v1217_v35  ;;  %v1302_v50 = vadd.f32 %v1301_v45, %v1300_v41  ;;  %v59_v39 = vld [vmem:[#allocation2 + $0x88] sm:$0xff] }
 0x12c   :  { %v1150_v46 = vpack.c.bf16 %v919_v38, %v919_v38 }
 0x12d   :  { %v1151_v52 = vpack.c.bf16 %v920_v48, %v920_v48  ;;  %v827_v53 = vadd.f32 %v778_v49, %v54_v43  ;;  %v781_v54 = vadd.f32 %v1302_v50, %v1220_v44 }
 0x12e   :  { %1026 = vst.msk [vmem:[%s1821_s3 + $0x20] sm:$0xf] %vm1017_vm2, %v1150_v46  ;;  %v1221_v56 = vpop.f32.mrb[28].mxu0 }
 0x12f   :  { %v872_v55 = vld [vmem:[#allocation2 + $0x50] sm:$0xff]  ;;  %1027 = vst.msk [vmem:[%s1821_s3 + $0x24] sm:$0xf] %vm1017_vm2, %v1151_v52  ;;  %v828_v58 = vadd.f32 %v781_v54, %v55_v51  ;;  %v1303_v59 = vpop.f32.mrb[28].mxu1  ;;  %v1222_v60 = vpop.f32.mrb[29].mxu0 }
 0x130   :  { %v900_v57 = vadd.f32 %v1693_v47, %v872_v55  ;;  %849 = vst.msk [vmem:[#allocation2 + $0x60] sm:$0xff] %vm19_vm0, %v827_v53  ;;  %v873_v61 = vld [vmem:[#allocation2 + $0x58] sm:$0xff]  ;;  %v1223_v62 = vadd.f32 %v1222_v60, %v1221_v56  ;;  %v1304_v63 = vpop.f32.mrb[29].mxu1  ;;  %v1224_v0 = vpop.f32.mrb[30].mxu0 }
 0x131   :  { %v901_v2 = vadd.f32 %v1693_v47, %v873_v61  ;;  %850 = vst.msk [vmem:[#allocation2 + $0x68] sm:$0xff] %vm19_vm0, %v828_v58  ;;  %v1305_v3 = vadd.f32 %v1304_v63, %v1303_v59  ;;  %v1306_v4 = vpop.f32.mrb[30].mxu1  ;;  %v1225_v5 = vpop.f32.mrb[31].mxu0  ;;  %v60_v59 = vld [vmem:[#allocation2 + $0x90] sm:$0xff] }
 0x132   :  { %v921_v1 = vmax.f32 %v900_v57, 0.0  ;;  %v1226_v7 = vadd.f32 %v1225_v5, %v1224_v0  ;;  %v1307_v8 = vpop.f32.mrb[31].mxu1 }
 0x133   :  { %v922_v10 = vmax.f32 %v901_v2, 0.0  ;;  %v786_v11 = vadd.f32 %v1305_v3, %v1223_v62  ;;  %v1308_v12 = vadd.f32 %v1307_v8, %v1306_v4  ;;  %v61_v2 = vld [vmem:[#allocation2 + $0x98] sm:$0xff] }
 0x134   :  { %v1152_v9 = vpack.c.bf16 %v921_v1, %v921_v1 }
 0x135   :  { %v1153_v14 = vpack.c.bf16 %v922_v10, %v922_v10  ;;  %v829_v15 = vadd.f32 %v786_v11, %v56_v6  ;;  %v789_v16 = vadd.f32 %v1308_v12, %v1226_v7 }
 0x136   :  { %1028 = vst.msk [vmem:[%s1821_s3 + $0x28] sm:$0xf] %vm1017_vm2, %v1152_v9  ;;  %v1227_v18 = vpop.f32.mrb[32].mxu0 }
 0x137   :  { %v874_v17 = vld [vmem:[#allocation2 + $0x60] sm:$0xff]  ;;  %1029 = vst.msk [vmem:[%s1821_s3 + $0x2c] sm:$0xf] %vm1017_vm2, %v1153_v14  ;;  %v830_v20 = vadd.f32 %v789_v16, %v57_v13  ;;  %v1309_v21 = vpop.f32.mrb[32].mxu1  ;;  %v1228_v22 = vpop.f32.mrb[33].mxu0 }
 0x138   :  { %v902_v19 = vadd.f32 %v1693_v47, %v874_v17  ;;  %851 = vst.msk [vmem:[#allocation2 + $0x70] sm:$0xff] %vm19_vm0, %v829_v15  ;;  %v875_v23 = vld [vmem:[#allocation2 + $0x68] sm:$0xff]  ;;  %v1229_v24 = vadd.f32 %v1228_v22, %v1227_v18  ;;  %v1310_v25 = vpop.f32.mrb[33].mxu1  ;;  %v1230_v26 = vpop.f32.mrb[34].mxu0 }
 0x139   :  { %v903_v28 = vadd.f32 %v1693_v47, %v875_v23  ;;  %852 = vst.msk [vmem:[#allocation2 + $0x78] sm:$0xff] %vm19_vm0, %v830_v20  ;;  %v1311_v29 = vadd.f32 %v1310_v25, %v1309_v21  ;;  %v1312_v30 = vpop.f32.mrb[34].mxu1  ;;  %v1231_v31 = vpop.f32.mrb[35].mxu0  ;;  %v62_v21 = vld [vmem:[#allocation2 + $0xa0] sm:$0x3] }
 0x13a   :  { %v923_v27 = vmax.f32 %v902_v19, 0.0  ;;  %v1232_v33 = vadd.f32 %v1231_v31, %v1230_v26  ;;  %v1313_v34 = vpop.f32.mrb[35].mxu1 }
 0x13b   :  { %v924_v36 = vmax.f32 %v903_v28, 0.0  ;;  %v794_v37 = vadd.f32 %v1311_v29, %v1229_v24  ;;  %v1314_v38 = vadd.f32 %v1313_v34, %v1312_v30 }
 0x13c   :  { %v1154_v35 = vpack.c.bf16 %v923_v27, %v923_v27 }
 0x13d   :  { %v1155_v40 = vpack.c.bf16 %v924_v36, %v924_v36  ;;  %v831_v41 = vadd.f32 %v794_v37, %v58_v32  ;;  %v797_v42 = vadd.f32 %v1314_v38, %v1232_v33 }
 0x13e   :  { %1030 = vst.msk [vmem:[%s1821_s3 + $0x30] sm:$0xf] %vm1017_vm2, %v1154_v35  ;;  %v1233_v44 = vpop.f32.mrb[36].mxu0 }
 0x13f   :  { %v876_v43 = vld [vmem:[#allocation2 + $0x70] sm:$0xff]  ;;  %1031 = vst.msk [vmem:[%s1821_s3 + $0x34] sm:$0xf] %vm1017_vm2, %v1155_v40  ;;  %v832_v46 = vadd.f32 %v797_v42, %v59_v39  ;;  %v1315_v48 = vpop.f32.mrb[36].mxu1  ;;  %v1234_v49 = vpop.f32.mrb[37].mxu0 }
 0x140   :  { %v904_v45 = vadd.f32 %v1693_v47, %v876_v43  ;;  %853 = vst.msk [vmem:[#allocation2 + $0x80] sm:$0xff] %vm19_vm0, %v831_v41  ;;  %v877_v50 = vld [vmem:[#allocation2 + $0x78] sm:$0xff]  ;;  %v1235_v51 = vadd.f32 %v1234_v49, %v1233_v44  ;;  %v1316_v52 = vpop.f32.mrb[37].mxu1  ;;  %v1236_v53 = vpop.f32.mrb[38].mxu0 }
 0x141   :  { %v905_v55 = vadd.f32 %v1693_v47, %v877_v50  ;;  %854 = vst.msk [vmem:[#allocation2 + $0x88] sm:$0xff] %vm19_vm0, %v832_v46  ;;  %v1317_v56 = vadd.f32 %v1316_v52, %v1315_v48  ;;  %v1318_v57 = vpop.f32.mrb[38].mxu1  ;;  %v1237_v58 = vpop.f32.mrb[39].mxu0 }
 0x142   :  { %v925_v54 = vmax.f32 %v904_v45, 0.0  ;;  %v1238_v60 = vadd.f32 %v1237_v58, %v1236_v53  ;;  %v1319_v61 = vpop.f32.mrb[39].mxu1 }
 0x143   :  { %v926_v63 = vmax.f32 %v905_v55, 0.0  ;;  %v802_v0 = vadd.f32 %v1317_v56, %v1235_v51  ;;  %v1320_v1 = vadd.f32 %v1319_v61, %v1318_v57 }
 0x144   :  { %v1156_v62 = vpack.c.bf16 %v925_v54, %v925_v54 }
 0x145   :  { %v1157_v3 = vpack.c.bf16 %v926_v63, %v926_v63  ;;  %v833_v4 = vadd.f32 %v802_v0, %v60_v59  ;;  %v805_v5 = vadd.f32 %v1320_v1, %v1238_v60 }
 0x146   :  { %1032 = vst.msk [vmem:[%s1821_s3 + $0x38] sm:$0xf] %vm1017_vm2, %v1156_v62  ;;  %v1239_v7 = vpop.f32.mrb[40].mxu0 }
 0x147   :  { %v878_v6 = vld [vmem:[#allocation2 + $0x80] sm:$0xff]  ;;  %1033 = vst.msk [vmem:[%s1821_s3 + $0x3c] sm:$0xf] %vm1017_vm2, %v1157_v3  ;;  %v834_v9 = vadd.f32 %v805_v5, %v61_v2  ;;  %v1321_v10 = vpop.f32.mrb[40].mxu1  ;;  %v1240_v11 = vpop.f32.mrb[41].mxu0 }
 0x148   :  { %v906_v8 = vadd.f32 %v1693_v47, %v878_v6  ;;  %855 = vst.msk [vmem:[#allocation2 + $0x90] sm:$0xff] %vm19_vm0, %v833_v4  ;;  %v879_v12 = vld [vmem:[#allocation2 + $0x88] sm:$0xff]  ;;  %v1241_v13 = vadd.f32 %v1240_v11, %v1239_v7  ;;  %v1322_v14 = vpop.f32.mrb[41].mxu1  ;;  %v1242_v15 = vpop.f32.mrb[42].mxu0 }
 0x149   :  { %v907_v17 = vadd.f32 %v1693_v47, %v879_v12  ;;  %856 = vst.msk [vmem:[#allocation2 + $0x98] sm:$0xff] %vm19_vm0, %v834_v9  ;;  %v1323_v18 = vadd.f32 %v1322_v14, %v1321_v10  ;;  %v1324_v19 = vpop.f32.mrb[42].mxu1  ;;  %v1243_v20 = vpop.f32.mrb[43].mxu0 }
 0x14a   :  { %v927_v16 = vmax.f32 %v906_v8, 0.0  ;;  %v1325_v22 = vpop.f32.mrb[43].mxu1 }
 0x14b   :  { %v928_v24 = vmax.f32 %v907_v17, 0.0  ;;  %v810_v25 = vadd.f32 %v1323_v18, %v1241_v13 }
 0x14c   :  { %v1158_v23 = vpack.c.bf16 %v927_v16, %v927_v16 }
 0x14d   :  { %v1159_v26 = vpack.c.bf16 %v928_v24, %v928_v24  ;;  %v835_v27 = vadd.f32 %v810_v25, %v62_v21 }
 0x14e   :  { %1034 = vst.msk [vmem:[%s1821_s3 + $0x40] sm:$0xf] %vm1017_vm2, %v1158_v23 }
 0x14f   :  { %v880_v28 = vld [vmem:[#allocation2 + $0x90] sm:$0xff]  ;;  %1035 = vst.msk [vmem:[%s1821_s3 + $0x44] sm:$0xf] %vm1017_vm2, %v1159_v26 }
 0x150   :  { %v908_v29 = vadd.f32 %v1693_v47, %v880_v28  ;;  %858 = vst.msk [vmem:[#allocation2 + $0xa0] sm:$0x3] %vm40_vm1, %v835_v27  ;;  %v881_v30 = vld [vmem:[#allocation2 + $0x98] sm:$0xff] }
 0x151   :  { %v909_v32 = vadd.f32 %v1693_v47, %v881_v30 }
 0x152   :  { %v929_v31 = vmax.f32 %v908_v29, 0.0 }
 0x153   :  { %v930_v34 = vmax.f32 %v909_v32, 0.0 }
 0x154   :  { %v1160_v33 = vpack.c.bf16 %v929_v31, %v929_v31 }
 0x155   :  { %v1161_v35 = vpack.c.bf16 %v930_v34, %v930_v34 }
 0x156   :  { %1036 = vst.msk [vmem:[%s1821_s3 + $0x48] sm:$0xf] %vm1017_vm2, %v1160_v33 }
 0x157   :  { %v882_v36 = vld [vmem:[#allocation2 + $0xa0] sm:$0x3]  ;;  %1037 = vst.msk [vmem:[%s1821_s3 + $0x4c] sm:$0xf] %vm1017_vm2, %v1161_v35 }
 0x158   :  { %v910_v37 = vadd.f32 %v1693_v47, %v882_v36 }
 0x15a   :  { %v931_v38 = vmax.f32 %v910_v37, 0.0 }
 0x15c   :  { %v1162_v39 = vpack.c.bf16 %v931_v38, %v931_v38 }
 0x15e   :  { %1039 = vst.msk [vmem:[%s1821_s3 + $0x50] sm:$0x1] %vm1038_vm3, %v1162_v39 }

// kernel: dqn_forward.7
= control target key start
LH: loop header
LB: loop body
LE: loop exit
PB: predicated region body
PF: predicated region fallthrough
CT: control target
= control target key end

     0   :  { %vm19_vm0 = vcmask 523264   ;;  %v1336_v1 = vmov 0.0   ;;  %vm1337_vm1 = vmmov 0   ;;  %vm32_vm2 = vcmask 517120   ;;  %s1729_s1 = inlined_call_operand.vmem [shape: bf16[576,64], index: 1, kind: input, shape index: {}]   ;;  %s1730_s0 = inlined_call_operand.vmem [shape: bf16[98,576], index: 0, kind: input, shape index: {}]   ;;  %s1731_s2 = inlined_call_operand.vmem [shape: f32[1,64], index: 2, kind: input, shape index: {}]   ;;  %s1732_s3 = inlined_call_operand.vmem [shape: bf16[98,64], index: 3, kind: output, shape index: {}]  }
   0x1   :  { %v1253_v0 = vld [vmem:[%s1729_s1 + $0x40] sm:$0xff]   ;;  %20 = vst.msk [vmem:[#allocation2] sm:$0xff] %vm19_vm0, %v1336_v1  ;;  %21 = vst.msk [vmem:[#allocation2 + $0x8] sm:$0xff] %vm19_vm0, %v1336_v1  ;;  %v1257_v5 = vld [vmem:[%s1729_s1 + $0x48] sm:$0xff]   ;;  %vm956_vm3 = vcmask 519168   ;;  %vm969_vm4 = vcmask 516096  }
   0x2   :  { %22 = vst.msk [vmem:[#allocation2 + $0x10] sm:$0xff] %vm19_vm0, %v1336_v1  ;;  %23 = vst.msk [vmem:[#allocation2 + $0x18] sm:$0xff] %vm19_vm0, %v1336_v1  ;;  %v1254_v2 = vld [vmem:[%s1729_s1 + $0xc0] sm:$0xff]   ;;  %1080 = vmatprep.subr.bf16.mxu0 %v1253_v0  ;;  %v1258_v6 = vld [vmem:[%s1729_s1 + $0xc8] sm:$0xff]  }
   0x3   :  { %24 = vst.msk [vmem:[#allocation2 + $0x20] sm:$0xff] %vm19_vm0, %v1336_v1  ;;  %25 = vst.msk [vmem:[#allocation2 + $0x28] sm:$0xff] %vm19_vm0, %v1336_v1  ;;  %v1255_v3 = vld [vmem:[%s1729_s1] sm:$0xff]   ;;  %1138 = vmatprep.subr.bf16.mxu1 %v1254_v2  ;;  %v1259_v7 = vld [vmem:[%s1729_s1 + $0x8] sm:$0xff]  }
   0x4   :  { %26 = vst.msk [vmem:[#allocation2 + $0x30] sm:$0xff] %vm19_vm0, %v1336_v1  ;;  %27 = vst.msk [vmem:[#allocation2 + $0x38] sm:$0xff] %vm19_vm0, %v1336_v1  ;;  %v1256_v4 = vld [vmem:[%s1729_s1 + $0x80] sm:$0xff]   ;;  %1081 = vmatpush3.bf16.msra.mxu0 %v1255_v3  ;;  %v1260_v8 = vld [vmem:[%s1729_s1 + $0x88] sm:$0xff]  }
   0x5   :  { %28 = vst.msk [vmem:[#allocation2 + $0x40] sm:$0xff] %vm19_vm0, %v1336_v1  ;;  %29 = vst.msk [vmem:[#allocation2 + $0x48] sm:$0xff] %vm19_vm0, %v1336_v1  ;;  %1139 = vmatpush3.bf16.msra.mxu1 %v1256_v4  ;;  %1082 = vmatprep.subr.bf16.mxu0 %v1257_v5  ;;  %v1261_v9 = vld [vmem:[%s1729_s1 + $0x50] sm:$0xff]   ;;  %v1265_v13 = vld [vmem:[%s1729_s1 + $0x58] sm:$0xff]  }
   0x6   :  { %30 = vst.msk [vmem:[#allocation2 + $0x50] sm:$0xff] %vm19_vm0, %v1336_v1  ;;  %31 = vst.msk [vmem:[#allocation2 + $0x58] sm:$0xff] %vm19_vm0, %v1336_v1  ;;  %1140 = vmatprep.subr.bf16.mxu1 %v1258_v6  ;;  %v1262_v10 = vld [vmem:[%s1729_s1 + $0xd0] sm:$0xff]   ;;  %v1266_v14 = vld [vmem:[%s1729_s1 + $0xd8] sm:$0xff]  }
   0x7   :  { %v1263_v11 = vld [vmem:[%s1729_s1 + $0x10] sm:$0xff]   ;;  %v1267_v15 = vld [vmem:[%s1729_s1 + $0x18] sm:$0xff]   ;;  %v1269_v17 = vld [vmem:[%s1729_s1 + $0x60] sm:$0xff]   ;;  %33 = vst.msk [vmem:[#allocation2 + $0x60] sm:$0x3] %vm32_vm2, %v1336_v1 }
   0x8   :  { %1083 = vmatpush3.bf16.msra.mxu0 %v1259_v7  ;;  %v1264_v12 = vld [vmem:[%s1729_s1 + $0x90] sm:$0xff]   ;;  %v1268_v16 = vld [vmem:[%s1729_s1 + $0x98] sm:$0xff]   ;;  %v1270_v18 = vld [vmem:[%s1729_s1 + $0xe0] sm:$0xff]  }
   0x9   :  { %1141 = vmatpush3.bf16.msra.mxu1 %v1260_v8  ;;  %1084 = vmatprep.subr.bf16.mxu0 %v1261_v9  ;;  %v1271_v19 = vld [vmem:[%s1729_s1 + $0x20] sm:$0xff]   ;;  %v1273_v21 = vld [vmem:[%s1729_s1 + $0x68] sm:$0xff]   ;;  %v1277_v25 = vld [vmem:[%s1729_s1 + $0x70] sm:$0xff]  }
   0xa   :  { %1142 = vmatprep.subr.bf16.mxu1 %v1262_v10  ;;  %v1272_v20 = vld [vmem:[%s1729_s1 + $0xa0] sm:$0xff]   ;;  %v1274_v22 = vld [vmem:[%s1729_s1 + $0xe8] sm:$0xff]   ;;  %v1278_v26 = vld [vmem:[%s1729_s1 + $0xf0] sm:$0xff]  }
   0xb   :  { %v1275_v23 = vld [vmem:[%s1729_s1 + $0x28] sm:$0xff]   ;;  %v1279_v27 = vld [vmem:[%s1729_s1 + $0x30] sm:$0xff]   ;;  %v1281_v29 = vld [vmem:[%s1729_s1 + $0x78] sm:$0xff]  }
   0xc   :  { %1085 = vmatpush3.bf16.msra.mxu0 %v1263_v11  ;;  %v1276_v24 = vld [vmem:[%s1729_s1 + $0xa8] sm:$0xff]   ;;  %v1280_v28 = vld [vmem:[%s1729_s1 + $0xb0] sm:$0xff]   ;;  %v1282_v30 = vld [vmem:[%s1729_s1 + $0xf8] sm:$0xff]  }
   0xd   :  { %1143 = vmatpush3.bf16.msra.mxu1 %v1264_v12  ;;  %1086 = vmatprep.subr.bf16.mxu0 %v1265_v13  ;;  %v1283_v31 = vld [vmem:[%s1729_s1 + $0x38] sm:$0xff]   ;;  %v1285_v33 = vld [vmem:[%s1730_s0] ss:$20 sps:$4 sm:$0xff]   ;;  %v1297_v41 = vld [vmem:[%s1730_s0 + $0x30] ss:$20 sps:$4 sm:$0xff]  }
   0xe   :  { %1144 = vmatprep.subr.bf16.mxu1 %v1266_v14  ;;  %v1284_v32 = vld [vmem:[%s1729_s1 + $0xb8] sm:$0xff]   ;;  %v1290_v36 = vld [vmem:[%s1730_s0 + $0xc] ss:$20 sps:$4 sm:$0xff]   ;;  %v1294_v39 = vld [vmem:[%s1730_s0 + $0x34] ss:$20 sps:$4 sm:$0xff]  }
   0xf   :  { %v1287_v34 = vld [vmem:[%s1730_s0 + $0x4] ss:$20 sps:$4 sm:$0xff]   ;;  %v1288_v35 = vld [vmem:[%s1730_s0 + $0x8] ss:$20 sps:$4 sm:$0xff]   ;;  %683 = vmatprep.mubr.bf16.mxu1 %v1290_v36  ;;  %v1292_v38 = vld [vmem:[%s1730_s0 + $0x2c] ss:$20 sps:$4 sm:$0xff]  }
  0x10   :  { %1087 = vmatpush3.bf16.msra.mxu0 %v1267_v15  ;;  %595 = vmatprep.mubr.bf16.mxu0 %v1287_v34  ;;  %v1291_v37 = vld [vmem:[%s1729_s1 + $0x100] sm:$0xff]   ;;  %v1296_v40 = vld [vmem:[%s1730_s0 + $0x28] ss:$20 sps:$4 sm:$0xff]   ;;  %v1311_v45 = vld [vmem:[%s1729_s1 + $0x110] sm:$0xff]  }
  0x11   :  { %1145 = vmatpush3.bf16.msra.mxu1 %v1268_v16  ;;  %1088 = vmatprep.subr.bf16.mxu0 %v1269_v17  ;;  %v1298_v42 = vld [vmem:[%s1730_s0 + $0x54] ss:$20 sps:$4 sm:$0xff]   ;;  %v1300_v44 = vld [vmem:[%s1730_s0 + $0x5c] ss:$20 sps:$4 sm:$0xff]   ;;  %v1304_v47 = vld [vmem:[%s1730_s0 + $0x58] ss:$20 sps:$4 sm:$0xff]  }
  0x12   :  { %1146 = vmatprep.subr.bf16.mxu1 %v1270_v18  ;;  %v1302_v43 = vld [vmem:[%s1729_s1 + $0x108] sm:$0xff]   ;;  %v1303_v46 = vld [vmem:[%s1730_s0 + $0x50] ss:$20 sps:$4 sm:$0xff]   ;;  %v1324_v50 = vld [vmem:[%s1729_s1 + $0x118] sm:$0xff]  }
  0x13   :  { %v1305_v48 = vld [vmem:[%s1730_s0 + $0x7c] ss:$20 sps:$4 sm:$0xff]   ;;  %v1307_v49 = vld [vmem:[%s1730_s0 + $0x84] ss:$20 sps:$4 sm:$0xff]   ;;  %v1310_v52 = vld [vmem:[%s1730_s0 + $0x80] ss:$20 sps:$4 sm:$0xff]  }
  0x14   :  { %1089 = vmatpush3.bf16.msra.mxu0 %v1271_v19  ;;  %v1309_v51 = vld [vmem:[%s1730_s0 + $0x78] ss:$20 sps:$4 sm:$0xff]   ;;  %v1316_v55 = vld [vmem:[%s1730_s0 + $0xa0] ss:$20 sps:$4 sm:$0xff]   ;;  %v1317_v56 = vld [vmem:[%s1730_s0 + $0xa8] ss:$20 sps:$4 sm:$0xff]  }
  0x15   :  { %1147 = vmatpush3.bf16.msra.mxu1 %v1272_v20  ;;  %1090 = vmatprep.subr.bf16.mxu0 %v1273_v21  ;;  %v1312_v53 = vld [vmem:[%s1730_s0 + $0xa4] ss:$20 sps:$4 sm:$0xff]   ;;  %v1314_v54 = vld [vmem:[%s1730_s0 + $0xac] ss:$20 sps:$4 sm:$0xff]   ;;  %v1320_v58 = vld [vmem:[%s1730_s0 + $0xd4] ss:$20 sps:$4 sm:$0xff]  }
  0x16   :  { %1148 = vmatprep.subr.bf16.mxu1 %v1274_v22  ;;  %v1318_v57 = vld [vmem:[%s1730_s0 + $0xcc] ss:$20 sps:$4 sm:$0xff]   ;;  %v83_v59 = vld [vmem:[%s1730_s0 + $0xf0] sm:$0x11]  ;;  %v84_v60 = vld [vmem:[%s1730_s0 + $0xf8] sm:$0x11] }
  0x17   :  { %v1322_v61 = vld [vmem:[%s1730_s0 + $0xc8] ss:$20 sps:$4 sm:$0xff]   ;;  %v1323_v62 = vld [vmem:[%s1730_s0 + $0xd0] ss:$20 sps:$4 sm:$0xff]   ;;  %v1006_v63 = vcombine.high %v83_v59, %v83_v59  ;;  %v1008_v0 = vcombine.high %v84_v60, %v84_v60  ;;  %v1005_v2 = vcombine.low %v83_v59, %v83_v59  ;;  %v1007_v3 = vcombine.low %v84_v60, %v84_v60  ;;  %v1331_v6 = vld [vmem:[%s1730_s0 + $0x38] ss:$20 sps:$4 sm:$0xff]  }
  0x18   :  { %1091 = vmatpush3.bf16.msra.mxu0 %v1275_v23  ;;  %v1329_v4 = vld [vmem:[%s1730_s0 + $0x10] ss:$20 sps:$4 sm:$0xff]   ;;  %v1332_v7 = vld [vmem:[%s1730_s0 + $0xd8] ss:$20 sps:$4 sm:$0xff]   ;;  %v1333_v8 = vld [vmem:[%s1730_s0 + $0x60] ss:$20 sps:$4 sm:$0xff]  }
  0x19   :  { %1149 = vmatpush3.bf16.msra.mxu1 %v1276_v24  ;;  %1092 = vmatprep.subr.bf16.mxu0 %v1277_v25  ;;  %v1330_v5 = vld [vmem:[%s1730_s0 + $0xb0] ss:$20 sps:$4 sm:$0xff]   ;;  %v1334_v9 = vld [vmem:[%s1730_s0 + $0x100] ss:$0 sps:$4 sm:$0x11]  }
  0x1a   :  { %1150 = vmatprep.subr.bf16.mxu1 %v1278_v26  ;;  %v1335_v10 = vld [vmem:[%s1730_s0 + $0x88] ss:$20 sps:$4 sm:$0xff]  }
  0x1c   :  { %1093 = vmatpush3.bf16.msra.mxu0 %v1279_v27 }
  0x1d   :  { %1151 = vmatpush3.bf16.msra.mxu1 %v1280_v28  ;;  %1094 = vmatprep.subr.bf16.mxu0 %v1281_v29 }
  0x1e   :  { %1152 = vmatprep.subr.bf16.mxu1 %v1282_v30 }
  0x20   :  { %1095 = vmatpush3.bf16.msra.mxu0 %v1283_v31 }
  0x21   :  { %1153 = vmatpush3.bf16.msra.mxu1 %v1284_v32  ;;  %1207 = vmatprep.subr.bf16.mxu0 %v1336_v1 }
  0x22   :  { %1243 = vmatprep.subr.bf16.mxu1 %v1336_v1 }
  0x23   :  { %596 = vmatmul.mubr.bf16.vlgmr.msra.gmra.mrb[0].mxu0 %v1285_v33 }
  0x24   :  { %684 = vmatmul.mubr.bf16.vlgmr.msra.gmra.mrb[0].mxu1 %v1288_v35  ;;  %1208 = vmatpush3.bf16.msra.mxu0 %v1291_v37 }
  0x25   :  { %603 = vmatprep.mubr.bf16.mxu0 %v1292_v38  ;;  %1247 = vmatpush3.bf16.msra.mxu1 %v1291_v37 }
  0x26   :  { %691 = vmatprep.mubr.bf16.mxu1 %v1294_v39  ;;  %1209 = vmatprep.subr.bf16.mxu0 %v1336_v1 }
  0x27   :  { %1244 = vmatprep.subr.bf16.mxu1 %v1336_v1 }
  0x28   :  { %1210 = vmatpush3.bf16.msra.mxu0 %v1302_v43 }
  0x29   :  { %1248 = vmatpush3.bf16.msra.mxu1 %v1302_v43  ;;  %1211 = vmatprep.subr.bf16.mxu0 %v1336_v1 }
  0x2a   :  { %1245 = vmatprep.subr.bf16.mxu1 %v1336_v1 }
  0x2b   :  { %604 = vmatmul.mubr.bf16.gmra.mrb[4].mxu0 %v1296_v40 }
  0x2c   :  { %692 = vmatmul.mubr.bf16.gmra.mrb[4].mxu1 %v1297_v41  ;;  %611 = vmatprep.mubr.bf16.mxu0 %v1298_v42 }
  0x2d   :  { %699 = vmatprep.mubr.bf16.mxu1 %v1300_v44  ;;  %1212 = vmatpush3.bf16.msra.mxu0 %v1311_v45 }
  0x2e   :  { %1249 = vmatpush3.bf16.msra.mxu1 %v1311_v45  ;;  %1213 = vmatprep.subr.bf16.mxu0 %v1336_v1 }
  0x2f   :  { %1246 = vmatprep.subr.bf16.mxu1 %v1336_v1 }
  0x31   :  { %1214 = vmatpush3.bf16.msra.mxu0 %v1324_v50 }
  0x32   :  { %1250 = vmatpush3.bf16.msra.mxu1 %v1324_v50 }
  0x33   :  { %612 = vmatmul.mubr.bf16.gmra.mrb[8].mxu0 %v1303_v46 }
  0x34   :  { %700 = vmatmul.mubr.bf16.gmra.mrb[8].mxu1 %v1304_v47  ;;  %619 = vmatprep.mubr.bf16.mxu0 %v1305_v48 }
  0x35   :  { %707 = vmatprep.mubr.bf16.mxu1 %v1307_v49 }
  0x3b   :  { %620 = vmatmul.mubr.bf16.gmra.mrb[12].mxu0 %v1309_v51 }
  0x3c   :  { %708 = vmatmul.mubr.bf16.gmra.mrb[12].mxu1 %v1310_v52  ;;  %627 = vmatprep.mubr.bf16.mxu0 %v1312_v53 }
  0x3d   :  { %715 = vmatprep.mubr.bf16.mxu1 %v1314_v54 }
  0x43   :  { %628 = vmatmul.mubr.bf16.gmra.mrb[16].mxu0 %v1316_v55 }
  0x44   :  { %716 = vmatmul.mubr.bf16.gmra.mrb[16].mxu1 %v1317_v56  ;;  %635 = vmatprep.mubr.bf16.mxu0 %v1318_v57 }
  0x45   :  { %723 = vmatprep.mubr.bf16.mxu1 %v1320_v58 }
  0x4b   :  { %636 = vmatmul.mubr.bf16.gmra.mrb[20].mxu0 %v1322_v61 }
  0x4c   :  { %724 = vmatmul.mubr.bf16.gmra.mrb[20].mxu1 %v1323_v62  ;;  %643 = vmatprep.mubr.bf16.mxu0 %v1006_v63 }
  0x4d   :  { %731 = vmatprep.mubr.bf16.mxu1 %v1008_v0 }
  0x53   :  { %644 = vmatmul.mubr.bf16.gmra.mrb[24].mxu0 %v1005_v2 }
  0x54   :  { %732 = vmatmul.mubr.bf16.gmra.mrb[24].mxu1 %v1007_v3  ;;  %1215 = vmatprep.mubr.msk.bf16.mxu0 %vm1337_vm1, %v1336_v1 }
  0x55   :  { %1231 = vmatprep.mubr.msk.bf16.mxu1 %vm1337_vm1, %v1336_v1 }
  0x5b   :  { %1216 = vmatmul.mubr.msk.bf16.vlgmr.msra.gmra.mrb[28].mxu0 %vm19_vm0, %v1329_v4 }
  0x5c   :  { %1232 = vmatmul.mubr.msk.bf16.vlgmr.msra.gmra.mrb[28].mxu1 %vm19_vm0, %v1330_v5  ;;  %1219 = vmatprep.mubr.msk.bf16.mxu0 %vm1337_vm1, %v1336_v1 }
  0x5d   :  { %1235 = vmatprep.mubr.msk.bf16.mxu1 %vm1337_vm1, %v1336_v1 }
  0x63   :  { %1220 = vmatmul.mubr.msk.bf16.gmra.mrb[32].mxu0 %vm19_vm0, %v1331_v6 }
  0x64   :  { %1236 = vmatmul.mubr.msk.bf16.gmra.mrb[32].mxu1 %vm19_vm0, %v1332_v7  ;;  %1223 = vmatprep.mubr.msk.bf16.mxu0 %vm1337_vm1, %v1336_v1 }
  0x65   :  { %1239 = vmatprep.mubr.msk.bf16.mxu1 %vm1337_vm1, %v1336_v1 }
  0x6b   :  { %1224 = vmatmul.mubr.msk.bf16.gmra.mrb[36].mxu0 %vm19_vm0, %v1333_v8 }
  0x6c   :  { %1240 = vmatmul.mubr.msk.bf16.gmra.mrb[36].mxu1 %vm19_vm0, %v1334_v9  ;;  %1227 = vmatprep.mubr.msk.bf16.mxu0 %vm1337_vm1, %v1336_v1 }
  0x73   :  { %1228 = vmatmul.mubr.msk.bf16.gmra.mrb[40].mxu0 %vm19_vm0, %v1335_v10 }
  0xf6   :  { %v1096_v11 = vpop.f32.mrb[0].mxu0 }
  0xf7   :  { %v1154_v12 = vpop.f32.mrb[0].mxu1  ;;  %v1097_v13 = vpop.f32.mrb[1].mxu0 }
  0xf8   :  { %v1098_v14 = vadd.f32 %v1097_v13, %v1096_v11  ;;  %v1155_v15 = vpop.f32.mrb[1].mxu1  ;;  %v1099_v16 = vpop.f32.mrb[2].mxu0 }
  0xf9   :  { %v1156_v17 = vadd.f32 %v1155_v15, %v1154_v12  ;;  %v1157_v18 = vpop.f32.mrb[2].mxu1  ;;  %v1100_v19 = vpop.f32.mrb[3].mxu0 }
  0xfa   :  { %v1101_v20 = vadd.f32 %v1100_v19, %v1099_v16  ;;  %v1158_v21 = vpop.f32.mrb[3].mxu1 }
  0xfb   :  { %v1159_v22 = vadd.f32 %v1158_v21, %v1157_v18  ;;  %v1620_v23 = vadd.f32 %v1156_v17, %v1098_v14 }
  0xfd   :  { %v1622_v24 = vadd.f32 %v1159_v22, %v1101_v20 }
  0xfe   :  { %v1102_v25 = vpop.f32.mrb[4].mxu0 }
  0xff   :  { %v1160_v26 = vpop.f32.mrb[4].mxu1  ;;  %v1103_v27 = vpop.f32.mrb[5].mxu0 }
 0x100   :  { %v1104_v1 = vadd.f32 %v1103_v27, %v1102_v25  ;;  %v1161_v28 = vpop.f32.mrb[5].mxu1  ;;  %v1105_v29 = vpop.f32.mrb[6].mxu0 }
 0x101   :  { %v1162_v30 = vadd.f32 %v1161_v28, %v1160_v26  ;;  %v1163_v31 = vpop.f32.mrb[6].mxu1  ;;  %v1106_v32 = vpop.f32.mrb[7].mxu0 }
 0x102   :  { %v1107_v33 = vadd.f32 %v1106_v32, %v1105_v29  ;;  %v1164_v34 = vpop.f32.mrb[7].mxu1 }
 0x103   :  { %v1165_v35 = vadd.f32 %v1164_v34, %v1163_v31  ;;  %v1624_v36 = vadd.f32 %v1162_v30, %v1104_v1 }
 0x105   :  { %v1626_v37 = vadd.f32 %v1165_v35, %v1107_v33 }
 0x106   :  { %v1108_v38 = vpop.f32.mrb[8].mxu0 }
 0x107   :  { %v1166_v39 = vpop.f32.mrb[8].mxu1  ;;  %v1109_v40 = vpop.f32.mrb[9].mxu0 }
 0x108   :  { %v1110_v41 = vadd.f32 %v1109_v40, %v1108_v38  ;;  %v1167_v42 = vpop.f32.mrb[9].mxu1  ;;  %v1111_v43 = vpop.f32.mrb[10].mxu0 }
 0x109   :  { %v1168_v44 = vadd.f32 %v1167_v42, %v1166_v39  ;;  %v1169_v45 = vpop.f32.mrb[10].mxu1  ;;  %v1112_v46 = vpop.f32.mrb[11].mxu0 }
 0x10a   :  { %v1113_v47 = vadd.f32 %v1112_v46, %v1111_v43  ;;  %v1170_v48 = vpop.f32.mrb[11].mxu1 }
 0x10b   :  { %v1171_v49 = vadd.f32 %v1170_v48, %v1169_v45  ;;  %v1628_v50 = vadd.f32 %v1168_v44, %v1110_v41  ;;  %v34_v45 = vld [vmem:[#allocation2] sm:$0xff] }
 0x10c   :  { %v42_v48 = vld [vmem:[#allocation2 + $0x40] sm:$0xff] }
 0x10d   :  { %v1630_v51 = vadd.f32 %v1171_v49, %v1113_v47 }
 0x10e   :  { %v1114_v52 = vpop.f32.mrb[12].mxu0 }
 0x10f   :  { %v1172_v53 = vpop.f32.mrb[12].mxu1  ;;  %v1115_v54 = vpop.f32.mrb[13].mxu0 }
 0x110   :  { %v1116_v55 = vadd.f32 %v1115_v54, %v1114_v52  ;;  %v1173_v56 = vpop.f32.mrb[13].mxu1  ;;  %v1117_v57 = vpop.f32.mrb[14].mxu0 }
 0x111   :  { %v1174_v58 = vadd.f32 %v1173_v56, %v1172_v53  ;;  %v1175_v59 = vpop.f32.mrb[14].mxu1  ;;  %v1118_v60 = vpop.f32.mrb[15].mxu0 }
 0x112   :  { %v1119_v61 = vadd.f32 %v1118_v60, %v1117_v57  ;;  %v1176_v62 = vpop.f32.mrb[15].mxu1 }
 0x113   :  { %v1177_v63 = vadd.f32 %v1176_v62, %v1175_v59  ;;  %v1632_v0 = vadd.f32 %v1174_v58, %v1116_v55  ;;  %v35_v55 = vld [vmem:[#allocation2 + $0x8] sm:$0xff] }
 0x114   :  { %v43_v59 = vld [vmem:[#allocation2 + $0x48] sm:$0xff] }
 0x115   :  { %v1634_v2 = vadd.f32 %v1177_v63, %v1119_v61 }
 0x116   :  { %v1120_v3 = vpop.f32.mrb[16].mxu0 }
 0x117   :  { %v1178_v4 = vpop.f32.mrb[16].mxu1  ;;  %v1121_v5 = vpop.f32.mrb[17].mxu0 }
 0x118   :  { %v1122_v6 = vadd.f32 %v1121_v5, %v1120_v3  ;;  %v1179_v7 = vpop.f32.mrb[17].mxu1  ;;  %v1123_v8 = vpop.f32.mrb[18].mxu0  ;;  %v36_v5 = vld [vmem:[#allocation2 + $0x10] sm:$0xff] }
 0x119   :  { %v1180_v9 = vadd.f32 %v1179_v7, %v1178_v4  ;;  %v1181_v10 = vpop.f32.mrb[18].mxu1  ;;  %v1124_v11 = vpop.f32.mrb[19].mxu0  ;;  %v44_v7 = vld [vmem:[#allocation2 + $0x50] sm:$0xff] }
 0x11a   :  { %v1125_v12 = vadd.f32 %v1124_v11, %v1123_v8  ;;  %v1182_v13 = vpop.f32.mrb[19].mxu1 }
 0x11b   :  { %v1183_v14 = vadd.f32 %v1182_v13, %v1181_v10  ;;  %v718_v15 = vadd.f32 %v1180_v9, %v1122_v6  ;;  %v1648_v10 = vld [vmem:[%s1731_s2] ss:$0 sm:$0xff]  ;;  %v37_v13 = vld [vmem:[#allocation2 + $0x18] sm:$0xff] }
 0x11d   :  { %v721_v16 = vadd.f32 %v1183_v14, %v1125_v12 }
 0x11e   :  { %v1126_v17 = vpop.f32.mrb[20].mxu0 }
 0x11f   :  { %v1184_v18 = vpop.f32.mrb[20].mxu1  ;;  %v1127_v19 = vpop.f32.mrb[21].mxu0 }
 0x120   :  { %v1128_v20 = vadd.f32 %v1127_v19, %v1126_v17  ;;  %v1185_v21 = vpop.f32.mrb[21].mxu1  ;;  %v1129_v22 = vpop.f32.mrb[22].mxu0  ;;  %v45_v17 = vld [vmem:[#allocation2 + $0x58] sm:$0xff] }
 0x121   :  { %v1186_v25 = vadd.f32 %v1185_v21, %v1184_v18  ;;  %v1187_v26 = vpop.f32.mrb[22].mxu1  ;;  %v1130_v27 = vpop.f32.mrb[23].mxu0 }
 0x122   :  { %v1131_v1 = vadd.f32 %v1130_v27, %v1129_v22  ;;  %v1188_v28 = vpop.f32.mrb[23].mxu1 }
 0x123   :  { %v1189_v29 = vadd.f32 %v1188_v28, %v1187_v26  ;;  %v726_v30 = vadd.f32 %v1186_v25, %v1128_v20 }
 0x125   :  { %v729_v31 = vadd.f32 %v1189_v29, %v1131_v1 }
 0x126   :  { %v1132_v32 = vpop.f32.mrb[24].mxu0 }
 0x127   :  { %v1190_v33 = vpop.f32.mrb[24].mxu1  ;;  %v1133_v34 = vpop.f32.mrb[25].mxu0 }
 0x128   :  { %v1134_v35 = vadd.f32 %v1133_v34, %v1132_v32  ;;  %v1191_v38 = vpop.f32.mrb[25].mxu1  ;;  %v1135_v39 = vpop.f32.mrb[26].mxu0  ;;  %v38_v34 = vld [vmem:[#allocation2 + $0x20] sm:$0xff] }
 0x129   :  { %v1192_v40 = vadd.f32 %v1191_v38, %v1190_v33  ;;  %v1136_v41 = vpop.f32.mrb[27].mxu0  ;;  %v1193_v42 = vpop.f32.mrb[26].mxu1 }
 0x12a   :  { %v1194_v43 = vpop.f32.mrb[27].mxu1  ;;  %v46_v41 = vld [vmem:[#allocation2 + $0x60] sm:$0x3] }
 0x12b   :  { %v1636_v44 = vadd.f32 %v1192_v40, %v1134_v35 }
 0x12e   :  { %v773_v46 = vpop.f32.mrb[28].mxu0 }
 0x12f   :  { %v774_v47 = vadd.f32 %v773_v46, %v1620_v23  ;;  %v805_v49 = vpop.f32.mrb[28].mxu1  ;;  %v1217_v52 = vpop.f32.mrb[29].mxu0 }
 0x130   :  { %v806_v53 = vadd.f32 %v805_v49, %v718_v15  ;;  %v1233_v54 = vpop.f32.mrb[29].mxu1  ;;  %v776_v56 = vpop.f32.mrb[30].mxu0 }
 0x131   :  { %v827_v57 = vadd.f32 %v774_v47, %v34_v45  ;;  %v777_v58 = vadd.f32 %v776_v56, %v1622_v24  ;;  %v808_v60 = vpop.f32.mrb[30].mxu1  ;;  %v1218_v61 = vpop.f32.mrb[31].mxu0 }
 0x132   :  { %v835_v62 = vadd.f32 %v806_v53, %v42_v48  ;;  %v809_v63 = vadd.f32 %v808_v60, %v721_v16  ;;  %v1234_v3 = vpop.f32.mrb[31].mxu1  ;;  %v39_v48 = vld [vmem:[#allocation2 + $0x28] sm:$0xff] }
 0x133   :  { %840 = vst.msk [vmem:[#allocation2] sm:$0xff] %vm19_vm0, %v827_v57  ;;  %v828_v4 = vadd.f32 %v777_v58, %v35_v55 }
 0x134   :  { %848 = vst.msk [vmem:[#allocation2 + $0x40] sm:$0xff] %vm19_vm0, %v835_v62  ;;  %v836_v23 = vadd.f32 %v809_v63, %v43_v59 }
 0x135   :  { %841 = vst.msk [vmem:[#allocation2 + $0x8] sm:$0xff] %vm19_vm0, %v828_v4 }
 0x136   :  { %849 = vst.msk [vmem:[#allocation2 + $0x48] sm:$0xff] %vm19_vm0, %v836_v23  ;;  %v781_v6 = vpop.f32.mrb[32].mxu0 }
 0x137   :  { %v782_v24 = vadd.f32 %v781_v6, %v1624_v36  ;;  %v813_v8 = vpop.f32.mrb[32].mxu1  ;;  %v1221_v9 = vpop.f32.mrb[33].mxu0 }
 0x138   :  { %v814_v11 = vadd.f32 %v813_v8, %v726_v30  ;;  %v1237_v12 = vpop.f32.mrb[33].mxu1  ;;  %v784_v14 = vpop.f32.mrb[34].mxu0 }
 0x139   :  { %v829_v15 = vadd.f32 %v782_v24, %v36_v5  ;;  %v785_v16 = vadd.f32 %v784_v14, %v1626_v37  ;;  %v816_v18 = vpop.f32.mrb[34].mxu1  ;;  %v1222_v19 = vpop.f32.mrb[35].mxu0  ;;  %v40_v24 = vld [vmem:[#allocation2 + $0x30] sm:$0xff] }
 0x13a   :  { %v857_v20 = vld [vmem:[#allocation2] sm:$0xff]  ;;  %v837_v36 = vadd.f32 %v814_v11, %v44_v7  ;;  %v817_v21 = vadd.f32 %v816_v18, %v729_v31  ;;  %v1238_v22 = vpop.f32.mrb[35].mxu1 }
 0x13b   :  { %v877_v25 = vadd.f32 %v1648_v10, %v857_v20  ;;  %v865_v26 = vld [vmem:[#allocation2 + $0x40] sm:$0xff]  ;;  %842 = vst.msk [vmem:[#allocation2 + $0x10] sm:$0xff] %vm19_vm0, %v829_v15  ;;  %v830_v27 = vadd.f32 %v785_v16, %v37_v13  ;;  %v41_v15 = vld [vmem:[#allocation2 + $0x38] sm:$0xff] }
 0x13c   :  { %v885_v1 = vadd.f32 %v1648_v10, %v865_v26  ;;  %v858_v28 = vld [vmem:[#allocation2 + $0x8] sm:$0xff]  ;;  %850 = vst.msk [vmem:[#allocation2 + $0x50] sm:$0xff] %vm19_vm0, %v837_v36  ;;  %v838_v29 = vadd.f32 %v817_v21, %v45_v17 }
 0x13d   :  { %v890_v37 = vmax.f32 %v877_v25, 0.0  ;;  %v878_v30 = vadd.f32 %v1648_v10, %v858_v28  ;;  %v866_v32 = vld [vmem:[#allocation2 + $0x48] sm:$0xff]  ;;  %843 = vst.msk [vmem:[#allocation2 + $0x18] sm:$0xff] %vm19_vm0, %v830_v27 }
 0x13e   :  { %v898_v31 = vmax.f32 %v885_v1, 0.0  ;;  %v886_v33 = vadd.f32 %v1648_v10, %v866_v32  ;;  %851 = vst.msk [vmem:[#allocation2 + $0x58] sm:$0xff] %vm19_vm0, %v838_v29  ;;  %v789_v35 = vpop.f32.mrb[36].mxu0 }
 0x13f   :  { %v1067_v38 = vpack.c.bf16 %v890_v37, %v890_v37  ;;  %v891_v39 = vmax.f32 %v878_v30, 0.0  ;;  %v790_v40 = vadd.f32 %v789_v35, %v1628_v50  ;;  %v821_v42 = vpop.f32.mrb[36].mxu1  ;;  %v1225_v43 = vpop.f32.mrb[37].mxu0 }
 0x140   :  { %v1075_v45 = vpack.c.bf16 %v898_v31, %v898_v31  ;;  %v899_v46 = vmax.f32 %v886_v33, 0.0  ;;  %v822_v47 = vadd.f32 %v821_v42, %v1636_v44  ;;  %v792_v49 = vpop.f32.mrb[38].mxu0  ;;  %v1241_v52 = vpop.f32.mrb[37].mxu1 }
 0x141   :  { %957 = vst.msk [vmem:[%s1732_s3] sm:$0xf] %vm956_vm3, %v1067_v38  ;;  %v1068_v53 = vpack.c.bf16 %v891_v39, %v891_v39  ;;  %v831_v54 = vadd.f32 %v790_v40, %v38_v34  ;;  %v793_v55 = vadd.f32 %v792_v49, %v1630_v51  ;;  %v1226_v50 = vpop.f32.mrb[39].mxu0  ;;  %v824_v56 = vpop.f32.mrb[38].mxu1 }
 0x142   :  { %965 = vst.msk [vmem:[%s1732_s3 + $0x20] sm:$0xf] %vm956_vm3, %v1075_v45  ;;  %v1076_v44 = vpack.c.bf16 %v899_v46, %v899_v46  ;;  %v859_v57 = vld [vmem:[#allocation2 + $0x10] sm:$0xff]  ;;  %v839_v58 = vadd.f32 %v822_v47, %v46_v41  ;;  %v1242_v59 = vpop.f32.mrb[39].mxu1 }
 0x143   :  { %958 = vst.msk [vmem:[%s1732_s3 + $0x4] sm:$0xf] %vm956_vm3, %v1068_v53  ;;  %v879_v60 = vadd.f32 %v1648_v10, %v859_v57  ;;  %v867_v61 = vld [vmem:[#allocation2 + $0x50] sm:$0xff]  ;;  %v832_v51 = vadd.f32 %v793_v55, %v39_v48 }
 0x144   :  { %844 = vst.msk [vmem:[#allocation2 + $0x20] sm:$0xff] %vm19_vm0, %v831_v54  ;;  %v887_v62 = vadd.f32 %v1648_v10, %v867_v61  ;;  %v860_v63 = vld [vmem:[#allocation2 + $0x18] sm:$0xff] }
 0x145   :  { %966 = vst.msk [vmem:[%s1732_s3 + $0x24] sm:$0xf] %vm956_vm3, %v1076_v44  ;;  %v892_v3 = vmax.f32 %v879_v60, 0.0  ;;  %v880_v4 = vadd.f32 %v1648_v10, %v860_v63  ;;  %v868_v23 = vld [vmem:[#allocation2 + $0x58] sm:$0xff] }
 0x146   :  { %853 = vst.msk [vmem:[#allocation2 + $0x60] sm:$0x3] %vm32_vm2, %v839_v58  ;;  %v900_v5 = vmax.f32 %v887_v62, 0.0  ;;  %v888_v6 = vadd.f32 %v1648_v10, %v868_v23  ;;  %v797_v7 = vpop.f32.mrb[40].mxu0 }
 0x147   :  { %845 = vst.msk [vmem:[#allocation2 + $0x28] sm:$0xff] %vm19_vm0, %v832_v51  ;;  %v1069_v8 = vpack.c.bf16 %v892_v3, %v892_v3  ;;  %v893_v9 = vmax.f32 %v880_v4, 0.0  ;;  %v798_v11 = vadd.f32 %v797_v7, %v1632_v0  ;;  %v1229_v12 = vpop.f32.mrb[41].mxu0 }
 0x148   :  { %v1077_v13 = vpack.c.bf16 %v900_v5, %v900_v5  ;;  %v901_v14 = vmax.f32 %v888_v6, 0.0  ;;  %v800_v16 = vpop.f32.mrb[42].mxu0 }
 0x149   :  { %959 = vst.msk [vmem:[%s1732_s3 + $0x8] sm:$0xf] %vm956_vm3, %v1069_v8  ;;  %v1070_v17 = vpack.c.bf16 %v893_v9, %v893_v9  ;;  %v833_v18 = vadd.f32 %v798_v11, %v40_v24  ;;  %v801_v19 = vadd.f32 %v800_v16, %v1634_v2  ;;  %v1230_v20 = vpop.f32.mrb[43].mxu0 }
 0x14a   :  { %967 = vst.msk [vmem:[%s1732_s3 + $0x28] sm:$0xf] %vm956_vm3, %v1077_v13  ;;  %v1078_v0 = vpack.c.bf16 %v901_v14, %v901_v14 }
 0x14b   :  { %v861_v36 = vld [vmem:[#allocation2 + $0x20] sm:$0xff]  ;;  %960 = vst.msk [vmem:[%s1732_s3 + $0xc] sm:$0xf] %vm956_vm3, %v1070_v17  ;;  %v834_v25 = vadd.f32 %v801_v19, %v41_v15 }
 0x14c   :  { %v881_v21 = vadd.f32 %v1648_v10, %v861_v36  ;;  %846 = vst.msk [vmem:[#allocation2 + $0x30] sm:$0xff] %vm19_vm0, %v833_v18 }
 0x14d   :  { %v869_v22 = vld [vmem:[#allocation2 + $0x60] sm:$0x3]  ;;  %968 = vst.msk [vmem:[%s1732_s3 + $0x2c] sm:$0xf] %vm956_vm3, %v1078_v0 }
 0x14e   :  { %v889_v2 = vadd.f32 %v1648_v10, %v869_v22  ;;  %v862_v26 = vld [vmem:[#allocation2 + $0x28] sm:$0xff]  ;;  %v894_v27 = vmax.f32 %v881_v21, 0.0  ;;  %847 = vst.msk [vmem:[#allocation2 + $0x38] sm:$0xff] %vm19_vm0, %v834_v25 }
 0x14f   :  { %v882_v1 = vadd.f32 %v1648_v10, %v862_v26 }
 0x150   :  { %v902_v28 = vmax.f32 %v889_v2, 0.0  ;;  %v1071_v29 = vpack.c.bf16 %v894_v27, %v894_v27 }
 0x151   :  { %v895_v37 = vmax.f32 %v882_v1, 0.0 }
 0x152   :  { %v1079_v30 = vpack.c.bf16 %v902_v28, %v902_v28  ;;  %961 = vst.msk [vmem:[%s1732_s3 + $0x10] sm:$0xf] %vm956_vm3, %v1071_v29 }
 0x153   :  { %v1072_v32 = vpack.c.bf16 %v895_v37, %v895_v37  ;;  %v863_v31 = vld [vmem:[#allocation2 + $0x30] sm:$0xff] }
 0x154   :  { %970 = vst.msk [vmem:[%s1732_s3 + $0x30] sm:$0x1] %vm969_vm4, %v1079_v30  ;;  %v883_v33 = vadd.f32 %v1648_v10, %v863_v31 }
 0x155   :  { %962 = vst.msk [vmem:[%s1732_s3 + $0x14] sm:$0xf] %vm956_vm3, %v1072_v32  ;;  %v864_v34 = vld [vmem:[#allocation2 + $0x38] sm:$0xff] }
 0x156   :  { %v896_v35 = vmax.f32 %v883_v33, 0.0  ;;  %v884_v38 = vadd.f32 %v1648_v10, %v864_v34 }
 0x158   :  { %v1073_v39 = vpack.c.bf16 %v896_v35, %v896_v35  ;;  %v897_v40 = vmax.f32 %v884_v38, 0.0 }
 0x15a   :  { %963 = vst.msk [vmem:[%s1732_s3 + $0x18] sm:$0xf] %vm956_vm3, %v1073_v39  ;;  %v1074_v41 = vpack.c.bf16 %v897_v40, %v897_v40 }
 0x15c   :  { %964 = vst.msk [vmem:[%s1732_s3 + $0x1c] sm:$0xf] %vm956_vm3, %v1074_v41 }

// kernel: dqn_forward.9
= control target key start
LH: loop header
LB: loop body
LE: loop exit
PB: predicated region body
PF: predicated region fallthrough
CT: control target
= control target key end

     0   :  { %v157_v28 = vlaneseq  ;;  %v1039_v36 = vmov 1966171168   ;;  %s1287_s0 = inlined_call_operand.vmem [shape: bf16[2,1024], index: 0, kind: input, shape index: {}]   ;;  %s1288_s1 = inlined_call_operand.vmem [shape: bf16[1024,128], index: 1, kind: input, shape index: {}]   ;;  %s1289_s2 = inlined_call_operand.vmem [shape: f32[1,128], index: 2, kind: input, shape index: {}]   ;;  %s1290_s3 = inlined_call_operand.hbm [shape: f32[2,6], index: 3, kind: output, shape index: {}]  }
   0x1   :  { %v950_v0 = vld [vmem:[%s1288_s1 + $0x40] sm:$0xff]   ;;  %v954_v4 = vld [vmem:[%s1288_s1 + $0x48] sm:$0xff]   ;;  %v958_v8 = vld [vmem:[%s1288_s1 + $0x50] sm:$0xff]   ;;  %v155_v37 = vunpack.c.l.s4 %v1039_v36 }
   0x2   :  { %v951_v1 = vld [vmem:[%s1288_s1 + $0xc0] sm:$0xff]   ;;  %856 = vmatprep.subr.bf16.mxu0 %v950_v0  ;;  %v955_v5 = vld [vmem:[%s1288_s1 + $0xc8] sm:$0xff]   ;;  %v959_v9 = vld [vmem:[%s1288_s1 + $0xd0] sm:$0xff]   ;;  %v158_v33 = vshrl.u32 %v157_v28, 7 }
   0x3   :  { %v952_v2 = vld [vmem:[%s1288_s1] sm:$0xff]   ;;  %878 = vmatprep.subr.bf16.mxu1 %v951_v1  ;;  %v956_v6 = vld [vmem:[%s1288_s1 + $0x8] sm:$0xff]   ;;  %v960_v10 = vld [vmem:[%s1288_s1 + $0x10] sm:$0xff]   ;;  %v156_v40 = vunpack.c.0.s8 %v155_v37 }
   0x4   :  { %v953_v3 = vld [vmem:[%s1288_s1 + $0x80] sm:$0xff]   ;;  %857 = vmatpush3.bf16.msra.mxu0 %v952_v2  ;;  %v957_v7 = vld [vmem:[%s1288_s1 + $0x88] sm:$0xff]   ;;  %v961_v11 = vld [vmem:[%s1288_s1 + $0x90] sm:$0xff]  }
   0x5   :  { %879 = vmatpush3.bf16.msra.mxu1 %v953_v3  ;;  %858 = vmatprep.subr.bf16.mxu0 %v954_v4  ;;  %v962_v12 = vld [vmem:[%s1288_s1 + $0x58] sm:$0xff]   ;;  %v966_v16 = vld [vmem:[%s1288_s1 + $0x60] sm:$0xff]   ;;  %v970_v20 = vld [vmem:[%s1288_s1 + $0x68] sm:$0xff]   ;;  %v1167_v41 = vsub.s32 %v156_v40, %v158_v33 }
   0x6   :  { %880 = vmatprep.subr.bf16.mxu1 %v955_v5  ;;  %v963_v13 = vld [vmem:[%s1288_s1 + $0xd8] sm:$0xff]   ;;  %v967_v17 = vld [vmem:[%s1288_s1 + $0xe0] sm:$0xff]   ;;  %v971_v21 = vld [vmem:[%s1288_s1 + $0xe8] sm:$0xff]  }
   0x7   :  { %v964_v14 = vld [vmem:[%s1288_s1 + $0x18] sm:$0xff]   ;;  %v968_v18 = vld [vmem:[%s1288_s1 + $0x20] sm:$0xff]   ;;  %v972_v22 = vld [vmem:[%s1288_s1 + $0x28] sm:$0xff]  }
   0x8   :  { %859 = vmatpush3.bf16.msra.mxu0 %v956_v6  ;;  %v965_v15 = vld [vmem:[%s1288_s1 + $0x98] sm:$0xff]   ;;  %v969_v19 = vld [vmem:[%s1288_s1 + $0xa0] sm:$0xff]   ;;  %v973_v23 = vld [vmem:[%s1288_s1 + $0xa8] sm:$0xff]  }
   0x9   :  { %881 = vmatpush3.bf16.msra.mxu1 %v957_v7  ;;  %860 = vmatprep.subr.bf16.mxu0 %v958_v8  ;;  %v974_v24 = vld [vmem:[%s1288_s1 + $0x70] sm:$0xff]   ;;  %v978_v29 = vld [vmem:[%s1288_s1 + $0x78] sm:$0xff]   ;;  %v16_v34 = vld [vmem:[%s1287_s0] sm:$0xff] }
   0xa   :  { %882 = vmatprep.subr.bf16.mxu1 %v959_v9  ;;  %v975_v25 = vld [vmem:[%s1288_s1 + $0xf0] sm:$0xff]   ;;  %v979_v30 = vld [vmem:[%s1288_s1 + $0xf8] sm:$0xff]   ;;  %v983_v35 = vld [vmem:[%s1288_s1 + $0x140] sm:$0xff]   ;;  %v153_v39 = vcombine.high %v16_v34, %v16_v34  ;;  %v160_v42 = vrot.slane %v16_v34, %v1167_v41 }
   0xb   :  { %v976_v26 = vld [vmem:[%s1288_s1 + $0x30] sm:$0xff]   ;;  %v980_v31 = vld [vmem:[%s1288_s1 + $0x38] sm:$0xff]   ;;  %v984_v38 = vld [vmem:[%s1288_s1 + $0x1c0] sm:$0xff]  }
   0xc   :  { %861 = vmatpush3.bf16.msra.mxu0 %v960_v10  ;;  %v977_v27 = vld [vmem:[%s1288_s1 + $0xb0] sm:$0xff]   ;;  %v981_v32 = vld [vmem:[%s1288_s1 + $0xb8] sm:$0xff]   ;;  %v1171_v43 = vrot.slane %v153_v39, %v1167_v41  ;;  %v168_v44 = vcombine.high %v160_v42, %v160_v42  ;;  %v176_v45 = vrot.slane %v160_v42, %v1167_v41  ;;  %v985_v48 = vld [vmem:[%s1288_s1 + $0x100] sm:$0xff]  }
   0xd   :  { %883 = vmatpush3.bf16.msra.mxu1 %v961_v11  ;;  %862 = vmatprep.subr.bf16.mxu0 %v962_v12  ;;  %v987_v51 = vld [vmem:[%s1288_s1 + $0x148] sm:$0xff]   ;;  %v986_v53 = vld [vmem:[%s1288_s1 + $0x180] sm:$0xff]   ;;  %v991_v57 = vld [vmem:[%s1288_s1 + $0x150] sm:$0xff]  }
   0xe   :  { %884 = vmatprep.subr.bf16.mxu1 %v963_v13  ;;  %v169_v46 = vcombine.high %v1171_v43, %v1171_v43  ;;  %v190_v47 = vrot.slane %v168_v44, %v1167_v41  ;;  %v198_v50 = vcombine.high %v176_v45, %v176_v45  ;;  %v988_v54 = vld [vmem:[%s1288_s1 + $0x1c8] sm:$0xff]   ;;  %v992_v59 = vld [vmem:[%s1288_s1 + $0x1d0] sm:$0xff]   ;;  %v995_v61 = vld [vmem:[%s1288_s1 + $0x158] sm:$0xff]  }
   0xf   :  { %v989_v56 = vld [vmem:[%s1288_s1 + $0x108] sm:$0xff]   ;;  %v993_v60 = vld [vmem:[%s1288_s1 + $0x110] sm:$0xff]   ;;  %v996_v63 = vld [vmem:[%s1288_s1 + $0x1d8] sm:$0xff]  }
  0x10   :  { %863 = vmatpush3.bf16.msra.mxu0 %v964_v14  ;;  %v197_v49 = vrot.slane %v169_v46, %v1167_v41  ;;  %626 = vmatprep.mubr.bf16.mxu0 %v190_v47  ;;  %v200_v52 = vcombine.high %v190_v47, %v190_v47  ;;  %v990_v58 = vld [vmem:[%s1288_s1 + $0x188] sm:$0xff]   ;;  %v994_v62 = vld [vmem:[%s1288_s1 + $0x190] sm:$0xff]   ;;  %v997_v0 = vld [vmem:[%s1288_s1 + $0x118] sm:$0xff]  }
  0x11   :  { %885 = vmatpush3.bf16.msra.mxu1 %v965_v15  ;;  %864 = vmatprep.subr.bf16.mxu0 %v966_v16  ;;  %v999_v1 = vld [vmem:[%s1288_s1 + $0x160] sm:$0xff]   ;;  %v998_v2 = vld [vmem:[%s1288_s1 + $0x198] sm:$0xff]   ;;  %v1003_v5 = vld [vmem:[%s1288_s1 + $0x168] sm:$0xff]  }
  0x12   :  { %886 = vmatprep.subr.bf16.mxu1 %v967_v17  ;;  %v201_v55 = vcombine.high %v197_v49, %v197_v49  ;;  %666 = vmatprep.mubr.bf16.mxu1 %v200_v52  ;;  %v1000_v3 = vld [vmem:[%s1288_s1 + $0x1e0] sm:$0xff]   ;;  %v1004_v7 = vld [vmem:[%s1288_s1 + $0x1e8] sm:$0xff]   ;;  %v1007_v9 = vld [vmem:[%s1288_s1 + $0x170] sm:$0xff]  }
  0x13   :  { %v1001_v4 = vld [vmem:[%s1288_s1 + $0x120] sm:$0xff]   ;;  %v1005_v8 = vld [vmem:[%s1288_s1 + $0x128] sm:$0xff]  }
  0x14   :  { %865 = vmatpush3.bf16.msra.mxu0 %v968_v18  ;;  %v1002_v6 = vld [vmem:[%s1288_s1 + $0x1a0] sm:$0xff]  }
  0x15   :  { %887 = vmatpush3.bf16.msra.mxu1 %v969_v19  ;;  %866 = vmatprep.subr.bf16.mxu0 %v970_v20 }
  0x16   :  { %888 = vmatprep.subr.bf16.mxu1 %v971_v21 }
  0x18   :  { %867 = vmatpush3.bf16.msra.mxu0 %v972_v22 }
  0x19   :  { %889 = vmatpush3.bf16.msra.mxu1 %v973_v23  ;;  %868 = vmatprep.subr.bf16.mxu0 %v974_v24 }
  0x1a   :  { %890 = vmatprep.subr.bf16.mxu1 %v975_v25 }
  0x1c   :  { %869 = vmatpush3.bf16.msra.mxu0 %v976_v26 }
  0x1d   :  { %891 = vmatpush3.bf16.msra.mxu1 %v977_v27  ;;  %870 = vmatprep.subr.bf16.mxu0 %v978_v29 }
  0x1e   :  { %892 = vmatprep.subr.bf16.mxu1 %v979_v30 }
  0x20   :  { %871 = vmatpush3.bf16.msra.mxu0 %v980_v31 }
  0x21   :  { %893 = vmatpush3.bf16.msra.mxu1 %v981_v32  ;;  %900 = vmatprep.subr.bf16.mxu0 %v983_v35 }
  0x22   :  { %922 = vmatprep.subr.bf16.mxu1 %v984_v38 }
  0x23   :  { %627 = vmatmul.mubr.bf16.vlgmr.msra.gmra.mrb[0].mxu0 %v176_v45 }
  0x24   :  { %901 = vmatpush3.bf16.msra.mxu0 %v985_v48  ;;  %667 = vmatmul.mubr.bf16.vlgmr.msra.gmra.mrb[0].mxu1 %v198_v50 }
  0x25   :  { %902 = vmatprep.subr.bf16.mxu0 %v987_v51  ;;  %923 = vmatpush3.bf16.msra.mxu1 %v986_v53 }
  0x26   :  { %706 = vmatprep.mubr.bf16.mxu0 %v197_v49  ;;  %924 = vmatprep.subr.bf16.mxu1 %v988_v54 }
  0x27   :  { %746 = vmatprep.mubr.bf16.mxu1 %v201_v55 }
  0x28   :  { %903 = vmatpush3.bf16.msra.mxu0 %v989_v56 }
  0x29   :  { %904 = vmatprep.subr.bf16.mxu0 %v991_v57  ;;  %925 = vmatpush3.bf16.msra.mxu1 %v990_v58 }
  0x2a   :  { %926 = vmatprep.subr.bf16.mxu1 %v992_v59 }
  0x2c   :  { %905 = vmatpush3.bf16.msra.mxu0 %v993_v60 }
  0x2d   :  { %906 = vmatprep.subr.bf16.mxu0 %v995_v61  ;;  %927 = vmatpush3.bf16.msra.mxu1 %v994_v62 }
  0x2e   :  { %928 = vmatprep.subr.bf16.mxu1 %v996_v63 }
  0x30   :  { %907 = vmatpush3.bf16.msra.mxu0 %v997_v0 }
  0x31   :  { %908 = vmatprep.subr.bf16.mxu0 %v999_v1  ;;  %929 = vmatpush3.bf16.msra.mxu1 %v998_v2 }
  0x32   :  { %930 = vmatprep.subr.bf16.mxu1 %v1000_v3 }
  0x34   :  { %909 = vmatpush3.bf16.msra.mxu0 %v1001_v4 }
  0x35   :  { %910 = vmatprep.subr.bf16.mxu0 %v1003_v5 }
  0x36   :  { %8 = vsyncpa [#allocation3], 0  ;;  %931 = vmatpush3.bf16.msra.mxu1 %v1002_v6  ;;  %v1006_v10 = vld [vmem:[%s1288_s1 + $0x1a8] sm:$0xff]   ;;  %v1008_v11 = vld [vmem:[%s1288_s1 + $0x1f0] sm:$0xff]   ;;  %v183_v17 = vrot.slane %v1171_v43, %v1167_v41  ;;  %v1040_v20 = vmov 6   ;;  %vm754_vm0 = vcmask 41984  }
  0x37   :  { %932 = vmatprep.subr.bf16.mxu1 %v1004_v7  ;;  %v1009_v12 = vld [vmem:[%s1288_s1 + $0x130] sm:$0xff]   ;;  %v1011_v13 = vld [vmem:[%s1288_s1 + $0x178] sm:$0xff]   ;;  %949 = vset.pattern.permute.xlu0 %v1040_v20  ;;  %v791_v22 = vld [vmem:[%s1289_s2] ss:$0 sm:$0xff]  ;;  %s1041_s6 = smov [#allocation2]  }
  0x38   :  { %911 = vmatpush3.bf16.msra.mxu0 %v1005_v8  ;;  %v1010_v14 = vld [vmem:[%s1288_s1 + $0x1b0] sm:$0xff]   ;;  %v1012_v15 = vld [vmem:[%s1288_s1 + $0x1f8] sm:$0xff]   ;;  %v199_v19 = vcombine.high %v183_v17, %v183_v17  ;;  %s783_s7 = sshll.u32 %s1041_s6, 4  ;;  %s784_s7 = int_to_ptr.vmem [resolvable:$true] %s783_s7 }
  0x39   :  { %912 = vmatprep.subr.bf16.mxu0 %v1007_v9  ;;  %v1013_v16 = vld [vmem:[%s1288_s1 + $0x138] sm:$0xff]   ;;  %s1015_s8 = scalar_lea.vmem %s784_s7, 32  ;;  %p1020_p1 = scmp.lt.s32.totalorder %s784_s7, %s784_s7 }
  0x3a   :  { %933 = vmatpush3.bf16.msra.mxu1 %v1006_v10  ;;  %v1014_v18 = vld [vmem:[%s1288_s1 + $0x1b8] sm:$0xff]   ;;  %p1016_p0 = scmp.ne.s32.totalorder %s784_s7, %s1015_s8  ;;  %p1021_p2 = scmp.lt.s32.totalorder %s1015_s8, %s1015_s8 }
  0x3b   :  { %934 = vmatprep.subr.bf16.mxu1 %v1008_v11 }
  0x3c   :  { %913 = vmatpush3.bf16.msra.mxu0 %v1009_v12  ;;  %p1022_p3 = por %p1021_p2, %p1020_p1 }
  0x3d   :  { %914 = vmatprep.subr.bf16.mxu0 %v1011_v13 }
  0x3e   :  { %935 = vmatpush3.bf16.msra.mxu1 %v1010_v14  ;;  %p1023_p4 = pnand %p1022_p3, %p1016_p0 }
  0x3f   :  { %936 = vmatprep.subr.bf16.mxu1 %v1012_v15 }
  0x40   :  { %915 = vmatpush3.bf16.msra.mxu0 %v1013_v16 }
  0x42   :  { %937 = vmatpush3.bf16.msra.mxu1 %v1014_v18 }
  0x43   :  { %707 = vmatmul.mubr.bf16.vlgmr.msra.gmra.mrb[4].mxu0 %v183_v17 }
  0x45   :  { %747 = vmatmul.mubr.bf16.vlgmr.msra.gmra.mrb[4].mxu1 %v199_v19 }
  0xf6   :  { %v872_v21 = vpop.f32.mrb[0].mxu0 }
  0xf7   :  { %v873_v23 = vpop.f32.mrb[1].mxu0  ;;  %v894_v24 = vpop.f32.mrb[0].mxu1 }
  0xf8   :  { %v874_v25 = vadd.f32 %v873_v23, %v872_v21  ;;  %v875_v26 = vpop.f32.mrb[2].mxu0  ;;  %v895_v27 = vpop.f32.mrb[1].mxu1 }
  0xf9   :  { %v876_v28 = vpop.f32.mrb[3].mxu0  ;;  %v896_v30 = vadd.f32 %v895_v27, %v894_v24  ;;  %v897_v31 = vpop.f32.mrb[2].mxu1 }
  0xfa   :  { %v629_v29 = vadd.f32 %v874_v25, %v791_v22  ;;  %v898_v32 = vpop.f32.mrb[3].mxu1 }
  0xfc   :  { %v669_v33 = vadd.f32 %v896_v30, %v629_v29 }
 0x116   :  { %v916_v34 = vpop.f32.mrb[4].mxu0 }
 0x117   :  { %v917_v35 = vpop.f32.mrb[5].mxu0 }
 0x118   :  { %v938_v36 = vpop.f32.mrb[4].mxu1  ;;  %v918_v37 = vadd.f32 %v917_v35, %v916_v34  ;;  %v919_v38 = vpop.f32.mrb[6].mxu0 }
 0x119   :  { %v939_v39 = vpop.f32.mrb[5].mxu1  ;;  %v920_v40 = vpop.f32.mrb[7].mxu0 }
 0x11a   :  { %v709_v41 = vadd.f32 %v918_v37, %v669_v33  ;;  %v940_v42 = vadd.f32 %v939_v39, %v938_v36  ;;  %v941_v43 = vpop.f32.mrb[6].mxu1 }
 0x11b   :  { %v942_v44 = vpop.f32.mrb[7].mxu1 }
 0x11c   :  { %v749_v45 = vadd.f32 %v940_v42, %v709_v41 }
 0x11e   :  { %v755_v46 = vsel %vm754_vm0, %v749_v45, 0.0 }
 0x11f   :  { %756 = vadd.xlane.f32.xlu0 %v755_v46 }
 0x135   :  { %770 = vperm.xlu0 %949, %v749_v45  }
 0x1ac   :  { %v757_v47 = vpop.xlane.xlu0 %756 }
 0x1ad   :  { %v758_v48 = vrot.slane %v757_v47, 4 }
 0x1af   :  { %v759_v49 = vadd.f32 %v758_v48, %v757_v47 }
 0x1b1   :  { %v760_v50 = vrot.slane %v759_v49, 2 }
 0x1b3   :  { %v761_v51 = vadd.f32 %v760_v50, %v759_v49 }
 0x1b4   :  { %v771_v54 = vpop.permute.xlu0 %770 }
 0x1b5   :  { %v762_v52 = vrot.slane %v761_v51, 1  ;;  %v773_v55 = vadd.f32 %v771_v54, %v749_v45 }
 0x1b7   :  { %v763_v53 = vadd.f32 %v762_v52, %v761_v51 }
 0x1b9   :  { %944 = vpush %v763_v53 }
 0x1ea   :  { %s945_s1 = spop %944 }
 0x1eb   :  { %s767_s2 = smul.f32 0.083333336, %s945_s1 }
 0x1ed   :  { %v774_v56 = vstv %s767_s2 }
 0x1ee   :  { %v775_v57 = vsub.f32 %v773_v55, %v774_v56 }
 0x1f0   :  { %776 = vst.msk [vmem:[#allocation2] sm:$0x3] %vm754_vm0, %v775_v57 }
 0x1f1   :  { %1026 = shalt.err (!%p1023_p4)
}
 0x1f2   :  { %s1027_s11 = scalar_lea.hbm %s1290_s3, 32 }
 0x1f3   :  { %p1028_p5 = scmp.ne.s32.totalorder %s1290_s3, %s1027_s11  ;;  %p1031_p6 = scmp.lt.u32.totalorder %s1027_s11, %s1290_s3 }
 0x1f5   :  { %p1033_p7 = pnand %p1031_p6, %p1028_p5 }
 0x1f7   :  { %1036 = shalt.err (!%p1033_p7)
}
 0x1f8   :  { %786 = dma.vmem_to_hbm [thread:$0]  %s784_s7, 32, %s1290_s3, [#allocation3]  }
 0x1f9   :  { %1037 = dma.done.wait [#allocation3], 32  }
 0x1fa   :  { %1038 = vsyncadd [#allocation3], 4294967264 }
 0x1fb   :  { %790 = vsyncpa [#allocation3], 1 }

// kernel: dqn_forward.8
= control target key start
LH: loop header
LB: loop body
LE: loop exit
PB: predicated region body
PF: predicated region fallthrough
CT: control target
= control target key end

     0   :  { %s10242_s12 = smov 0   ;;  %s10244_s13 = smov 0   ;;  %s12829_s0 = inlined_call_operand.vmem [shape: bf16[2,3136], index: 0, kind: input, shape index: {}]   ;;  %s12830_s1 = inlined_call_operand.vmem [shape: bf16[3136,1024], index: 1, kind: input, shape index: {}]   ;;  %s12831_s2 = inlined_call_operand.vmem [shape: f32[1,1024], index: 2, kind: input, shape index: {}]   ;;  %s12832_s3 = inlined_call_operand.vmem [shape: bf16[2,1024], index: 3, kind: output, shape index: {}]  }
   0x1   :  { %s10246_s14 = smov 0   ;;  %s10248_s15 = smov 0  }
   0x2   :  { %s10250_s16 = smov 0  }
   0x3 LB: > { %s28_s17 = sadd.s32 1, %s10213_s15  ;;  %p76_p1 = scmp.ne.s32.totalorder %s10205_s13, %s10201_s12  ;;  %s10217_s16 = sphi %s10250_s16, %s13_s16   ;;  %s10213_s15 = sphi %s10248_s15, %s12836_s15   ;;  %s10209_s14 = sphi %s10246_s14, %s12835_s14   ;;  %s10205_s13 = sphi %s10244_s13, %s12834_s13   ;;  %s10201_s12 = sphi %s10242_s12, %s12833_s12  }
   0x4   : > { %p30_p0 = scmp.ge.s32.totalorder %s28_s17, 2  ;;  %p77_p2 = scmp.eq.s32.totalorder %s10217_s16, 0 }
   0x5   : > { %s69_s19 = sadd.s32 1, %s10205_s13  ;;  %p8058_p5 = scmp.ge.s32.totalorder %s10217_s16, 2 }
   0x6   : > { %s12838_s17 = smov (%p30_p0, %s28_s17), 0  ;;  %p78_p3 = por %p77_p2, %p76_p1 }
   0x7   : > { %s65_s18 = ssub.s32 %s10213_s15, %s12838_s17  ;;  %168 = sbr.rel (%p8058_p5) target bundleno = 410 (0x19a), region = 20 }
   0x8   : > { %p67_p4 = scmp.eq.s32.totalorder %s65_s18, 0 }
   0xa   : > { %s10277_s20 = scalar_select %p67_p4, %s10205_s13, %s69_s19  }
   0xe   : > { %171 = sbr.rel (!%p78_p3) target bundleno = 410 (0x19a), region = 24  ;;  %s173_s21 = sand.u32 (%p78_p3), 1, %s10205_s13  }
   0xf   : > { %s8856_s22 = sshll.u32 (%p78_p3), %s10213_s15, 4  ;;  %s8953_s23 = smul.u32 (%p78_p3), 6272, %s173_s21 }
  0x10   : > { %s10285_s26 = scalar_lea.vmem (%p78_p3), %s12830_s1, %s8856_s22 }
  0x11   : > { %v194_v0 = vld [vmem:[%s10285_s26] sm:$0xff] (%p78_p3)  ;;  %v196_v1 = vld [vmem:[%s10285_s26 + $0x8] sm:$0xff] (%p78_p3)  ;;  %s10293_s27 = scalar_lea.vmem (%p78_p3), [#allocation3], %s8953_s23 }
  0x12   : > { %v198_v2 = vld [vmem:[%s10285_s26 + $0x20] sm:$0xff] (%p78_p3)  ;;  %v200_v3 = vld [vmem:[%s10285_s26 + $0x28] sm:$0xff] (%p78_p3)  ;;  %195 = vst [vmem:[%s10293_s27] sm:$0xff] (%p78_p3), %v194_v0  ;;  %197 = vst [vmem:[%s10293_s27 + $0x8] sm:$0xff] (%p78_p3), %v196_v1 }
  0x13   : > { %v202_v4 = vld [vmem:[%s10285_s26 + $0x40] sm:$0xff] (%p78_p3)  ;;  %v204_v5 = vld [vmem:[%s10285_s26 + $0x48] sm:$0xff] (%p78_p3)  ;;  %199 = vst [vmem:[%s10293_s27 + $0x10] sm:$0xff] (%p78_p3), %v198_v2  ;;  %201 = vst [vmem:[%s10293_s27 + $0x18] sm:$0xff] (%p78_p3), %v200_v3 }
  0x14   : > { %203 = vst [vmem:[%s10293_s27 + $0x20] sm:$0xff] (%p78_p3), %v202_v4  ;;  %205 = vst [vmem:[%s10293_s27 + $0x28] sm:$0xff] (%p78_p3), %v204_v5  ;;  %v206_v6 = vld [vmem:[%s10285_s26 + $0x60] sm:$0xff] (%p78_p3)  ;;  %v208_v7 = vld [vmem:[%s10285_s26 + $0x68] sm:$0xff] (%p78_p3) }
  0x15   : > { %v210_v8 = vld [vmem:[%s10285_s26 + $0x80] sm:$0xff]  ;;  %207 = vst [vmem:[%s10293_s27 + $0x30] sm:$0xff] %v206_v6  ;;  %209 = vst [vmem:[%s10293_s27 + $0x38] sm:$0xff] %v208_v7  ;;  %v212_v9 = vld [vmem:[%s10285_s26 + $0x88] sm:$0xff] }
  0x16   : > { %211 = vst [vmem:[%s10293_s27 + $0x40] sm:$0xff] %v210_v8  ;;  %v214_v10 = vld [vmem:[%s10285_s26 + $0xa0] sm:$0xff]  ;;  %v216_v11 = vld [vmem:[%s10285_s26 + $0xa8] sm:$0xff]  ;;  %213 = vst [vmem:[%s10293_s27 + $0x48] sm:$0xff] %v212_v9 }
  0x17   : > { %215 = vst [vmem:[%s10293_s27 + $0x50] sm:$0xff] %v214_v10  ;;  %217 = vst [vmem:[%s10293_s27 + $0x58] sm:$0xff] %v216_v11  ;;  %v218_v12 = vld [vmem:[%s10285_s26 + $0xc0] sm:$0xff]  ;;  %v220_v13 = vld [vmem:[%s10285_s26 + $0xc8] sm:$0xff] }
  0x18   : > { %v222_v14 = vld [vmem:[%s10285_s26 + $0xe0] sm:$0xff]  ;;  %219 = vst [vmem:[%s10293_s27 + $0x60] sm:$0xff] %v218_v12  ;;  %221 = vst [vmem:[%s10293_s27 + $0x68] sm:$0xff] %v220_v13  ;;  %v224_v15 = vld [vmem:[%s10285_s26 + $0xe8] sm:$0xff] }
  0x19   : > { %223 = vst [vmem:[%s10293_s27 + $0x70] sm:$0xff] %v222_v14  ;;  %v226_v16 = vld [vmem:[%s10285_s26 + $0x100] sm:$0xff]  ;;  %v228_v17 = vld [vmem:[%s10285_s26 + $0x108] sm:$0xff]  ;;  %225 = vst [vmem:[%s10293_s27 + $0x78] sm:$0xff] %v224_v15 }
  0x1a   : > { %227 = vst [vmem:[%s10293_s27 + $0x80] sm:$0xff] %v226_v16  ;;  %229 = vst [vmem:[%s10293_s27 + $0x88] sm:$0xff] %v228_v17  ;;  %v230_v18 = vld [vmem:[%s10285_s26 + $0x120] sm:$0xff]  ;;  %v232_v19 = vld [vmem:[%s10285_s26 + $0x128] sm:$0xff] }
  0x1b   : > { %v234_v20 = vld [vmem:[%s10285_s26 + $0x140] sm:$0xff]  ;;  %231 = vst [vmem:[%s10293_s27 + $0x90] sm:$0xff] %v230_v18  ;;  %233 = vst [vmem:[%s10293_s27 + $0x98] sm:$0xff] %v232_v19  ;;  %v236_v21 = vld [vmem:[%s10285_s26 + $0x148] sm:$0xff] }
  0x1c   : > { %235 = vst [vmem:[%s10293_s27 + $0xa0] sm:$0xff] %v234_v20  ;;  %v238_v22 = vld [vmem:[%s10285_s26 + $0x160] sm:$0xff]  ;;  %v240_v23 = vld [vmem:[%s10285_s26 + $0x168] sm:$0xff]  ;;  %237 = vst [vmem:[%s10293_s27 + $0xa8] sm:$0xff] %v236_v21 }
  0x1d   : > { %239 = vst [vmem:[%s10293_s27 + $0xb0] sm:$0xff] %v238_v22  ;;  %241 = vst [vmem:[%s10293_s27 + $0xb8] sm:$0xff] %v240_v23  ;;  %v242_v24 = vld [vmem:[%s10285_s26 + $0x180] sm:$0xff]  ;;  %v244_v25 = vld [vmem:[%s10285_s26 + $0x188] sm:$0xff] }
  0x1e   : > { %v246_v26 = vld [vmem:[%s10285_s26 + $0x1a0] sm:$0xff]  ;;  %243 = vst [vmem:[%s10293_s27 + $0xc0] sm:$0xff] %v242_v24  ;;  %245 = vst [vmem:[%s10293_s27 + $0xc8] sm:$0xff] %v244_v25  ;;  %v248_v27 = vld [vmem:[%s10285_s26 + $0x1a8] sm:$0xff] }
  0x1f   : > { %247 = vst [vmem:[%s10293_s27 + $0xd0] sm:$0xff] %v246_v26  ;;  %v250_v28 = vld [vmem:[%s10285_s26 + $0x1c0] sm:$0xff]  ;;  %v252_v29 = vld [vmem:[%s10285_s26 + $0x1c8] sm:$0xff]  ;;  %249 = vst [vmem:[%s10293_s27 + $0xd8] sm:$0xff] %v248_v27 }
  0x20   : > { %251 = vst [vmem:[%s10293_s27 + $0xe0] sm:$0xff] %v250_v28  ;;  %253 = vst [vmem:[%s10293_s27 + $0xe8] sm:$0xff] %v252_v29  ;;  %v254_v30 = vld [vmem:[%s10285_s26 + $0x1e0] sm:$0xff]  ;;  %v256_v31 = vld [vmem:[%s10285_s26 + $0x1e8] sm:$0xff] }
  0x21   : > { %v258_v32 = vld [vmem:[%s10285_s26 + $0x200] sm:$0xff]  ;;  %255 = vst [vmem:[%s10293_s27 + $0xf0] sm:$0xff] %v254_v30  ;;  %257 = vst [vmem:[%s10293_s27 + $0xf8] sm:$0xff] %v256_v31  ;;  %v260_v33 = vld [vmem:[%s10285_s26 + $0x208] sm:$0xff] }
  0x22   : > { %259 = vst [vmem:[%s10293_s27 + $0x100] sm:$0xff] %v258_v32  ;;  %v262_v34 = vld [vmem:[%s10285_s26 + $0x220] sm:$0xff]  ;;  %v264_v35 = vld [vmem:[%s10285_s26 + $0x228] sm:$0xff]  ;;  %261 = vst [vmem:[%s10293_s27 + $0x108] sm:$0xff] %v260_v33 }
  0x23   : > { %263 = vst [vmem:[%s10293_s27 + $0x110] sm:$0xff] %v262_v34  ;;  %265 = vst [vmem:[%s10293_s27 + $0x118] sm:$0xff] %v264_v35  ;;  %v266_v36 = vld [vmem:[%s10285_s26 + $0x240] sm:$0xff]  ;;  %v268_v37 = vld [vmem:[%s10285_s26 + $0x248] sm:$0xff] }
  0x24   : > { %v270_v38 = vld [vmem:[%s10285_s26 + $0x260] sm:$0xff]  ;;  %267 = vst [vmem:[%s10293_s27 + $0x120] sm:$0xff] %v266_v36  ;;  %269 = vst [vmem:[%s10293_s27 + $0x128] sm:$0xff] %v268_v37  ;;  %v272_v39 = vld [vmem:[%s10285_s26 + $0x268] sm:$0xff] }
  0x25   : > { %271 = vst [vmem:[%s10293_s27 + $0x130] sm:$0xff] %v270_v38  ;;  %v274_v40 = vld [vmem:[%s10285_s26 + $0x280] sm:$0xff]  ;;  %v276_v41 = vld [vmem:[%s10285_s26 + $0x288] sm:$0xff]  ;;  %273 = vst [vmem:[%s10293_s27 + $0x138] sm:$0xff] %v272_v39 }
  0x26   : > { %275 = vst [vmem:[%s10293_s27 + $0x140] sm:$0xff] %v274_v40  ;;  %277 = vst [vmem:[%s10293_s27 + $0x148] sm:$0xff] %v276_v41  ;;  %v278_v42 = vld [vmem:[%s10285_s26 + $0x2a0] sm:$0xff]  ;;  %v280_v43 = vld [vmem:[%s10285_s26 + $0x2a8] sm:$0xff] }
  0x27   : > { %v282_v44 = vld [vmem:[%s10285_s26 + $0x2c0] sm:$0xff]  ;;  %279 = vst [vmem:[%s10293_s27 + $0x150] sm:$0xff] %v278_v42  ;;  %281 = vst [vmem:[%s10293_s27 + $0x158] sm:$0xff] %v280_v43  ;;  %v284_v45 = vld [vmem:[%s10285_s26 + $0x2c8] sm:$0xff] }
  0x28   : > { %283 = vst [vmem:[%s10293_s27 + $0x160] sm:$0xff] %v282_v44  ;;  %v286_v46 = vld [vmem:[%s10285_s26 + $0x2e0] sm:$0xff]  ;;  %v288_v47 = vld [vmem:[%s10285_s26 + $0x2e8] sm:$0xff]  ;;  %285 = vst [vmem:[%s10293_s27 + $0x168] sm:$0xff] %v284_v45 }
  0x29   : > { %287 = vst [vmem:[%s10293_s27 + $0x170] sm:$0xff] %v286_v46  ;;  %289 = vst [vmem:[%s10293_s27 + $0x178] sm:$0xff] %v288_v47  ;;  %v290_v48 = vld [vmem:[%s10285_s26 + $0x300] sm:$0xff]  ;;  %v292_v49 = vld [vmem:[%s10285_s26 + $0x308] sm:$0xff] }
  0x2a   : > { %v294_v50 = vld [vmem:[%s10285_s26 + $0x320] sm:$0xff]  ;;  %291 = vst [vmem:[%s10293_s27 + $0x180] sm:$0xff] %v290_v48  ;;  %293 = vst [vmem:[%s10293_s27 + $0x188] sm:$0xff] %v292_v49  ;;  %v296_v51 = vld [vmem:[%s10285_s26 + $0x328] sm:$0xff] }
  0x2b   : > { %295 = vst [vmem:[%s10293_s27 + $0x190] sm:$0xff] %v294_v50  ;;  %v298_v52 = vld [vmem:[%s10285_s26 + $0x340] sm:$0xff]  ;;  %v300_v53 = vld [vmem:[%s10285_s26 + $0x348] sm:$0xff]  ;;  %297 = vst [vmem:[%s10293_s27 + $0x198] sm:$0xff] %v296_v51 }
  0x2c   : > { %299 = vst [vmem:[%s10293_s27 + $0x1a0] sm:$0xff] %v298_v52  ;;  %301 = vst [vmem:[%s10293_s27 + $0x1a8] sm:$0xff] %v300_v53  ;;  %v302_v54 = vld [vmem:[%s10285_s26 + $0x360] sm:$0xff]  ;;  %v304_v55 = vld [vmem:[%s10285_s26 + $0x368] sm:$0xff] }
  0x2d   : > { %v306_v56 = vld [vmem:[%s10285_s26 + $0x380] sm:$0xff]  ;;  %303 = vst [vmem:[%s10293_s27 + $0x1b0] sm:$0xff] %v302_v54  ;;  %305 = vst [vmem:[%s10293_s27 + $0x1b8] sm:$0xff] %v304_v55  ;;  %v308_v57 = vld [vmem:[%s10285_s26 + $0x388] sm:$0xff] }
  0x2e   : > { %307 = vst [vmem:[%s10293_s27 + $0x1c0] sm:$0xff] %v306_v56  ;;  %v310_v58 = vld [vmem:[%s10285_s26 + $0x3a0] sm:$0xff]  ;;  %v312_v59 = vld [vmem:[%s10285_s26 + $0x3a8] sm:$0xff]  ;;  %309 = vst [vmem:[%s10293_s27 + $0x1c8] sm:$0xff] %v308_v57 }
  0x2f   : > { %311 = vst [vmem:[%s10293_s27 + $0x1d0] sm:$0xff] %v310_v58  ;;  %313 = vst [vmem:[%s10293_s27 + $0x1d8] sm:$0xff] %v312_v59  ;;  %v314_v60 = vld [vmem:[%s10285_s26 + $0x3c0] sm:$0xff]  ;;  %v316_v61 = vld [vmem:[%s10285_s26 + $0x3c8] sm:$0xff] }
  0x30   : > { %v318_v62 = vld [vmem:[%s10285_s26 + $0x3e0] sm:$0xff]  ;;  %315 = vst [vmem:[%s10293_s27 + $0x1e0] sm:$0xff] %v314_v60  ;;  %317 = vst [vmem:[%s10293_s27 + $0x1e8] sm:$0xff] %v316_v61  ;;  %v320_v63 = vld [vmem:[%s10285_s26 + $0x3e8] sm:$0xff] }
  0x31   : > { %319 = vst [vmem:[%s10293_s27 + $0x1f0] sm:$0xff] %v318_v62  ;;  %v322_v0 = vld [vmem:[%s10285_s26 + $0x400] sm:$0xff]  ;;  %v324_v1 = vld [vmem:[%s10285_s26 + $0x408] sm:$0xff]  ;;  %321 = vst [vmem:[%s10293_s27 + $0x1f8] sm:$0xff] %v320_v63 }
  0x32   : > { %323 = vst [vmem:[%s10293_s27 + $0x200] sm:$0xff] %v322_v0  ;;  %325 = vst [vmem:[%s10293_s27 + $0x208] sm:$0xff] %v324_v1  ;;  %v326_v2 = vld [vmem:[%s10285_s26 + $0x420] sm:$0xff]  ;;  %v328_v3 = vld [vmem:[%s10285_s26 + $0x428] sm:$0xff] }
  0x33   : > { %v330_v4 = vld [vmem:[%s10285_s26 + $0x440] sm:$0xff]  ;;  %327 = vst [vmem:[%s10293_s27 + $0x210] sm:$0xff] %v326_v2  ;;  %329 = vst [vmem:[%s10293_s27 + $0x218] sm:$0xff] %v328_v3  ;;  %v332_v5 = vld [vmem:[%s10285_s26 + $0x448] sm:$0xff] }
  0x34   : > { %331 = vst [vmem:[%s10293_s27 + $0x220] sm:$0xff] %v330_v4  ;;  %v334_v6 = vld [vmem:[%s10285_s26 + $0x460] sm:$0xff]  ;;  %v336_v7 = vld [vmem:[%s10285_s26 + $0x468] sm:$0xff]  ;;  %333 = vst [vmem:[%s10293_s27 + $0x228] sm:$0xff] %v332_v5 }
  0x35   : > { %335 = vst [vmem:[%s10293_s27 + $0x230] sm:$0xff] %v334_v6  ;;  %337 = vst [vmem:[%s10293_s27 + $0x238] sm:$0xff] %v336_v7  ;;  %v338_v8 = vld [vmem:[%s10285_s26 + $0x480] sm:$0xff]  ;;  %v340_v9 = vld [vmem:[%s10285_s26 + $0x488] sm:$0xff] }
  0x36   : > { %v342_v10 = vld [vmem:[%s10285_s26 + $0x4a0] sm:$0xff]  ;;  %339 = vst [vmem:[%s10293_s27 + $0x240] sm:$0xff] %v338_v8  ;;  %341 = vst [vmem:[%s10293_s27 + $0x248] sm:$0xff] %v340_v9  ;;  %v344_v11 = vld [vmem:[%s10285_s26 + $0x4a8] sm:$0xff] }
  0x37   : > { %343 = vst [vmem:[%s10293_s27 + $0x250] sm:$0xff] %v342_v10  ;;  %v346_v12 = vld [vmem:[%s10285_s26 + $0x4c0] sm:$0xff]  ;;  %v348_v13 = vld [vmem:[%s10285_s26 + $0x4c8] sm:$0xff]  ;;  %345 = vst [vmem:[%s10293_s27 + $0x258] sm:$0xff] %v344_v11 }
  0x38   : > { %347 = vst [vmem:[%s10293_s27 + $0x260] sm:$0xff] %v346_v12  ;;  %349 = vst [vmem:[%s10293_s27 + $0x268] sm:$0xff] %v348_v13  ;;  %v350_v14 = vld [vmem:[%s10285_s26 + $0x4e0] sm:$0xff]  ;;  %v352_v15 = vld [vmem:[%s10285_s26 + $0x4e8] sm:$0xff] }
  0x39   : > { %v354_v16 = vld [vmem:[%s10285_s26 + $0x500] sm:$0xff]  ;;  %351 = vst [vmem:[%s10293_s27 + $0x270] sm:$0xff] %v350_v14  ;;  %353 = vst [vmem:[%s10293_s27 + $0x278] sm:$0xff] %v352_v15  ;;  %v356_v17 = vld [vmem:[%s10285_s26 + $0x508] sm:$0xff] }
  0x3a   : > { %355 = vst [vmem:[%s10293_s27 + $0x280] sm:$0xff] %v354_v16  ;;  %v358_v18 = vld [vmem:[%s10285_s26 + $0x520] sm:$0xff]  ;;  %v360_v19 = vld [vmem:[%s10285_s26 + $0x528] sm:$0xff]  ;;  %357 = vst [vmem:[%s10293_s27 + $0x288] sm:$0xff] %v356_v17 }
  0x3b   : > { %359 = vst [vmem:[%s10293_s27 + $0x290] sm:$0xff] %v358_v18  ;;  %361 = vst [vmem:[%s10293_s27 + $0x298] sm:$0xff] %v360_v19  ;;  %v362_v20 = vld [vmem:[%s10285_s26 + $0x540] sm:$0xff]  ;;  %v364_v21 = vld [vmem:[%s10285_s26 + $0x548] sm:$0xff] }
  0x3c   : > { %v366_v22 = vld [vmem:[%s10285_s26 + $0x560] sm:$0xff]  ;;  %363 = vst [vmem:[%s10293_s27 + $0x2a0] sm:$0xff] %v362_v20  ;;  %365 = vst [vmem:[%s10293_s27 + $0x2a8] sm:$0xff] %v364_v21  ;;  %v368_v23 = vld [vmem:[%s10285_s26 + $0x568] sm:$0xff] }
  0x3d   : > { %367 = vst [vmem:[%s10293_s27 + $0x2b0] sm:$0xff] %v366_v22  ;;  %v370_v24 = vld [vmem:[%s10285_s26 + $0x580] sm:$0xff]  ;;  %v372_v25 = vld [vmem:[%s10285_s26 + $0x588] sm:$0xff]  ;;  %369 = vst [vmem:[%s10293_s27 + $0x2b8] sm:$0xff] %v368_v23 }
  0x3e   : > { %371 = vst [vmem:[%s10293_s27 + $0x2c0] sm:$0xff] %v370_v24  ;;  %373 = vst [vmem:[%s10293_s27 + $0x2c8] sm:$0xff] %v372_v25  ;;  %v374_v26 = vld [vmem:[%s10285_s26 + $0x5a0] sm:$0xff]  ;;  %v376_v27 = vld [vmem:[%s10285_s26 + $0x5a8] sm:$0xff] }
  0x3f   : > { %v378_v28 = vld [vmem:[%s10285_s26 + $0x5c0] sm:$0xff]  ;;  %375 = vst [vmem:[%s10293_s27 + $0x2d0] sm:$0xff] %v374_v26  ;;  %377 = vst [vmem:[%s10293_s27 + $0x2d8] sm:$0xff] %v376_v27  ;;  %v380_v29 = vld [vmem:[%s10285_s26 + $0x5c8] sm:$0xff] }
  0x40   : > { %379 = vst [vmem:[%s10293_s27 + $0x2e0] sm:$0xff] %v378_v28  ;;  %v382_v30 = vld [vmem:[%s10285_s26 + $0x5e0] sm:$0xff]  ;;  %v384_v31 = vld [vmem:[%s10285_s26 + $0x5e8] sm:$0xff]  ;;  %381 = vst [vmem:[%s10293_s27 + $0x2e8] sm:$0xff] %v380_v29 }
  0x41   : > { %383 = vst [vmem:[%s10293_s27 + $0x2f0] sm:$0xff] %v382_v30  ;;  %385 = vst [vmem:[%s10293_s27 + $0x2f8] sm:$0xff] %v384_v31  ;;  %v386_v32 = vld [vmem:[%s10285_s26 + $0x600] sm:$0xff]  ;;  %v388_v33 = vld [vmem:[%s10285_s26 + $0x608] sm:$0xff] }
  0x42   : > { %v390_v34 = vld [vmem:[%s10285_s26 + $0x620] sm:$0xff]  ;;  %387 = vst [vmem:[%s10293_s27 + $0x300] sm:$0xff] %v386_v32  ;;  %389 = vst [vmem:[%s10293_s27 + $0x308] sm:$0xff] %v388_v33  ;;  %v392_v35 = vld [vmem:[%s10285_s26 + $0x628] sm:$0xff] }
  0x43   : > { %391 = vst [vmem:[%s10293_s27 + $0x310] sm:$0xff] %v390_v34  ;;  %v394_v36 = vld [vmem:[%s10285_s26 + $0x640] sm:$0xff]  ;;  %v396_v37 = vld [vmem:[%s10285_s26 + $0x648] sm:$0xff]  ;;  %393 = vst [vmem:[%s10293_s27 + $0x318] sm:$0xff] %v392_v35 }
  0x44   : > { %395 = vst [vmem:[%s10293_s27 + $0x320] sm:$0xff] %v394_v36  ;;  %397 = vst [vmem:[%s10293_s27 + $0x328] sm:$0xff] %v396_v37  ;;  %v398_v38 = vld [vmem:[%s10285_s26 + $0x660] sm:$0xff]  ;;  %v400_v39 = vld [vmem:[%s10285_s26 + $0x668] sm:$0xff] }
  0x45   : > { %v402_v40 = vld [vmem:[%s10285_s26 + $0x680] sm:$0xff]  ;;  %399 = vst [vmem:[%s10293_s27 + $0x330] sm:$0xff] %v398_v38  ;;  %401 = vst [vmem:[%s10293_s27 + $0x338] sm:$0xff] %v400_v39  ;;  %v404_v41 = vld [vmem:[%s10285_s26 + $0x688] sm:$0xff] }
  0x46   : > { %403 = vst [vmem:[%s10293_s27 + $0x340] sm:$0xff] %v402_v40  ;;  %v406_v42 = vld [vmem:[%s10285_s26 + $0x6a0] sm:$0xff]  ;;  %v408_v43 = vld [vmem:[%s10285_s26 + $0x6a8] sm:$0xff]  ;;  %405 = vst [vmem:[%s10293_s27 + $0x348] sm:$0xff] %v404_v41 }
  0x47   : > { %407 = vst [vmem:[%s10293_s27 + $0x350] sm:$0xff] %v406_v42  ;;  %409 = vst [vmem:[%s10293_s27 + $0x358] sm:$0xff] %v408_v43  ;;  %v410_v44 = vld [vmem:[%s10285_s26 + $0x6c0] sm:$0xff]  ;;  %v412_v45 = vld [vmem:[%s10285_s26 + $0x6c8] sm:$0xff] }
  0x48   : > { %v414_v46 = vld [vmem:[%s10285_s26 + $0x6e0] sm:$0xff]  ;;  %411 = vst [vmem:[%s10293_s27 + $0x360] sm:$0xff] %v410_v44  ;;  %413 = vst [vmem:[%s10293_s27 + $0x368] sm:$0xff] %v412_v45  ;;  %v416_v47 = vld [vmem:[%s10285_s26 + $0x6e8] sm:$0xff] }
  0x49   : > { %415 = vst [vmem:[%s10293_s27 + $0x370] sm:$0xff] %v414_v46  ;;  %v418_v48 = vld [vmem:[%s10285_s26 + $0x700] sm:$0xff]  ;;  %v420_v49 = vld [vmem:[%s10285_s26 + $0x708] sm:$0xff]  ;;  %417 = vst [vmem:[%s10293_s27 + $0x378] sm:$0xff] %v416_v47 }
  0x4a   : > { %419 = vst [vmem:[%s10293_s27 + $0x380] sm:$0xff] %v418_v48  ;;  %421 = vst [vmem:[%s10293_s27 + $0x388] sm:$0xff] %v420_v49  ;;  %v422_v50 = vld [vmem:[%s10285_s26 + $0x720] sm:$0xff]  ;;  %v424_v51 = vld [vmem:[%s10285_s26 + $0x728] sm:$0xff] }
  0x4b   : > { %v426_v52 = vld [vmem:[%s10285_s26 + $0x740] sm:$0xff]  ;;  %423 = vst [vmem:[%s10293_s27 + $0x390] sm:$0xff] %v422_v50  ;;  %425 = vst [vmem:[%s10293_s27 + $0x398] sm:$0xff] %v424_v51  ;;  %v428_v53 = vld [vmem:[%s10285_s26 + $0x748] sm:$0xff] }
  0x4c   : > { %427 = vst [vmem:[%s10293_s27 + $0x3a0] sm:$0xff] %v426_v52  ;;  %v430_v54 = vld [vmem:[%s10285_s26 + $0x760] sm:$0xff]  ;;  %v432_v55 = vld [vmem:[%s10285_s26 + $0x768] sm:$0xff]  ;;  %429 = vst [vmem:[%s10293_s27 + $0x3a8] sm:$0xff] %v428_v53 }
  0x4d   : > { %431 = vst [vmem:[%s10293_s27 + $0x3b0] sm:$0xff] %v430_v54  ;;  %433 = vst [vmem:[%s10293_s27 + $0x3b8] sm:$0xff] %v432_v55  ;;  %v434_v56 = vld [vmem:[%s10285_s26 + $0x780] sm:$0xff]  ;;  %v436_v57 = vld [vmem:[%s10285_s26 + $0x788] sm:$0xff] }
  0x4e   : > { %v438_v58 = vld [vmem:[%s10285_s26 + $0x7a0] sm:$0xff]  ;;  %435 = vst [vmem:[%s10293_s27 + $0x3c0] sm:$0xff] %v434_v56  ;;  %437 = vst [vmem:[%s10293_s27 + $0x3c8] sm:$0xff] %v436_v57  ;;  %v440_v59 = vld [vmem:[%s10285_s26 + $0x7a8] sm:$0xff] }
  0x4f   : > { %439 = vst [vmem:[%s10293_s27 + $0x3d0] sm:$0xff] %v438_v58  ;;  %v442_v60 = vld [vmem:[%s10285_s26 + $0x7c0] sm:$0xff]  ;;  %v444_v61 = vld [vmem:[%s10285_s26 + $0x7c8] sm:$0xff]  ;;  %441 = vst [vmem:[%s10293_s27 + $0x3d8] sm:$0xff] %v440_v59 }
  0x50   : > { %443 = vst [vmem:[%s10293_s27 + $0x3e0] sm:$0xff] %v442_v60  ;;  %445 = vst [vmem:[%s10293_s27 + $0x3e8] sm:$0xff] %v444_v61  ;;  %v446_v62 = vld [vmem:[%s10285_s26 + $0x7e0] sm:$0xff]  ;;  %v448_v63 = vld [vmem:[%s10285_s26 + $0x7e8] sm:$0xff] }
  0x51   : > { %v450_v0 = vld [vmem:[%s10285_s26 + $0x800] sm:$0xff]  ;;  %447 = vst [vmem:[%s10293_s27 + $0x3f0] sm:$0xff] %v446_v62  ;;  %449 = vst [vmem:[%s10293_s27 + $0x3f8] sm:$0xff] %v448_v63  ;;  %v452_v1 = vld [vmem:[%s10285_s26 + $0x808] sm:$0xff] }
  0x52   : > { %451 = vst [vmem:[%s10293_s27 + $0x400] sm:$0xff] %v450_v0  ;;  %v454_v2 = vld [vmem:[%s10285_s26 + $0x820] sm:$0xff]  ;;  %v456_v3 = vld [vmem:[%s10285_s26 + $0x828] sm:$0xff]  ;;  %453 = vst [vmem:[%s10293_s27 + $0x408] sm:$0xff] %v452_v1 }
  0x53   : > { %455 = vst [vmem:[%s10293_s27 + $0x410] sm:$0xff] %v454_v2  ;;  %457 = vst [vmem:[%s10293_s27 + $0x418] sm:$0xff] %v456_v3  ;;  %v458_v4 = vld [vmem:[%s10285_s26 + $0x840] sm:$0xff]  ;;  %v460_v5 = vld [vmem:[%s10285_s26 + $0x848] sm:$0xff] }
  0x54   : > { %v462_v6 = vld [vmem:[%s10285_s26 + $0x860] sm:$0xff]  ;;  %459 = vst [vmem:[%s10293_s27 + $0x420] sm:$0xff] %v458_v4  ;;  %461 = vst [vmem:[%s10293_s27 + $0x428] sm:$0xff] %v460_v5  ;;  %v464_v7 = vld [vmem:[%s10285_s26 + $0x868] sm:$0xff] }
  0x55   : > { %463 = vst [vmem:[%s10293_s27 + $0x430] sm:$0xff] %v462_v6  ;;  %v466_v8 = vld [vmem:[%s10285_s26 + $0x880] sm:$0xff]  ;;  %v468_v9 = vld [vmem:[%s10285_s26 + $0x888] sm:$0xff]  ;;  %465 = vst [vmem:[%s10293_s27 + $0x438] sm:$0xff] %v464_v7 }
  0x56   : > { %467 = vst [vmem:[%s10293_s27 + $0x440] sm:$0xff] %v466_v8  ;;  %469 = vst [vmem:[%s10293_s27 + $0x448] sm:$0xff] %v468_v9  ;;  %v470_v10 = vld [vmem:[%s10285_s26 + $0x8a0] sm:$0xff]  ;;  %v472_v11 = vld [vmem:[%s10285_s26 + $0x8a8] sm:$0xff] }
  0x57   : > { %v474_v12 = vld [vmem:[%s10285_s26 + $0x8c0] sm:$0xff]  ;;  %471 = vst [vmem:[%s10293_s27 + $0x450] sm:$0xff] %v470_v10  ;;  %473 = vst [vmem:[%s10293_s27 + $0x458] sm:$0xff] %v472_v11  ;;  %v476_v13 = vld [vmem:[%s10285_s26 + $0x8c8] sm:$0xff] }
  0x58   : > { %475 = vst [vmem:[%s10293_s27 + $0x460] sm:$0xff] %v474_v12  ;;  %v478_v14 = vld [vmem:[%s10285_s26 + $0x8e0] sm:$0xff]  ;;  %v480_v15 = vld [vmem:[%s10285_s26 + $0x8e8] sm:$0xff]  ;;  %477 = vst [vmem:[%s10293_s27 + $0x468] sm:$0xff] %v476_v13 }
  0x59   : > { %479 = vst [vmem:[%s10293_s27 + $0x470] sm:$0xff] %v478_v14  ;;  %481 = vst [vmem:[%s10293_s27 + $0x478] sm:$0xff] %v480_v15  ;;  %v482_v16 = vld [vmem:[%s10285_s26 + $0x900] sm:$0xff]  ;;  %v484_v17 = vld [vmem:[%s10285_s26 + $0x908] sm:$0xff] }
  0x5a   : > { %v486_v18 = vld [vmem:[%s10285_s26 + $0x920] sm:$0xff]  ;;  %483 = vst [vmem:[%s10293_s27 + $0x480] sm:$0xff] %v482_v16  ;;  %485 = vst [vmem:[%s10293_s27 + $0x488] sm:$0xff] %v484_v17  ;;  %v488_v19 = vld [vmem:[%s10285_s26 + $0x928] sm:$0xff] }
  0x5b   : > { %487 = vst [vmem:[%s10293_s27 + $0x490] sm:$0xff] %v486_v18  ;;  %v490_v20 = vld [vmem:[%s10285_s26 + $0x940] sm:$0xff]  ;;  %v492_v21 = vld [vmem:[%s10285_s26 + $0x948] sm:$0xff]  ;;  %489 = vst [vmem:[%s10293_s27 + $0x498] sm:$0xff] %v488_v19 }
  0x5c   : > { %491 = vst [vmem:[%s10293_s27 + $0x4a0] sm:$0xff] %v490_v20  ;;  %493 = vst [vmem:[%s10293_s27 + $0x4a8] sm:$0xff] %v492_v21  ;;  %v494_v22 = vld [vmem:[%s10285_s26 + $0x960] sm:$0xff]  ;;  %v496_v23 = vld [vmem:[%s10285_s26 + $0x968] sm:$0xff] }
  0x5d   : > { %v498_v24 = vld [vmem:[%s10285_s26 + $0x980] sm:$0xff]  ;;  %495 = vst [vmem:[%s10293_s27 + $0x4b0] sm:$0xff] %v494_v22  ;;  %497 = vst [vmem:[%s10293_s27 + $0x4b8] sm:$0xff] %v496_v23  ;;  %v500_v25 = vld [vmem:[%s10285_s26 + $0x988] sm:$0xff] }
  0x5e   : > { %499 = vst [vmem:[%s10293_s27 + $0x4c0] sm:$0xff] %v498_v24  ;;  %v502_v26 = vld [vmem:[%s10285_s26 + $0x9a0] sm:$0xff]  ;;  %v504_v27 = vld [vmem:[%s10285_s26 + $0x9a8] sm:$0xff]  ;;  %501 = vst [vmem:[%s10293_s27 + $0x4c8] sm:$0xff] %v500_v25 }
  0x5f   : > { %503 = vst [vmem:[%s10293_s27 + $0x4d0] sm:$0xff] %v502_v26  ;;  %505 = vst [vmem:[%s10293_s27 + $0x4d8] sm:$0xff] %v504_v27  ;;  %v506_v28 = vld [vmem:[%s10285_s26 + $0x9c0] sm:$0xff]  ;;  %v508_v29 = vld [vmem:[%s10285_s26 + $0x9c8] sm:$0xff] }
  0x60   : > { %v510_v30 = vld [vmem:[%s10285_s26 + $0x9e0] sm:$0xff]  ;;  %507 = vst [vmem:[%s10293_s27 + $0x4e0] sm:$0xff] %v506_v28  ;;  %509 = vst [vmem:[%s10293_s27 + $0x4e8] sm:$0xff] %v508_v29  ;;  %v512_v31 = vld [vmem:[%s10285_s26 + $0x9e8] sm:$0xff] }
  0x61   : > { %511 = vst [vmem:[%s10293_s27 + $0x4f0] sm:$0xff] %v510_v30  ;;  %v514_v32 = vld [vmem:[%s10285_s26 + $0xa00] sm:$0xff]  ;;  %v516_v33 = vld [vmem:[%s10285_s26 + $0xa08] sm:$0xff]  ;;  %513 = vst [vmem:[%s10293_s27 + $0x4f8] sm:$0xff] %v512_v31 }
  0x62   : > { %515 = vst [vmem:[%s10293_s27 + $0x500] sm:$0xff] %v514_v32  ;;  %517 = vst [vmem:[%s10293_s27 + $0x508] sm:$0xff] %v516_v33  ;;  %v518_v34 = vld [vmem:[%s10285_s26 + $0xa20] sm:$0xff]  ;;  %v520_v35 = vld [vmem:[%s10285_s26 + $0xa28] sm:$0xff] }
  0x63   : > { %v522_v36 = vld [vmem:[%s10285_s26 + $0xa40] sm:$0xff]  ;;  %519 = vst [vmem:[%s10293_s27 + $0x510] sm:$0xff] %v518_v34  ;;  %521 = vst [vmem:[%s10293_s27 + $0x518] sm:$0xff] %v520_v35  ;;  %v524_v37 = vld [vmem:[%s10285_s26 + $0xa48] sm:$0xff] }
  0x64   : > { %523 = vst [vmem:[%s10293_s27 + $0x520] sm:$0xff] %v522_v36  ;;  %v526_v38 = vld [vmem:[%s10285_s26 + $0xa60] sm:$0xff]  ;;  %v528_v39 = vld [vmem:[%s10285_s26 + $0xa68] sm:$0xff]  ;;  %525 = vst [vmem:[%s10293_s27 + $0x528] sm:$0xff] %v524_v37 }
  0x65   : > { %527 = vst [vmem:[%s10293_s27 + $0x530] sm:$0xff] %v526_v38  ;;  %529 = vst [vmem:[%s10293_s27 + $0x538] sm:$0xff] %v528_v39  ;;  %v530_v40 = vld [vmem:[%s10285_s26 + $0xa80] sm:$0xff]  ;;  %v532_v41 = vld [vmem:[%s10285_s26 + $0xa88] sm:$0xff] }
  0x66   : > { %v534_v42 = vld [vmem:[%s10285_s26 + $0xaa0] sm:$0xff]  ;;  %531 = vst [vmem:[%s10293_s27 + $0x540] sm:$0xff] %v530_v40  ;;  %533 = vst [vmem:[%s10293_s27 + $0x548] sm:$0xff] %v532_v41  ;;  %v536_v43 = vld [vmem:[%s10285_s26 + $0xaa8] sm:$0xff] }
  0x67   : > { %535 = vst [vmem:[%s10293_s27 + $0x550] sm:$0xff] %v534_v42  ;;  %v538_v44 = vld [vmem:[%s10285_s26 + $0xac0] sm:$0xff]  ;;  %v540_v45 = vld [vmem:[%s10285_s26 + $0xac8] sm:$0xff]  ;;  %537 = vst [vmem:[%s10293_s27 + $0x558] sm:$0xff] %v536_v43 }
  0x68   : > { %539 = vst [vmem:[%s10293_s27 + $0x560] sm:$0xff] %v538_v44  ;;  %541 = vst [vmem:[%s10293_s27 + $0x568] sm:$0xff] %v540_v45  ;;  %v542_v46 = vld [vmem:[%s10285_s26 + $0xae0] sm:$0xff]  ;;  %v544_v47 = vld [vmem:[%s10285_s26 + $0xae8] sm:$0xff] }
  0x69   : > { %v546_v48 = vld [vmem:[%s10285_s26 + $0xb00] sm:$0xff]  ;;  %543 = vst [vmem:[%s10293_s27 + $0x570] sm:$0xff] %v542_v46  ;;  %545 = vst [vmem:[%s10293_s27 + $0x578] sm:$0xff] %v544_v47  ;;  %v548_v49 = vld [vmem:[%s10285_s26 + $0xb08] sm:$0xff] }
  0x6a   : > { %547 = vst [vmem:[%s10293_s27 + $0x580] sm:$0xff] %v546_v48  ;;  %v550_v50 = vld [vmem:[%s10285_s26 + $0xb20] sm:$0xff]  ;;  %v552_v51 = vld [vmem:[%s10285_s26 + $0xb28] sm:$0xff]  ;;  %549 = vst [vmem:[%s10293_s27 + $0x588] sm:$0xff] %v548_v49 }
  0x6b   : > { %551 = vst [vmem:[%s10293_s27 + $0x590] sm:$0xff] %v550_v50  ;;  %553 = vst [vmem:[%s10293_s27 + $0x598] sm:$0xff] %v552_v51  ;;  %v554_v52 = vld [vmem:[%s10285_s26 + $0xb40] sm:$0xff]  ;;  %v556_v53 = vld [vmem:[%s10285_s26 + $0xb48] sm:$0xff] }
  0x6c   : > { %v558_v54 = vld [vmem:[%s10285_s26 + $0xb60] sm:$0xff]  ;;  %555 = vst [vmem:[%s10293_s27 + $0x5a0] sm:$0xff] %v554_v52  ;;  %557 = vst [vmem:[%s10293_s27 + $0x5a8] sm:$0xff] %v556_v53  ;;  %v560_v55 = vld [vmem:[%s10285_s26 + $0xb68] sm:$0xff] }
  0x6d   : > { %559 = vst [vmem:[%s10293_s27 + $0x5b0] sm:$0xff] %v558_v54  ;;  %v562_v56 = vld [vmem:[%s10285_s26 + $0xb80] sm:$0xff]  ;;  %v564_v57 = vld [vmem:[%s10285_s26 + $0xb88] sm:$0xff]  ;;  %561 = vst [vmem:[%s10293_s27 + $0x5b8] sm:$0xff] %v560_v55 }
  0x6e   : > { %563 = vst [vmem:[%s10293_s27 + $0x5c0] sm:$0xff] %v562_v56  ;;  %565 = vst [vmem:[%s10293_s27 + $0x5c8] sm:$0xff] %v564_v57  ;;  %v566_v58 = vld [vmem:[%s10285_s26 + $0xba0] sm:$0xff]  ;;  %v568_v59 = vld [vmem:[%s10285_s26 + $0xba8] sm:$0xff] }
  0x6f   : > { %v570_v60 = vld [vmem:[%s10285_s26 + $0xbc0] sm:$0xff]  ;;  %567 = vst [vmem:[%s10293_s27 + $0x5d0] sm:$0xff] %v566_v58  ;;  %569 = vst [vmem:[%s10293_s27 + $0x5d8] sm:$0xff] %v568_v59  ;;  %v572_v61 = vld [vmem:[%s10285_s26 + $0xbc8] sm:$0xff] }
  0x70   : > { %571 = vst [vmem:[%s10293_s27 + $0x5e0] sm:$0xff] %v570_v60  ;;  %v574_v62 = vld [vmem:[%s10285_s26 + $0xbe0] sm:$0xff]  ;;  %v576_v63 = vld [vmem:[%s10285_s26 + $0xbe8] sm:$0xff]  ;;  %573 = vst [vmem:[%s10293_s27 + $0x5e8] sm:$0xff] %v572_v61 }
  0x71   : > { %575 = vst [vmem:[%s10293_s27 + $0x5f0] sm:$0xff] %v574_v62  ;;  %577 = vst [vmem:[%s10293_s27 + $0x5f8] sm:$0xff] %v576_v63  ;;  %v578_v0 = vld [vmem:[%s10285_s26 + $0xc00] sm:$0xff]  ;;  %v580_v1 = vld [vmem:[%s10285_s26 + $0xc08] sm:$0xff] }
  0x72   : > { %v582_v2 = vld [vmem:[%s10285_s26 + $0xc20] sm:$0xff]  ;;  %579 = vst [vmem:[%s10293_s27 + $0x600] sm:$0xff] %v578_v0  ;;  %581 = vst [vmem:[%s10293_s27 + $0x608] sm:$0xff] %v580_v1  ;;  %v584_v3 = vld [vmem:[%s10285_s26 + $0xc28] sm:$0xff] }
  0x73   : > { %583 = vst [vmem:[%s10293_s27 + $0x610] sm:$0xff] %v582_v2  ;;  %v586_v4 = vld [vmem:[%s10285_s26 + $0xc40] sm:$0xff]  ;;  %v588_v5 = vld [vmem:[%s10285_s26 + $0xc48] sm:$0xff]  ;;  %585 = vst [vmem:[%s10293_s27 + $0x618] sm:$0xff] %v584_v3 }
  0x74   : > { %587 = vst [vmem:[%s10293_s27 + $0x620] sm:$0xff] %v586_v4  ;;  %589 = vst [vmem:[%s10293_s27 + $0x628] sm:$0xff] %v588_v5  ;;  %v590_v6 = vld [vmem:[%s10285_s26 + $0xc60] sm:$0xff]  ;;  %v592_v7 = vld [vmem:[%s10285_s26 + $0xc68] sm:$0xff] }
  0x75   : > { %v594_v8 = vld [vmem:[%s10285_s26 + $0xc80] sm:$0xff]  ;;  %591 = vst [vmem:[%s10293_s27 + $0x630] sm:$0xff] %v590_v6  ;;  %593 = vst [vmem:[%s10293_s27 + $0x638] sm:$0xff] %v592_v7  ;;  %v596_v9 = vld [vmem:[%s10285_s26 + $0xc88] sm:$0xff] }
  0x76   : > { %595 = vst [vmem:[%s10293_s27 + $0x640] sm:$0xff] %v594_v8  ;;  %v598_v10 = vld [vmem:[%s10285_s26 + $0xca0] sm:$0xff]  ;;  %v600_v11 = vld [vmem:[%s10285_s26 + $0xca8] sm:$0xff]  ;;  %597 = vst [vmem:[%s10293_s27 + $0x648] sm:$0xff] %v596_v9 }
  0x77   : > { %599 = vst [vmem:[%s10293_s27 + $0x650] sm:$0xff] %v598_v10  ;;  %601 = vst [vmem:[%s10293_s27 + $0x658] sm:$0xff] %v600_v11  ;;  %v602_v12 = vld [vmem:[%s10285_s26 + $0xcc0] sm:$0xff]  ;;  %v604_v13 = vld [vmem:[%s10285_s26 + $0xcc8] sm:$0xff] }
  0x78   : > { %v606_v14 = vld [vmem:[%s10285_s26 + $0xce0] sm:$0xff]  ;;  %603 = vst [vmem:[%s10293_s27 + $0x660] sm:$0xff] %v602_v12  ;;  %605 = vst [vmem:[%s10293_s27 + $0x668] sm:$0xff] %v604_v13  ;;  %v608_v15 = vld [vmem:[%s10285_s26 + $0xce8] sm:$0xff] }
  0x79   : > { %607 = vst [vmem:[%s10293_s27 + $0x670] sm:$0xff] %v606_v14  ;;  %v610_v16 = vld [vmem:[%s10285_s26 + $0xd00] sm:$0xff]  ;;  %v612_v17 = vld [vmem:[%s10285_s26 + $0xd08] sm:$0xff]  ;;  %609 = vst [vmem:[%s10293_s27 + $0x678] sm:$0xff] %v608_v15 }
  0x7a   : > { %611 = vst [vmem:[%s10293_s27 + $0x680] sm:$0xff] %v610_v16  ;;  %613 = vst [vmem:[%s10293_s27 + $0x688] sm:$0xff] %v612_v17  ;;  %v614_v18 = vld [vmem:[%s10285_s26 + $0xd20] sm:$0xff]  ;;  %v616_v19 = vld [vmem:[%s10285_s26 + $0xd28] sm:$0xff] }
  0x7b   : > { %v618_v20 = vld [vmem:[%s10285_s26 + $0xd40] sm:$0xff]  ;;  %615 = vst [vmem:[%s10293_s27 + $0x690] sm:$0xff] %v614_v18  ;;  %617 = vst [vmem:[%s10293_s27 + $0x698] sm:$0xff] %v616_v19  ;;  %v620_v21 = vld [vmem:[%s10285_s26 + $0xd48] sm:$0xff] }
  0x7c   : > { %619 = vst [vmem:[%s10293_s27 + $0x6a0] sm:$0xff] %v618_v20  ;;  %v622_v22 = vld [vmem:[%s10285_s26 + $0xd60] sm:$0xff]  ;;  %v624_v23 = vld [vmem:[%s10285_s26 + $0xd68] sm:$0xff]  ;;  %621 = vst [vmem:[%s10293_s27 + $0x6a8] sm:$0xff] %v620_v21 }
  0x7d   : > { %623 = vst [vmem:[%s10293_s27 + $0x6b0] sm:$0xff] %v622_v22  ;;  %625 = vst [vmem:[%s10293_s27 + $0x6b8] sm:$0xff] %v624_v23  ;;  %v626_v24 = vld [vmem:[%s10285_s26 + $0xd80] sm:$0xff]  ;;  %v628_v25 = vld [vmem:[%s10285_s26 + $0xd88] sm:$0xff] }
  0x7e   : > { %v630_v26 = vld [vmem:[%s10285_s26 + $0xda0] sm:$0xff]  ;;  %627 = vst [vmem:[%s10293_s27 + $0x6c0] sm:$0xff] %v626_v24  ;;  %629 = vst [vmem:[%s10293_s27 + $0x6c8] sm:$0xff] %v628_v25  ;;  %v632_v27 = vld [vmem:[%s10285_s26 + $0xda8] sm:$0xff] }
  0x7f   : > { %631 = vst [vmem:[%s10293_s27 + $0x6d0] sm:$0xff] %v630_v26  ;;  %v634_v28 = vld [vmem:[%s10285_s26 + $0xdc0] sm:$0xff]  ;;  %v636_v29 = vld [vmem:[%s10285_s26 + $0xdc8] sm:$0xff]  ;;  %633 = vst [vmem:[%s10293_s27 + $0x6d8] sm:$0xff] %v632_v27 }
  0x80   : > { %635 = vst [vmem:[%s10293_s27 + $0x6e0] sm:$0xff] %v634_v28  ;;  %637 = vst [vmem:[%s10293_s27 + $0x6e8] sm:$0xff] %v636_v29  ;;  %v638_v30 = vld [vmem:[%s10285_s26 + $0xde0] sm:$0xff]  ;;  %v640_v31 = vld [vmem:[%s10285_s26 + $0xde8] sm:$0xff] }
  0x81   : > { %v642_v32 = vld [vmem:[%s10285_s26 + $0xe00] sm:$0xff]  ;;  %639 = vst [vmem:[%s10293_s27 + $0x6f0] sm:$0xff] %v638_v30  ;;  %641 = vst [vmem:[%s10293_s27 + $0x6f8] sm:$0xff] %v640_v31  ;;  %v644_v33 = vld [vmem:[%s10285_s26 + $0xe08] sm:$0xff] }
  0x82   : > { %643 = vst [vmem:[%s10293_s27 + $0x700] sm:$0xff] %v642_v32  ;;  %v646_v34 = vld [vmem:[%s10285_s26 + $0xe20] sm:$0xff]  ;;  %v648_v35 = vld [vmem:[%s10285_s26 + $0xe28] sm:$0xff]  ;;  %645 = vst [vmem:[%s10293_s27 + $0x708] sm:$0xff] %v644_v33 }
  0x83   : > { %647 = vst [vmem:[%s10293_s27 + $0x710] sm:$0xff] %v646_v34  ;;  %649 = vst [vmem:[%s10293_s27 + $0x718] sm:$0xff] %v648_v35  ;;  %v650_v36 = vld [vmem:[%s10285_s26 + $0xe40] sm:$0xff]  ;;  %v652_v37 = vld [vmem:[%s10285_s26 + $0xe48] sm:$0xff] }
  0x84   : > { %v654_v38 = vld [vmem:[%s10285_s26 + $0xe60] sm:$0xff]  ;;  %651 = vst [vmem:[%s10293_s27 + $0x720] sm:$0xff] %v650_v36  ;;  %653 = vst [vmem:[%s10293_s27 + $0x728] sm:$0xff] %v652_v37  ;;  %v656_v39 = vld [vmem:[%s10285_s26 + $0xe68] sm:$0xff] }
  0x85   : > { %655 = vst [vmem:[%s10293_s27 + $0x730] sm:$0xff] %v654_v38  ;;  %v658_v40 = vld [vmem:[%s10285_s26 + $0xe80] sm:$0xff]  ;;  %v660_v41 = vld [vmem:[%s10285_s26 + $0xe88] sm:$0xff]  ;;  %657 = vst [vmem:[%s10293_s27 + $0x738] sm:$0xff] %v656_v39 }
  0x86   : > { %659 = vst [vmem:[%s10293_s27 + $0x740] sm:$0xff] %v658_v40  ;;  %661 = vst [vmem:[%s10293_s27 + $0x748] sm:$0xff] %v660_v41  ;;  %v662_v42 = vld [vmem:[%s10285_s26 + $0xea0] sm:$0xff]  ;;  %v664_v43 = vld [vmem:[%s10285_s26 + $0xea8] sm:$0xff] }
  0x87   : > { %v666_v44 = vld [vmem:[%s10285_s26 + $0xec0] sm:$0xff]  ;;  %663 = vst [vmem:[%s10293_s27 + $0x750] sm:$0xff] %v662_v42  ;;  %665 = vst [vmem:[%s10293_s27 + $0x758] sm:$0xff] %v664_v43  ;;  %v668_v45 = vld [vmem:[%s10285_s26 + $0xec8] sm:$0xff] }
  0x88   : > { %667 = vst [vmem:[%s10293_s27 + $0x760] sm:$0xff] %v666_v44  ;;  %v670_v46 = vld [vmem:[%s10285_s26 + $0xee0] sm:$0xff]  ;;  %v672_v47 = vld [vmem:[%s10285_s26 + $0xee8] sm:$0xff]  ;;  %669 = vst [vmem:[%s10293_s27 + $0x768] sm:$0xff] %v668_v45 }
  0x89   : > { %671 = vst [vmem:[%s10293_s27 + $0x770] sm:$0xff] %v670_v46  ;;  %673 = vst [vmem:[%s10293_s27 + $0x778] sm:$0xff] %v672_v47  ;;  %v674_v48 = vld [vmem:[%s10285_s26 + $0xf00] sm:$0xff]  ;;  %v676_v49 = vld [vmem:[%s10285_s26 + $0xf08] sm:$0xff] }
  0x8a   : > { %v678_v50 = vld [vmem:[%s10285_s26 + $0xf20] sm:$0xff]  ;;  %675 = vst [vmem:[%s10293_s27 + $0x780] sm:$0xff] %v674_v48  ;;  %677 = vst [vmem:[%s10293_s27 + $0x788] sm:$0xff] %v676_v49  ;;  %v680_v51 = vld [vmem:[%s10285_s26 + $0xf28] sm:$0xff] }
  0x8b   : > { %679 = vst [vmem:[%s10293_s27 + $0x790] sm:$0xff] %v678_v50  ;;  %v682_v52 = vld [vmem:[%s10285_s26 + $0xf40] sm:$0xff]  ;;  %v684_v53 = vld [vmem:[%s10285_s26 + $0xf48] sm:$0xff]  ;;  %681 = vst [vmem:[%s10293_s27 + $0x798] sm:$0xff] %v680_v51 }
  0x8c   : > { %683 = vst [vmem:[%s10293_s27 + $0x7a0] sm:$0xff] %v682_v52  ;;  %685 = vst [vmem:[%s10293_s27 + $0x7a8] sm:$0xff] %v684_v53  ;;  %v686_v54 = vld [vmem:[%s10285_s26 + $0xf60] sm:$0xff]  ;;  %v688_v55 = vld [vmem:[%s10285_s26 + $0xf68] sm:$0xff] }
  0x8d   : > { %v690_v56 = vld [vmem:[%s10285_s26 + $0xf80] sm:$0xff]  ;;  %687 = vst [vmem:[%s10293_s27 + $0x7b0] sm:$0xff] %v686_v54  ;;  %689 = vst [vmem:[%s10293_s27 + $0x7b8] sm:$0xff] %v688_v55  ;;  %v692_v57 = vld [vmem:[%s10285_s26 + $0xf88] sm:$0xff] }
  0x8e   : > { %691 = vst [vmem:[%s10293_s27 + $0x7c0] sm:$0xff] %v690_v56  ;;  %v694_v58 = vld [vmem:[%s10285_s26 + $0xfa0] sm:$0xff]  ;;  %v696_v59 = vld [vmem:[%s10285_s26 + $0xfa8] sm:$0xff]  ;;  %693 = vst [vmem:[%s10293_s27 + $0x7c8] sm:$0xff] %v692_v57 }
  0x8f   : > { %695 = vst [vmem:[%s10293_s27 + $0x7d0] sm:$0xff] %v694_v58  ;;  %697 = vst [vmem:[%s10293_s27 + $0x7d8] sm:$0xff] %v696_v59  ;;  %v698_v60 = vld [vmem:[%s10285_s26 + $0xfc0] sm:$0xff]  ;;  %v700_v61 = vld [vmem:[%s10285_s26 + $0xfc8] sm:$0xff] }
  0x90   : > { %v702_v62 = vld [vmem:[%s10285_s26 + $0xfe0] sm:$0xff]  ;;  %699 = vst [vmem:[%s10293_s27 + $0x7e0] sm:$0xff] %v698_v60  ;;  %701 = vst [vmem:[%s10293_s27 + $0x7e8] sm:$0xff] %v700_v61  ;;  %v704_v63 = vld [vmem:[%s10285_s26 + $0xfe8] sm:$0xff] }
  0x91   : > { %703 = vst [vmem:[%s10293_s27 + $0x7f0] sm:$0xff] %v702_v62  ;;  %v706_v0 = vld [vmem:[%s10285_s26 + $0x1000] sm:$0xff]  ;;  %v708_v1 = vld [vmem:[%s10285_s26 + $0x1008] sm:$0xff]  ;;  %705 = vst [vmem:[%s10293_s27 + $0x7f8] sm:$0xff] %v704_v63 }
  0x92   : > { %707 = vst [vmem:[%s10293_s27 + $0x800] sm:$0xff] %v706_v0  ;;  %709 = vst [vmem:[%s10293_s27 + $0x808] sm:$0xff] %v708_v1  ;;  %v710_v2 = vld [vmem:[%s10285_s26 + $0x1020] sm:$0xff]  ;;  %v712_v3 = vld [vmem:[%s10285_s26 + $0x1028] sm:$0xff] }
  0x93   : > { %v714_v4 = vld [vmem:[%s10285_s26 + $0x1040] sm:$0xff]  ;;  %711 = vst [vmem:[%s10293_s27 + $0x810] sm:$0xff] %v710_v2  ;;  %713 = vst [vmem:[%s10293_s27 + $0x818] sm:$0xff] %v712_v3  ;;  %v716_v5 = vld [vmem:[%s10285_s26 + $0x1048] sm:$0xff] }
  0x94   : > { %715 = vst [vmem:[%s10293_s27 + $0x820] sm:$0xff] %v714_v4  ;;  %v718_v6 = vld [vmem:[%s10285_s26 + $0x1060] sm:$0xff]  ;;  %v720_v7 = vld [vmem:[%s10285_s26 + $0x1068] sm:$0xff]  ;;  %717 = vst [vmem:[%s10293_s27 + $0x828] sm:$0xff] %v716_v5 }
  0x95   : > { %719 = vst [vmem:[%s10293_s27 + $0x830] sm:$0xff] %v718_v6  ;;  %721 = vst [vmem:[%s10293_s27 + $0x838] sm:$0xff] %v720_v7  ;;  %v722_v8 = vld [vmem:[%s10285_s26 + $0x1080] sm:$0xff]  ;;  %v724_v9 = vld [vmem:[%s10285_s26 + $0x1088] sm:$0xff] }
  0x96   : > { %v726_v10 = vld [vmem:[%s10285_s26 + $0x10a0] sm:$0xff]  ;;  %723 = vst [vmem:[%s10293_s27 + $0x840] sm:$0xff] %v722_v8  ;;  %725 = vst [vmem:[%s10293_s27 + $0x848] sm:$0xff] %v724_v9  ;;  %v728_v11 = vld [vmem:[%s10285_s26 + $0x10a8] sm:$0xff] }
  0x97   : > { %727 = vst [vmem:[%s10293_s27 + $0x850] sm:$0xff] %v726_v10  ;;  %v730_v12 = vld [vmem:[%s10285_s26 + $0x10c0] sm:$0xff]  ;;  %v732_v13 = vld [vmem:[%s10285_s26 + $0x10c8] sm:$0xff]  ;;  %729 = vst [vmem:[%s10293_s27 + $0x858] sm:$0xff] %v728_v11 }
  0x98   : > { %731 = vst [vmem:[%s10293_s27 + $0x860] sm:$0xff] %v730_v12  ;;  %733 = vst [vmem:[%s10293_s27 + $0x868] sm:$0xff] %v732_v13  ;;  %v734_v14 = vld [vmem:[%s10285_s26 + $0x10e0] sm:$0xff]  ;;  %v736_v15 = vld [vmem:[%s10285_s26 + $0x10e8] sm:$0xff] }
  0x99   : > { %v738_v16 = vld [vmem:[%s10285_s26 + $0x1100] sm:$0xff]  ;;  %735 = vst [vmem:[%s10293_s27 + $0x870] sm:$0xff] %v734_v14  ;;  %737 = vst [vmem:[%s10293_s27 + $0x878] sm:$0xff] %v736_v15  ;;  %v740_v17 = vld [vmem:[%s10285_s26 + $0x1108] sm:$0xff] }
  0x9a   : > { %739 = vst [vmem:[%s10293_s27 + $0x880] sm:$0xff] %v738_v16  ;;  %v742_v18 = vld [vmem:[%s10285_s26 + $0x1120] sm:$0xff]  ;;  %v744_v19 = vld [vmem:[%s10285_s26 + $0x1128] sm:$0xff]  ;;  %741 = vst [vmem:[%s10293_s27 + $0x888] sm:$0xff] %v740_v17 }
  0x9b   : > { %743 = vst [vmem:[%s10293_s27 + $0x890] sm:$0xff] %v742_v18  ;;  %745 = vst [vmem:[%s10293_s27 + $0x898] sm:$0xff] %v744_v19  ;;  %v746_v20 = vld [vmem:[%s10285_s26 + $0x1140] sm:$0xff]  ;;  %v748_v21 = vld [vmem:[%s10285_s26 + $0x1148] sm:$0xff] }
  0x9c   : > { %v750_v22 = vld [vmem:[%s10285_s26 + $0x1160] sm:$0xff]  ;;  %747 = vst [vmem:[%s10293_s27 + $0x8a0] sm:$0xff] %v746_v20  ;;  %749 = vst [vmem:[%s10293_s27 + $0x8a8] sm:$0xff] %v748_v21  ;;  %v752_v23 = vld [vmem:[%s10285_s26 + $0x1168] sm:$0xff] }
  0x9d   : > { %751 = vst [vmem:[%s10293_s27 + $0x8b0] sm:$0xff] %v750_v22  ;;  %v754_v24 = vld [vmem:[%s10285_s26 + $0x1180] sm:$0xff]  ;;  %v756_v25 = vld [vmem:[%s10285_s26 + $0x1188] sm:$0xff]  ;;  %753 = vst [vmem:[%s10293_s27 + $0x8b8] sm:$0xff] %v752_v23 }
  0x9e   : > { %755 = vst [vmem:[%s10293_s27 + $0x8c0] sm:$0xff] %v754_v24  ;;  %757 = vst [vmem:[%s10293_s27 + $0x8c8] sm:$0xff] %v756_v25  ;;  %v758_v26 = vld [vmem:[%s10285_s26 + $0x11a0] sm:$0xff]  ;;  %v760_v27 = vld [vmem:[%s10285_s26 + $0x11a8] sm:$0xff] }
  0x9f   : > { %v762_v28 = vld [vmem:[%s10285_s26 + $0x11c0] sm:$0xff]  ;;  %759 = vst [vmem:[%s10293_s27 + $0x8d0] sm:$0xff] %v758_v26  ;;  %761 = vst [vmem:[%s10293_s27 + $0x8d8] sm:$0xff] %v760_v27  ;;  %v764_v29 = vld [vmem:[%s10285_s26 + $0x11c8] sm:$0xff] }
  0xa0   : > { %763 = vst [vmem:[%s10293_s27 + $0x8e0] sm:$0xff] %v762_v28  ;;  %v766_v30 = vld [vmem:[%s10285_s26 + $0x11e0] sm:$0xff]  ;;  %v768_v31 = vld [vmem:[%s10285_s26 + $0x11e8] sm:$0xff]  ;;  %765 = vst [vmem:[%s10293_s27 + $0x8e8] sm:$0xff] %v764_v29 }
  0xa1   : > { %767 = vst [vmem:[%s10293_s27 + $0x8f0] sm:$0xff] %v766_v30  ;;  %769 = vst [vmem:[%s10293_s27 + $0x8f8] sm:$0xff] %v768_v31  ;;  %v770_v32 = vld [vmem:[%s10285_s26 + $0x1200] sm:$0xff]  ;;  %v772_v33 = vld [vmem:[%s10285_s26 + $0x1208] sm:$0xff] }
  0xa2   : > { %v774_v34 = vld [vmem:[%s10285_s26 + $0x1220] sm:$0xff]  ;;  %771 = vst [vmem:[%s10293_s27 + $0x900] sm:$0xff] %v770_v32  ;;  %773 = vst [vmem:[%s10293_s27 + $0x908] sm:$0xff] %v772_v33  ;;  %v776_v35 = vld [vmem:[%s10285_s26 + $0x1228] sm:$0xff] }
  0xa3   : > { %775 = vst [vmem:[%s10293_s27 + $0x910] sm:$0xff] %v774_v34  ;;  %v778_v36 = vld [vmem:[%s10285_s26 + $0x1240] sm:$0xff]  ;;  %v780_v37 = vld [vmem:[%s10285_s26 + $0x1248] sm:$0xff]  ;;  %777 = vst [vmem:[%s10293_s27 + $0x918] sm:$0xff] %v776_v35 }
  0xa4   : > { %779 = vst [vmem:[%s10293_s27 + $0x920] sm:$0xff] %v778_v36  ;;  %781 = vst [vmem:[%s10293_s27 + $0x928] sm:$0xff] %v780_v37  ;;  %v782_v38 = vld [vmem:[%s10285_s26 + $0x1260] sm:$0xff]  ;;  %v784_v39 = vld [vmem:[%s10285_s26 + $0x1268] sm:$0xff] }
  0xa5   : > { %v786_v40 = vld [vmem:[%s10285_s26 + $0x1280] sm:$0xff]  ;;  %783 = vst [vmem:[%s10293_s27 + $0x930] sm:$0xff] %v782_v38  ;;  %785 = vst [vmem:[%s10293_s27 + $0x938] sm:$0xff] %v784_v39  ;;  %v788_v41 = vld [vmem:[%s10285_s26 + $0x1288] sm:$0xff] }
  0xa6   : > { %787 = vst [vmem:[%s10293_s27 + $0x940] sm:$0xff] %v786_v40  ;;  %v790_v42 = vld [vmem:[%s10285_s26 + $0x12a0] sm:$0xff]  ;;  %v792_v43 = vld [vmem:[%s10285_s26 + $0x12a8] sm:$0xff]  ;;  %789 = vst [vmem:[%s10293_s27 + $0x948] sm:$0xff] %v788_v41 }
  0xa7   : > { %791 = vst [vmem:[%s10293_s27 + $0x950] sm:$0xff] %v790_v42  ;;  %793 = vst [vmem:[%s10293_s27 + $0x958] sm:$0xff] %v792_v43  ;;  %v794_v44 = vld [vmem:[%s10285_s26 + $0x12c0] sm:$0xff]  ;;  %v796_v45 = vld [vmem:[%s10285_s26 + $0x12c8] sm:$0xff] }
  0xa8   : > { %v798_v46 = vld [vmem:[%s10285_s26 + $0x12e0] sm:$0xff]  ;;  %795 = vst [vmem:[%s10293_s27 + $0x960] sm:$0xff] %v794_v44  ;;  %797 = vst [vmem:[%s10293_s27 + $0x968] sm:$0xff] %v796_v45  ;;  %v800_v47 = vld [vmem:[%s10285_s26 + $0x12e8] sm:$0xff] }
  0xa9   : > { %799 = vst [vmem:[%s10293_s27 + $0x970] sm:$0xff] %v798_v46  ;;  %v802_v48 = vld [vmem:[%s10285_s26 + $0x1300] sm:$0xff]  ;;  %v804_v49 = vld [vmem:[%s10285_s26 + $0x1308] sm:$0xff]  ;;  %801 = vst [vmem:[%s10293_s27 + $0x978] sm:$0xff] %v800_v47 }
  0xaa   : > { %803 = vst [vmem:[%s10293_s27 + $0x980] sm:$0xff] %v802_v48  ;;  %805 = vst [vmem:[%s10293_s27 + $0x988] sm:$0xff] %v804_v49  ;;  %v806_v50 = vld [vmem:[%s10285_s26 + $0x1320] sm:$0xff]  ;;  %v808_v51 = vld [vmem:[%s10285_s26 + $0x1328] sm:$0xff] }
  0xab   : > { %v810_v52 = vld [vmem:[%s10285_s26 + $0x1340] sm:$0xff]  ;;  %807 = vst [vmem:[%s10293_s27 + $0x990] sm:$0xff] %v806_v50  ;;  %809 = vst [vmem:[%s10293_s27 + $0x998] sm:$0xff] %v808_v51  ;;  %v812_v53 = vld [vmem:[%s10285_s26 + $0x1348] sm:$0xff] }
  0xac   : > { %811 = vst [vmem:[%s10293_s27 + $0x9a0] sm:$0xff] %v810_v52  ;;  %v814_v54 = vld [vmem:[%s10285_s26 + $0x1360] sm:$0xff]  ;;  %v816_v55 = vld [vmem:[%s10285_s26 + $0x1368] sm:$0xff]  ;;  %813 = vst [vmem:[%s10293_s27 + $0x9a8] sm:$0xff] %v812_v53 }
  0xad   : > { %815 = vst [vmem:[%s10293_s27 + $0x9b0] sm:$0xff] %v814_v54  ;;  %817 = vst [vmem:[%s10293_s27 + $0x9b8] sm:$0xff] %v816_v55  ;;  %v818_v56 = vld [vmem:[%s10285_s26 + $0x1380] sm:$0xff]  ;;  %v820_v57 = vld [vmem:[%s10285_s26 + $0x1388] sm:$0xff] }
  0xae   : > { %v822_v58 = vld [vmem:[%s10285_s26 + $0x13a0] sm:$0xff]  ;;  %819 = vst [vmem:[%s10293_s27 + $0x9c0] sm:$0xff] %v818_v56  ;;  %821 = vst [vmem:[%s10293_s27 + $0x9c8] sm:$0xff] %v820_v57  ;;  %v824_v59 = vld [vmem:[%s10285_s26 + $0x13a8] sm:$0xff] }
  0xaf   : > { %823 = vst [vmem:[%s10293_s27 + $0x9d0] sm:$0xff] %v822_v58  ;;  %v826_v60 = vld [vmem:[%s10285_s26 + $0x13c0] sm:$0xff]  ;;  %v828_v61 = vld [vmem:[%s10285_s26 + $0x13c8] sm:$0xff]  ;;  %825 = vst [vmem:[%s10293_s27 + $0x9d8] sm:$0xff] %v824_v59 }
  0xb0   : > { %827 = vst [vmem:[%s10293_s27 + $0x9e0] sm:$0xff] %v826_v60  ;;  %829 = vst [vmem:[%s10293_s27 + $0x9e8] sm:$0xff] %v828_v61  ;;  %v830_v62 = vld [vmem:[%s10285_s26 + $0x13e0] sm:$0xff]  ;;  %v832_v63 = vld [vmem:[%s10285_s26 + $0x13e8] sm:$0xff] }
  0xb1   : > { %v834_v0 = vld [vmem:[%s10285_s26 + $0x1400] sm:$0xff]  ;;  %831 = vst [vmem:[%s10293_s27 + $0x9f0] sm:$0xff] %v830_v62  ;;  %833 = vst [vmem:[%s10293_s27 + $0x9f8] sm:$0xff] %v832_v63  ;;  %v836_v1 = vld [vmem:[%s10285_s26 + $0x1408] sm:$0xff] }
  0xb2   : > { %835 = vst [vmem:[%s10293_s27 + $0xa00] sm:$0xff] %v834_v0  ;;  %v838_v2 = vld [vmem:[%s10285_s26 + $0x1420] sm:$0xff]  ;;  %v840_v3 = vld [vmem:[%s10285_s26 + $0x1428] sm:$0xff]  ;;  %837 = vst [vmem:[%s10293_s27 + $0xa08] sm:$0xff] %v836_v1 }
  0xb3   : > { %839 = vst [vmem:[%s10293_s27 + $0xa10] sm:$0xff] %v838_v2  ;;  %841 = vst [vmem:[%s10293_s27 + $0xa18] sm:$0xff] %v840_v3  ;;  %v842_v4 = vld [vmem:[%s10285_s26 + $0x1440] sm:$0xff]  ;;  %v844_v5 = vld [vmem:[%s10285_s26 + $0x1448] sm:$0xff] }
  0xb4   : > { %v846_v6 = vld [vmem:[%s10285_s26 + $0x1460] sm:$0xff]  ;;  %843 = vst [vmem:[%s10293_s27 + $0xa20] sm:$0xff] %v842_v4  ;;  %845 = vst [vmem:[%s10293_s27 + $0xa28] sm:$0xff] %v844_v5  ;;  %v848_v7 = vld [vmem:[%s10285_s26 + $0x1468] sm:$0xff] }
  0xb5   : > { %847 = vst [vmem:[%s10293_s27 + $0xa30] sm:$0xff] %v846_v6  ;;  %v850_v8 = vld [vmem:[%s10285_s26 + $0x1480] sm:$0xff]  ;;  %v852_v9 = vld [vmem:[%s10285_s26 + $0x1488] sm:$0xff]  ;;  %849 = vst [vmem:[%s10293_s27 + $0xa38] sm:$0xff] %v848_v7 }
  0xb6   : > { %851 = vst [vmem:[%s10293_s27 + $0xa40] sm:$0xff] %v850_v8  ;;  %853 = vst [vmem:[%s10293_s27 + $0xa48] sm:$0xff] %v852_v9  ;;  %v854_v10 = vld [vmem:[%s10285_s26 + $0x14a0] sm:$0xff]  ;;  %v856_v11 = vld [vmem:[%s10285_s26 + $0x14a8] sm:$0xff] }
  0xb7   : > { %v858_v12 = vld [vmem:[%s10285_s26 + $0x14c0] sm:$0xff]  ;;  %855 = vst [vmem:[%s10293_s27 + $0xa50] sm:$0xff] %v854_v10  ;;  %857 = vst [vmem:[%s10293_s27 + $0xa58] sm:$0xff] %v856_v11  ;;  %v860_v13 = vld [vmem:[%s10285_s26 + $0x14c8] sm:$0xff] }
  0xb8   : > { %859 = vst [vmem:[%s10293_s27 + $0xa60] sm:$0xff] %v858_v12  ;;  %v862_v14 = vld [vmem:[%s10285_s26 + $0x14e0] sm:$0xff]  ;;  %v864_v15 = vld [vmem:[%s10285_s26 + $0x14e8] sm:$0xff]  ;;  %861 = vst [vmem:[%s10293_s27 + $0xa68] sm:$0xff] %v860_v13 }
  0xb9   : > { %863 = vst [vmem:[%s10293_s27 + $0xa70] sm:$0xff] %v862_v14  ;;  %865 = vst [vmem:[%s10293_s27 + $0xa78] sm:$0xff] %v864_v15  ;;  %v866_v16 = vld [vmem:[%s10285_s26 + $0x1500] sm:$0xff]  ;;  %v868_v17 = vld [vmem:[%s10285_s26 + $0x1508] sm:$0xff] }
  0xba   : > { %v870_v18 = vld [vmem:[%s10285_s26 + $0x1520] sm:$0xff]  ;;  %867 = vst [vmem:[%s10293_s27 + $0xa80] sm:$0xff] %v866_v16  ;;  %869 = vst [vmem:[%s10293_s27 + $0xa88] sm:$0xff] %v868_v17  ;;  %v872_v19 = vld [vmem:[%s10285_s26 + $0x1528] sm:$0xff] }
  0xbb   : > { %871 = vst [vmem:[%s10293_s27 + $0xa90] sm:$0xff] %v870_v18  ;;  %v874_v20 = vld [vmem:[%s10285_s26 + $0x1540] sm:$0xff]  ;;  %v876_v21 = vld [vmem:[%s10285_s26 + $0x1548] sm:$0xff]  ;;  %873 = vst [vmem:[%s10293_s27 + $0xa98] sm:$0xff] %v872_v19 }
  0xbc   : > { %875 = vst [vmem:[%s10293_s27 + $0xaa0] sm:$0xff] %v874_v20  ;;  %877 = vst [vmem:[%s10293_s27 + $0xaa8] sm:$0xff] %v876_v21  ;;  %v878_v22 = vld [vmem:[%s10285_s26 + $0x1560] sm:$0xff]  ;;  %v880_v23 = vld [vmem:[%s10285_s26 + $0x1568] sm:$0xff] }
  0xbd   : > { %v882_v24 = vld [vmem:[%s10285_s26 + $0x1580] sm:$0xff]  ;;  %879 = vst [vmem:[%s10293_s27 + $0xab0] sm:$0xff] %v878_v22  ;;  %881 = vst [vmem:[%s10293_s27 + $0xab8] sm:$0xff] %v880_v23  ;;  %v884_v25 = vld [vmem:[%s10285_s26 + $0x1588] sm:$0xff] }
  0xbe   : > { %883 = vst [vmem:[%s10293_s27 + $0xac0] sm:$0xff] %v882_v24  ;;  %v886_v26 = vld [vmem:[%s10285_s26 + $0x15a0] sm:$0xff]  ;;  %v888_v27 = vld [vmem:[%s10285_s26 + $0x15a8] sm:$0xff]  ;;  %885 = vst [vmem:[%s10293_s27 + $0xac8] sm:$0xff] %v884_v25 }
  0xbf   : > { %887 = vst [vmem:[%s10293_s27 + $0xad0] sm:$0xff] %v886_v26  ;;  %889 = vst [vmem:[%s10293_s27 + $0xad8] sm:$0xff] %v888_v27  ;;  %v890_v28 = vld [vmem:[%s10285_s26 + $0x15c0] sm:$0xff]  ;;  %v892_v29 = vld [vmem:[%s10285_s26 + $0x15c8] sm:$0xff] }
  0xc0   : > { %v894_v30 = vld [vmem:[%s10285_s26 + $0x15e0] sm:$0xff]  ;;  %891 = vst [vmem:[%s10293_s27 + $0xae0] sm:$0xff] %v890_v28  ;;  %893 = vst [vmem:[%s10293_s27 + $0xae8] sm:$0xff] %v892_v29  ;;  %v896_v31 = vld [vmem:[%s10285_s26 + $0x15e8] sm:$0xff] }
  0xc1   : > { %895 = vst [vmem:[%s10293_s27 + $0xaf0] sm:$0xff] %v894_v30  ;;  %v898_v32 = vld [vmem:[%s10285_s26 + $0x1600] sm:$0xff]  ;;  %v900_v33 = vld [vmem:[%s10285_s26 + $0x1608] sm:$0xff]  ;;  %897 = vst [vmem:[%s10293_s27 + $0xaf8] sm:$0xff] %v896_v31 }
  0xc2   : > { %899 = vst [vmem:[%s10293_s27 + $0xb00] sm:$0xff] %v898_v32  ;;  %901 = vst [vmem:[%s10293_s27 + $0xb08] sm:$0xff] %v900_v33  ;;  %v902_v34 = vld [vmem:[%s10285_s26 + $0x1620] sm:$0xff]  ;;  %v904_v35 = vld [vmem:[%s10285_s26 + $0x1628] sm:$0xff] }
  0xc3   : > { %v906_v36 = vld [vmem:[%s10285_s26 + $0x1640] sm:$0xff]  ;;  %903 = vst [vmem:[%s10293_s27 + $0xb10] sm:$0xff] %v902_v34  ;;  %905 = vst [vmem:[%s10293_s27 + $0xb18] sm:$0xff] %v904_v35  ;;  %v908_v37 = vld [vmem:[%s10285_s26 + $0x1648] sm:$0xff] }
  0xc4   : > { %907 = vst [vmem:[%s10293_s27 + $0xb20] sm:$0xff] %v906_v36  ;;  %v910_v38 = vld [vmem:[%s10285_s26 + $0x1660] sm:$0xff]  ;;  %v912_v39 = vld [vmem:[%s10285_s26 + $0x1668] sm:$0xff]  ;;  %909 = vst [vmem:[%s10293_s27 + $0xb28] sm:$0xff] %v908_v37 }
  0xc5   : > { %911 = vst [vmem:[%s10293_s27 + $0xb30] sm:$0xff] %v910_v38  ;;  %913 = vst [vmem:[%s10293_s27 + $0xb38] sm:$0xff] %v912_v39  ;;  %v914_v40 = vld [vmem:[%s10285_s26 + $0x1680] sm:$0xff]  ;;  %v916_v41 = vld [vmem:[%s10285_s26 + $0x1688] sm:$0xff] }
  0xc6   : > { %v918_v42 = vld [vmem:[%s10285_s26 + $0x16a0] sm:$0xff]  ;;  %915 = vst [vmem:[%s10293_s27 + $0xb40] sm:$0xff] %v914_v40  ;;  %917 = vst [vmem:[%s10293_s27 + $0xb48] sm:$0xff] %v916_v41  ;;  %v920_v43 = vld [vmem:[%s10285_s26 + $0x16a8] sm:$0xff] }
  0xc7   : > { %919 = vst [vmem:[%s10293_s27 + $0xb50] sm:$0xff] %v918_v42  ;;  %v922_v44 = vld [vmem:[%s10285_s26 + $0x16c0] sm:$0xff]  ;;  %v924_v45 = vld [vmem:[%s10285_s26 + $0x16c8] sm:$0xff]  ;;  %921 = vst [vmem:[%s10293_s27 + $0xb58] sm:$0xff] %v920_v43 }
  0xc8   : > { %923 = vst [vmem:[%s10293_s27 + $0xb60] sm:$0xff] %v922_v44  ;;  %925 = vst [vmem:[%s10293_s27 + $0xb68] sm:$0xff] %v924_v45  ;;  %v926_v46 = vld [vmem:[%s10285_s26 + $0x16e0] sm:$0xff]  ;;  %v928_v47 = vld [vmem:[%s10285_s26 + $0x16e8] sm:$0xff] }
  0xc9   : > { %v930_v48 = vld [vmem:[%s10285_s26 + $0x1700] sm:$0xff]  ;;  %927 = vst [vmem:[%s10293_s27 + $0xb70] sm:$0xff] %v926_v46  ;;  %929 = vst [vmem:[%s10293_s27 + $0xb78] sm:$0xff] %v928_v47  ;;  %v932_v49 = vld [vmem:[%s10285_s26 + $0x1708] sm:$0xff] }
  0xca   : > { %931 = vst [vmem:[%s10293_s27 + $0xb80] sm:$0xff] %v930_v48  ;;  %v934_v50 = vld [vmem:[%s10285_s26 + $0x1720] sm:$0xff]  ;;  %v936_v51 = vld [vmem:[%s10285_s26 + $0x1728] sm:$0xff]  ;;  %933 = vst [vmem:[%s10293_s27 + $0xb88] sm:$0xff] %v932_v49 }
  0xcb   : > { %935 = vst [vmem:[%s10293_s27 + $0xb90] sm:$0xff] %v934_v50  ;;  %937 = vst [vmem:[%s10293_s27 + $0xb98] sm:$0xff] %v936_v51  ;;  %v938_v52 = vld [vmem:[%s10285_s26 + $0x1740] sm:$0xff]  ;;  %v940_v53 = vld [vmem:[%s10285_s26 + $0x1748] sm:$0xff] }
  0xcc   : > { %v942_v54 = vld [vmem:[%s10285_s26 + $0x1760] sm:$0xff]  ;;  %939 = vst [vmem:[%s10293_s27 + $0xba0] sm:$0xff] %v938_v52  ;;  %941 = vst [vmem:[%s10293_s27 + $0xba8] sm:$0xff] %v940_v53  ;;  %v944_v55 = vld [vmem:[%s10285_s26 + $0x1768] sm:$0xff] }
  0xcd   : > { %943 = vst [vmem:[%s10293_s27 + $0xbb0] sm:$0xff] %v942_v54  ;;  %v946_v56 = vld [vmem:[%s10285_s26 + $0x1780] sm:$0xff]  ;;  %v948_v57 = vld [vmem:[%s10285_s26 + $0x1788] sm:$0xff]  ;;  %945 = vst [vmem:[%s10293_s27 + $0xbb8] sm:$0xff] %v944_v55 }
  0xce   : > { %947 = vst [vmem:[%s10293_s27 + $0xbc0] sm:$0xff] %v946_v56  ;;  %949 = vst [vmem:[%s10293_s27 + $0xbc8] sm:$0xff] %v948_v57  ;;  %v950_v58 = vld [vmem:[%s10285_s26 + $0x17a0] sm:$0xff]  ;;  %v952_v59 = vld [vmem:[%s10285_s26 + $0x17a8] sm:$0xff] }
  0xcf   : > { %v954_v60 = vld [vmem:[%s10285_s26 + $0x17c0] sm:$0xff]  ;;  %951 = vst [vmem:[%s10293_s27 + $0xbd0] sm:$0xff] %v950_v58  ;;  %953 = vst [vmem:[%s10293_s27 + $0xbd8] sm:$0xff] %v952_v59  ;;  %v956_v61 = vld [vmem:[%s10285_s26 + $0x17c8] sm:$0xff] }
  0xd0   : > { %955 = vst [vmem:[%s10293_s27 + $0xbe0] sm:$0xff] %v954_v60  ;;  %v958_v62 = vld [vmem:[%s10285_s26 + $0x17e0] sm:$0xff]  ;;  %v960_v63 = vld [vmem:[%s10285_s26 + $0x17e8] sm:$0xff]  ;;  %957 = vst [vmem:[%s10293_s27 + $0xbe8] sm:$0xff] %v956_v61 }
  0xd1   : > { %959 = vst [vmem:[%s10293_s27 + $0xbf0] sm:$0xff] %v958_v62  ;;  %961 = vst [vmem:[%s10293_s27 + $0xbf8] sm:$0xff] %v960_v63  ;;  %v962_v0 = vld [vmem:[%s10285_s26 + $0x1800] sm:$0xff]  ;;  %v964_v1 = vld [vmem:[%s10285_s26 + $0x1808] sm:$0xff] }
  0xd2   : > { %v966_v2 = vld [vmem:[%s10285_s26 + $0x1820] sm:$0xff]  ;;  %963 = vst [vmem:[%s10293_s27 + $0xc00] sm:$0xff] %v962_v0  ;;  %965 = vst [vmem:[%s10293_s27 + $0xc08] sm:$0xff] %v964_v1  ;;  %v968_v3 = vld [vmem:[%s10285_s26 + $0x1828] sm:$0xff] }
  0xd3   : > { %967 = vst [vmem:[%s10293_s27 + $0xc10] sm:$0xff] %v966_v2  ;;  %v970_v4 = vld [vmem:[%s10285_s26 + $0x1840] sm:$0xff]  ;;  %v972_v5 = vld [vmem:[%s10285_s26 + $0x1848] sm:$0xff]  ;;  %969 = vst [vmem:[%s10293_s27 + $0xc18] sm:$0xff] %v968_v3 }
  0xd4   : > { %971 = vst [vmem:[%s10293_s27 + $0xc20] sm:$0xff] %v970_v4  ;;  %973 = vst [vmem:[%s10293_s27 + $0xc28] sm:$0xff] %v972_v5  ;;  %v974_v6 = vld [vmem:[%s10285_s26 + $0x1860] sm:$0xff]  ;;  %v976_v7 = vld [vmem:[%s10285_s26 + $0x1868] sm:$0xff] }
  0xd5   : > { %v978_v8 = vld [vmem:[%s10285_s26 + $0x1880] sm:$0xff]  ;;  %975 = vst [vmem:[%s10293_s27 + $0xc30] sm:$0xff] %v974_v6  ;;  %977 = vst [vmem:[%s10293_s27 + $0xc38] sm:$0xff] %v976_v7  ;;  %v980_v9 = vld [vmem:[%s10285_s26 + $0x1888] sm:$0xff] }
  0xd6   : > { %979 = vst [vmem:[%s10293_s27 + $0xc40] sm:$0xff] %v978_v8  ;;  %v982_v10 = vld [vmem:[%s10285_s26 + $0x18a0] sm:$0xff]  ;;  %v984_v11 = vld [vmem:[%s10285_s26 + $0x18a8] sm:$0xff]  ;;  %981 = vst [vmem:[%s10293_s27 + $0xc48] sm:$0xff] %v980_v9 }
  0xd7   : > { %983 = vst [vmem:[%s10293_s27 + $0xc50] sm:$0xff] %v982_v10  ;;  %985 = vst [vmem:[%s10293_s27 + $0xc58] sm:$0xff] %v984_v11  ;;  %v986_v12 = vld [vmem:[%s10285_s26 + $0x18c0] sm:$0xff]  ;;  %v988_v13 = vld [vmem:[%s10285_s26 + $0x18c8] sm:$0xff] }
  0xd8   : > { %v990_v14 = vld [vmem:[%s10285_s26 + $0x18e0] sm:$0xff]  ;;  %987 = vst [vmem:[%s10293_s27 + $0xc60] sm:$0xff] %v986_v12  ;;  %989 = vst [vmem:[%s10293_s27 + $0xc68] sm:$0xff] %v988_v13  ;;  %v992_v15 = vld [vmem:[%s10285_s26 + $0x18e8] sm:$0xff] }
  0xd9   : > { %991 = vst [vmem:[%s10293_s27 + $0xc70] sm:$0xff] %v990_v14  ;;  %v994_v16 = vld [vmem:[%s10285_s26 + $0x1900] sm:$0xff]  ;;  %v996_v17 = vld [vmem:[%s10285_s26 + $0x1908] sm:$0xff]  ;;  %993 = vst [vmem:[%s10293_s27 + $0xc78] sm:$0xff] %v992_v15 }
  0xda   : > { %995 = vst [vmem:[%s10293_s27 + $0xc80] sm:$0xff] %v994_v16  ;;  %997 = vst [vmem:[%s10293_s27 + $0xc88] sm:$0xff] %v996_v17  ;;  %v998_v18 = vld [vmem:[%s10285_s26 + $0x1920] sm:$0xff]  ;;  %v1000_v19 = vld [vmem:[%s10285_s26 + $0x1928] sm:$0xff] }
  0xdb   : > { %v1002_v20 = vld [vmem:[%s10285_s26 + $0x1940] sm:$0xff]  ;;  %999 = vst [vmem:[%s10293_s27 + $0xc90] sm:$0xff] %v998_v18  ;;  %1001 = vst [vmem:[%s10293_s27 + $0xc98] sm:$0xff] %v1000_v19  ;;  %v1004_v21 = vld [vmem:[%s10285_s26 + $0x1948] sm:$0xff] }
  0xdc   : > { %1003 = vst [vmem:[%s10293_s27 + $0xca0] sm:$0xff] %v1002_v20  ;;  %v1006_v22 = vld [vmem:[%s10285_s26 + $0x1960] sm:$0xff]  ;;  %v1008_v23 = vld [vmem:[%s10285_s26 + $0x1968] sm:$0xff]  ;;  %1005 = vst [vmem:[%s10293_s27 + $0xca8] sm:$0xff] %v1004_v21 }
  0xdd   : > { %1007 = vst [vmem:[%s10293_s27 + $0xcb0] sm:$0xff] %v1006_v22  ;;  %1009 = vst [vmem:[%s10293_s27 + $0xcb8] sm:$0xff] %v1008_v23  ;;  %v1010_v24 = vld [vmem:[%s10285_s26 + $0x1980] sm:$0xff]  ;;  %v1012_v25 = vld [vmem:[%s10285_s26 + $0x1988] sm:$0xff] }
  0xde   : > { %v1014_v26 = vld [vmem:[%s10285_s26 + $0x19a0] sm:$0xff]  ;;  %1011 = vst [vmem:[%s10293_s27 + $0xcc0] sm:$0xff] %v1010_v24  ;;  %1013 = vst [vmem:[%s10293_s27 + $0xcc8] sm:$0xff] %v1012_v25  ;;  %v1016_v27 = vld [vmem:[%s10285_s26 + $0x19a8] sm:$0xff] }
  0xdf   : > { %1015 = vst [vmem:[%s10293_s27 + $0xcd0] sm:$0xff] %v1014_v26  ;;  %v1018_v28 = vld [vmem:[%s10285_s26 + $0x19c0] sm:$0xff]  ;;  %v1020_v29 = vld [vmem:[%s10285_s26 + $0x19c8] sm:$0xff]  ;;  %1017 = vst [vmem:[%s10293_s27 + $0xcd8] sm:$0xff] %v1016_v27 }
  0xe0   : > { %1019 = vst [vmem:[%s10293_s27 + $0xce0] sm:$0xff] %v1018_v28  ;;  %1021 = vst [vmem:[%s10293_s27 + $0xce8] sm:$0xff] %v1020_v29  ;;  %v1022_v30 = vld [vmem:[%s10285_s26 + $0x19e0] sm:$0xff]  ;;  %v1024_v31 = vld [vmem:[%s10285_s26 + $0x19e8] sm:$0xff] }
  0xe1   : > { %v1026_v32 = vld [vmem:[%s10285_s26 + $0x1a00] sm:$0xff]  ;;  %1023 = vst [vmem:[%s10293_s27 + $0xcf0] sm:$0xff] %v1022_v30  ;;  %1025 = vst [vmem:[%s10293_s27 + $0xcf8] sm:$0xff] %v1024_v31  ;;  %v1028_v33 = vld [vmem:[%s10285_s26 + $0x1a08] sm:$0xff] }
  0xe2   : > { %1027 = vst [vmem:[%s10293_s27 + $0xd00] sm:$0xff] %v1026_v32  ;;  %v1030_v34 = vld [vmem:[%s10285_s26 + $0x1a20] sm:$0xff]  ;;  %v1032_v35 = vld [vmem:[%s10285_s26 + $0x1a28] sm:$0xff]  ;;  %1029 = vst [vmem:[%s10293_s27 + $0xd08] sm:$0xff] %v1028_v33 }
  0xe3   : > { %1031 = vst [vmem:[%s10293_s27 + $0xd10] sm:$0xff] %v1030_v34  ;;  %1033 = vst [vmem:[%s10293_s27 + $0xd18] sm:$0xff] %v1032_v35  ;;  %v1034_v36 = vld [vmem:[%s10285_s26 + $0x1a40] sm:$0xff]  ;;  %v1036_v37 = vld [vmem:[%s10285_s26 + $0x1a48] sm:$0xff] }
  0xe4   : > { %v1038_v38 = vld [vmem:[%s10285_s26 + $0x1a60] sm:$0xff]  ;;  %1035 = vst [vmem:[%s10293_s27 + $0xd20] sm:$0xff] %v1034_v36  ;;  %1037 = vst [vmem:[%s10293_s27 + $0xd28] sm:$0xff] %v1036_v37  ;;  %v1040_v39 = vld [vmem:[%s10285_s26 + $0x1a68] sm:$0xff] }
  0xe5   : > { %1039 = vst [vmem:[%s10293_s27 + $0xd30] sm:$0xff] %v1038_v38  ;;  %v1042_v40 = vld [vmem:[%s10285_s26 + $0x1a80] sm:$0xff]  ;;  %v1044_v41 = vld [vmem:[%s10285_s26 + $0x1a88] sm:$0xff]  ;;  %1041 = vst [vmem:[%s10293_s27 + $0xd38] sm:$0xff] %v1040_v39 }
  0xe6   : > { %1043 = vst [vmem:[%s10293_s27 + $0xd40] sm:$0xff] %v1042_v40  ;;  %1045 = vst [vmem:[%s10293_s27 + $0xd48] sm:$0xff] %v1044_v41  ;;  %v1046_v42 = vld [vmem:[%s10285_s26 + $0x1aa0] sm:$0xff]  ;;  %v1048_v43 = vld [vmem:[%s10285_s26 + $0x1aa8] sm:$0xff] }
  0xe7   : > { %v1050_v44 = vld [vmem:[%s10285_s26 + $0x1ac0] sm:$0xff]  ;;  %1047 = vst [vmem:[%s10293_s27 + $0xd50] sm:$0xff] %v1046_v42  ;;  %1049 = vst [vmem:[%s10293_s27 + $0xd58] sm:$0xff] %v1048_v43  ;;  %v1052_v45 = vld [vmem:[%s10285_s26 + $0x1ac8] sm:$0xff] }
  0xe8   : > { %1051 = vst [vmem:[%s10293_s27 + $0xd60] sm:$0xff] %v1050_v44  ;;  %v1054_v46 = vld [vmem:[%s10285_s26 + $0x1ae0] sm:$0xff]  ;;  %v1056_v47 = vld [vmem:[%s10285_s26 + $0x1ae8] sm:$0xff]  ;;  %1053 = vst [vmem:[%s10293_s27 + $0xd68] sm:$0xff] %v1052_v45 }
  0xe9   : > { %1055 = vst [vmem:[%s10293_s27 + $0xd70] sm:$0xff] %v1054_v46  ;;  %1057 = vst [vmem:[%s10293_s27 + $0xd78] sm:$0xff] %v1056_v47  ;;  %v1058_v48 = vld [vmem:[%s10285_s26 + $0x1b00] sm:$0xff]  ;;  %v1060_v49 = vld [vmem:[%s10285_s26 + $0x1b08] sm:$0xff] }
  0xea   : > { %v1062_v50 = vld [vmem:[%s10285_s26 + $0x1b20] sm:$0xff]  ;;  %1059 = vst [vmem:[%s10293_s27 + $0xd80] sm:$0xff] %v1058_v48  ;;  %1061 = vst [vmem:[%s10293_s27 + $0xd88] sm:$0xff] %v1060_v49  ;;  %v1064_v51 = vld [vmem:[%s10285_s26 + $0x1b28] sm:$0xff] }
  0xeb   : > { %1063 = vst [vmem:[%s10293_s27 + $0xd90] sm:$0xff] %v1062_v50  ;;  %v1066_v52 = vld [vmem:[%s10285_s26 + $0x1b40] sm:$0xff]  ;;  %v1068_v53 = vld [vmem:[%s10285_s26 + $0x1b48] sm:$0xff]  ;;  %1065 = vst [vmem:[%s10293_s27 + $0xd98] sm:$0xff] %v1064_v51 }
  0xec   : > { %1067 = vst [vmem:[%s10293_s27 + $0xda0] sm:$0xff] %v1066_v52  ;;  %1069 = vst [vmem:[%s10293_s27 + $0xda8] sm:$0xff] %v1068_v53  ;;  %v1070_v54 = vld [vmem:[%s10285_s26 + $0x1b60] sm:$0xff]  ;;  %v1072_v55 = vld [vmem:[%s10285_s26 + $0x1b68] sm:$0xff] }
  0xed   : > { %v1074_v56 = vld [vmem:[%s10285_s26 + $0x1b80] sm:$0xff]  ;;  %1071 = vst [vmem:[%s10293_s27 + $0xdb0] sm:$0xff] %v1070_v54  ;;  %1073 = vst [vmem:[%s10293_s27 + $0xdb8] sm:$0xff] %v1072_v55  ;;  %v1076_v57 = vld [vmem:[%s10285_s26 + $0x1b88] sm:$0xff] }
  0xee   : > { %1075 = vst [vmem:[%s10293_s27 + $0xdc0] sm:$0xff] %v1074_v56  ;;  %v1078_v58 = vld [vmem:[%s10285_s26 + $0x1ba0] sm:$0xff]  ;;  %v1080_v59 = vld [vmem:[%s10285_s26 + $0x1ba8] sm:$0xff]  ;;  %1077 = vst [vmem:[%s10293_s27 + $0xdc8] sm:$0xff] %v1076_v57 }
  0xef   : > { %1079 = vst [vmem:[%s10293_s27 + $0xdd0] sm:$0xff] %v1078_v58  ;;  %1081 = vst [vmem:[%s10293_s27 + $0xdd8] sm:$0xff] %v1080_v59  ;;  %v1082_v60 = vld [vmem:[%s10285_s26 + $0x1bc0] sm:$0xff]  ;;  %v1084_v61 = vld [vmem:[%s10285_s26 + $0x1bc8] sm:$0xff] }
  0xf0   : > { %v1086_v62 = vld [vmem:[%s10285_s26 + $0x1be0] sm:$0xff]  ;;  %1083 = vst [vmem:[%s10293_s27 + $0xde0] sm:$0xff] %v1082_v60  ;;  %1085 = vst [vmem:[%s10293_s27 + $0xde8] sm:$0xff] %v1084_v61  ;;  %v1088_v63 = vld [vmem:[%s10285_s26 + $0x1be8] sm:$0xff] }
  0xf1   : > { %1087 = vst [vmem:[%s10293_s27 + $0xdf0] sm:$0xff] %v1086_v62  ;;  %v1090_v0 = vld [vmem:[%s10285_s26 + $0x1c00] sm:$0xff]  ;;  %v1092_v1 = vld [vmem:[%s10285_s26 + $0x1c08] sm:$0xff]  ;;  %1089 = vst [vmem:[%s10293_s27 + $0xdf8] sm:$0xff] %v1088_v63 }
  0xf2   : > { %1091 = vst [vmem:[%s10293_s27 + $0xe00] sm:$0xff] %v1090_v0  ;;  %1093 = vst [vmem:[%s10293_s27 + $0xe08] sm:$0xff] %v1092_v1  ;;  %v1094_v2 = vld [vmem:[%s10285_s26 + $0x1c20] sm:$0xff]  ;;  %v1096_v3 = vld [vmem:[%s10285_s26 + $0x1c28] sm:$0xff] }
  0xf3   : > { %v1098_v4 = vld [vmem:[%s10285_s26 + $0x1c40] sm:$0xff]  ;;  %1095 = vst [vmem:[%s10293_s27 + $0xe10] sm:$0xff] %v1094_v2  ;;  %1097 = vst [vmem:[%s10293_s27 + $0xe18] sm:$0xff] %v1096_v3  ;;  %v1100_v5 = vld [vmem:[%s10285_s26 + $0x1c48] sm:$0xff] }
  0xf4   : > { %1099 = vst [vmem:[%s10293_s27 + $0xe20] sm:$0xff] %v1098_v4  ;;  %v1102_v6 = vld [vmem:[%s10285_s26 + $0x1c60] sm:$0xff]  ;;  %v1104_v7 = vld [vmem:[%s10285_s26 + $0x1c68] sm:$0xff]  ;;  %1101 = vst [vmem:[%s10293_s27 + $0xe28] sm:$0xff] %v1100_v5 }
  0xf5   : > { %1103 = vst [vmem:[%s10293_s27 + $0xe30] sm:$0xff] %v1102_v6  ;;  %1105 = vst [vmem:[%s10293_s27 + $0xe38] sm:$0xff] %v1104_v7  ;;  %v1106_v8 = vld [vmem:[%s10285_s26 + $0x1c80] sm:$0xff]  ;;  %v1108_v9 = vld [vmem:[%s10285_s26 + $0x1c88] sm:$0xff] }
  0xf6   : > { %v1110_v10 = vld [vmem:[%s10285_s26 + $0x1ca0] sm:$0xff]  ;;  %1107 = vst [vmem:[%s10293_s27 + $0xe40] sm:$0xff] %v1106_v8  ;;  %1109 = vst [vmem:[%s10293_s27 + $0xe48] sm:$0xff] %v1108_v9  ;;  %v1112_v11 = vld [vmem:[%s10285_s26 + $0x1ca8] sm:$0xff] }
  0xf7   : > { %1111 = vst [vmem:[%s10293_s27 + $0xe50] sm:$0xff] %v1110_v10  ;;  %v1114_v12 = vld [vmem:[%s10285_s26 + $0x1cc0] sm:$0xff]  ;;  %v1116_v13 = vld [vmem:[%s10285_s26 + $0x1cc8] sm:$0xff]  ;;  %1113 = vst [vmem:[%s10293_s27 + $0xe58] sm:$0xff] %v1112_v11 }
  0xf8   : > { %1115 = vst [vmem:[%s10293_s27 + $0xe60] sm:$0xff] %v1114_v12  ;;  %1117 = vst [vmem:[%s10293_s27 + $0xe68] sm:$0xff] %v1116_v13  ;;  %v1118_v14 = vld [vmem:[%s10285_s26 + $0x1ce0] sm:$0xff]  ;;  %v1120_v15 = vld [vmem:[%s10285_s26 + $0x1ce8] sm:$0xff] }
  0xf9   : > { %v1122_v16 = vld [vmem:[%s10285_s26 + $0x1d00] sm:$0xff]  ;;  %1119 = vst [vmem:[%s10293_s27 + $0xe70] sm:$0xff] %v1118_v14  ;;  %1121 = vst [vmem:[%s10293_s27 + $0xe78] sm:$0xff] %v1120_v15  ;;  %v1124_v17 = vld [vmem:[%s10285_s26 + $0x1d08] sm:$0xff] }
  0xfa   : > { %1123 = vst [vmem:[%s10293_s27 + $0xe80] sm:$0xff] %v1122_v16  ;;  %v1126_v18 = vld [vmem:[%s10285_s26 + $0x1d20] sm:$0xff]  ;;  %v1128_v19 = vld [vmem:[%s10285_s26 + $0x1d28] sm:$0xff]  ;;  %1125 = vst [vmem:[%s10293_s27 + $0xe88] sm:$0xff] %v1124_v17 }
  0xfb   : > { %1127 = vst [vmem:[%s10293_s27 + $0xe90] sm:$0xff] %v1126_v18  ;;  %1129 = vst [vmem:[%s10293_s27 + $0xe98] sm:$0xff] %v1128_v19  ;;  %v1130_v20 = vld [vmem:[%s10285_s26 + $0x1d40] sm:$0xff]  ;;  %v1132_v21 = vld [vmem:[%s10285_s26 + $0x1d48] sm:$0xff] }
  0xfc   : > { %v1134_v22 = vld [vmem:[%s10285_s26 + $0x1d60] sm:$0xff]  ;;  %1131 = vst [vmem:[%s10293_s27 + $0xea0] sm:$0xff] %v1130_v20  ;;  %1133 = vst [vmem:[%s10293_s27 + $0xea8] sm:$0xff] %v1132_v21  ;;  %v1136_v23 = vld [vmem:[%s10285_s26 + $0x1d68] sm:$0xff] }
  0xfd   : > { %1135 = vst [vmem:[%s10293_s27 + $0xeb0] sm:$0xff] %v1134_v22  ;;  %v1138_v24 = vld [vmem:[%s10285_s26 + $0x1d80] sm:$0xff]  ;;  %v1140_v25 = vld [vmem:[%s10285_s26 + $0x1d88] sm:$0xff]  ;;  %1137 = vst [vmem:[%s10293_s27 + $0xeb8] sm:$0xff] %v1136_v23 }
  0xfe   : > { %1139 = vst [vmem:[%s10293_s27 + $0xec0] sm:$0xff] %v1138_v24  ;;  %1141 = vst [vmem:[%s10293_s27 + $0xec8] sm:$0xff] %v1140_v25  ;;  %v1142_v26 = vld [vmem:[%s10285_s26 + $0x1da0] sm:$0xff]  ;;  %v1144_v27 = vld [vmem:[%s10285_s26 + $0x1da8] sm:$0xff] }
  0xff   : > { %v1146_v28 = vld [vmem:[%s10285_s26 + $0x1dc0] sm:$0xff]  ;;  %1143 = vst [vmem:[%s10293_s27 + $0xed0] sm:$0xff] %v1142_v26  ;;  %1145 = vst [vmem:[%s10293_s27 + $0xed8] sm:$0xff] %v1144_v27  ;;  %v1148_v29 = vld [vmem:[%s10285_s26 + $0x1dc8] sm:$0xff] }
 0x100   : > { %1147 = vst [vmem:[%s10293_s27 + $0xee0] sm:$0xff] %v1146_v28  ;;  %v1150_v30 = vld [vmem:[%s10285_s26 + $0x1de0] sm:$0xff]  ;;  %v1152_v31 = vld [vmem:[%s10285_s26 + $0x1de8] sm:$0xff]  ;;  %1149 = vst [vmem:[%s10293_s27 + $0xee8] sm:$0xff] %v1148_v29 }
 0x101   : > { %1151 = vst [vmem:[%s10293_s27 + $0xef0] sm:$0xff] %v1150_v30  ;;  %1153 = vst [vmem:[%s10293_s27 + $0xef8] sm:$0xff] %v1152_v31  ;;  %v1154_v32 = vld [vmem:[%s10285_s26 + $0x1e00] sm:$0xff]  ;;  %v1156_v33 = vld [vmem:[%s10285_s26 + $0x1e08] sm:$0xff] }
 0x102   : > { %v1158_v34 = vld [vmem:[%s10285_s26 + $0x1e20] sm:$0xff]  ;;  %1155 = vst [vmem:[%s10293_s27 + $0xf00] sm:$0xff] %v1154_v32  ;;  %1157 = vst [vmem:[%s10293_s27 + $0xf08] sm:$0xff] %v1156_v33  ;;  %v1160_v35 = vld [vmem:[%s10285_s26 + $0x1e28] sm:$0xff] }
 0x103   : > { %1159 = vst [vmem:[%s10293_s27 + $0xf10] sm:$0xff] %v1158_v34  ;;  %v1162_v36 = vld [vmem:[%s10285_s26 + $0x1e40] sm:$0xff]  ;;  %v1164_v37 = vld [vmem:[%s10285_s26 + $0x1e48] sm:$0xff]  ;;  %1161 = vst [vmem:[%s10293_s27 + $0xf18] sm:$0xff] %v1160_v35 }
 0x104   : > { %1163 = vst [vmem:[%s10293_s27 + $0xf20] sm:$0xff] %v1162_v36  ;;  %1165 = vst [vmem:[%s10293_s27 + $0xf28] sm:$0xff] %v1164_v37  ;;  %v1166_v38 = vld [vmem:[%s10285_s26 + $0x1e60] sm:$0xff]  ;;  %v1168_v39 = vld [vmem:[%s10285_s26 + $0x1e68] sm:$0xff] }
 0x105   : > { %v1170_v40 = vld [vmem:[%s10285_s26 + $0x1e80] sm:$0xff]  ;;  %1167 = vst [vmem:[%s10293_s27 + $0xf30] sm:$0xff] %v1166_v38  ;;  %1169 = vst [vmem:[%s10293_s27 + $0xf38] sm:$0xff] %v1168_v39  ;;  %v1172_v41 = vld [vmem:[%s10285_s26 + $0x1e88] sm:$0xff] }
 0x106   : > { %1171 = vst [vmem:[%s10293_s27 + $0xf40] sm:$0xff] %v1170_v40  ;;  %v1174_v42 = vld [vmem:[%s10285_s26 + $0x1ea0] sm:$0xff]  ;;  %v1176_v43 = vld [vmem:[%s10285_s26 + $0x1ea8] sm:$0xff]  ;;  %1173 = vst [vmem:[%s10293_s27 + $0xf48] sm:$0xff] %v1172_v41 }
 0x107   : > { %1175 = vst [vmem:[%s10293_s27 + $0xf50] sm:$0xff] %v1174_v42  ;;  %1177 = vst [vmem:[%s10293_s27 + $0xf58] sm:$0xff] %v1176_v43  ;;  %v1178_v44 = vld [vmem:[%s10285_s26 + $0x1ec0] sm:$0xff]  ;;  %v1180_v45 = vld [vmem:[%s10285_s26 + $0x1ec8] sm:$0xff] }
 0x108   : > { %v1182_v46 = vld [vmem:[%s10285_s26 + $0x1ee0] sm:$0xff]  ;;  %1179 = vst [vmem:[%s10293_s27 + $0xf60] sm:$0xff] %v1178_v44  ;;  %1181 = vst [vmem:[%s10293_s27 + $0xf68] sm:$0xff] %v1180_v45  ;;  %v1184_v47 = vld [vmem:[%s10285_s26 + $0x1ee8] sm:$0xff] }
 0x109   : > { %1183 = vst [vmem:[%s10293_s27 + $0xf70] sm:$0xff] %v1182_v46  ;;  %v1186_v48 = vld [vmem:[%s10285_s26 + $0x1f00] sm:$0xff]  ;;  %v1188_v49 = vld [vmem:[%s10285_s26 + $0x1f08] sm:$0xff]  ;;  %1185 = vst [vmem:[%s10293_s27 + $0xf78] sm:$0xff] %v1184_v47 }
 0x10a   : > { %1187 = vst [vmem:[%s10293_s27 + $0xf80] sm:$0xff] %v1186_v48  ;;  %1189 = vst [vmem:[%s10293_s27 + $0xf88] sm:$0xff] %v1188_v49  ;;  %v1190_v50 = vld [vmem:[%s10285_s26 + $0x1f20] sm:$0xff]  ;;  %v1192_v51 = vld [vmem:[%s10285_s26 + $0x1f28] sm:$0xff] }
 0x10b   : > { %v1194_v52 = vld [vmem:[%s10285_s26 + $0x1f40] sm:$0xff]  ;;  %1191 = vst [vmem:[%s10293_s27 + $0xf90] sm:$0xff] %v1190_v50  ;;  %1193 = vst [vmem:[%s10293_s27 + $0xf98] sm:$0xff] %v1192_v51  ;;  %v1196_v53 = vld [vmem:[%s10285_s26 + $0x1f48] sm:$0xff] }
 0x10c   : > { %1195 = vst [vmem:[%s10293_s27 + $0xfa0] sm:$0xff] %v1194_v52  ;;  %v1198_v54 = vld [vmem:[%s10285_s26 + $0x1f60] sm:$0xff]  ;;  %v1200_v55 = vld [vmem:[%s10285_s26 + $0x1f68] sm:$0xff]  ;;  %1197 = vst [vmem:[%s10293_s27 + $0xfa8] sm:$0xff] %v1196_v53 }
 0x10d   : > { %1199 = vst [vmem:[%s10293_s27 + $0xfb0] sm:$0xff] %v1198_v54  ;;  %1201 = vst [vmem:[%s10293_s27 + $0xfb8] sm:$0xff] %v1200_v55  ;;  %v1202_v56 = vld [vmem:[%s10285_s26 + $0x1f80] sm:$0xff]  ;;  %v1204_v57 = vld [vmem:[%s10285_s26 + $0x1f88] sm:$0xff] }
 0x10e   : > { %v1206_v58 = vld [vmem:[%s10285_s26 + $0x1fa0] sm:$0xff]  ;;  %1203 = vst [vmem:[%s10293_s27 + $0xfc0] sm:$0xff] %v1202_v56  ;;  %1205 = vst [vmem:[%s10293_s27 + $0xfc8] sm:$0xff] %v1204_v57  ;;  %v1208_v59 = vld [vmem:[%s10285_s26 + $0x1fa8] sm:$0xff] }
 0x10f   : > { %1207 = vst [vmem:[%s10293_s27 + $0xfd0] sm:$0xff] %v1206_v58  ;;  %v1210_v60 = vld [vmem:[%s10285_s26 + $0x1fc0] sm:$0xff]  ;;  %v1212_v61 = vld [vmem:[%s10285_s26 + $0x1fc8] sm:$0xff]  ;;  %1209 = vst [vmem:[%s10293_s27 + $0xfd8] sm:$0xff] %v1208_v59 }
 0x110   : > { %1211 = vst [vmem:[%s10293_s27 + $0xfe0] sm:$0xff] %v1210_v60  ;;  %1213 = vst [vmem:[%s10293_s27 + $0xfe8] sm:$0xff] %v1212_v61  ;;  %v1214_v62 = vld [vmem:[%s10285_s26 + $0x1fe0] sm:$0xff]  ;;  %v1216_v63 = vld [vmem:[%s10285_s26 + $0x1fe8] sm:$0xff] }
 0x111   : > { %v1218_v0 = vld [vmem:[%s10285_s26 + $0x2000] sm:$0xff]  ;;  %1215 = vst [vmem:[%s10293_s27 + $0xff0] sm:$0xff] %v1214_v62  ;;  %1217 = vst [vmem:[%s10293_s27 + $0xff8] sm:$0xff] %v1216_v63  ;;  %v1220_v1 = vld [vmem:[%s10285_s26 + $0x2008] sm:$0xff] }
 0x112   : > { %1219 = vst [vmem:[%s10293_s27 + $0x1000] sm:$0xff] %v1218_v0  ;;  %v1222_v2 = vld [vmem:[%s10285_s26 + $0x2020] sm:$0xff]  ;;  %v1224_v3 = vld [vmem:[%s10285_s26 + $0x2028] sm:$0xff]  ;;  %1221 = vst [vmem:[%s10293_s27 + $0x1008] sm:$0xff] %v1220_v1 }
 0x113   : > { %1223 = vst [vmem:[%s10293_s27 + $0x1010] sm:$0xff] %v1222_v2  ;;  %1225 = vst [vmem:[%s10293_s27 + $0x1018] sm:$0xff] %v1224_v3  ;;  %v1226_v4 = vld [vmem:[%s10285_s26 + $0x2040] sm:$0xff]  ;;  %v1228_v5 = vld [vmem:[%s10285_s26 + $0x2048] sm:$0xff] }
 0x114   : > { %v1230_v6 = vld [vmem:[%s10285_s26 + $0x2060] sm:$0xff]  ;;  %1227 = vst [vmem:[%s10293_s27 + $0x1020] sm:$0xff] %v1226_v4  ;;  %1229 = vst [vmem:[%s10293_s27 + $0x1028] sm:$0xff] %v1228_v5  ;;  %v1232_v7 = vld [vmem:[%s10285_s26 + $0x2068] sm:$0xff] }
 0x115   : > { %1231 = vst [vmem:[%s10293_s27 + $0x1030] sm:$0xff] %v1230_v6  ;;  %v1234_v8 = vld [vmem:[%s10285_s26 + $0x2080] sm:$0xff]  ;;  %v1236_v9 = vld [vmem:[%s10285_s26 + $0x2088] sm:$0xff]  ;;  %1233 = vst [vmem:[%s10293_s27 + $0x1038] sm:$0xff] %v1232_v7 }
 0x116   : > { %1235 = vst [vmem:[%s10293_s27 + $0x1040] sm:$0xff] %v1234_v8  ;;  %1237 = vst [vmem:[%s10293_s27 + $0x1048] sm:$0xff] %v1236_v9  ;;  %v1238_v10 = vld [vmem:[%s10285_s26 + $0x20a0] sm:$0xff]  ;;  %v1240_v11 = vld [vmem:[%s10285_s26 + $0x20a8] sm:$0xff] }
 0x117   : > { %v1242_v12 = vld [vmem:[%s10285_s26 + $0x20c0] sm:$0xff]  ;;  %1239 = vst [vmem:[%s10293_s27 + $0x1050] sm:$0xff] %v1238_v10  ;;  %1241 = vst [vmem:[%s10293_s27 + $0x1058] sm:$0xff] %v1240_v11  ;;  %v1244_v13 = vld [vmem:[%s10285_s26 + $0x20c8] sm:$0xff] }
 0x118   : > { %1243 = vst [vmem:[%s10293_s27 + $0x1060] sm:$0xff] %v1242_v12  ;;  %v1246_v14 = vld [vmem:[%s10285_s26 + $0x20e0] sm:$0xff]  ;;  %v1248_v15 = vld [vmem:[%s10285_s26 + $0x20e8] sm:$0xff]  ;;  %1245 = vst [vmem:[%s10293_s27 + $0x1068] sm:$0xff] %v1244_v13 }
 0x119   : > { %1247 = vst [vmem:[%s10293_s27 + $0x1070] sm:$0xff] %v1246_v14  ;;  %1249 = vst [vmem:[%s10293_s27 + $0x1078] sm:$0xff] %v1248_v15  ;;  %v1250_v16 = vld [vmem:[%s10285_s26 + $0x2100] sm:$0xff]  ;;  %v1252_v17 = vld [vmem:[%s10285_s26 + $0x2108] sm:$0xff] }
 0x11a   : > { %v1254_v18 = vld [vmem:[%s10285_s26 + $0x2120] sm:$0xff]  ;;  %1251 = vst [vmem:[%s10293_s27 + $0x1080] sm:$0xff] %v1250_v16  ;;  %1253 = vst [vmem:[%s10293_s27 + $0x1088] sm:$0xff] %v1252_v17  ;;  %v1256_v19 = vld [vmem:[%s10285_s26 + $0x2128] sm:$0xff] }
 0x11b   : > { %1255 = vst [vmem:[%s10293_s27 + $0x1090] sm:$0xff] %v1254_v18  ;;  %v1258_v20 = vld [vmem:[%s10285_s26 + $0x2140] sm:$0xff]  ;;  %v1260_v21 = vld [vmem:[%s10285_s26 + $0x2148] sm:$0xff]  ;;  %1257 = vst [vmem:[%s10293_s27 + $0x1098] sm:$0xff] %v1256_v19 }
 0x11c   : > { %1259 = vst [vmem:[%s10293_s27 + $0x10a0] sm:$0xff] %v1258_v20  ;;  %1261 = vst [vmem:[%s10293_s27 + $0x10a8] sm:$0xff] %v1260_v21  ;;  %v1262_v22 = vld [vmem:[%s10285_s26 + $0x2160] sm:$0xff]  ;;  %v1264_v23 = vld [vmem:[%s10285_s26 + $0x2168] sm:$0xff] }
 0x11d   : > { %v1266_v24 = vld [vmem:[%s10285_s26 + $0x2180] sm:$0xff]  ;;  %1263 = vst [vmem:[%s10293_s27 + $0x10b0] sm:$0xff] %v1262_v22  ;;  %1265 = vst [vmem:[%s10293_s27 + $0x10b8] sm:$0xff] %v1264_v23  ;;  %v1268_v25 = vld [vmem:[%s10285_s26 + $0x2188] sm:$0xff] }
 0x11e   : > { %1267 = vst [vmem:[%s10293_s27 + $0x10c0] sm:$0xff] %v1266_v24  ;;  %v1270_v26 = vld [vmem:[%s10285_s26 + $0x21a0] sm:$0xff]  ;;  %v1272_v27 = vld [vmem:[%s10285_s26 + $0x21a8] sm:$0xff]  ;;  %1269 = vst [vmem:[%s10293_s27 + $0x10c8] sm:$0xff] %v1268_v25 }
 0x11f   : > { %1271 = vst [vmem:[%s10293_s27 + $0x10d0] sm:$0xff] %v1270_v26  ;;  %1273 = vst [vmem:[%s10293_s27 + $0x10d8] sm:$0xff] %v1272_v27  ;;  %v1274_v28 = vld [vmem:[%s10285_s26 + $0x21c0] sm:$0xff]  ;;  %v1276_v29 = vld [vmem:[%s10285_s26 + $0x21c8] sm:$0xff] }
 0x120   : > { %v1278_v30 = vld [vmem:[%s10285_s26 + $0x21e0] sm:$0xff]  ;;  %1275 = vst [vmem:[%s10293_s27 + $0x10e0] sm:$0xff] %v1274_v28  ;;  %1277 = vst [vmem:[%s10293_s27 + $0x10e8] sm:$0xff] %v1276_v29  ;;  %v1280_v31 = vld [vmem:[%s10285_s26 + $0x21e8] sm:$0xff] }
 0x121   : > { %1279 = vst [vmem:[%s10293_s27 + $0x10f0] sm:$0xff] %v1278_v30  ;;  %v1282_v32 = vld [vmem:[%s10285_s26 + $0x2200] sm:$0xff]  ;;  %v1284_v33 = vld [vmem:[%s10285_s26 + $0x2208] sm:$0xff]  ;;  %1281 = vst [vmem:[%s10293_s27 + $0x10f8] sm:$0xff] %v1280_v31 }
 0x122   : > { %1283 = vst [vmem:[%s10293_s27 + $0x1100] sm:$0xff] %v1282_v32  ;;  %1285 = vst [vmem:[%s10293_s27 + $0x1108] sm:$0xff] %v1284_v33  ;;  %v1286_v34 = vld [vmem:[%s10285_s26 + $0x2220] sm:$0xff]  ;;  %v1288_v35 = vld [vmem:[%s10285_s26 + $0x2228] sm:$0xff] }
 0x123   : > { %v1290_v36 = vld [vmem:[%s10285_s26 + $0x2240] sm:$0xff]  ;;  %1287 = vst [vmem:[%s10293_s27 + $0x1110] sm:$0xff] %v1286_v34  ;;  %1289 = vst [vmem:[%s10293_s27 + $0x1118] sm:$0xff] %v1288_v35  ;;  %v1292_v37 = vld [vmem:[%s10285_s26 + $0x2248] sm:$0xff] }
 0x124   : > { %1291 = vst [vmem:[%s10293_s27 + $0x1120] sm:$0xff] %v1290_v36  ;;  %v1294_v38 = vld [vmem:[%s10285_s26 + $0x2260] sm:$0xff]  ;;  %v1296_v39 = vld [vmem:[%s10285_s26 + $0x2268] sm:$0xff]  ;;  %1293 = vst [vmem:[%s10293_s27 + $0x1128] sm:$0xff] %v1292_v37 }
 0x125   : > { %1295 = vst [vmem:[%s10293_s27 + $0x1130] sm:$0xff] %v1294_v38  ;;  %1297 = vst [vmem:[%s10293_s27 + $0x1138] sm:$0xff] %v1296_v39  ;;  %v1298_v40 = vld [vmem:[%s10285_s26 + $0x2280] sm:$0xff]  ;;  %v1300_v41 = vld [vmem:[%s10285_s26 + $0x2288] sm:$0xff] }
 0x126   : > { %v1302_v42 = vld [vmem:[%s10285_s26 + $0x22a0] sm:$0xff]  ;;  %1299 = vst [vmem:[%s10293_s27 + $0x1140] sm:$0xff] %v1298_v40  ;;  %1301 = vst [vmem:[%s10293_s27 + $0x1148] sm:$0xff] %v1300_v41  ;;  %v1304_v43 = vld [vmem:[%s10285_s26 + $0x22a8] sm:$0xff] }
 0x127   : > { %1303 = vst [vmem:[%s10293_s27 + $0x1150] sm:$0xff] %v1302_v42  ;;  %v1306_v44 = vld [vmem:[%s10285_s26 + $0x22c0] sm:$0xff]  ;;  %v1308_v45 = vld [vmem:[%s10285_s26 + $0x22c8] sm:$0xff]  ;;  %1305 = vst [vmem:[%s10293_s27 + $0x1158] sm:$0xff] %v1304_v43 }
 0x128   : > { %1307 = vst [vmem:[%s10293_s27 + $0x1160] sm:$0xff] %v1306_v44  ;;  %1309 = vst [vmem:[%s10293_s27 + $0x1168] sm:$0xff] %v1308_v45  ;;  %v1310_v46 = vld [vmem:[%s10285_s26 + $0x22e0] sm:$0xff]  ;;  %v1312_v47 = vld [vmem:[%s10285_s26 + $0x22e8] sm:$0xff] }
 0x129   : > { %v1314_v48 = vld [vmem:[%s10285_s26 + $0x2300] sm:$0xff]  ;;  %1311 = vst [vmem:[%s10293_s27 + $0x1170] sm:$0xff] %v1310_v46  ;;  %1313 = vst [vmem:[%s10293_s27 + $0x1178] sm:$0xff] %v1312_v47  ;;  %v1316_v49 = vld [vmem:[%s10285_s26 + $0x2308] sm:$0xff] }
 0x12a   : > { %1315 = vst [vmem:[%s10293_s27 + $0x1180] sm:$0xff] %v1314_v48  ;;  %v1318_v50 = vld [vmem:[%s10285_s26 + $0x2320] sm:$0xff]  ;;  %v1320_v51 = vld [vmem:[%s10285_s26 + $0x2328] sm:$0xff]  ;;  %1317 = vst [vmem:[%s10293_s27 + $0x1188] sm:$0xff] %v1316_v49 }
 0x12b   : > { %1319 = vst [vmem:[%s10293_s27 + $0x1190] sm:$0xff] %v1318_v50  ;;  %1321 = vst [vmem:[%s10293_s27 + $0x1198] sm:$0xff] %v1320_v51  ;;  %v1322_v52 = vld [vmem:[%s10285_s26 + $0x2340] sm:$0xff]  ;;  %v1324_v53 = vld [vmem:[%s10285_s26 + $0x2348] sm:$0xff] }
 0x12c   : > { %v1326_v54 = vld [vmem:[%s10285_s26 + $0x2360] sm:$0xff]  ;;  %1323 = vst [vmem:[%s10293_s27 + $0x11a0] sm:$0xff] %v1322_v52  ;;  %1325 = vst [vmem:[%s10293_s27 + $0x11a8] sm:$0xff] %v1324_v53  ;;  %v1328_v55 = vld [vmem:[%s10285_s26 + $0x2368] sm:$0xff] }
 0x12d   : > { %1327 = vst [vmem:[%s10293_s27 + $0x11b0] sm:$0xff] %v1326_v54  ;;  %v1330_v56 = vld [vmem:[%s10285_s26 + $0x2380] sm:$0xff]  ;;  %v1332_v57 = vld [vmem:[%s10285_s26 + $0x2388] sm:$0xff]  ;;  %1329 = vst [vmem:[%s10293_s27 + $0x11b8] sm:$0xff] %v1328_v55 }
 0x12e   : > { %1331 = vst [vmem:[%s10293_s27 + $0x11c0] sm:$0xff] %v1330_v56  ;;  %1333 = vst [vmem:[%s10293_s27 + $0x11c8] sm:$0xff] %v1332_v57  ;;  %v1334_v58 = vld [vmem:[%s10285_s26 + $0x23a0] sm:$0xff]  ;;  %v1336_v59 = vld [vmem:[%s10285_s26 + $0x23a8] sm:$0xff] }
 0x12f   : > { %v1338_v60 = vld [vmem:[%s10285_s26 + $0x23c0] sm:$0xff]  ;;  %1335 = vst [vmem:[%s10293_s27 + $0x11d0] sm:$0xff] %v1334_v58  ;;  %1337 = vst [vmem:[%s10293_s27 + $0x11d8] sm:$0xff] %v1336_v59  ;;  %v1340_v61 = vld [vmem:[%s10285_s26 + $0x23c8] sm:$0xff] }
 0x130   : > { %1339 = vst [vmem:[%s10293_s27 + $0x11e0] sm:$0xff] %v1338_v60  ;;  %v1342_v62 = vld [vmem:[%s10285_s26 + $0x23e0] sm:$0xff]  ;;  %v1344_v63 = vld [vmem:[%s10285_s26 + $0x23e8] sm:$0xff]  ;;  %1341 = vst [vmem:[%s10293_s27 + $0x11e8] sm:$0xff] %v1340_v61 }
 0x131   : > { %1343 = vst [vmem:[%s10293_s27 + $0x11f0] sm:$0xff] %v1342_v62  ;;  %1345 = vst [vmem:[%s10293_s27 + $0x11f8] sm:$0xff] %v1344_v63  ;;  %v1346_v0 = vld [vmem:[%s10285_s26 + $0x2400] sm:$0xff]  ;;  %v1348_v1 = vld [vmem:[%s10285_s26 + $0x2408] sm:$0xff] }
 0x132   : > { %v1350_v2 = vld [vmem:[%s10285_s26 + $0x2420] sm:$0xff]  ;;  %1347 = vst [vmem:[%s10293_s27 + $0x1200] sm:$0xff] %v1346_v0  ;;  %1349 = vst [vmem:[%s10293_s27 + $0x1208] sm:$0xff] %v1348_v1  ;;  %v1352_v3 = vld [vmem:[%s10285_s26 + $0x2428] sm:$0xff] }
 0x133   : > { %1351 = vst [vmem:[%s10293_s27 + $0x1210] sm:$0xff] %v1350_v2  ;;  %v1354_v4 = vld [vmem:[%s10285_s26 + $0x2440] sm:$0xff]  ;;  %v1356_v5 = vld [vmem:[%s10285_s26 + $0x2448] sm:$0xff]  ;;  %1353 = vst [vmem:[%s10293_s27 + $0x1218] sm:$0xff] %v1352_v3 }
 0x134   : > { %1355 = vst [vmem:[%s10293_s27 + $0x1220] sm:$0xff] %v1354_v4  ;;  %1357 = vst [vmem:[%s10293_s27 + $0x1228] sm:$0xff] %v1356_v5  ;;  %v1358_v6 = vld [vmem:[%s10285_s26 + $0x2460] sm:$0xff]  ;;  %v1360_v7 = vld [vmem:[%s10285_s26 + $0x2468] sm:$0xff] }
 0x135   : > { %v1362_v8 = vld [vmem:[%s10285_s26 + $0x2480] sm:$0xff]  ;;  %1359 = vst [vmem:[%s10293_s27 + $0x1230] sm:$0xff] %v1358_v6  ;;  %1361 = vst [vmem:[%s10293_s27 + $0x1238] sm:$0xff] %v1360_v7  ;;  %v1364_v9 = vld [vmem:[%s10285_s26 + $0x2488] sm:$0xff] }
 0x136   : > { %1363 = vst [vmem:[%s10293_s27 + $0x1240] sm:$0xff] %v1362_v8  ;;  %v1366_v10 = vld [vmem:[%s10285_s26 + $0x24a0] sm:$0xff]  ;;  %v1368_v11 = vld [vmem:[%s10285_s26 + $0x24a8] sm:$0xff]  ;;  %1365 = vst [vmem:[%s10293_s27 + $0x1248] sm:$0xff] %v1364_v9 }
 0x137   : > { %1367 = vst [vmem:[%s10293_s27 + $0x1250] sm:$0xff] %v1366_v10  ;;  %1369 = vst [vmem:[%s10293_s27 + $0x1258] sm:$0xff] %v1368_v11  ;;  %v1370_v12 = vld [vmem:[%s10285_s26 + $0x24c0] sm:$0xff]  ;;  %v1372_v13 = vld [vmem:[%s10285_s26 + $0x24c8] sm:$0xff] }
 0x138   : > { %v1374_v14 = vld [vmem:[%s10285_s26 + $0x24e0] sm:$0xff]  ;;  %1371 = vst [vmem:[%s10293_s27 + $0x1260] sm:$0xff] %v1370_v12  ;;  %1373 = vst [vmem:[%s10293_s27 + $0x1268] sm:$0xff] %v1372_v13  ;;  %v1376_v15 = vld [vmem:[%s10285_s26 + $0x24e8] sm:$0xff] }
 0x139   : > { %1375 = vst [vmem:[%s10293_s27 + $0x1270] sm:$0xff] %v1374_v14  ;;  %v1378_v16 = vld [vmem:[%s10285_s26 + $0x2500] sm:$0xff]  ;;  %v1380_v17 = vld [vmem:[%s10285_s26 + $0x2508] sm:$0xff]  ;;  %1377 = vst [vmem:[%s10293_s27 + $0x1278] sm:$0xff] %v1376_v15 }
 0x13a   : > { %1379 = vst [vmem:[%s10293_s27 + $0x1280] sm:$0xff] %v1378_v16  ;;  %1381 = vst [vmem:[%s10293_s27 + $0x1288] sm:$0xff] %v1380_v17  ;;  %v1382_v18 = vld [vmem:[%s10285_s26 + $0x2520] sm:$0xff]  ;;  %v1384_v19 = vld [vmem:[%s10285_s26 + $0x2528] sm:$0xff] }
 0x13b   : > { %v1386_v20 = vld [vmem:[%s10285_s26 + $0x2540] sm:$0xff]  ;;  %1383 = vst [vmem:[%s10293_s27 + $0x1290] sm:$0xff] %v1382_v18  ;;  %1385 = vst [vmem:[%s10293_s27 + $0x1298] sm:$0xff] %v1384_v19  ;;  %v1388_v21 = vld [vmem:[%s10285_s26 + $0x2548] sm:$0xff] }
 0x13c   : > { %1387 = vst [vmem:[%s10293_s27 + $0x12a0] sm:$0xff] %v1386_v20  ;;  %v1390_v22 = vld [vmem:[%s10285_s26 + $0x2560] sm:$0xff]  ;;  %v1392_v23 = vld [vmem:[%s10285_s26 + $0x2568] sm:$0xff]  ;;  %1389 = vst [vmem:[%s10293_s27 + $0x12a8] sm:$0xff] %v1388_v21 }
 0x13d   : > { %1391 = vst [vmem:[%s10293_s27 + $0x12b0] sm:$0xff] %v1390_v22  ;;  %1393 = vst [vmem:[%s10293_s27 + $0x12b8] sm:$0xff] %v1392_v23  ;;  %v1394_v24 = vld [vmem:[%s10285_s26 + $0x2580] sm:$0xff]  ;;  %v1396_v25 = vld [vmem:[%s10285_s26 + $0x2588] sm:$0xff] }
 0x13e   : > { %v1398_v26 = vld [vmem:[%s10285_s26 + $0x25a0] sm:$0xff]  ;;  %1395 = vst [vmem:[%s10293_s27 + $0x12c0] sm:$0xff] %v1394_v24  ;;  %1397 = vst [vmem:[%s10293_s27 + $0x12c8] sm:$0xff] %v1396_v25  ;;  %v1400_v27 = vld [vmem:[%s10285_s26 + $0x25a8] sm:$0xff] }
 0x13f   : > { %1399 = vst [vmem:[%s10293_s27 + $0x12d0] sm:$0xff] %v1398_v26  ;;  %v1402_v28 = vld [vmem:[%s10285_s26 + $0x25c0] sm:$0xff]  ;;  %v1404_v29 = vld [vmem:[%s10285_s26 + $0x25c8] sm:$0xff]  ;;  %1401 = vst [vmem:[%s10293_s27 + $0x12d8] sm:$0xff] %v1400_v27 }
 0x140   : > { %1403 = vst [vmem:[%s10293_s27 + $0x12e0] sm:$0xff] %v1402_v28  ;;  %1405 = vst [vmem:[%s10293_s27 + $0x12e8] sm:$0xff] %v1404_v29  ;;  %v1406_v30 = vld [vmem:[%s10285_s26 + $0x25e0] sm:$0xff]  ;;  %v1408_v31 = vld [vmem:[%s10285_s26 + $0x25e8] sm:$0xff] }
 0x141   : > { %v1410_v32 = vld [vmem:[%s10285_s26 + $0x2600] sm:$0xff]  ;;  %1407 = vst [vmem:[%s10293_s27 + $0x12f0] sm:$0xff] %v1406_v30  ;;  %1409 = vst [vmem:[%s10293_s27 + $0x12f8] sm:$0xff] %v1408_v31  ;;  %v1412_v33 = vld [vmem:[%s10285_s26 + $0x2608] sm:$0xff] }
 0x142   : > { %1411 = vst [vmem:[%s10293_s27 + $0x1300] sm:$0xff] %v1410_v32  ;;  %v1414_v34 = vld [vmem:[%s10285_s26 + $0x2620] sm:$0xff]  ;;  %v1416_v35 = vld [vmem:[%s10285_s26 + $0x2628] sm:$0xff]  ;;  %1413 = vst [vmem:[%s10293_s27 + $0x1308] sm:$0xff] %v1412_v33 }
 0x143   : > { %1415 = vst [vmem:[%s10293_s27 + $0x1310] sm:$0xff] %v1414_v34  ;;  %1417 = vst [vmem:[%s10293_s27 + $0x1318] sm:$0xff] %v1416_v35  ;;  %v1418_v36 = vld [vmem:[%s10285_s26 + $0x2640] sm:$0xff]  ;;  %v1420_v37 = vld [vmem:[%s10285_s26 + $0x2648] sm:$0xff] }
 0x144   : > { %v1422_v38 = vld [vmem:[%s10285_s26 + $0x2660] sm:$0xff]  ;;  %1419 = vst [vmem:[%s10293_s27 + $0x1320] sm:$0xff] %v1418_v36  ;;  %1421 = vst [vmem:[%s10293_s27 + $0x1328] sm:$0xff] %v1420_v37  ;;  %v1424_v39 = vld [vmem:[%s10285_s26 + $0x2668] sm:$0xff] }
 0x145   : > { %1423 = vst [vmem:[%s10293_s27 + $0x1330] sm:$0xff] %v1422_v38  ;;  %v1426_v40 = vld [vmem:[%s10285_s26 + $0x2680] sm:$0xff]  ;;  %v1428_v41 = vld [vmem:[%s10285_s26 + $0x2688] sm:$0xff]  ;;  %1425 = vst [vmem:[%s10293_s27 + $0x1338] sm:$0xff] %v1424_v39 }
 0x146   : > { %1427 = vst [vmem:[%s10293_s27 + $0x1340] sm:$0xff] %v1426_v40  ;;  %1429 = vst [vmem:[%s10293_s27 + $0x1348] sm:$0xff] %v1428_v41  ;;  %v1430_v42 = vld [vmem:[%s10285_s26 + $0x26a0] sm:$0xff]  ;;  %v1432_v43 = vld [vmem:[%s10285_s26 + $0x26a8] sm:$0xff] }
 0x147   : > { %v1434_v44 = vld [vmem:[%s10285_s26 + $0x26c0] sm:$0xff]  ;;  %1431 = vst [vmem:[%s10293_s27 + $0x1350] sm:$0xff] %v1430_v42  ;;  %1433 = vst [vmem:[%s10293_s27 + $0x1358] sm:$0xff] %v1432_v43  ;;  %v1436_v45 = vld [vmem:[%s10285_s26 + $0x26c8] sm:$0xff] }
 0x148   : > { %1435 = vst [vmem:[%s10293_s27 + $0x1360] sm:$0xff] %v1434_v44  ;;  %v1438_v46 = vld [vmem:[%s10285_s26 + $0x26e0] sm:$0xff]  ;;  %v1440_v47 = vld [vmem:[%s10285_s26 + $0x26e8] sm:$0xff]  ;;  %1437 = vst [vmem:[%s10293_s27 + $0x1368] sm:$0xff] %v1436_v45 }
 0x149   : > { %1439 = vst [vmem:[%s10293_s27 + $0x1370] sm:$0xff] %v1438_v46  ;;  %1441 = vst [vmem:[%s10293_s27 + $0x1378] sm:$0xff] %v1440_v47  ;;  %v1442_v48 = vld [vmem:[%s10285_s26 + $0x2700] sm:$0xff]  ;;  %v1444_v49 = vld [vmem:[%s10285_s26 + $0x2708] sm:$0xff] }
 0x14a   : > { %v1446_v50 = vld [vmem:[%s10285_s26 + $0x2720] sm:$0xff]  ;;  %1443 = vst [vmem:[%s10293_s27 + $0x1380] sm:$0xff] %v1442_v48  ;;  %1445 = vst [vmem:[%s10293_s27 + $0x1388] sm:$0xff] %v1444_v49  ;;  %v1448_v51 = vld [vmem:[%s10285_s26 + $0x2728] sm:$0xff] }
 0x14b   : > { %1447 = vst [vmem:[%s10293_s27 + $0x1390] sm:$0xff] %v1446_v50  ;;  %v1450_v52 = vld [vmem:[%s10285_s26 + $0x2740] sm:$0xff]  ;;  %v1452_v53 = vld [vmem:[%s10285_s26 + $0x2748] sm:$0xff]  ;;  %1449 = vst [vmem:[%s10293_s27 + $0x1398] sm:$0xff] %v1448_v51 }
 0x14c   : > { %1451 = vst [vmem:[%s10293_s27 + $0x13a0] sm:$0xff] %v1450_v52  ;;  %1453 = vst [vmem:[%s10293_s27 + $0x13a8] sm:$0xff] %v1452_v53  ;;  %v1454_v54 = vld [vmem:[%s10285_s26 + $0x2760] sm:$0xff]  ;;  %v1456_v55 = vld [vmem:[%s10285_s26 + $0x2768] sm:$0xff] }
 0x14d   : > { %v1458_v56 = vld [vmem:[%s10285_s26 + $0x2780] sm:$0xff]  ;;  %1455 = vst [vmem:[%s10293_s27 + $0x13b0] sm:$0xff] %v1454_v54  ;;  %1457 = vst [vmem:[%s10293_s27 + $0x13b8] sm:$0xff] %v1456_v55  ;;  %v1460_v57 = vld [vmem:[%s10285_s26 + $0x2788] sm:$0xff] }
 0x14e   : > { %1459 = vst [vmem:[%s10293_s27 + $0x13c0] sm:$0xff] %v1458_v56  ;;  %v1462_v58 = vld [vmem:[%s10285_s26 + $0x27a0] sm:$0xff]  ;;  %v1464_v59 = vld [vmem:[%s10285_s26 + $0x27a8] sm:$0xff]  ;;  %1461 = vst [vmem:[%s10293_s27 + $0x13c8] sm:$0xff] %v1460_v57 }
 0x14f   : > { %1463 = vst [vmem:[%s10293_s27 + $0x13d0] sm:$0xff] %v1462_v58  ;;  %1465 = vst [vmem:[%s10293_s27 + $0x13d8] sm:$0xff] %v1464_v59  ;;  %v1466_v60 = vld [vmem:[%s10285_s26 + $0x27c0] sm:$0xff]  ;;  %v1468_v61 = vld [vmem:[%s10285_s26 + $0x27c8] sm:$0xff] }
 0x150   : > { %v1470_v62 = vld [vmem:[%s10285_s26 + $0x27e0] sm:$0xff]  ;;  %1467 = vst [vmem:[%s10293_s27 + $0x13e0] sm:$0xff] %v1466_v60  ;;  %1469 = vst [vmem:[%s10293_s27 + $0x13e8] sm:$0xff] %v1468_v61  ;;  %v1472_v63 = vld [vmem:[%s10285_s26 + $0x27e8] sm:$0xff] }
 0x151   : > { %1471 = vst [vmem:[%s10293_s27 + $0x13f0] sm:$0xff] %v1470_v62  ;;  %v1474_v0 = vld [vmem:[%s10285_s26 + $0x2800] sm:$0xff]  ;;  %v1476_v1 = vld [vmem:[%s10285_s26 + $0x2808] sm:$0xff]  ;;  %1473 = vst [vmem:[%s10293_s27 + $0x13f8] sm:$0xff] %v1472_v63 }
 0x152   : > { %1475 = vst [vmem:[%s10293_s27 + $0x1400] sm:$0xff] %v1474_v0  ;;  %1477 = vst [vmem:[%s10293_s27 + $0x1408] sm:$0xff] %v1476_v1  ;;  %v1478_v2 = vld [vmem:[%s10285_s26 + $0x2820] sm:$0xff]  ;;  %v1480_v3 = vld [vmem:[%s10285_s26 + $0x2828] sm:$0xff] }
 0x153   : > { %v1482_v4 = vld [vmem:[%s10285_s26 + $0x2840] sm:$0xff]  ;;  %1479 = vst [vmem:[%s10293_s27 + $0x1410] sm:$0xff] %v1478_v2  ;;  %1481 = vst [vmem:[%s10293_s27 + $0x1418] sm:$0xff] %v1480_v3  ;;  %v1484_v5 = vld [vmem:[%s10285_s26 + $0x2848] sm:$0xff] }
 0x154   : > { %1483 = vst [vmem:[%s10293_s27 + $0x1420] sm:$0xff] %v1482_v4  ;;  %v1486_v6 = vld [vmem:[%s10285_s26 + $0x2860] sm:$0xff]  ;;  %v1488_v7 = vld [vmem:[%s10285_s26 + $0x2868] sm:$0xff]  ;;  %1485 = vst [vmem:[%s10293_s27 + $0x1428] sm:$0xff] %v1484_v5 }
 0x155   : > { %1487 = vst [vmem:[%s10293_s27 + $0x1430] sm:$0xff] %v1486_v6  ;;  %1489 = vst [vmem:[%s10293_s27 + $0x1438] sm:$0xff] %v1488_v7  ;;  %v1490_v8 = vld [vmem:[%s10285_s26 + $0x2880] sm:$0xff]  ;;  %v1492_v9 = vld [vmem:[%s10285_s26 + $0x2888] sm:$0xff] }
 0x156   : > { %v1494_v10 = vld [vmem:[%s10285_s26 + $0x28a0] sm:$0xff]  ;;  %1491 = vst [vmem:[%s10293_s27 + $0x1440] sm:$0xff] %v1490_v8  ;;  %1493 = vst [vmem:[%s10293_s27 + $0x1448] sm:$0xff] %v1492_v9  ;;  %v1496_v11 = vld [vmem:[%s10285_s26 + $0x28a8] sm:$0xff] }
 0x157   : > { %1495 = vst [vmem:[%s10293_s27 + $0x1450] sm:$0xff] %v1494_v10  ;;  %v1498_v12 = vld [vmem:[%s10285_s26 + $0x28c0] sm:$0xff]  ;;  %v1500_v13 = vld [vmem:[%s10285_s26 + $0x28c8] sm:$0xff]  ;;  %1497 = vst [vmem:[%s10293_s27 + $0x1458] sm:$0xff] %v1496_v11 }
 0x158   : > { %1499 = vst [vmem:[%s10293_s27 + $0x1460] sm:$0xff] %v1498_v12  ;;  %1501 = vst [vmem:[%s10293_s27 + $0x1468] sm:$0xff] %v1500_v13  ;;  %v1502_v14 = vld [vmem:[%s10285_s26 + $0x28e0] sm:$0xff]  ;;  %v1504_v15 = vld [vmem:[%s10285_s26 + $0x28e8] sm:$0xff] }
 0x159   : > { %v1506_v16 = vld [vmem:[%s10285_s26 + $0x2900] sm:$0xff]  ;;  %1503 = vst [vmem:[%s10293_s27 + $0x1470] sm:$0xff] %v1502_v14  ;;  %1505 = vst [vmem:[%s10293_s27 + $0x1478] sm:$0xff] %v1504_v15  ;;  %v1508_v17 = vld [vmem:[%s10285_s26 + $0x2908] sm:$0xff] }
 0x15a   : > { %1507 = vst [vmem:[%s10293_s27 + $0x1480] sm:$0xff] %v1506_v16  ;;  %v1510_v18 = vld [vmem:[%s10285_s26 + $0x2920] sm:$0xff]  ;;  %v1512_v19 = vld [vmem:[%s10285_s26 + $0x2928] sm:$0xff]  ;;  %1509 = vst [vmem:[%s10293_s27 + $0x1488] sm:$0xff] %v1508_v17 }
 0x15b   : > { %1511 = vst [vmem:[%s10293_s27 + $0x1490] sm:$0xff] %v1510_v18  ;;  %1513 = vst [vmem:[%s10293_s27 + $0x1498] sm:$0xff] %v1512_v19  ;;  %v1514_v20 = vld [vmem:[%s10285_s26 + $0x2940] sm:$0xff]  ;;  %v1516_v21 = vld [vmem:[%s10285_s26 + $0x2948] sm:$0xff] }
 0x15c   : > { %v1518_v22 = vld [vmem:[%s10285_s26 + $0x2960] sm:$0xff]  ;;  %1515 = vst [vmem:[%s10293_s27 + $0x14a0] sm:$0xff] %v1514_v20  ;;  %1517 = vst [vmem:[%s10293_s27 + $0x14a8] sm:$0xff] %v1516_v21  ;;  %v1520_v23 = vld [vmem:[%s10285_s26 + $0x2968] sm:$0xff] }
 0x15d   : > { %1519 = vst [vmem:[%s10293_s27 + $0x14b0] sm:$0xff] %v1518_v22  ;;  %v1522_v24 = vld [vmem:[%s10285_s26 + $0x2980] sm:$0xff]  ;;  %v1524_v25 = vld [vmem:[%s10285_s26 + $0x2988] sm:$0xff]  ;;  %1521 = vst [vmem:[%s10293_s27 + $0x14b8] sm:$0xff] %v1520_v23 }
 0x15e   : > { %1523 = vst [vmem:[%s10293_s27 + $0x14c0] sm:$0xff] %v1522_v24  ;;  %1525 = vst [vmem:[%s10293_s27 + $0x14c8] sm:$0xff] %v1524_v25  ;;  %v1526_v26 = vld [vmem:[%s10285_s26 + $0x29a0] sm:$0xff]  ;;  %v1528_v27 = vld [vmem:[%s10285_s26 + $0x29a8] sm:$0xff] }
 0x15f   : > { %v1530_v28 = vld [vmem:[%s10285_s26 + $0x29c0] sm:$0xff]  ;;  %1527 = vst [vmem:[%s10293_s27 + $0x14d0] sm:$0xff] %v1526_v26  ;;  %1529 = vst [vmem:[%s10293_s27 + $0x14d8] sm:$0xff] %v1528_v27  ;;  %v1532_v29 = vld [vmem:[%s10285_s26 + $0x29c8] sm:$0xff] }
 0x160   : > { %1531 = vst [vmem:[%s10293_s27 + $0x14e0] sm:$0xff] %v1530_v28  ;;  %v1534_v30 = vld [vmem:[%s10285_s26 + $0x29e0] sm:$0xff]  ;;  %v1536_v31 = vld [vmem:[%s10285_s26 + $0x29e8] sm:$0xff]  ;;  %1533 = vst [vmem:[%s10293_s27 + $0x14e8] sm:$0xff] %v1532_v29 }
 0x161   : > { %1535 = vst [vmem:[%s10293_s27 + $0x14f0] sm:$0xff] %v1534_v30  ;;  %1537 = vst [vmem:[%s10293_s27 + $0x14f8] sm:$0xff] %v1536_v31  ;;  %v1538_v32 = vld [vmem:[%s10285_s26 + $0x2a00] sm:$0xff]  ;;  %v1540_v33 = vld [vmem:[%s10285_s26 + $0x2a08] sm:$0xff] }
 0x162   : > { %v1542_v34 = vld [vmem:[%s10285_s26 + $0x2a20] sm:$0xff]  ;;  %1539 = vst [vmem:[%s10293_s27 + $0x1500] sm:$0xff] %v1538_v32  ;;  %1541 = vst [vmem:[%s10293_s27 + $0x1508] sm:$0xff] %v1540_v33  ;;  %v1544_v35 = vld [vmem:[%s10285_s26 + $0x2a28] sm:$0xff] }
 0x163   : > { %1543 = vst [vmem:[%s10293_s27 + $0x1510] sm:$0xff] %v1542_v34  ;;  %v1546_v36 = vld [vmem:[%s10285_s26 + $0x2a40] sm:$0xff]  ;;  %v1548_v37 = vld [vmem:[%s10285_s26 + $0x2a48] sm:$0xff]  ;;  %1545 = vst [vmem:[%s10293_s27 + $0x1518] sm:$0xff] %v1544_v35 }
 0x164   : > { %1547 = vst [vmem:[%s10293_s27 + $0x1520] sm:$0xff] %v1546_v36  ;;  %1549 = vst [vmem:[%s10293_s27 + $0x1528] sm:$0xff] %v1548_v37  ;;  %v1550_v38 = vld [vmem:[%s10285_s26 + $0x2a60] sm:$0xff]  ;;  %v1552_v39 = vld [vmem:[%s10285_s26 + $0x2a68] sm:$0xff] }
 0x165   : > { %v1554_v40 = vld [vmem:[%s10285_s26 + $0x2a80] sm:$0xff]  ;;  %1551 = vst [vmem:[%s10293_s27 + $0x1530] sm:$0xff] %v1550_v38  ;;  %1553 = vst [vmem:[%s10293_s27 + $0x1538] sm:$0xff] %v1552_v39  ;;  %v1556_v41 = vld [vmem:[%s10285_s26 + $0x2a88] sm:$0xff] }
 0x166   : > { %1555 = vst [vmem:[%s10293_s27 + $0x1540] sm:$0xff] %v1554_v40  ;;  %v1558_v42 = vld [vmem:[%s10285_s26 + $0x2aa0] sm:$0xff]  ;;  %v1560_v43 = vld [vmem:[%s10285_s26 + $0x2aa8] sm:$0xff]  ;;  %1557 = vst [vmem:[%s10293_s27 + $0x1548] sm:$0xff] %v1556_v41 }
 0x167   : > { %1559 = vst [vmem:[%s10293_s27 + $0x1550] sm:$0xff] %v1558_v42  ;;  %1561 = vst [vmem:[%s10293_s27 + $0x1558] sm:$0xff] %v1560_v43  ;;  %v1562_v44 = vld [vmem:[%s10285_s26 + $0x2ac0] sm:$0xff]  ;;  %v1564_v45 = vld [vmem:[%s10285_s26 + $0x2ac8] sm:$0xff] }
 0x168   : > { %v1566_v46 = vld [vmem:[%s10285_s26 + $0x2ae0] sm:$0xff]  ;;  %1563 = vst [vmem:[%s10293_s27 + $0x1560] sm:$0xff] %v1562_v44  ;;  %1565 = vst [vmem:[%s10293_s27 + $0x1568] sm:$0xff] %v1564_v45  ;;  %v1568_v47 = vld [vmem:[%s10285_s26 + $0x2ae8] sm:$0xff] }
 0x169   : > { %1567 = vst [vmem:[%s10293_s27 + $0x1570] sm:$0xff] %v1566_v46  ;;  %v1570_v48 = vld [vmem:[%s10285_s26 + $0x2b00] sm:$0xff]  ;;  %v1572_v49 = vld [vmem:[%s10285_s26 + $0x2b08] sm:$0xff]  ;;  %1569 = vst [vmem:[%s10293_s27 + $0x1578] sm:$0xff] %v1568_v47 }
 0x16a   : > { %1571 = vst [vmem:[%s10293_s27 + $0x1580] sm:$0xff] %v1570_v48  ;;  %1573 = vst [vmem:[%s10293_s27 + $0x1588] sm:$0xff] %v1572_v49  ;;  %v1574_v50 = vld [vmem:[%s10285_s26 + $0x2b20] sm:$0xff]  ;;  %v1576_v51 = vld [vmem:[%s10285_s26 + $0x2b28] sm:$0xff] }
 0x16b   : > { %v1578_v52 = vld [vmem:[%s10285_s26 + $0x2b40] sm:$0xff]  ;;  %1575 = vst [vmem:[%s10293_s27 + $0x1590] sm:$0xff] %v1574_v50  ;;  %1577 = vst [vmem:[%s10293_s27 + $0x1598] sm:$0xff] %v1576_v51  ;;  %v1580_v53 = vld [vmem:[%s10285_s26 + $0x2b48] sm:$0xff] }
 0x16c   : > { %1579 = vst [vmem:[%s10293_s27 + $0x15a0] sm:$0xff] %v1578_v52  ;;  %v1582_v54 = vld [vmem:[%s10285_s26 + $0x2b60] sm:$0xff]  ;;  %v1584_v55 = vld [vmem:[%s10285_s26 + $0x2b68] sm:$0xff]  ;;  %1581 = vst [vmem:[%s10293_s27 + $0x15a8] sm:$0xff] %v1580_v53 }
 0x16d   : > { %1583 = vst [vmem:[%s10293_s27 + $0x15b0] sm:$0xff] %v1582_v54  ;;  %1585 = vst [vmem:[%s10293_s27 + $0x15b8] sm:$0xff] %v1584_v55  ;;  %v1586_v56 = vld [vmem:[%s10285_s26 + $0x2b80] sm:$0xff]  ;;  %v1588_v57 = vld [vmem:[%s10285_s26 + $0x2b88] sm:$0xff] }
 0x16e   : > { %v1590_v58 = vld [vmem:[%s10285_s26 + $0x2ba0] sm:$0xff]  ;;  %1587 = vst [vmem:[%s10293_s27 + $0x15c0] sm:$0xff] %v1586_v56  ;;  %1589 = vst [vmem:[%s10293_s27 + $0x15c8] sm:$0xff] %v1588_v57  ;;  %v1592_v59 = vld [vmem:[%s10285_s26 + $0x2ba8] sm:$0xff] }
 0x16f   : > { %1591 = vst [vmem:[%s10293_s27 + $0x15d0] sm:$0xff] %v1590_v58  ;;  %v1594_v60 = vld [vmem:[%s10285_s26 + $0x2bc0] sm:$0xff]  ;;  %v1596_v61 = vld [vmem:[%s10285_s26 + $0x2bc8] sm:$0xff]  ;;  %1593 = vst [vmem:[%s10293_s27 + $0x15d8] sm:$0xff] %v1592_v59 }
 0x170   : > { %1595 = vst [vmem:[%s10293_s27 + $0x15e0] sm:$0xff] %v1594_v60  ;;  %1597 = vst [vmem:[%s10293_s27 + $0x15e8] sm:$0xff] %v1596_v61  ;;  %v1598_v62 = vld [vmem:[%s10285_s26 + $0x2be0] sm:$0xff]  ;;  %v1600_v63 = vld [vmem:[%s10285_s26 + $0x2be8] sm:$0xff] }
 0x171   : > { %v1602_v0 = vld [vmem:[%s10285_s26 + $0x2c00] sm:$0xff]  ;;  %1599 = vst [vmem:[%s10293_s27 + $0x15f0] sm:$0xff] %v1598_v62  ;;  %1601 = vst [vmem:[%s10293_s27 + $0x15f8] sm:$0xff] %v1600_v63  ;;  %v1604_v1 = vld [vmem:[%s10285_s26 + $0x2c08] sm:$0xff] }
 0x172   : > { %1603 = vst [vmem:[%s10293_s27 + $0x1600] sm:$0xff] %v1602_v0  ;;  %v1606_v2 = vld [vmem:[%s10285_s26 + $0x2c20] sm:$0xff]  ;;  %v1608_v3 = vld [vmem:[%s10285_s26 + $0x2c28] sm:$0xff]  ;;  %1605 = vst [vmem:[%s10293_s27 + $0x1608] sm:$0xff] %v1604_v1 }
 0x173   : > { %1607 = vst [vmem:[%s10293_s27 + $0x1610] sm:$0xff] %v1606_v2  ;;  %1609 = vst [vmem:[%s10293_s27 + $0x1618] sm:$0xff] %v1608_v3  ;;  %v1610_v4 = vld [vmem:[%s10285_s26 + $0x2c40] sm:$0xff]  ;;  %v1612_v5 = vld [vmem:[%s10285_s26 + $0x2c48] sm:$0xff] }
 0x174   : > { %v1614_v6 = vld [vmem:[%s10285_s26 + $0x2c60] sm:$0xff]  ;;  %1611 = vst [vmem:[%s10293_s27 + $0x1620] sm:$0xff] %v1610_v4  ;;  %1613 = vst [vmem:[%s10293_s27 + $0x1628] sm:$0xff] %v1612_v5  ;;  %v1616_v7 = vld [vmem:[%s10285_s26 + $0x2c68] sm:$0xff] }
 0x175   : > { %1615 = vst [vmem:[%s10293_s27 + $0x1630] sm:$0xff] %v1614_v6  ;;  %v1618_v8 = vld [vmem:[%s10285_s26 + $0x2c80] sm:$0xff]  ;;  %v1620_v9 = vld [vmem:[%s10285_s26 + $0x2c88] sm:$0xff]  ;;  %1617 = vst [vmem:[%s10293_s27 + $0x1638] sm:$0xff] %v1616_v7 }
 0x176   : > { %1619 = vst [vmem:[%s10293_s27 + $0x1640] sm:$0xff] %v1618_v8  ;;  %1621 = vst [vmem:[%s10293_s27 + $0x1648] sm:$0xff] %v1620_v9  ;;  %v1622_v10 = vld [vmem:[%s10285_s26 + $0x2ca0] sm:$0xff]  ;;  %v1624_v11 = vld [vmem:[%s10285_s26 + $0x2ca8] sm:$0xff] }
 0x177   : > { %v1626_v12 = vld [vmem:[%s10285_s26 + $0x2cc0] sm:$0xff]  ;;  %1623 = vst [vmem:[%s10293_s27 + $0x1650] sm:$0xff] %v1622_v10  ;;  %1625 = vst [vmem:[%s10293_s27 + $0x1658] sm:$0xff] %v1624_v11  ;;  %v1628_v13 = vld [vmem:[%s10285_s26 + $0x2cc8] sm:$0xff] }
 0x178   : > { %1627 = vst [vmem:[%s10293_s27 + $0x1660] sm:$0xff] %v1626_v12  ;;  %v1630_v14 = vld [vmem:[%s10285_s26 + $0x2ce0] sm:$0xff]  ;;  %v1632_v15 = vld [vmem:[%s10285_s26 + $0x2ce8] sm:$0xff]  ;;  %1629 = vst [vmem:[%s10293_s27 + $0x1668] sm:$0xff] %v1628_v13 }
 0x179   : > { %1631 = vst [vmem:[%s10293_s27 + $0x1670] sm:$0xff] %v1630_v14  ;;  %1633 = vst [vmem:[%s10293_s27 + $0x1678] sm:$0xff] %v1632_v15  ;;  %v1634_v16 = vld [vmem:[%s10285_s26 + $0x2d00] sm:$0xff]  ;;  %v1636_v17 = vld [vmem:[%s10285_s26 + $0x2d08] sm:$0xff] }
 0x17a   : > { %v1638_v18 = vld [vmem:[%s10285_s26 + $0x2d20] sm:$0xff]  ;;  %1635 = vst [vmem:[%s10293_s27 + $0x1680] sm:$0xff] %v1634_v16  ;;  %1637 = vst [vmem:[%s10293_s27 + $0x1688] sm:$0xff] %v1636_v17  ;;  %v1640_v19 = vld [vmem:[%s10285_s26 + $0x2d28] sm:$0xff] }
 0x17b   : > { %1639 = vst [vmem:[%s10293_s27 + $0x1690] sm:$0xff] %v1638_v18  ;;  %v1642_v20 = vld [vmem:[%s10285_s26 + $0x2d40] sm:$0xff]  ;;  %v1644_v21 = vld [vmem:[%s10285_s26 + $0x2d48] sm:$0xff]  ;;  %1641 = vst [vmem:[%s10293_s27 + $0x1698] sm:$0xff] %v1640_v19 }
 0x17c   : > { %1643 = vst [vmem:[%s10293_s27 + $0x16a0] sm:$0xff] %v1642_v20  ;;  %1645 = vst [vmem:[%s10293_s27 + $0x16a8] sm:$0xff] %v1644_v21  ;;  %v1646_v22 = vld [vmem:[%s10285_s26 + $0x2d60] sm:$0xff]  ;;  %v1648_v23 = vld [vmem:[%s10285_s26 + $0x2d68] sm:$0xff] }
 0x17d   : > { %v1650_v24 = vld [vmem:[%s10285_s26 + $0x2d80] sm:$0xff]  ;;  %1647 = vst [vmem:[%s10293_s27 + $0x16b0] sm:$0xff] %v1646_v22  ;;  %1649 = vst [vmem:[%s10293_s27 + $0x16b8] sm:$0xff] %v1648_v23  ;;  %v1652_v25 = vld [vmem:[%s10285_s26 + $0x2d88] sm:$0xff] }
 0x17e   : > { %1651 = vst [vmem:[%s10293_s27 + $0x16c0] sm:$0xff] %v1650_v24  ;;  %v1654_v26 = vld [vmem:[%s10285_s26 + $0x2da0] sm:$0xff]  ;;  %v1656_v27 = vld [vmem:[%s10285_s26 + $0x2da8] sm:$0xff]  ;;  %1653 = vst [vmem:[%s10293_s27 + $0x16c8] sm:$0xff] %v1652_v25 }
 0x17f   : > { %1655 = vst [vmem:[%s10293_s27 + $0x16d0] sm:$0xff] %v1654_v26  ;;  %1657 = vst [vmem:[%s10293_s27 + $0x16d8] sm:$0xff] %v1656_v27  ;;  %v1658_v28 = vld [vmem:[%s10285_s26 + $0x2dc0] sm:$0xff]  ;;  %v1660_v29 = vld [vmem:[%s10285_s26 + $0x2dc8] sm:$0xff] }
 0x180   : > { %v1662_v30 = vld [vmem:[%s10285_s26 + $0x2de0] sm:$0xff]  ;;  %1659 = vst [vmem:[%s10293_s27 + $0x16e0] sm:$0xff] %v1658_v28  ;;  %1661 = vst [vmem:[%s10293_s27 + $0x16e8] sm:$0xff] %v1660_v29  ;;  %v1664_v31 = vld [vmem:[%s10285_s26 + $0x2de8] sm:$0xff] }
 0x181   : > { %1663 = vst [vmem:[%s10293_s27 + $0x16f0] sm:$0xff] %v1662_v30  ;;  %v1666_v32 = vld [vmem:[%s10285_s26 + $0x2e00] sm:$0xff]  ;;  %v1668_v33 = vld [vmem:[%s10285_s26 + $0x2e08] sm:$0xff]  ;;  %1665 = vst [vmem:[%s10293_s27 + $0x16f8] sm:$0xff] %v1664_v31 }
 0x182   : > { %1667 = vst [vmem:[%s10293_s27 + $0x1700] sm:$0xff] %v1666_v32  ;;  %1669 = vst [vmem:[%s10293_s27 + $0x1708] sm:$0xff] %v1668_v33  ;;  %v1670_v34 = vld [vmem:[%s10285_s26 + $0x2e20] sm:$0xff]  ;;  %v1672_v35 = vld [vmem:[%s10285_s26 + $0x2e28] sm:$0xff] }
 0x183   : > { %v1674_v36 = vld [vmem:[%s10285_s26 + $0x2e40] sm:$0xff]  ;;  %1671 = vst [vmem:[%s10293_s27 + $0x1710] sm:$0xff] %v1670_v34  ;;  %1673 = vst [vmem:[%s10293_s27 + $0x1718] sm:$0xff] %v1672_v35  ;;  %v1676_v37 = vld [vmem:[%s10285_s26 + $0x2e48] sm:$0xff] }
 0x184   : > { %1675 = vst [vmem:[%s10293_s27 + $0x1720] sm:$0xff] %v1674_v36  ;;  %v1678_v38 = vld [vmem:[%s10285_s26 + $0x2e60] sm:$0xff]  ;;  %v1680_v39 = vld [vmem:[%s10285_s26 + $0x2e68] sm:$0xff]  ;;  %1677 = vst [vmem:[%s10293_s27 + $0x1728] sm:$0xff] %v1676_v37 }
 0x185   : > { %1679 = vst [vmem:[%s10293_s27 + $0x1730] sm:$0xff] %v1678_v38  ;;  %1681 = vst [vmem:[%s10293_s27 + $0x1738] sm:$0xff] %v1680_v39  ;;  %v1682_v40 = vld [vmem:[%s10285_s26 + $0x2e80] sm:$0xff]  ;;  %v1684_v41 = vld [vmem:[%s10285_s26 + $0x2e88] sm:$0xff] }
 0x186   : > { %v1686_v42 = vld [vmem:[%s10285_s26 + $0x2ea0] sm:$0xff]  ;;  %1683 = vst [vmem:[%s10293_s27 + $0x1740] sm:$0xff] %v1682_v40  ;;  %1685 = vst [vmem:[%s10293_s27 + $0x1748] sm:$0xff] %v1684_v41  ;;  %v1688_v43 = vld [vmem:[%s10285_s26 + $0x2ea8] sm:$0xff] }
 0x187   : > { %1687 = vst [vmem:[%s10293_s27 + $0x1750] sm:$0xff] %v1686_v42  ;;  %v1690_v44 = vld [vmem:[%s10285_s26 + $0x2ec0] sm:$0xff]  ;;  %v1692_v45 = vld [vmem:[%s10285_s26 + $0x2ec8] sm:$0xff]  ;;  %1689 = vst [vmem:[%s10293_s27 + $0x1758] sm:$0xff] %v1688_v43 }
 0x188   : > { %1691 = vst [vmem:[%s10293_s27 + $0x1760] sm:$0xff] %v1690_v44  ;;  %1693 = vst [vmem:[%s10293_s27 + $0x1768] sm:$0xff] %v1692_v45  ;;  %v1694_v46 = vld [vmem:[%s10285_s26 + $0x2ee0] sm:$0xff]  ;;  %v1696_v47 = vld [vmem:[%s10285_s26 + $0x2ee8] sm:$0xff] }
 0x189   : > { %v1698_v48 = vld [vmem:[%s10285_s26 + $0x2f00] sm:$0xff]  ;;  %1695 = vst [vmem:[%s10293_s27 + $0x1770] sm:$0xff] %v1694_v46  ;;  %1697 = vst [vmem:[%s10293_s27 + $0x1778] sm:$0xff] %v1696_v47  ;;  %v1700_v49 = vld [vmem:[%s10285_s26 + $0x2f08] sm:$0xff] }
 0x18a   : > { %1699 = vst [vmem:[%s10293_s27 + $0x1780] sm:$0xff] %v1698_v48  ;;  %v1702_v50 = vld [vmem:[%s10285_s26 + $0x2f20] sm:$0xff]  ;;  %v1704_v51 = vld [vmem:[%s10285_s26 + $0x2f28] sm:$0xff]  ;;  %1701 = vst [vmem:[%s10293_s27 + $0x1788] sm:$0xff] %v1700_v49 }
 0x18b   : > { %1703 = vst [vmem:[%s10293_s27 + $0x1790] sm:$0xff] %v1702_v50  ;;  %1705 = vst [vmem:[%s10293_s27 + $0x1798] sm:$0xff] %v1704_v51  ;;  %v1706_v52 = vld [vmem:[%s10285_s26 + $0x2f40] sm:$0xff]  ;;  %v1708_v53 = vld [vmem:[%s10285_s26 + $0x2f48] sm:$0xff] }
 0x18c   : > { %v1710_v54 = vld [vmem:[%s10285_s26 + $0x2f60] sm:$0xff]  ;;  %1707 = vst [vmem:[%s10293_s27 + $0x17a0] sm:$0xff] %v1706_v52  ;;  %1709 = vst [vmem:[%s10293_s27 + $0x17a8] sm:$0xff] %v1708_v53  ;;  %v1712_v55 = vld [vmem:[%s10285_s26 + $0x2f68] sm:$0xff] }
 0x18d   : > { %1711 = vst [vmem:[%s10293_s27 + $0x17b0] sm:$0xff] %v1710_v54  ;;  %v1714_v56 = vld [vmem:[%s10285_s26 + $0x2f80] sm:$0xff]  ;;  %v1716_v57 = vld [vmem:[%s10285_s26 + $0x2f88] sm:$0xff]  ;;  %1713 = vst [vmem:[%s10293_s27 + $0x17b8] sm:$0xff] %v1712_v55 }
 0x18e   : > { %1715 = vst [vmem:[%s10293_s27 + $0x17c0] sm:$0xff] %v1714_v56  ;;  %1717 = vst [vmem:[%s10293_s27 + $0x17c8] sm:$0xff] %v1716_v57  ;;  %v1718_v58 = vld [vmem:[%s10285_s26 + $0x2fa0] sm:$0xff]  ;;  %v1720_v59 = vld [vmem:[%s10285_s26 + $0x2fa8] sm:$0xff] }
 0x18f   : > { %v1722_v60 = vld [vmem:[%s10285_s26 + $0x2fc0] sm:$0xff]  ;;  %1719 = vst [vmem:[%s10293_s27 + $0x17d0] sm:$0xff] %v1718_v58  ;;  %1721 = vst [vmem:[%s10293_s27 + $0x17d8] sm:$0xff] %v1720_v59  ;;  %v1724_v61 = vld [vmem:[%s10285_s26 + $0x2fc8] sm:$0xff] }
 0x190   : > { %1723 = vst [vmem:[%s10293_s27 + $0x17e0] sm:$0xff] %v1722_v60  ;;  %v1726_v62 = vld [vmem:[%s10285_s26 + $0x2fe0] sm:$0xff]  ;;  %v1728_v63 = vld [vmem:[%s10285_s26 + $0x2fe8] sm:$0xff]  ;;  %1725 = vst [vmem:[%s10293_s27 + $0x17e8] sm:$0xff] %v1724_v61 }
 0x191   : > { %1727 = vst [vmem:[%s10293_s27 + $0x17f0] sm:$0xff] %v1726_v62  ;;  %1729 = vst [vmem:[%s10293_s27 + $0x17f8] sm:$0xff] %v1728_v63  ;;  %v1730_v0 = vld [vmem:[%s10285_s26 + $0x3000] sm:$0xff]  ;;  %v1732_v1 = vld [vmem:[%s10285_s26 + $0x3008] sm:$0xff] }
 0x192   : > { %v1734_v2 = vld [vmem:[%s10285_s26 + $0x3020] sm:$0xff]  ;;  %1731 = vst [vmem:[%s10293_s27 + $0x1800] sm:$0xff] %v1730_v0  ;;  %1733 = vst [vmem:[%s10293_s27 + $0x1808] sm:$0xff] %v1732_v1  ;;  %v1736_v3 = vld [vmem:[%s10285_s26 + $0x3028] sm:$0xff] }
 0x193   : > { %1735 = vst [vmem:[%s10293_s27 + $0x1810] sm:$0xff] %v1734_v2  ;;  %v1738_v4 = vld [vmem:[%s10285_s26 + $0x3040] sm:$0xff]  ;;  %v1740_v5 = vld [vmem:[%s10285_s26 + $0x3048] sm:$0xff]  ;;  %1737 = vst [vmem:[%s10293_s27 + $0x1818] sm:$0xff] %v1736_v3 }
 0x194   : > { %1739 = vst [vmem:[%s10293_s27 + $0x1820] sm:$0xff] %v1738_v4  ;;  %1741 = vst [vmem:[%s10293_s27 + $0x1828] sm:$0xff] %v1740_v5  ;;  %v1742_v6 = vld [vmem:[%s10285_s26 + $0x3060] sm:$0xff]  ;;  %v1744_v7 = vld [vmem:[%s10285_s26 + $0x3068] sm:$0xff] }
 0x195   : > { %v1746_v8 = vld [vmem:[%s10285_s26 + $0x3080] sm:$0xff]  ;;  %1743 = vst [vmem:[%s10293_s27 + $0x1830] sm:$0xff] %v1742_v6  ;;  %1745 = vst [vmem:[%s10293_s27 + $0x1838] sm:$0xff] %v1744_v7  ;;  %v1748_v9 = vld [vmem:[%s10285_s26 + $0x3088] sm:$0xff] }
 0x196   : > { %1747 = vst [vmem:[%s10293_s27 + $0x1840] sm:$0xff] %v1746_v8  ;;  %v1750_v10 = vld [vmem:[%s10285_s26 + $0x30a0] sm:$0xff]  ;;  %v1752_v11 = vld [vmem:[%s10285_s26 + $0x30a8] sm:$0xff]  ;;  %1749 = vst [vmem:[%s10293_s27 + $0x1848] sm:$0xff] %v1748_v9 }
 0x197   : > { %1751 = vst [vmem:[%s10293_s27 + $0x1850] sm:$0xff] %v1750_v10  ;;  %1753 = vst [vmem:[%s10293_s27 + $0x1858] sm:$0xff] %v1752_v11  ;;  %v1754_v12 = vld [vmem:[%s10285_s26 + $0x30c0] sm:$0xff]  ;;  %v1756_v13 = vld [vmem:[%s10285_s26 + $0x30c8] sm:$0xff] }
 0x198   : > { %v1758_v14 = vld [vmem:[%s10285_s26 + $0x30e0] sm:$0xff]  ;;  %1755 = vst [vmem:[%s10293_s27 + $0x1860] sm:$0xff] %v1754_v12  ;;  %1757 = vst [vmem:[%s10293_s27 + $0x1868] sm:$0xff] %v1756_v13  ;;  %v1760_v15 = vld [vmem:[%s10285_s26 + $0x30e8] sm:$0xff] }
 0x199   : > { %1759 = vst [vmem:[%s10293_s27 + $0x1870] sm:$0xff] %v1758_v14  ;;  %1761 = vst [vmem:[%s10293_s27 + $0x1878] sm:$0xff] %v1760_v15 }
 0x19a PF: > { %p8061_p6 = scmp.ge.s32.totalorder %s10217_s16, 1  ;;  %p1774_p7 = scmp.lt.s32.totalorder %s10217_s16, 3 }
 0x19c   : > { %p1775_p8 = pnand %p8061_p6, %p1774_p7 }
 0x19d   : > { %s1781_s28 = sand.u32 (!%p1775_p8), 1, %s10201_s12   ;;  %v2647_v16 = vlaneseq (!%p1775_p8)  ;;  %v10219_v17 = vmov (!%p1775_p8), 1966171168   ;;  %v11865_v20 = vld [vmem:[%s12829_s0] sm:$0xff] (!%p1775_p8)  ;;  %vm6748_vm0 = vcmask (!%p1775_p8), 523264   ;;  %s8062_s19 = sshll.u32 (!%p1775_p8), %s10209_s14, 2 }
 0x19e   : > { %1778 = sbr.rel (%p1775_p8) target bundleno = 1439 (0x59f), region = 51  ;;  %v2645_v18 = vunpack.c.l.s4 (!%p1775_p8), %v10219_v17  ;;  %p1831_p9 = scmp.lt.s32.totalorder (!%p1775_p8), %s8062_s19, 7 }
 0x19f   : > { %s8954_s29 = smul.u32 (!%p1775_p8), 6272, %s1781_s28  ;;  %v11860_v19 = vshrl.u32 (!%p1775_p8), %v2647_v16, 7 }
 0x1a0   : > { %v2646_v21 = vunpack.c.0.s8 (!%p1775_p8), %v2645_v18 }
 0x1a1   : > { %s11867_s5 = scalar_lea.vmem (!%p1775_p8), [#allocation3], %s8954_s29 }
 0x1a2   : > { %v8998_v22 = vld [vmem:[%s11867_s5 + $0x4] ss:$16 sps:$4 sm:$0xff] (!%p1775_p8)   ;;  %v9000_v23 = vld [vmem:[%s11867_s5 + $0xc] ss:$16 sps:$4 sm:$0xff] (!%p1775_p8)   ;;  %v11872_v24 = vsub.s32 (!%p1775_p8), %v2646_v21, %v11860_v19  ;;  %v9002_v25 = vld [vmem:[%s11867_s5] ss:$16 sps:$4 sm:$0xff] (!%p1775_p8)  }
 0x1a3   : > { %6752 = vmatprep.subr.bf16.mxu0 (!%p1775_p8), %v8998_v22  ;;  %v9003_v26 = vld [vmem:[%s11867_s5 + $0x8] ss:$16 sps:$4 sm:$0xff] (!%p1775_p8)   ;;  %7285 = vmatprep.subr.bf16.mxu1 (!%p1775_p8), %v9000_v23  ;;  %v9004_v27 = vld [vmem:[%s11867_s5 + $0x24] ss:$16 sps:$4 sm:$0xff] (!%p1775_p8)   ;;  %v9006_v29 = vld [vmem:[%s11867_s5 + $0x2c] ss:$16 sps:$4 sm:$0xff] (!%p1775_p8)  }
 0x1a4   : > { %v11879_v28 = vrot.slane (!%p1775_p8), %v11865_v20, %v11872_v24  ;;  %6753 = vmatpush1.bf16.msra.mxu0 (!%p1775_p8), %v9002_v25  ;;  %7286 = vmatpush1.bf16.msra.mxu1 (!%p1775_p8), %v9003_v26  ;;  %v9008_v30 = vld [vmem:[%s11867_s5 + $0x20] ss:$16 sps:$4 sm:$0xff] (!%p1775_p8)   ;;  %v9009_v31 = vld [vmem:[%s11867_s5 + $0x28] ss:$16 sps:$4 sm:$0xff] (!%p1775_p8)   ;;  %v9010_v33 = vld [vmem:[%s11867_s5 + $0x44] ss:$16 sps:$4 sm:$0xff] (!%p1775_p8)  }
 0x1a5   : > { %6754 = vmatprep.subr.bf16.mxu0 %v9004_v27  ;;  %7287 = vmatprep.subr.bf16.mxu1 %v9006_v29  ;;  %v9012_v34 = vld [vmem:[%s11867_s5 + $0x4c] ss:$16 sps:$4 sm:$0xff]   ;;  %v9014_v35 = vld [vmem:[%s11867_s5 + $0x40] ss:$16 sps:$4 sm:$0xff]   ;;  %v9015_v36 = vld [vmem:[%s11867_s5 + $0x48] ss:$16 sps:$4 sm:$0xff]  }
 0x1a6   : > { %v2658_v32 = vcombine.high %v11879_v28, %v11879_v28  ;;  %v9016_v38 = vld [vmem:[%s11867_s5 + $0x64] ss:$16 sps:$4 sm:$0xff]   ;;  %v9018_v39 = vld [vmem:[%s11867_s5 + $0x6c] ss:$16 sps:$4 sm:$0xff]   ;;  %v9020_v40 = vld [vmem:[%s11867_s5 + $0x60] ss:$16 sps:$4 sm:$0xff]  }
 0x1a7   : > { %v9021_v41 = vld [vmem:[%s11867_s5 + $0x68] ss:$16 sps:$4 sm:$0xff]   ;;  %v9022_v42 = vld [vmem:[%s11867_s5 + $0x84] ss:$16 sps:$4 sm:$0xff]   ;;  %v9024_v43 = vld [vmem:[%s11867_s5 + $0x8c] ss:$16 sps:$4 sm:$0xff]  }
 0x1a8   : > { %v11891_v37 = vrot.slane %v2658_v32, %v11872_v24  ;;  %6755 = vmatpush1.bf16.msra.mxu0 %v9008_v30  ;;  %7288 = vmatpush1.bf16.msra.mxu1 %v9009_v31  ;;  %v9026_v44 = vld [vmem:[%s11867_s5 + $0x80] ss:$16 sps:$4 sm:$0xff]   ;;  %v9027_v45 = vld [vmem:[%s11867_s5 + $0x88] ss:$16 sps:$4 sm:$0xff]   ;;  %v9028_v46 = vld [vmem:[%s11867_s5 + $0xa4] ss:$16 sps:$4 sm:$0xff]  }
 0x1a9   : > { %6756 = vmatprep.subr.bf16.mxu0 %v9010_v33  ;;  %7289 = vmatprep.subr.bf16.mxu1 %v9012_v34  ;;  %v9030_v47 = vld [vmem:[%s11867_s5 + $0xac] ss:$16 sps:$4 sm:$0xff]   ;;  %v9032_v48 = vld [vmem:[%s11867_s5 + $0xa0] ss:$16 sps:$4 sm:$0xff]   ;;  %v9033_v49 = vld [vmem:[%s11867_s5 + $0xa8] ss:$16 sps:$4 sm:$0xff]   ;;  %v11953_v34 = vrot.slane %v11879_v28, %v11872_v24 }
 0x1aa   : > { %6784 = vmatprep.mubr.bf16.mxu0 %v11891_v37  ;;  %7317 = vmatprep.mubr.bf16.mxu1 %v11891_v37  ;;  %v9034_v50 = vld [vmem:[%s11867_s5 + $0xc4] ss:$16 sps:$4 sm:$0xff]   ;;  %v9036_v51 = vld [vmem:[%s11867_s5 + $0xcc] ss:$16 sps:$4 sm:$0xff]   ;;  %v9038_v52 = vld [vmem:[%s11867_s5 + $0xc0] ss:$16 sps:$4 sm:$0xff]  }
 0x1ab   : > { %v9039_v53 = vld [vmem:[%s11867_s5 + $0xc8] ss:$16 sps:$4 sm:$0xff]   ;;  %v9040_v54 = vld [vmem:[%s11867_s5 + $0xe4] ss:$16 sps:$4 sm:$0xff]   ;;  %v9042_v55 = vld [vmem:[%s11867_s5 + $0xec] ss:$16 sps:$4 sm:$0xff]  }
 0x1ac   : > { %6757 = vmatpush1.bf16.msra.mxu0 %v9014_v35  ;;  %7290 = vmatpush1.bf16.msra.mxu1 %v9015_v36  ;;  %v9044_v56 = vld [vmem:[%s11867_s5 + $0xe0] ss:$16 sps:$4 sm:$0xff]   ;;  %v9045_v57 = vld [vmem:[%s11867_s5 + $0xe8] ss:$16 sps:$4 sm:$0xff]   ;;  %v9046_v58 = vld [vmem:[%s11867_s5 + $0x104] ss:$16 sps:$4 sm:$0xff]  }
 0x1ad   : > { %6758 = vmatprep.subr.bf16.mxu0 %v9016_v38  ;;  %7291 = vmatprep.subr.bf16.mxu1 %v9018_v39  ;;  %v9048_v59 = vld [vmem:[%s11867_s5 + $0x10c] ss:$16 sps:$4 sm:$0xff]   ;;  %v9050_v60 = vld [vmem:[%s11867_s5 + $0x100] ss:$16 sps:$4 sm:$0xff]   ;;  %v9051_v61 = vld [vmem:[%s11867_s5 + $0x108] ss:$16 sps:$4 sm:$0xff]   ;;  %v2690_v38 = vcombine.high %v11891_v37, %v11891_v37 }
 0x1ae   : > { %v9052_v62 = vld [vmem:[%s11867_s5 + $0x124] ss:$16 sps:$4 sm:$0xff]   ;;  %v9054_v63 = vld [vmem:[%s11867_s5 + $0x12c] ss:$16 sps:$4 sm:$0xff]   ;;  %v9056_v0 = vld [vmem:[%s11867_s5 + $0x120] ss:$16 sps:$4 sm:$0xff]  }
 0x1af   : > { %v9057_v1 = vld [vmem:[%s11867_s5 + $0x128] ss:$16 sps:$4 sm:$0xff]   ;;  %v9058_v2 = vld [vmem:[%s11867_s5 + $0x144] ss:$16 sps:$4 sm:$0xff]   ;;  %v9060_v3 = vld [vmem:[%s11867_s5 + $0x14c] ss:$16 sps:$4 sm:$0xff]  }
 0x1b0   : > { %6759 = vmatpush1.bf16.msra.mxu0 %v9020_v40  ;;  %7292 = vmatpush1.bf16.msra.mxu1 %v9021_v41  ;;  %v9062_v4 = vld [vmem:[%s11867_s5 + $0x140] ss:$16 sps:$4 sm:$0xff]   ;;  %v9063_v5 = vld [vmem:[%s11867_s5 + $0x148] ss:$16 sps:$4 sm:$0xff]   ;;  %v9064_v6 = vld [vmem:[%s11867_s5 + $0x164] ss:$16 sps:$4 sm:$0xff]  }
 0x1b1   : > { %6760 = vmatprep.subr.bf16.mxu0 %v9022_v42  ;;  %7293 = vmatprep.subr.bf16.mxu1 %v9024_v43  ;;  %v9066_v7 = vld [vmem:[%s11867_s5 + $0x16c] ss:$16 sps:$4 sm:$0xff]   ;;  %v9068_v8 = vld [vmem:[%s11867_s5 + $0x160] ss:$16 sps:$4 sm:$0xff]   ;;  %v9069_v9 = vld [vmem:[%s11867_s5 + $0x168] ss:$16 sps:$4 sm:$0xff]  }
 0x1b2   : > { %v9070_v10 = vld [vmem:[%s11867_s5 + $0x184] ss:$16 sps:$4 sm:$0xff]   ;;  %v9072_v11 = vld [vmem:[%s11867_s5 + $0x18c] ss:$16 sps:$4 sm:$0xff]   ;;  %v9074_v12 = vld [vmem:[%s11867_s5 + $0x180] ss:$16 sps:$4 sm:$0xff]  }
 0x1b3   : > { %v9075_v13 = vld [vmem:[%s11867_s5 + $0x188] ss:$16 sps:$4 sm:$0xff]   ;;  %v9076_v14 = vld [vmem:[%s11867_s5 + $0x1a4] ss:$16 sps:$4 sm:$0xff]   ;;  %v9078_v15 = vld [vmem:[%s11867_s5 + $0x1ac] ss:$16 sps:$4 sm:$0xff]  }
 0x1b4   : > { %6761 = vmatpush1.bf16.msra.mxu0 %v9026_v44  ;;  %7294 = vmatpush1.bf16.msra.mxu1 %v9027_v45  ;;  %v9080_v16 = vld [vmem:[%s11867_s5 + $0x1a0] ss:$16 sps:$4 sm:$0xff]   ;;  %v9081_v17 = vld [vmem:[%s11867_s5 + $0x1a8] ss:$16 sps:$4 sm:$0xff]   ;;  %v9082_v18 = vld [vmem:[%s11867_s5 + $0x1c4] ss:$16 sps:$4 sm:$0xff]  }
 0x1b5   : > { %6762 = vmatprep.subr.bf16.mxu0 %v9028_v46  ;;  %7295 = vmatprep.subr.bf16.mxu1 %v9030_v47  ;;  %v9084_v21 = vld [vmem:[%s11867_s5 + $0x1cc] ss:$16 sps:$4 sm:$0xff]   ;;  %v9086_v22 = vld [vmem:[%s11867_s5 + $0x1c0] ss:$16 sps:$4 sm:$0xff]   ;;  %v9087_v23 = vld [vmem:[%s11867_s5 + $0x1c8] ss:$16 sps:$4 sm:$0xff]  }
 0x1b6   : > { %v9088_v25 = vld [vmem:[%s11867_s5 + $0x1e4] ss:$16 sps:$4 sm:$0xff]   ;;  %v9090_v26 = vld [vmem:[%s11867_s5 + $0x1ec] ss:$16 sps:$4 sm:$0xff]   ;;  %v9092_v27 = vld [vmem:[%s11867_s5 + $0x1e0] ss:$16 sps:$4 sm:$0xff]  }
 0x1b7   : > { %v9093_v29 = vld [vmem:[%s11867_s5 + $0x1e8] ss:$16 sps:$4 sm:$0xff]   ;;  %v9096_v30 = vld [vmem:[%s11867_s5 + $0x204] ss:$16 sps:$4 sm:$0xff]   ;;  %v9099_v31 = vld [vmem:[%s11867_s5 + $0x20c] ss:$16 sps:$4 sm:$0xff]  }
 0x1b8   : > { %6763 = vmatpush1.bf16.msra.mxu0 %v9032_v48  ;;  %7296 = vmatpush1.bf16.msra.mxu1 %v9033_v49  ;;  %v9094_v32 = vld [vmem:[%s11867_s5 + $0x200] ss:$16 sps:$4 sm:$0xff]   ;;  %v9097_v33 = vld [vmem:[%s11867_s5 + $0x208] ss:$16 sps:$4 sm:$0xff]   ;;  %v9102_v35 = vld [vmem:[%s11867_s5 + $0x224] ss:$16 sps:$4 sm:$0xff]  }
 0x1b9   : > { %6764 = vmatprep.subr.bf16.mxu0 %v9034_v50  ;;  %7297 = vmatprep.subr.bf16.mxu1 %v9036_v51  ;;  %v9105_v36 = vld [vmem:[%s11867_s5 + $0x22c] ss:$16 sps:$4 sm:$0xff]   ;;  %v9100_v39 = vld [vmem:[%s11867_s5 + $0x220] ss:$16 sps:$4 sm:$0xff]   ;;  %v9103_v28 = vld [vmem:[%s11867_s5 + $0x228] ss:$16 sps:$4 sm:$0xff]  }
 0x1ba   : > { %v9108_v40 = vld [vmem:[%s11867_s5 + $0x244] ss:$16 sps:$4 sm:$0xff]   ;;  %v9111_v41 = vld [vmem:[%s11867_s5 + $0x24c] ss:$16 sps:$4 sm:$0xff]   ;;  %v9106_v37 = vld [vmem:[%s11867_s5 + $0x240] ss:$16 sps:$4 sm:$0xff]  }
 0x1bb   : > { %v9109_v42 = vld [vmem:[%s11867_s5 + $0x248] ss:$16 sps:$4 sm:$0xff]   ;;  %v9114_v43 = vld [vmem:[%s11867_s5 + $0x264] ss:$16 sps:$4 sm:$0xff]   ;;  %v9117_v44 = vld [vmem:[%s11867_s5 + $0x26c] ss:$16 sps:$4 sm:$0xff]  }
 0x1bc   : > { %6765 = vmatpush1.bf16.msra.mxu0 %v9038_v52  ;;  %7298 = vmatpush1.bf16.msra.mxu1 %v9039_v53  ;;  %v9112_v45 = vld [vmem:[%s11867_s5 + $0x260] ss:$16 sps:$4 sm:$0xff]   ;;  %v9115_v46 = vld [vmem:[%s11867_s5 + $0x268] ss:$16 sps:$4 sm:$0xff]   ;;  %v9120_v47 = vld [vmem:[%s11867_s5 + $0x284] ss:$16 sps:$4 sm:$0xff]  }
 0x1bd   : > { %6766 = vmatprep.subr.bf16.mxu0 %v9040_v54  ;;  %7299 = vmatprep.subr.bf16.mxu1 %v9042_v55  ;;  %v9123_v48 = vld [vmem:[%s11867_s5 + $0x28c] ss:$16 sps:$4 sm:$0xff]   ;;  %v9118_v49 = vld [vmem:[%s11867_s5 + $0x280] ss:$16 sps:$4 sm:$0xff]   ;;  %v9121_v50 = vld [vmem:[%s11867_s5 + $0x288] ss:$16 sps:$4 sm:$0xff]  }
 0x1be   : > { %v9126_v51 = vld [vmem:[%s11867_s5 + $0x2a4] ss:$16 sps:$4 sm:$0xff]   ;;  %v9129_v52 = vld [vmem:[%s11867_s5 + $0x2ac] ss:$16 sps:$4 sm:$0xff]   ;;  %v9124_v53 = vld [vmem:[%s11867_s5 + $0x2a0] ss:$16 sps:$4 sm:$0xff]  }
 0x1bf   : > { %v9127_v54 = vld [vmem:[%s11867_s5 + $0x2a8] ss:$16 sps:$4 sm:$0xff]   ;;  %v9132_v55 = vld [vmem:[%s11867_s5 + $0x2c4] ss:$16 sps:$4 sm:$0xff]   ;;  %s12840_s19 = smov (!%p1831_p9, %s8062_s19), 7 }
 0x1c0   : > { %6767 = vmatpush1.bf16.msra.mxu0 %v9044_v56  ;;  %7300 = vmatpush1.bf16.msra.mxu1 %v9045_v57  ;;  %v9135_v56 = vld [vmem:[%s11867_s5 + $0x2cc] ss:$16 sps:$4 sm:$0xff]   ;;  %v9130_v57 = vld [vmem:[%s11867_s5 + $0x2c0] ss:$16 sps:$4 sm:$0xff]   ;;  %s1833_s23 = scalar_lea.vmem %s12831_s2, %s12840_s19  ;;  %s1842_s25 = scalar_lea.vmem %s12832_s3, %s12840_s19 }
 0x1c1   : > { %6768 = vmatprep.subr.bf16.mxu0 %v9046_v58  ;;  %7301 = vmatprep.subr.bf16.mxu1 %v9048_v59  ;;  %v9133_v58 = vld [vmem:[%s11867_s5 + $0x2c8] ss:$16 sps:$4 sm:$0xff]   ;;  %v9138_v59 = vld [vmem:[%s11867_s5 + $0x2e4] ss:$16 sps:$4 sm:$0xff]  }
 0x1c4   : > { %6769 = vmatpush1.bf16.msra.mxu0 %v9050_v60  ;;  %7302 = vmatpush1.bf16.msra.mxu1 %v9051_v61  ;;  %v9141_v60 = vld [vmem:[%s11867_s5 + $0x2ec] ss:$16 sps:$4 sm:$0xff]   ;;  %v9136_v61 = vld [vmem:[%s11867_s5 + $0x2e0] ss:$16 sps:$4 sm:$0xff]  }
 0x1c5   : > { %6770 = vmatprep.subr.bf16.mxu0 %v9052_v62  ;;  %7303 = vmatprep.subr.bf16.mxu1 %v9054_v63  ;;  %v9139_v62 = vld [vmem:[%s11867_s5 + $0x2e8] ss:$16 sps:$4 sm:$0xff]   ;;  %v9144_v63 = vld [vmem:[%s11867_s5 + $0x304] ss:$16 sps:$4 sm:$0xff]  }
 0x1c8   : > { %6771 = vmatpush1.bf16.msra.mxu0 %v9056_v0  ;;  %7304 = vmatpush1.bf16.msra.mxu1 %v9057_v1  ;;  %v9147_v0 = vld [vmem:[%s11867_s5 + $0x30c] ss:$16 sps:$4 sm:$0xff]   ;;  %v9142_v1 = vld [vmem:[%s11867_s5 + $0x300] ss:$16 sps:$4 sm:$0xff]  }
 0x1c9   : > { %6772 = vmatprep.subr.bf16.mxu0 %v9058_v2  ;;  %7305 = vmatprep.subr.bf16.mxu1 %v9060_v3  ;;  %v9145_v2 = vld [vmem:[%s11867_s5 + $0x308] ss:$16 sps:$4 sm:$0xff]   ;;  %v9150_v3 = vld [vmem:[%s11867_s5 + $0x324] ss:$16 sps:$4 sm:$0xff]  }
 0x1cc   : > { %6773 = vmatpush1.bf16.msra.mxu0 %v9062_v4  ;;  %7306 = vmatpush1.bf16.msra.mxu1 %v9063_v5  ;;  %v9153_v4 = vld [vmem:[%s11867_s5 + $0x32c] ss:$16 sps:$4 sm:$0xff]   ;;  %v9148_v5 = vld [vmem:[%s11867_s5 + $0x320] ss:$16 sps:$4 sm:$0xff]  }
 0x1cd   : > { %6774 = vmatprep.subr.bf16.mxu0 %v9064_v6  ;;  %7307 = vmatprep.subr.bf16.mxu1 %v9066_v7  ;;  %v9151_v6 = vld [vmem:[%s11867_s5 + $0x328] ss:$16 sps:$4 sm:$0xff]   ;;  %v9156_v7 = vld [vmem:[%s11867_s5 + $0x344] ss:$16 sps:$4 sm:$0xff]  }
 0x1d0   : > { %6775 = vmatpush1.bf16.msra.mxu0 %v9068_v8  ;;  %7308 = vmatpush1.bf16.msra.mxu1 %v9069_v9  ;;  %v9159_v8 = vld [vmem:[%s11867_s5 + $0x34c] ss:$16 sps:$4 sm:$0xff]   ;;  %v9154_v9 = vld [vmem:[%s11867_s5 + $0x340] ss:$16 sps:$4 sm:$0xff]  }
 0x1d1   : > { %6776 = vmatprep.subr.bf16.mxu0 %v9070_v10  ;;  %7309 = vmatprep.subr.bf16.mxu1 %v9072_v11  ;;  %v9157_v10 = vld [vmem:[%s11867_s5 + $0x348] ss:$16 sps:$4 sm:$0xff]   ;;  %v9162_v11 = vld [vmem:[%s11867_s5 + $0x364] ss:$16 sps:$4 sm:$0xff]  }
 0x1d4   : > { %6777 = vmatpush1.bf16.msra.mxu0 %v9074_v12  ;;  %7310 = vmatpush1.bf16.msra.mxu1 %v9075_v13  ;;  %v9165_v12 = vld [vmem:[%s11867_s5 + $0x36c] ss:$16 sps:$4 sm:$0xff]   ;;  %v9160_v13 = vld [vmem:[%s11867_s5 + $0x360] ss:$16 sps:$4 sm:$0xff]  }
 0x1d5   : > { %6778 = vmatprep.subr.bf16.mxu0 %v9076_v14  ;;  %7311 = vmatprep.subr.bf16.mxu1 %v9078_v15  ;;  %v9163_v14 = vld [vmem:[%s11867_s5 + $0x368] ss:$16 sps:$4 sm:$0xff]   ;;  %v9168_v15 = vld [vmem:[%s11867_s5 + $0x384] ss:$16 sps:$4 sm:$0xff]  }
 0x1d8   : > { %6779 = vmatpush1.bf16.msra.mxu0 %v9080_v16  ;;  %7312 = vmatpush1.bf16.msra.mxu1 %v9081_v17  ;;  %v9171_v16 = vld [vmem:[%s11867_s5 + $0x38c] ss:$16 sps:$4 sm:$0xff]   ;;  %v9166_v17 = vld [vmem:[%s11867_s5 + $0x380] ss:$16 sps:$4 sm:$0xff]  }
 0x1d9   : > { %6780 = vmatprep.subr.bf16.mxu0 %v9082_v18  ;;  %7313 = vmatprep.subr.bf16.mxu1 %v9084_v21  ;;  %v9169_v18 = vld [vmem:[%s11867_s5 + $0x388] ss:$16 sps:$4 sm:$0xff]   ;;  %v9174_v21 = vld [vmem:[%s11867_s5 + $0x3a4] ss:$16 sps:$4 sm:$0xff]  }
 0x1dc   : > { %6781 = vmatpush1.bf16.msra.mxu0 %v9086_v22  ;;  %7314 = vmatpush1.bf16.msra.mxu1 %v9087_v23  ;;  %v9177_v22 = vld [vmem:[%s11867_s5 + $0x3ac] ss:$16 sps:$4 sm:$0xff]   ;;  %v9172_v23 = vld [vmem:[%s11867_s5 + $0x3a0] ss:$16 sps:$4 sm:$0xff]  }
 0x1dd   : > { %6782 = vmatprep.subr.bf16.mxu0 %v9088_v25  ;;  %7315 = vmatprep.subr.bf16.mxu1 %v9090_v26  ;;  %v9175_v25 = vld [vmem:[%s11867_s5 + $0x3a8] ss:$16 sps:$4 sm:$0xff]   ;;  %v9180_v26 = vld [vmem:[%s11867_s5 + $0x3c4] ss:$16 sps:$4 sm:$0xff]  }
 0x1e0   : > { %6783 = vmatpush1.bf16.msra.mxu0 %v9092_v27  ;;  %7316 = vmatpush1.bf16.msra.mxu1 %v9093_v29  ;;  %v9183_v27 = vld [vmem:[%s11867_s5 + $0x3cc] ss:$16 sps:$4 sm:$0xff]   ;;  %v2643_v29 = vcombine.high %v11865_v20, %v11865_v20  ;;  %v9192_v20 = vld [vmem:[%s11867_s5 + $0x404] ss:$16 sps:$4 sm:$0xff]  }
 0x1e1   : > { %6793 = vmatprep.subr.bf16.mxu0 %v9096_v30  ;;  %7326 = vmatprep.subr.bf16.mxu1 %v9099_v31  ;;  %v9178_v30 = vld [vmem:[%s11867_s5 + $0x3c0] ss:$16 sps:$4 sm:$0xff]   ;;  %v9181_v31 = vld [vmem:[%s11867_s5 + $0x3c8] ss:$16 sps:$4 sm:$0xff]  }
 0x1e3   : > { %6785 = vmatmul.mubr.bf16.vlgmr.msra.gmra.mrb[0].mxu0 %v11953_v34  ;;  %7318 = vmatmul.mubr.bf16.vlgmr.msra.gmra.mrb[0].mxu1 %v11953_v34 }
 0x1e4   : > { %6794 = vmatpush1.bf16.msra.mxu0 %v9094_v32  ;;  %7327 = vmatpush1.bf16.msra.mxu1 %v9097_v33  ;;  %v9186_v32 = vld [vmem:[%s11867_s5 + $0x3e4] ss:$16 sps:$4 sm:$0xff]   ;;  %v9189_v33 = vld [vmem:[%s11867_s5 + $0x3ec] ss:$16 sps:$4 sm:$0xff]  }
 0x1e5   : > { %6795 = vmatprep.subr.bf16.mxu0 %v9102_v35  ;;  %7328 = vmatprep.subr.bf16.mxu1 %v9105_v36  ;;  %v12020_v35 = vrot.slane %v2643_v29, %v11872_v24  ;;  %v9184_v36 = vld [vmem:[%s11867_s5 + $0x3e0] ss:$16 sps:$4 sm:$0xff]   ;;  %v9265_v29 = vld [vmem:[%s11867_s5 + $0x588] ss:$16 sps:$4 sm:$0xff]  }
 0x1e6   : > { %6825 = vmatprep.mubr.bf16.mxu0 %v2690_v38  ;;  %7358 = vmatprep.mubr.bf16.mxu1 %v2690_v38  ;;  %v9187_v38 = vld [vmem:[%s11867_s5 + $0x3e8] ss:$16 sps:$4 sm:$0xff]  }
 0x1e8   : > { %6796 = vmatpush1.bf16.msra.mxu0 %v9100_v39  ;;  %7329 = vmatpush1.bf16.msra.mxu1 %v9103_v28  ;;  %v9195_v39 = vld [vmem:[%s11867_s5 + $0x40c] ss:$16 sps:$4 sm:$0xff]   ;;  %v2659_v28 = vcombine.high %v12020_v35, %v12020_v35 }
 0x1e9   : > { %6797 = vmatprep.subr.bf16.mxu0 %v9108_v40  ;;  %7330 = vmatprep.subr.bf16.mxu1 %v9111_v41  ;;  %v9190_v40 = vld [vmem:[%s11867_s5 + $0x400] ss:$16 sps:$4 sm:$0xff]   ;;  %v9193_v41 = vld [vmem:[%s11867_s5 + $0x408] ss:$16 sps:$4 sm:$0xff]  }
 0x1ec   : > { %6798 = vmatpush1.bf16.msra.mxu0 %v9106_v37  ;;  %7331 = vmatpush1.bf16.msra.mxu1 %v9109_v42  ;;  %v2688_v37 = vcombine.high %v11953_v34, %v11953_v34  ;;  %v9198_v42 = vld [vmem:[%s11867_s5 + $0x424] ss:$16 sps:$4 sm:$0xff]  }
 0x1ed   : > { %6799 = vmatprep.subr.bf16.mxu0 %v9114_v43  ;;  %7332 = vmatprep.subr.bf16.mxu1 %v9117_v44  ;;  %v9201_v43 = vld [vmem:[%s11867_s5 + $0x42c] ss:$16 sps:$4 sm:$0xff]   ;;  %v12035_v44 = vrot.slane %v2659_v28, %v11872_v24  ;;  %v9204_v34 = vld [vmem:[%s11867_s5 + $0x444] ss:$16 sps:$4 sm:$0xff]  }
 0x1ee   : > { %v9282_v28 = vld [vmem:[%s11867_s5 + $0x5e4] ss:$16 sps:$4 sm:$0xff]  }
 0x1f0   : > { %6800 = vmatpush1.bf16.msra.mxu0 %v9112_v45  ;;  %7333 = vmatpush1.bf16.msra.mxu1 %v9115_v46  ;;  %v9196_v45 = vld [vmem:[%s11867_s5 + $0x420] ss:$16 sps:$4 sm:$0xff]   ;;  %v9199_v46 = vld [vmem:[%s11867_s5 + $0x428] ss:$16 sps:$4 sm:$0xff]  }
 0x1f1   : > { %6801 = vmatprep.subr.bf16.mxu0 %v9120_v47  ;;  %7334 = vmatprep.subr.bf16.mxu1 %v9123_v48  ;;  %v9207_v47 = vld [vmem:[%s11867_s5 + $0x44c] ss:$16 sps:$4 sm:$0xff]   ;;  %v9202_v48 = vld [vmem:[%s11867_s5 + $0x440] ss:$16 sps:$4 sm:$0xff]  }
 0x1f4   : > { %6802 = vmatpush1.bf16.msra.mxu0 %v9118_v49  ;;  %7335 = vmatpush1.bf16.msra.mxu1 %v9121_v50  ;;  %v9205_v49 = vld [vmem:[%s11867_s5 + $0x448] ss:$16 sps:$4 sm:$0xff]   ;;  %v9210_v50 = vld [vmem:[%s11867_s5 + $0x464] ss:$16 sps:$4 sm:$0xff]  }
 0x1f5   : > { %6803 = vmatprep.subr.bf16.mxu0 %v9126_v51  ;;  %7336 = vmatprep.subr.bf16.mxu1 %v9129_v52  ;;  %v9213_v51 = vld [vmem:[%s11867_s5 + $0x46c] ss:$16 sps:$4 sm:$0xff]   ;;  %v9208_v52 = vld [vmem:[%s11867_s5 + $0x460] ss:$16 sps:$4 sm:$0xff]  }
 0x1f8   : > { %6804 = vmatpush1.bf16.msra.mxu0 %v9124_v53  ;;  %7337 = vmatpush1.bf16.msra.mxu1 %v9127_v54  ;;  %v9211_v53 = vld [vmem:[%s11867_s5 + $0x468] ss:$16 sps:$4 sm:$0xff]   ;;  %v9216_v54 = vld [vmem:[%s11867_s5 + $0x484] ss:$16 sps:$4 sm:$0xff]  }
 0x1f9   : > { %6805 = vmatprep.subr.bf16.mxu0 %v9132_v55  ;;  %7338 = vmatprep.subr.bf16.mxu1 %v9135_v56  ;;  %v9219_v55 = vld [vmem:[%s11867_s5 + $0x48c] ss:$16 sps:$4 sm:$0xff]   ;;  %v9214_v56 = vld [vmem:[%s11867_s5 + $0x480] ss:$16 sps:$4 sm:$0xff]  }
 0x1fc   : > { %6806 = vmatpush1.bf16.msra.mxu0 %v9130_v57  ;;  %7339 = vmatpush1.bf16.msra.mxu1 %v9133_v58  ;;  %v9217_v57 = vld [vmem:[%s11867_s5 + $0x488] ss:$16 sps:$4 sm:$0xff]   ;;  %v9222_v58 = vld [vmem:[%s11867_s5 + $0x4a4] ss:$16 sps:$4 sm:$0xff]  }
 0x1fd   : > { %6807 = vmatprep.subr.bf16.mxu0 %v9138_v59  ;;  %7340 = vmatprep.subr.bf16.mxu1 %v9141_v60  ;;  %v9225_v59 = vld [vmem:[%s11867_s5 + $0x4ac] ss:$16 sps:$4 sm:$0xff]   ;;  %v9220_v60 = vld [vmem:[%s11867_s5 + $0x4a0] ss:$16 sps:$4 sm:$0xff]  }
 0x200   : > { %6808 = vmatpush1.bf16.msra.mxu0 %v9136_v61  ;;  %7341 = vmatpush1.bf16.msra.mxu1 %v9139_v62  ;;  %v9223_v61 = vld [vmem:[%s11867_s5 + $0x4a8] ss:$16 sps:$4 sm:$0xff]   ;;  %v9228_v62 = vld [vmem:[%s11867_s5 + $0x4c4] ss:$16 sps:$4 sm:$0xff]  }
 0x201   : > { %6809 = vmatprep.subr.bf16.mxu0 %v9144_v63  ;;  %7342 = vmatprep.subr.bf16.mxu1 %v9147_v0  ;;  %v9231_v63 = vld [vmem:[%s11867_s5 + $0x4cc] ss:$16 sps:$4 sm:$0xff]   ;;  %v9226_v0 = vld [vmem:[%s11867_s5 + $0x4c0] ss:$16 sps:$4 sm:$0xff]  }
 0x204   : > { %6810 = vmatpush1.bf16.msra.mxu0 %v9142_v1  ;;  %7343 = vmatpush1.bf16.msra.mxu1 %v9145_v2  ;;  %v9229_v1 = vld [vmem:[%s11867_s5 + $0x4c8] ss:$16 sps:$4 sm:$0xff]   ;;  %v9234_v2 = vld [vmem:[%s11867_s5 + $0x4e4] ss:$16 sps:$4 sm:$0xff]  }
 0x205   : > { %6811 = vmatprep.subr.bf16.mxu0 %v9150_v3  ;;  %7344 = vmatprep.subr.bf16.mxu1 %v9153_v4  ;;  %v9237_v3 = vld [vmem:[%s11867_s5 + $0x4ec] ss:$16 sps:$4 sm:$0xff]   ;;  %v9232_v4 = vld [vmem:[%s11867_s5 + $0x4e0] ss:$16 sps:$4 sm:$0xff]  }
 0x208   : > { %6812 = vmatpush1.bf16.msra.mxu0 %v9148_v5  ;;  %7345 = vmatpush1.bf16.msra.mxu1 %v9151_v6  ;;  %v9235_v5 = vld [vmem:[%s11867_s5 + $0x4e8] ss:$16 sps:$4 sm:$0xff]   ;;  %v9240_v6 = vld [vmem:[%s11867_s5 + $0x504] ss:$16 sps:$4 sm:$0xff]  }
 0x209   : > { %6813 = vmatprep.subr.bf16.mxu0 %v9156_v7  ;;  %7346 = vmatprep.subr.bf16.mxu1 %v9159_v8  ;;  %v9243_v7 = vld [vmem:[%s11867_s5 + $0x50c] ss:$16 sps:$4 sm:$0xff]   ;;  %v9238_v8 = vld [vmem:[%s11867_s5 + $0x500] ss:$16 sps:$4 sm:$0xff]  }
 0x20c   : > { %6814 = vmatpush1.bf16.msra.mxu0 %v9154_v9  ;;  %7347 = vmatpush1.bf16.msra.mxu1 %v9157_v10  ;;  %v9241_v9 = vld [vmem:[%s11867_s5 + $0x508] ss:$16 sps:$4 sm:$0xff]   ;;  %v9246_v10 = vld [vmem:[%s11867_s5 + $0x524] ss:$16 sps:$4 sm:$0xff]  }
 0x20d   : > { %6815 = vmatprep.subr.bf16.mxu0 %v9162_v11  ;;  %7348 = vmatprep.subr.bf16.mxu1 %v9165_v12  ;;  %v9249_v11 = vld [vmem:[%s11867_s5 + $0x52c] ss:$16 sps:$4 sm:$0xff]   ;;  %v9244_v12 = vld [vmem:[%s11867_s5 + $0x520] ss:$16 sps:$4 sm:$0xff]  }
 0x210   : > { %6816 = vmatpush1.bf16.msra.mxu0 %v9160_v13  ;;  %7349 = vmatpush1.bf16.msra.mxu1 %v9163_v14  ;;  %v9247_v13 = vld [vmem:[%s11867_s5 + $0x528] ss:$16 sps:$4 sm:$0xff]   ;;  %v9252_v14 = vld [vmem:[%s11867_s5 + $0x544] ss:$16 sps:$4 sm:$0xff]  }
 0x211   : > { %6817 = vmatprep.subr.bf16.mxu0 %v9168_v15  ;;  %7350 = vmatprep.subr.bf16.mxu1 %v9171_v16  ;;  %v9255_v15 = vld [vmem:[%s11867_s5 + $0x54c] ss:$16 sps:$4 sm:$0xff]   ;;  %v9250_v16 = vld [vmem:[%s11867_s5 + $0x540] ss:$16 sps:$4 sm:$0xff]  }
 0x214   : > { %6818 = vmatpush1.bf16.msra.mxu0 %v9166_v17  ;;  %7351 = vmatpush1.bf16.msra.mxu1 %v9169_v18  ;;  %v9253_v17 = vld [vmem:[%s11867_s5 + $0x548] ss:$16 sps:$4 sm:$0xff]   ;;  %v9258_v18 = vld [vmem:[%s11867_s5 + $0x564] ss:$16 sps:$4 sm:$0xff]  }
 0x215   : > { %6819 = vmatprep.subr.bf16.mxu0 %v9174_v21  ;;  %7352 = vmatprep.subr.bf16.mxu1 %v9177_v22  ;;  %v9261_v21 = vld [vmem:[%s11867_s5 + $0x56c] ss:$16 sps:$4 sm:$0xff]   ;;  %v9256_v22 = vld [vmem:[%s11867_s5 + $0x560] ss:$16 sps:$4 sm:$0xff]  }
 0x218   : > { %6820 = vmatpush1.bf16.msra.mxu0 %v9172_v23  ;;  %7353 = vmatpush1.bf16.msra.mxu1 %v9175_v25  ;;  %v9259_v23 = vld [vmem:[%s11867_s5 + $0x568] ss:$16 sps:$4 sm:$0xff]   ;;  %v9264_v25 = vld [vmem:[%s11867_s5 + $0x584] ss:$16 sps:$4 sm:$0xff]  }
 0x219   : > { %6821 = vmatprep.subr.bf16.mxu0 %v9180_v26  ;;  %7354 = vmatprep.subr.bf16.mxu1 %v9183_v27  ;;  %v9267_v26 = vld [vmem:[%s11867_s5 + $0x58c] ss:$16 sps:$4 sm:$0xff]   ;;  %v9262_v27 = vld [vmem:[%s11867_s5 + $0x580] ss:$16 sps:$4 sm:$0xff]  }
 0x21c   : > { %6822 = vmatpush1.bf16.msra.mxu0 %v9178_v30  ;;  %7355 = vmatpush1.bf16.msra.mxu1 %v9181_v31  ;;  %v9270_v30 = vld [vmem:[%s11867_s5 + $0x5a4] ss:$16 sps:$4 sm:$0xff]   ;;  %v9273_v31 = vld [vmem:[%s11867_s5 + $0x5ac] ss:$16 sps:$4 sm:$0xff]  }
 0x21d   : > { %6823 = vmatprep.subr.bf16.mxu0 %v9186_v32  ;;  %7356 = vmatprep.subr.bf16.mxu1 %v9189_v33  ;;  %v9268_v32 = vld [vmem:[%s11867_s5 + $0x5a0] ss:$16 sps:$4 sm:$0xff]   ;;  %v9271_v33 = vld [vmem:[%s11867_s5 + $0x5a8] ss:$16 sps:$4 sm:$0xff]  }
 0x220   : > { %6824 = vmatpush1.bf16.msra.mxu0 %v9184_v36  ;;  %7357 = vmatpush1.bf16.msra.mxu1 %v9187_v38  ;;  %v9276_v36 = vld [vmem:[%s11867_s5 + $0x5c4] ss:$16 sps:$4 sm:$0xff]   ;;  %v9279_v38 = vld [vmem:[%s11867_s5 + $0x5cc] ss:$16 sps:$4 sm:$0xff]  }
 0x221   : > { %6834 = vmatprep.subr.bf16.mxu0 %v9192_v20  ;;  %7367 = vmatprep.subr.bf16.mxu1 %v9195_v39  ;;  %v9274_v20 = vld [vmem:[%s11867_s5 + $0x5c0] ss:$16 sps:$4 sm:$0xff]   ;;  %v9277_v39 = vld [vmem:[%s11867_s5 + $0x5c8] ss:$16 sps:$4 sm:$0xff]  }
 0x223   : > { %6826 = vmatmul.mubr.bf16.vlgmr.msra.gmra.mrb[0].mxu0 %v2688_v37  ;;  %7359 = vmatmul.mubr.bf16.vlgmr.msra.gmra.mrb[0].mxu1 %v2688_v37  ;;  %v9283_v37 = vld [vmem:[%s11867_s5 + $0x5e8] ss:$16 sps:$4 sm:$0xff]  }
 0x224   : > { %6835 = vmatpush1.bf16.msra.mxu0 %v9190_v40  ;;  %7368 = vmatpush1.bf16.msra.mxu1 %v9193_v41  ;;  %v9285_v40 = vld [vmem:[%s11867_s5 + $0x5ec] ss:$16 sps:$4 sm:$0xff]   ;;  %v9280_v41 = vld [vmem:[%s11867_s5 + $0x5e0] ss:$16 sps:$4 sm:$0xff]  }
 0x225   : > { %6836 = vmatprep.subr.bf16.mxu0 %v9198_v42  ;;  %7369 = vmatprep.subr.bf16.mxu1 %v9201_v43  ;;  %v9289_v42 = vld [vmem:[%s11867_s5 + $0x604] ss:$16 sps:$4 sm:$0xff]   ;;  %v9292_v43 = vld [vmem:[%s11867_s5 + $0x60c] ss:$16 sps:$4 sm:$0xff]  }
 0x226   : > { %6866 = vmatprep.mubr.bf16.mxu0 %v12035_v44  ;;  %7399 = vmatprep.mubr.bf16.mxu1 %v12035_v44 }
 0x228   : > { %6837 = vmatpush1.bf16.msra.mxu0 %v9196_v45  ;;  %7370 = vmatpush1.bf16.msra.mxu1 %v9199_v46  ;;  %v9287_v45 = vld [vmem:[%s11867_s5 + $0x600] ss:$16 sps:$4 sm:$0xff]   ;;  %v9290_v46 = vld [vmem:[%s11867_s5 + $0x608] ss:$16 sps:$4 sm:$0xff]  }
 0x229   : > { %6838 = vmatprep.subr.bf16.mxu0 %v9204_v34  ;;  %7371 = vmatprep.subr.bf16.mxu1 %v9207_v47  ;;  %v12103_v34 = vrot.slane %v12020_v35, %v11872_v24  ;;  %v9295_v47 = vld [vmem:[%s11867_s5 + $0x624] ss:$16 sps:$4 sm:$0xff]   ;;  %v9296_v35 = vld [vmem:[%s11867_s5 + $0x628] ss:$16 sps:$4 sm:$0xff]  }
 0x22c   : > { %6839 = vmatpush1.bf16.msra.mxu0 %v9202_v48  ;;  %7372 = vmatpush1.bf16.msra.mxu1 %v9205_v49  ;;  %v9298_v48 = vld [vmem:[%s11867_s5 + $0x62c] ss:$16 sps:$4 sm:$0xff]   ;;  %v2691_v49 = vcombine.high %v12035_v44, %v12035_v44  ;;  %v9299_v44 = vld [vmem:[%s11867_s5 + $0x640] ss:$16 sps:$4 sm:$0xff]  }
 0x22d   : > { %6840 = vmatprep.subr.bf16.mxu0 %v9210_v50  ;;  %7373 = vmatprep.subr.bf16.mxu1 %v9213_v51  ;;  %v9293_v50 = vld [vmem:[%s11867_s5 + $0x620] ss:$16 sps:$4 sm:$0xff]   ;;  %v9301_v51 = vld [vmem:[%s11867_s5 + $0x644] ss:$16 sps:$4 sm:$0xff]  }
 0x230   : > { %6841 = vmatpush1.bf16.msra.mxu0 %v9208_v52  ;;  %7374 = vmatpush1.bf16.msra.mxu1 %v9211_v53  ;;  %v9304_v52 = vld [vmem:[%s11867_s5 + $0x64c] ss:$16 sps:$4 sm:$0xff]   ;;  %v9302_v53 = vld [vmem:[%s11867_s5 + $0x648] ss:$16 sps:$4 sm:$0xff]  }
 0x231   : > { %6842 = vmatprep.subr.bf16.mxu0 %v9216_v54  ;;  %7375 = vmatprep.subr.bf16.mxu1 %v9219_v55  ;;  %v9307_v54 = vld [vmem:[%s11867_s5 + $0x664] ss:$16 sps:$4 sm:$0xff]   ;;  %v9310_v55 = vld [vmem:[%s11867_s5 + $0x66c] ss:$16 sps:$4 sm:$0xff]  }
 0x234   : > { %6843 = vmatpush1.bf16.msra.mxu0 %v9214_v56  ;;  %7376 = vmatpush1.bf16.msra.mxu1 %v9217_v57  ;;  %v9305_v56 = vld [vmem:[%s11867_s5 + $0x660] ss:$16 sps:$4 sm:$0xff]   ;;  %v9308_v57 = vld [vmem:[%s11867_s5 + $0x668] ss:$16 sps:$4 sm:$0xff]  }
 0x235   : > { %6844 = vmatprep.subr.bf16.mxu0 %v9222_v58  ;;  %7377 = vmatprep.subr.bf16.mxu1 %v9225_v59  ;;  %v9313_v58 = vld [vmem:[%s11867_s5 + $0x684] ss:$16 sps:$4 sm:$0xff]   ;;  %v9316_v59 = vld [vmem:[%s11867_s5 + $0x68c] ss:$16 sps:$4 sm:$0xff]  }
 0x238   : > { %6845 = vmatpush1.bf16.msra.mxu0 %v9220_v60  ;;  %7378 = vmatpush1.bf16.msra.mxu1 %v9223_v61  ;;  %v9311_v60 = vld [vmem:[%s11867_s5 + $0x680] ss:$16 sps:$4 sm:$0xff]   ;;  %v9314_v61 = vld [vmem:[%s11867_s5 + $0x688] ss:$16 sps:$4 sm:$0xff]  }
 0x239   : > { %6846 = vmatprep.subr.bf16.mxu0 %v9228_v62  ;;  %7379 = vmatprep.subr.bf16.mxu1 %v9231_v63  ;;  %v9319_v62 = vld [vmem:[%s11867_s5 + $0x6a4] ss:$16 sps:$4 sm:$0xff]   ;;  %v9322_v63 = vld [vmem:[%s11867_s5 + $0x6ac] ss:$16 sps:$4 sm:$0xff]  }
 0x23c   : > { %6847 = vmatpush1.bf16.msra.mxu0 %v9226_v0  ;;  %7380 = vmatpush1.bf16.msra.mxu1 %v9229_v1  ;;  %v9317_v0 = vld [vmem:[%s11867_s5 + $0x6a0] ss:$16 sps:$4 sm:$0xff]   ;;  %v9320_v1 = vld [vmem:[%s11867_s5 + $0x6a8] ss:$16 sps:$4 sm:$0xff]  }
 0x23d   : > { %6848 = vmatprep.subr.bf16.mxu0 %v9234_v2  ;;  %7381 = vmatprep.subr.bf16.mxu1 %v9237_v3  ;;  %v9325_v2 = vld [vmem:[%s11867_s5 + $0x6c4] ss:$16 sps:$4 sm:$0xff]   ;;  %v9328_v3 = vld [vmem:[%s11867_s5 + $0x6cc] ss:$16 sps:$4 sm:$0xff]  }
 0x240   : > { %6849 = vmatpush1.bf16.msra.mxu0 %v9232_v4  ;;  %7382 = vmatpush1.bf16.msra.mxu1 %v9235_v5  ;;  %v9323_v4 = vld [vmem:[%s11867_s5 + $0x6c0] ss:$16 sps:$4 sm:$0xff]   ;;  %v9326_v5 = vld [vmem:[%s11867_s5 + $0x6c8] ss:$16 sps:$4 sm:$0xff]  }
 0x241   : > { %6850 = vmatprep.subr.bf16.mxu0 %v9240_v6  ;;  %7383 = vmatprep.subr.bf16.mxu1 %v9243_v7  ;;  %v9331_v6 = vld [vmem:[%s11867_s5 + $0x6e4] ss:$16 sps:$4 sm:$0xff]   ;;  %v9334_v7 = vld [vmem:[%s11867_s5 + $0x6ec] ss:$16 sps:$4 sm:$0xff]  }
 0x244   : > { %6851 = vmatpush1.bf16.msra.mxu0 %v9238_v8  ;;  %7384 = vmatpush1.bf16.msra.mxu1 %v9241_v9  ;;  %v9329_v8 = vld [vmem:[%s11867_s5 + $0x6e0] ss:$16 sps:$4 sm:$0xff]   ;;  %v9332_v9 = vld [vmem:[%s11867_s5 + $0x6e8] ss:$16 sps:$4 sm:$0xff]  }
 0x245   : > { %6852 = vmatprep.subr.bf16.mxu0 %v9246_v10  ;;  %7385 = vmatprep.subr.bf16.mxu1 %v9249_v11  ;;  %v9337_v10 = vld [vmem:[%s11867_s5 + $0x704] ss:$16 sps:$4 sm:$0xff]   ;;  %v9340_v11 = vld [vmem:[%s11867_s5 + $0x70c] ss:$16 sps:$4 sm:$0xff]  }
 0x248   : > { %6853 = vmatpush1.bf16.msra.mxu0 %v9244_v12  ;;  %7386 = vmatpush1.bf16.msra.mxu1 %v9247_v13  ;;  %v9335_v12 = vld [vmem:[%s11867_s5 + $0x700] ss:$16 sps:$4 sm:$0xff]   ;;  %v9338_v13 = vld [vmem:[%s11867_s5 + $0x708] ss:$16 sps:$4 sm:$0xff]  }
 0x249   : > { %6854 = vmatprep.subr.bf16.mxu0 %v9252_v14  ;;  %7387 = vmatprep.subr.bf16.mxu1 %v9255_v15  ;;  %v9343_v14 = vld [vmem:[%s11867_s5 + $0x724] ss:$16 sps:$4 sm:$0xff]   ;;  %v9346_v15 = vld [vmem:[%s11867_s5 + $0x72c] ss:$16 sps:$4 sm:$0xff]  }
 0x24c   : > { %6855 = vmatpush1.bf16.msra.mxu0 %v9250_v16  ;;  %7388 = vmatpush1.bf16.msra.mxu1 %v9253_v17  ;;  %v9341_v16 = vld [vmem:[%s11867_s5 + $0x720] ss:$16 sps:$4 sm:$0xff]   ;;  %v9344_v17 = vld [vmem:[%s11867_s5 + $0x728] ss:$16 sps:$4 sm:$0xff]  }
 0x24d   : > { %6856 = vmatprep.subr.bf16.mxu0 %v9258_v18  ;;  %7389 = vmatprep.subr.bf16.mxu1 %v9261_v21  ;;  %v9349_v18 = vld [vmem:[%s11867_s5 + $0x744] ss:$16 sps:$4 sm:$0xff]   ;;  %v9352_v21 = vld [vmem:[%s11867_s5 + $0x74c] ss:$16 sps:$4 sm:$0xff]  }
 0x250   : > { %6857 = vmatpush1.bf16.msra.mxu0 %v9256_v22  ;;  %7390 = vmatpush1.bf16.msra.mxu1 %v9259_v23  ;;  %v9347_v22 = vld [vmem:[%s11867_s5 + $0x740] ss:$16 sps:$4 sm:$0xff]   ;;  %v9350_v23 = vld [vmem:[%s11867_s5 + $0x748] ss:$16 sps:$4 sm:$0xff]  }
 0x251   : > { %6858 = vmatprep.subr.bf16.mxu0 %v9264_v25  ;;  %7391 = vmatprep.subr.bf16.mxu1 %v9267_v26  ;;  %v9355_v25 = vld [vmem:[%s11867_s5 + $0x764] ss:$16 sps:$4 sm:$0xff]   ;;  %v9358_v26 = vld [vmem:[%s11867_s5 + $0x76c] ss:$16 sps:$4 sm:$0xff]  }
 0x254   : > { %6859 = vmatpush1.bf16.msra.mxu0 %v9262_v27  ;;  %7392 = vmatpush1.bf16.msra.mxu1 %v9265_v29  ;;  %v9353_v27 = vld [vmem:[%s11867_s5 + $0x760] ss:$16 sps:$4 sm:$0xff]   ;;  %v9356_v29 = vld [vmem:[%s11867_s5 + $0x768] ss:$16 sps:$4 sm:$0xff]  }
 0x255   : > { %6860 = vmatprep.subr.bf16.mxu0 %v9270_v30  ;;  %7393 = vmatprep.subr.bf16.mxu1 %v9273_v31  ;;  %v9361_v30 = vld [vmem:[%s11867_s5 + $0x784] ss:$16 sps:$4 sm:$0xff]   ;;  %v9364_v31 = vld [vmem:[%s11867_s5 + $0x78c] ss:$16 sps:$4 sm:$0xff]  }
 0x258   : > { %6861 = vmatpush1.bf16.msra.mxu0 %v9268_v32  ;;  %7394 = vmatpush1.bf16.msra.mxu1 %v9271_v33  ;;  %v9359_v32 = vld [vmem:[%s11867_s5 + $0x780] ss:$16 sps:$4 sm:$0xff]   ;;  %v9362_v33 = vld [vmem:[%s11867_s5 + $0x788] ss:$16 sps:$4 sm:$0xff]  }
 0x259   : > { %6862 = vmatprep.subr.bf16.mxu0 %v9276_v36  ;;  %7395 = vmatprep.subr.bf16.mxu1 %v9279_v38  ;;  %v9367_v36 = vld [vmem:[%s11867_s5 + $0x7a4] ss:$16 sps:$4 sm:$0xff]   ;;  %v9370_v38 = vld [vmem:[%s11867_s5 + $0x7ac] ss:$16 sps:$4 sm:$0xff]  }
 0x25c   : > { %6863 = vmatpush1.bf16.msra.mxu0 %v9274_v20  ;;  %7396 = vmatpush1.bf16.msra.mxu1 %v9277_v39  ;;  %v9365_v20 = vld [vmem:[%s11867_s5 + $0x7a0] ss:$16 sps:$4 sm:$0xff]   ;;  %v9368_v39 = vld [vmem:[%s11867_s5 + $0x7a8] ss:$16 sps:$4 sm:$0xff]  }
 0x25d   : > { %6864 = vmatprep.subr.bf16.mxu0 %v9282_v28  ;;  %7397 = vmatprep.subr.bf16.mxu1 %v9285_v40  ;;  %v9373_v28 = vld [vmem:[%s11867_s5 + $0x7c4] ss:$16 sps:$4 sm:$0xff]   ;;  %v9376_v40 = vld [vmem:[%s11867_s5 + $0x7cc] ss:$16 sps:$4 sm:$0xff]  }
 0x260   : > { %6865 = vmatpush1.bf16.msra.mxu0 %v9280_v41  ;;  %7398 = vmatpush1.bf16.msra.mxu1 %v9283_v37  ;;  %v9371_v41 = vld [vmem:[%s11867_s5 + $0x7c0] ss:$16 sps:$4 sm:$0xff]   ;;  %v12167_v37 = vld.sshfl [vmem:[%s12829_s0 + $0x8] sm:$0xff pattern:$0x75316420] }
 0x261   : > { %6875 = vmatprep.subr.bf16.mxu0 %v9289_v42  ;;  %7408 = vmatprep.subr.bf16.mxu1 %v9292_v43  ;;  %v9374_v42 = vld [vmem:[%s11867_s5 + $0x7c8] ss:$16 sps:$4 sm:$0xff]   ;;  %v9379_v43 = vld [vmem:[%s11867_s5 + $0x7e4] ss:$16 sps:$4 sm:$0xff]  }
 0x263   : > { %6867 = vmatmul.mubr.bf16.vlgmr.msra.gmra.mrb[0].mxu0 %v12103_v34  ;;  %7400 = vmatmul.mubr.bf16.vlgmr.msra.gmra.mrb[0].mxu1 %v12103_v34 }
 0x264   : > { %6876 = vmatpush1.bf16.msra.mxu0 %v9287_v45  ;;  %7409 = vmatpush1.bf16.msra.mxu1 %v9290_v46  ;;  %v9382_v45 = vld [vmem:[%s11867_s5 + $0x7ec] ss:$16 sps:$4 sm:$0xff]   ;;  %v9377_v46 = vld [vmem:[%s11867_s5 + $0x7e0] ss:$16 sps:$4 sm:$0xff]  }
 0x265   : > { %6877 = vmatprep.subr.bf16.mxu0 %v9295_v47  ;;  %7410 = vmatprep.subr.bf16.mxu1 %v9298_v48  ;;  %v9380_v47 = vld [vmem:[%s11867_s5 + $0x7e8] ss:$16 sps:$4 sm:$0xff]   ;;  %v9385_v48 = vld [vmem:[%s11867_s5 + $0x804] ss:$16 sps:$4 sm:$0xff]  }
 0x266   : > { %6907 = vmatprep.mubr.bf16.mxu0 %v2691_v49  ;;  %7440 = vmatprep.mubr.bf16.mxu1 %v2691_v49  ;;  %v9388_v49 = vld [vmem:[%s11867_s5 + $0x80c] ss:$16 sps:$4 sm:$0xff]  }
 0x268   : > { %6878 = vmatpush1.bf16.msra.mxu0 %v9293_v50  ;;  %7411 = vmatpush1.bf16.msra.mxu1 %v9296_v35  ;;  %v2707_v50 = vcombine.high %v12167_v37, %v12167_v37  ;;  %v9383_v35 = vld [vmem:[%s11867_s5 + $0x800] ss:$16 sps:$4 sm:$0xff]  }
 0x269   : > { %6879 = vmatprep.subr.bf16.mxu0 %v9301_v51  ;;  %7412 = vmatprep.subr.bf16.mxu1 %v9304_v52  ;;  %v2689_v51 = vcombine.high %v12103_v34, %v12103_v34  ;;  %v9386_v52 = vld [vmem:[%s11867_s5 + $0x808] ss:$16 sps:$4 sm:$0xff]   ;;  %v9389_v34 = vld [vmem:[%s11867_s5 + $0x820] ss:$16 sps:$4 sm:$0xff]  }
 0x26c   : > { %6880 = vmatpush1.bf16.msra.mxu0 %v9299_v44  ;;  %7413 = vmatpush1.bf16.msra.mxu1 %v9302_v53  ;;  %v9391_v44 = vld [vmem:[%s11867_s5 + $0x824] ss:$16 sps:$4 sm:$0xff]   ;;  %v9394_v53 = vld [vmem:[%s11867_s5 + $0x82c] ss:$16 sps:$4 sm:$0xff]  }
 0x26d   : > { %6881 = vmatprep.subr.bf16.mxu0 %v9307_v54  ;;  %7414 = vmatprep.subr.bf16.mxu1 %v9310_v55  ;;  %v12185_v54 = vrot.slane %v2707_v50, %v11872_v24  ;;  %v9392_v55 = vld [vmem:[%s11867_s5 + $0x828] ss:$16 sps:$4 sm:$0xff]   ;;  %v9475_v50 = vld [vmem:[%s11867_s5 + $0x9e4] ss:$16 sps:$4 sm:$0xff]  }
 0x270   : > { %6882 = vmatpush1.bf16.msra.mxu0 %v9305_v56  ;;  %7415 = vmatpush1.bf16.msra.mxu1 %v9308_v57  ;;  %v9397_v56 = vld [vmem:[%s11867_s5 + $0x844] ss:$16 sps:$4 sm:$0xff]   ;;  %v9400_v57 = vld [vmem:[%s11867_s5 + $0x84c] ss:$16 sps:$4 sm:$0xff]  }
 0x271   : > { %6883 = vmatprep.subr.bf16.mxu0 %v9313_v58  ;;  %7416 = vmatprep.subr.bf16.mxu1 %v9316_v59  ;;  %v9395_v58 = vld [vmem:[%s11867_s5 + $0x840] ss:$16 sps:$4 sm:$0xff]   ;;  %v9398_v59 = vld [vmem:[%s11867_s5 + $0x848] ss:$16 sps:$4 sm:$0xff]  }
 0x274   : > { %6884 = vmatpush1.bf16.msra.mxu0 %v9311_v60  ;;  %7417 = vmatpush1.bf16.msra.mxu1 %v9314_v61  ;;  %v9403_v60 = vld [vmem:[%s11867_s5 + $0x864] ss:$16 sps:$4 sm:$0xff]   ;;  %v9406_v61 = vld [vmem:[%s11867_s5 + $0x86c] ss:$16 sps:$4 sm:$0xff]  }
 0x275   : > { %6885 = vmatprep.subr.bf16.mxu0 %v9319_v62  ;;  %7418 = vmatprep.subr.bf16.mxu1 %v9322_v63  ;;  %v9401_v62 = vld [vmem:[%s11867_s5 + $0x860] ss:$16 sps:$4 sm:$0xff]   ;;  %v9404_v63 = vld [vmem:[%s11867_s5 + $0x868] ss:$16 sps:$4 sm:$0xff]  }
 0x278   : > { %6886 = vmatpush1.bf16.msra.mxu0 %v9317_v0  ;;  %7419 = vmatpush1.bf16.msra.mxu1 %v9320_v1  ;;  %v9409_v0 = vld [vmem:[%s11867_s5 + $0x884] ss:$16 sps:$4 sm:$0xff]   ;;  %v9412_v1 = vld [vmem:[%s11867_s5 + $0x88c] ss:$16 sps:$4 sm:$0xff]  }
 0x279   : > { %6887 = vmatprep.subr.bf16.mxu0 %v9325_v2  ;;  %7420 = vmatprep.subr.bf16.mxu1 %v9328_v3  ;;  %v9407_v2 = vld [vmem:[%s11867_s5 + $0x880] ss:$16 sps:$4 sm:$0xff]   ;;  %v9410_v3 = vld [vmem:[%s11867_s5 + $0x888] ss:$16 sps:$4 sm:$0xff]  }
 0x27c   : > { %6888 = vmatpush1.bf16.msra.mxu0 %v9323_v4  ;;  %7421 = vmatpush1.bf16.msra.mxu1 %v9326_v5  ;;  %v9415_v4 = vld [vmem:[%s11867_s5 + $0x8a4] ss:$16 sps:$4 sm:$0xff]   ;;  %v9418_v5 = vld [vmem:[%s11867_s5 + $0x8ac] ss:$16 sps:$4 sm:$0xff]  }
 0x27d   : > { %6889 = vmatprep.subr.bf16.mxu0 %v9331_v6  ;;  %7422 = vmatprep.subr.bf16.mxu1 %v9334_v7  ;;  %v9413_v6 = vld [vmem:[%s11867_s5 + $0x8a0] ss:$16 sps:$4 sm:$0xff]   ;;  %v9416_v7 = vld [vmem:[%s11867_s5 + $0x8a8] ss:$16 sps:$4 sm:$0xff]  }
 0x280   : > { %6890 = vmatpush1.bf16.msra.mxu0 %v9329_v8  ;;  %7423 = vmatpush1.bf16.msra.mxu1 %v9332_v9  ;;  %v9421_v8 = vld [vmem:[%s11867_s5 + $0x8c4] ss:$16 sps:$4 sm:$0xff]   ;;  %v9424_v9 = vld [vmem:[%s11867_s5 + $0x8cc] ss:$16 sps:$4 sm:$0xff]  }
 0x281   : > { %6891 = vmatprep.subr.bf16.mxu0 %v9337_v10  ;;  %7424 = vmatprep.subr.bf16.mxu1 %v9340_v11  ;;  %v9419_v10 = vld [vmem:[%s11867_s5 + $0x8c0] ss:$16 sps:$4 sm:$0xff]   ;;  %v9422_v11 = vld [vmem:[%s11867_s5 + $0x8c8] ss:$16 sps:$4 sm:$0xff]  }
 0x284   : > { %6892 = vmatpush1.bf16.msra.mxu0 %v9335_v12  ;;  %7425 = vmatpush1.bf16.msra.mxu1 %v9338_v13  ;;  %v9427_v12 = vld [vmem:[%s11867_s5 + $0x8e4] ss:$16 sps:$4 sm:$0xff]   ;;  %v9430_v13 = vld [vmem:[%s11867_s5 + $0x8ec] ss:$16 sps:$4 sm:$0xff]  }
 0x285   : > { %6893 = vmatprep.subr.bf16.mxu0 %v9343_v14  ;;  %7426 = vmatprep.subr.bf16.mxu1 %v9346_v15  ;;  %v9425_v14 = vld [vmem:[%s11867_s5 + $0x8e0] ss:$16 sps:$4 sm:$0xff]   ;;  %v9428_v15 = vld [vmem:[%s11867_s5 + $0x8e8] ss:$16 sps:$4 sm:$0xff]  }
 0x288   : > { %6894 = vmatpush1.bf16.msra.mxu0 %v9341_v16  ;;  %7427 = vmatpush1.bf16.msra.mxu1 %v9344_v17  ;;  %v9433_v16 = vld [vmem:[%s11867_s5 + $0x904] ss:$16 sps:$4 sm:$0xff]   ;;  %v9436_v17 = vld [vmem:[%s11867_s5 + $0x90c] ss:$16 sps:$4 sm:$0xff]  }
 0x289   : > { %6895 = vmatprep.subr.bf16.mxu0 %v9349_v18  ;;  %7428 = vmatprep.subr.bf16.mxu1 %v9352_v21  ;;  %v9431_v18 = vld [vmem:[%s11867_s5 + $0x900] ss:$16 sps:$4 sm:$0xff]   ;;  %v9434_v21 = vld [vmem:[%s11867_s5 + $0x908] ss:$16 sps:$4 sm:$0xff]  }
 0x28c   : > { %6896 = vmatpush1.bf16.msra.mxu0 %v9347_v22  ;;  %7429 = vmatpush1.bf16.msra.mxu1 %v9350_v23  ;;  %v9439_v22 = vld [vmem:[%s11867_s5 + $0x924] ss:$16 sps:$4 sm:$0xff]   ;;  %v9442_v23 = vld [vmem:[%s11867_s5 + $0x92c] ss:$16 sps:$4 sm:$0xff]  }
 0x28d   : > { %6897 = vmatprep.subr.bf16.mxu0 %v9355_v25  ;;  %7430 = vmatprep.subr.bf16.mxu1 %v9358_v26  ;;  %v9437_v25 = vld [vmem:[%s11867_s5 + $0x920] ss:$16 sps:$4 sm:$0xff]   ;;  %v9440_v26 = vld [vmem:[%s11867_s5 + $0x928] ss:$16 sps:$4 sm:$0xff]  }
 0x290   : > { %6898 = vmatpush1.bf16.msra.mxu0 %v9353_v27  ;;  %7431 = vmatpush1.bf16.msra.mxu1 %v9356_v29  ;;  %v9445_v27 = vld [vmem:[%s11867_s5 + $0x944] ss:$16 sps:$4 sm:$0xff]   ;;  %v9448_v29 = vld [vmem:[%s11867_s5 + $0x94c] ss:$16 sps:$4 sm:$0xff]  }
 0x291   : > { %6899 = vmatprep.subr.bf16.mxu0 %v9361_v30  ;;  %7432 = vmatprep.subr.bf16.mxu1 %v9364_v31  ;;  %v9443_v30 = vld [vmem:[%s11867_s5 + $0x940] ss:$16 sps:$4 sm:$0xff]   ;;  %v9446_v31 = vld [vmem:[%s11867_s5 + $0x948] ss:$16 sps:$4 sm:$0xff]  }
 0x294   : > { %6900 = vmatpush1.bf16.msra.mxu0 %v9359_v32  ;;  %7433 = vmatpush1.bf16.msra.mxu1 %v9362_v33  ;;  %v9451_v32 = vld [vmem:[%s11867_s5 + $0x964] ss:$16 sps:$4 sm:$0xff]   ;;  %v9454_v33 = vld [vmem:[%s11867_s5 + $0x96c] ss:$16 sps:$4 sm:$0xff]  }
 0x295   : > { %6901 = vmatprep.subr.bf16.mxu0 %v9367_v36  ;;  %7434 = vmatprep.subr.bf16.mxu1 %v9370_v38  ;;  %v9449_v36 = vld [vmem:[%s11867_s5 + $0x960] ss:$16 sps:$4 sm:$0xff]   ;;  %v9452_v38 = vld [vmem:[%s11867_s5 + $0x968] ss:$16 sps:$4 sm:$0xff]  }
 0x298   : > { %6902 = vmatpush1.bf16.msra.mxu0 %v9365_v20  ;;  %7435 = vmatpush1.bf16.msra.mxu1 %v9368_v39  ;;  %v9457_v20 = vld [vmem:[%s11867_s5 + $0x984] ss:$16 sps:$4 sm:$0xff]   ;;  %v9460_v39 = vld [vmem:[%s11867_s5 + $0x98c] ss:$16 sps:$4 sm:$0xff]  }
 0x299   : > { %6903 = vmatprep.subr.bf16.mxu0 %v9373_v28  ;;  %7436 = vmatprep.subr.bf16.mxu1 %v9376_v40  ;;  %v9455_v28 = vld [vmem:[%s11867_s5 + $0x980] ss:$16 sps:$4 sm:$0xff]   ;;  %v9458_v40 = vld [vmem:[%s11867_s5 + $0x988] ss:$16 sps:$4 sm:$0xff]  }
 0x29c   : > { %6904 = vmatpush1.bf16.msra.mxu0 %v9371_v41  ;;  %7437 = vmatpush1.bf16.msra.mxu1 %v9374_v42  ;;  %v9463_v41 = vld [vmem:[%s11867_s5 + $0x9a4] ss:$16 sps:$4 sm:$0xff]   ;;  %v9466_v42 = vld [vmem:[%s11867_s5 + $0x9ac] ss:$16 sps:$4 sm:$0xff]  }
 0x29d   : > { %6905 = vmatprep.subr.bf16.mxu0 %v9379_v43  ;;  %7438 = vmatprep.subr.bf16.mxu1 %v9382_v45  ;;  %v9461_v43 = vld [vmem:[%s11867_s5 + $0x9a0] ss:$16 sps:$4 sm:$0xff]   ;;  %v9464_v45 = vld [vmem:[%s11867_s5 + $0x9a8] ss:$16 sps:$4 sm:$0xff]  }
 0x2a0   : > { %6906 = vmatpush1.bf16.msra.mxu0 %v9377_v46  ;;  %7439 = vmatpush1.bf16.msra.mxu1 %v9380_v47  ;;  %v9469_v46 = vld [vmem:[%s11867_s5 + $0x9c4] ss:$16 sps:$4 sm:$0xff]   ;;  %v9472_v47 = vld [vmem:[%s11867_s5 + $0x9cc] ss:$16 sps:$4 sm:$0xff]  }
 0x2a1   : > { %6916 = vmatprep.subr.bf16.mxu0 %v9385_v48  ;;  %7449 = vmatprep.subr.bf16.mxu1 %v9388_v49  ;;  %v9467_v48 = vld [vmem:[%s11867_s5 + $0x9c0] ss:$16 sps:$4 sm:$0xff]   ;;  %v9470_v49 = vld [vmem:[%s11867_s5 + $0x9c8] ss:$16 sps:$4 sm:$0xff]  }
 0x2a3   : > { %6908 = vmatmul.mubr.bf16.vlgmr.msra.gmra.mrb[0].mxu0 %v2689_v51  ;;  %7441 = vmatmul.mubr.bf16.vlgmr.msra.gmra.mrb[0].mxu1 %v2689_v51  ;;  %v9473_v51 = vld [vmem:[%s11867_s5 + $0x9e0] ss:$16 sps:$4 sm:$0xff]  }
 0x2a4   : > { %6917 = vmatpush1.bf16.msra.mxu0 %v9383_v35  ;;  %7450 = vmatpush1.bf16.msra.mxu1 %v9386_v52  ;;  %v9478_v35 = vld [vmem:[%s11867_s5 + $0x9ec] ss:$16 sps:$4 sm:$0xff]   ;;  %v9476_v52 = vld [vmem:[%s11867_s5 + $0x9e8] ss:$16 sps:$4 sm:$0xff]  }
 0x2a5   : > { %6918 = vmatprep.subr.bf16.mxu0 %v9391_v44  ;;  %7451 = vmatprep.subr.bf16.mxu1 %v9394_v53  ;;  %v9481_v44 = vld [vmem:[%s11867_s5 + $0xa04] ss:$16 sps:$4 sm:$0xff]   ;;  %v9484_v53 = vld [vmem:[%s11867_s5 + $0xa0c] ss:$16 sps:$4 sm:$0xff]  }
 0x2a6   : > { %6948 = vmatprep.mubr.bf16.mxu0 %v12185_v54  ;;  %7481 = vmatprep.mubr.bf16.mxu1 %v12185_v54 }
 0x2a8   : > { %6919 = vmatpush1.bf16.msra.mxu0 %v9389_v34  ;;  %7452 = vmatpush1.bf16.msra.mxu1 %v9392_v55  ;;  %v12251_v34 = vrot.slane %v12167_v37, %v11872_v24  ;;  %v9479_v55 = vld [vmem:[%s11867_s5 + $0xa00] ss:$16 sps:$4 sm:$0xff]  }
 0x2a9   : > { %6920 = vmatprep.subr.bf16.mxu0 %v9397_v56  ;;  %7453 = vmatprep.subr.bf16.mxu1 %v9400_v57  ;;  %v9482_v56 = vld [vmem:[%s11867_s5 + $0xa08] ss:$16 sps:$4 sm:$0xff]   ;;  %v9487_v57 = vld [vmem:[%s11867_s5 + $0xa24] ss:$16 sps:$4 sm:$0xff]   ;;  %v9485_v37 = vld [vmem:[%s11867_s5 + $0xa20] ss:$16 sps:$4 sm:$0xff]  }
 0x2ac   : > { %6921 = vmatpush1.bf16.msra.mxu0 %v9395_v58  ;;  %7454 = vmatpush1.bf16.msra.mxu1 %v9398_v59  ;;  %v9490_v58 = vld [vmem:[%s11867_s5 + $0xa2c] ss:$16 sps:$4 sm:$0xff]   ;;  %v2739_v59 = vcombine.high %v12185_v54, %v12185_v54  ;;  %v9491_v54 = vld [vmem:[%s11867_s5 + $0xa40] ss:$16 sps:$4 sm:$0xff]  }
 0x2ad   : > { %6922 = vmatprep.subr.bf16.mxu0 %v9403_v60  ;;  %7455 = vmatprep.subr.bf16.mxu1 %v9406_v61  ;;  %v9488_v60 = vld [vmem:[%s11867_s5 + $0xa28] ss:$16 sps:$4 sm:$0xff]   ;;  %v9493_v61 = vld [vmem:[%s11867_s5 + $0xa44] ss:$16 sps:$4 sm:$0xff]  }
 0x2b0   : > { %6923 = vmatpush1.bf16.msra.mxu0 %v9401_v62  ;;  %7456 = vmatpush1.bf16.msra.mxu1 %v9404_v63  ;;  %v9496_v62 = vld [vmem:[%s11867_s5 + $0xa4c] ss:$16 sps:$4 sm:$0xff]   ;;  %v9494_v63 = vld [vmem:[%s11867_s5 + $0xa48] ss:$16 sps:$4 sm:$0xff]  }
 0x2b1   : > { %6924 = vmatprep.subr.bf16.mxu0 %v9409_v0  ;;  %7457 = vmatprep.subr.bf16.mxu1 %v9412_v1  ;;  %v9499_v0 = vld [vmem:[%s11867_s5 + $0xa64] ss:$16 sps:$4 sm:$0xff]   ;;  %v9502_v1 = vld [vmem:[%s11867_s5 + $0xa6c] ss:$16 sps:$4 sm:$0xff]  }
 0x2b4   : > { %6925 = vmatpush1.bf16.msra.mxu0 %v9407_v2  ;;  %7458 = vmatpush1.bf16.msra.mxu1 %v9410_v3  ;;  %v9497_v2 = vld [vmem:[%s11867_s5 + $0xa60] ss:$16 sps:$4 sm:$0xff]   ;;  %v9500_v3 = vld [vmem:[%s11867_s5 + $0xa68] ss:$16 sps:$4 sm:$0xff]  }
 0x2b5   : > { %6926 = vmatprep.subr.bf16.mxu0 %v9415_v4  ;;  %7459 = vmatprep.subr.bf16.mxu1 %v9418_v5  ;;  %v9505_v4 = vld [vmem:[%s11867_s5 + $0xa84] ss:$16 sps:$4 sm:$0xff]   ;;  %v9508_v5 = vld [vmem:[%s11867_s5 + $0xa8c] ss:$16 sps:$4 sm:$0xff]  }
 0x2b8   : > { %6927 = vmatpush1.bf16.msra.mxu0 %v9413_v6  ;;  %7460 = vmatpush1.bf16.msra.mxu1 %v9416_v7  ;;  %v9503_v6 = vld [vmem:[%s11867_s5 + $0xa80] ss:$16 sps:$4 sm:$0xff]   ;;  %v9506_v7 = vld [vmem:[%s11867_s5 + $0xa88] ss:$16 sps:$4 sm:$0xff]  }
 0x2b9   : > { %6928 = vmatprep.subr.bf16.mxu0 %v9421_v8  ;;  %7461 = vmatprep.subr.bf16.mxu1 %v9424_v9  ;;  %v9511_v8 = vld [vmem:[%s11867_s5 + $0xaa4] ss:$16 sps:$4 sm:$0xff]   ;;  %v9514_v9 = vld [vmem:[%s11867_s5 + $0xaac] ss:$16 sps:$4 sm:$0xff]  }
 0x2bc   : > { %6929 = vmatpush1.bf16.msra.mxu0 %v9419_v10  ;;  %7462 = vmatpush1.bf16.msra.mxu1 %v9422_v11  ;;  %v9509_v10 = vld [vmem:[%s11867_s5 + $0xaa0] ss:$16 sps:$4 sm:$0xff]   ;;  %v9512_v11 = vld [vmem:[%s11867_s5 + $0xaa8] ss:$16 sps:$4 sm:$0xff]  }
 0x2bd   : > { %6930 = vmatprep.subr.bf16.mxu0 %v9427_v12  ;;  %7463 = vmatprep.subr.bf16.mxu1 %v9430_v13  ;;  %v9517_v12 = vld [vmem:[%s11867_s5 + $0xac4] ss:$16 sps:$4 sm:$0xff]   ;;  %v9520_v13 = vld [vmem:[%s11867_s5 + $0xacc] ss:$16 sps:$4 sm:$0xff]  }
 0x2c0   : > { %6931 = vmatpush1.bf16.msra.mxu0 %v9425_v14  ;;  %7464 = vmatpush1.bf16.msra.mxu1 %v9428_v15  ;;  %v9515_v14 = vld [vmem:[%s11867_s5 + $0xac0] ss:$16 sps:$4 sm:$0xff]   ;;  %v9518_v15 = vld [vmem:[%s11867_s5 + $0xac8] ss:$16 sps:$4 sm:$0xff]  }
 0x2c1   : > { %6932 = vmatprep.subr.bf16.mxu0 %v9433_v16  ;;  %7465 = vmatprep.subr.bf16.mxu1 %v9436_v17  ;;  %v9523_v16 = vld [vmem:[%s11867_s5 + $0xae4] ss:$16 sps:$4 sm:$0xff]   ;;  %v9526_v17 = vld [vmem:[%s11867_s5 + $0xaec] ss:$16 sps:$4 sm:$0xff]  }
 0x2c4   : > { %6933 = vmatpush1.bf16.msra.mxu0 %v9431_v18  ;;  %7466 = vmatpush1.bf16.msra.mxu1 %v9434_v21  ;;  %v9521_v18 = vld [vmem:[%s11867_s5 + $0xae0] ss:$16 sps:$4 sm:$0xff]   ;;  %v9524_v21 = vld [vmem:[%s11867_s5 + $0xae8] ss:$16 sps:$4 sm:$0xff]  }
 0x2c5   : > { %6934 = vmatprep.subr.bf16.mxu0 %v9439_v22  ;;  %7467 = vmatprep.subr.bf16.mxu1 %v9442_v23  ;;  %v9529_v22 = vld [vmem:[%s11867_s5 + $0xb04] ss:$16 sps:$4 sm:$0xff]   ;;  %v9532_v23 = vld [vmem:[%s11867_s5 + $0xb0c] ss:$16 sps:$4 sm:$0xff]  }
 0x2c8   : > { %6935 = vmatpush1.bf16.msra.mxu0 %v9437_v25  ;;  %7468 = vmatpush1.bf16.msra.mxu1 %v9440_v26  ;;  %v9527_v25 = vld [vmem:[%s11867_s5 + $0xb00] ss:$16 sps:$4 sm:$0xff]   ;;  %v9530_v26 = vld [vmem:[%s11867_s5 + $0xb08] ss:$16 sps:$4 sm:$0xff]  }
 0x2c9   : > { %6936 = vmatprep.subr.bf16.mxu0 %v9445_v27  ;;  %7469 = vmatprep.subr.bf16.mxu1 %v9448_v29  ;;  %v9535_v27 = vld [vmem:[%s11867_s5 + $0xb24] ss:$16 sps:$4 sm:$0xff]   ;;  %v9538_v29 = vld [vmem:[%s11867_s5 + $0xb2c] ss:$16 sps:$4 sm:$0xff]  }
 0x2cc   : > { %6937 = vmatpush1.bf16.msra.mxu0 %v9443_v30  ;;  %7470 = vmatpush1.bf16.msra.mxu1 %v9446_v31  ;;  %v9533_v30 = vld [vmem:[%s11867_s5 + $0xb20] ss:$16 sps:$4 sm:$0xff]   ;;  %v9536_v31 = vld [vmem:[%s11867_s5 + $0xb28] ss:$16 sps:$4 sm:$0xff]  }
 0x2cd   : > { %6938 = vmatprep.subr.bf16.mxu0 %v9451_v32  ;;  %7471 = vmatprep.subr.bf16.mxu1 %v9454_v33  ;;  %v9541_v32 = vld [vmem:[%s11867_s5 + $0xb44] ss:$16 sps:$4 sm:$0xff]   ;;  %v9544_v33 = vld [vmem:[%s11867_s5 + $0xb4c] ss:$16 sps:$4 sm:$0xff]  }
 0x2d0   : > { %6939 = vmatpush1.bf16.msra.mxu0 %v9449_v36  ;;  %7472 = vmatpush1.bf16.msra.mxu1 %v9452_v38  ;;  %v9539_v36 = vld [vmem:[%s11867_s5 + $0xb40] ss:$16 sps:$4 sm:$0xff]   ;;  %v9542_v38 = vld [vmem:[%s11867_s5 + $0xb48] ss:$16 sps:$4 sm:$0xff]  }
 0x2d1   : > { %6940 = vmatprep.subr.bf16.mxu0 %v9457_v20  ;;  %7473 = vmatprep.subr.bf16.mxu1 %v9460_v39  ;;  %v9547_v20 = vld [vmem:[%s11867_s5 + $0xb64] ss:$16 sps:$4 sm:$0xff]   ;;  %v9550_v39 = vld [vmem:[%s11867_s5 + $0xb6c] ss:$16 sps:$4 sm:$0xff]  }
 0x2d4   : > { %6941 = vmatpush1.bf16.msra.mxu0 %v9455_v28  ;;  %7474 = vmatpush1.bf16.msra.mxu1 %v9458_v40  ;;  %v9545_v28 = vld [vmem:[%s11867_s5 + $0xb60] ss:$16 sps:$4 sm:$0xff]   ;;  %v9548_v40 = vld [vmem:[%s11867_s5 + $0xb68] ss:$16 sps:$4 sm:$0xff]  }
 0x2d5   : > { %6942 = vmatprep.subr.bf16.mxu0 %v9463_v41  ;;  %7475 = vmatprep.subr.bf16.mxu1 %v9466_v42  ;;  %v9553_v41 = vld [vmem:[%s11867_s5 + $0xb84] ss:$16 sps:$4 sm:$0xff]   ;;  %v9556_v42 = vld [vmem:[%s11867_s5 + $0xb8c] ss:$16 sps:$4 sm:$0xff]  }
 0x2d8   : > { %6943 = vmatpush1.bf16.msra.mxu0 %v9461_v43  ;;  %7476 = vmatpush1.bf16.msra.mxu1 %v9464_v45  ;;  %v9551_v43 = vld [vmem:[%s11867_s5 + $0xb80] ss:$16 sps:$4 sm:$0xff]   ;;  %v9554_v45 = vld [vmem:[%s11867_s5 + $0xb88] ss:$16 sps:$4 sm:$0xff]  }
 0x2d9   : > { %6944 = vmatprep.subr.bf16.mxu0 %v9469_v46  ;;  %7477 = vmatprep.subr.bf16.mxu1 %v9472_v47  ;;  %v9559_v46 = vld [vmem:[%s11867_s5 + $0xba4] ss:$16 sps:$4 sm:$0xff]   ;;  %v9562_v47 = vld [vmem:[%s11867_s5 + $0xbac] ss:$16 sps:$4 sm:$0xff]  }
 0x2dc   : > { %6945 = vmatpush1.bf16.msra.mxu0 %v9467_v48  ;;  %7478 = vmatpush1.bf16.msra.mxu1 %v9470_v49  ;;  %v9557_v48 = vld [vmem:[%s11867_s5 + $0xba0] ss:$16 sps:$4 sm:$0xff]   ;;  %v9560_v49 = vld [vmem:[%s11867_s5 + $0xba8] ss:$16 sps:$4 sm:$0xff]  }
 0x2dd   : > { %6946 = vmatprep.subr.bf16.mxu0 %v9475_v50  ;;  %7479 = vmatprep.subr.bf16.mxu1 %v9478_v35  ;;  %v9565_v50 = vld [vmem:[%s11867_s5 + $0xbc4] ss:$16 sps:$4 sm:$0xff]   ;;  %v9568_v35 = vld [vmem:[%s11867_s5 + $0xbcc] ss:$16 sps:$4 sm:$0xff]  }
 0x2e0   : > { %6947 = vmatpush1.bf16.msra.mxu0 %v9473_v51  ;;  %7480 = vmatpush1.bf16.msra.mxu1 %v9476_v52  ;;  %v10177_v51 = vld [vmem:[%s12829_s0 + $0x8] sm:$0xff] }
 0x2e1   : > { %6957 = vmatprep.subr.bf16.mxu0 %v9481_v44  ;;  %7490 = vmatprep.subr.bf16.mxu1 %v9484_v53  ;;  %v2692_v52 = vcombine.high %v10177_v51, %v10177_v51  ;;  %v9563_v44 = vld [vmem:[%s11867_s5 + $0xbc0] ss:$16 sps:$4 sm:$0xff]   ;;  %v9566_v53 = vld [vmem:[%s11867_s5 + $0xbc8] ss:$16 sps:$4 sm:$0xff]  }
 0x2e2   : > { %v9647_v51 = vld [vmem:[%s11867_s5 + $0xd80] ss:$16 sps:$4 sm:$0xff]  }
 0x2e3   : > { %6949 = vmatmul.mubr.bf16.vlgmr.msra.gmra.mrb[0].mxu0 %v12251_v34  ;;  %7482 = vmatmul.mubr.bf16.vlgmr.msra.gmra.mrb[0].mxu1 %v12251_v34 }
 0x2e4   : > { %6958 = vmatpush1.bf16.msra.mxu0 %v9479_v55  ;;  %7491 = vmatpush1.bf16.msra.mxu1 %v9482_v56  ;;  %v9571_v55 = vld [vmem:[%s11867_s5 + $0xbe4] ss:$16 sps:$4 sm:$0xff]   ;;  %v9574_v56 = vld [vmem:[%s11867_s5 + $0xbec] ss:$16 sps:$4 sm:$0xff]  }
 0x2e5   : > { %6959 = vmatprep.subr.bf16.mxu0 %v9487_v57  ;;  %7492 = vmatprep.subr.bf16.mxu1 %v9490_v58  ;;  %v12321_v57 = vrot.slane %v2692_v52, %v11872_v24  ;;  %v9569_v58 = vld [vmem:[%s11867_s5 + $0xbe0] ss:$16 sps:$4 sm:$0xff]   ;;  %v9650_v52 = vld [vmem:[%s11867_s5 + $0xd88] ss:$16 sps:$4 sm:$0xff]  }
 0x2e6   : > { %6989 = vmatprep.mubr.bf16.mxu0 %v2739_v59  ;;  %7522 = vmatprep.mubr.bf16.mxu1 %v2739_v59  ;;  %v9572_v59 = vld [vmem:[%s11867_s5 + $0xbe8] ss:$16 sps:$4 sm:$0xff]  }
 0x2e8   : > { %6960 = vmatpush1.bf16.msra.mxu0 %v9485_v37  ;;  %7493 = vmatpush1.bf16.msra.mxu1 %v9488_v60  ;;  %v9577_v37 = vld [vmem:[%s11867_s5 + $0xc04] ss:$16 sps:$4 sm:$0xff]   ;;  %v9580_v60 = vld [vmem:[%s11867_s5 + $0xc0c] ss:$16 sps:$4 sm:$0xff]  }
 0x2e9   : > { %6961 = vmatprep.subr.bf16.mxu0 %v9493_v61  ;;  %7494 = vmatprep.subr.bf16.mxu1 %v9496_v62  ;;  %v2708_v61 = vcombine.high %v12321_v57, %v12321_v57  ;;  %v2737_v62 = vcombine.high %v12251_v34, %v12251_v34  ;;  %v9581_v34 = vld [vmem:[%s11867_s5 + $0xc20] ss:$16 sps:$4 sm:$0xff]  }
 0x2ec   : > { %6962 = vmatpush1.bf16.msra.mxu0 %v9491_v54  ;;  %7495 = vmatpush1.bf16.msra.mxu1 %v9494_v63  ;;  %v9575_v54 = vld [vmem:[%s11867_s5 + $0xc00] ss:$16 sps:$4 sm:$0xff]   ;;  %v9578_v63 = vld [vmem:[%s11867_s5 + $0xc08] ss:$16 sps:$4 sm:$0xff]  }
 0x2ed   : > { %6963 = vmatprep.subr.bf16.mxu0 %v9499_v0  ;;  %7496 = vmatprep.subr.bf16.mxu1 %v9502_v1  ;;  %v9583_v0 = vld [vmem:[%s11867_s5 + $0xc24] ss:$16 sps:$4 sm:$0xff]   ;;  %v9586_v1 = vld [vmem:[%s11867_s5 + $0xc2c] ss:$16 sps:$4 sm:$0xff]  }
 0x2f0   : > { %6964 = vmatpush1.bf16.msra.mxu0 %v9497_v2  ;;  %7497 = vmatpush1.bf16.msra.mxu1 %v9500_v3  ;;  %v12336_v2 = vrot.slane %v2708_v61, %v11872_v24  ;;  %v9584_v3 = vld [vmem:[%s11867_s5 + $0xc28] ss:$16 sps:$4 sm:$0xff]   ;;  %v9667_v61 = vld [vmem:[%s11867_s5 + $0xde4] ss:$16 sps:$4 sm:$0xff]  }
 0x2f1   : > { %6965 = vmatprep.subr.bf16.mxu0 %v9505_v4  ;;  %7498 = vmatprep.subr.bf16.mxu1 %v9508_v5  ;;  %v9589_v4 = vld [vmem:[%s11867_s5 + $0xc44] ss:$16 sps:$4 sm:$0xff]   ;;  %v9592_v5 = vld [vmem:[%s11867_s5 + $0xc4c] ss:$16 sps:$4 sm:$0xff]  }
 0x2f4   : > { %6966 = vmatpush1.bf16.msra.mxu0 %v9503_v6  ;;  %7499 = vmatpush1.bf16.msra.mxu1 %v9506_v7  ;;  %v9587_v6 = vld [vmem:[%s11867_s5 + $0xc40] ss:$16 sps:$4 sm:$0xff]   ;;  %v9590_v7 = vld [vmem:[%s11867_s5 + $0xc48] ss:$16 sps:$4 sm:$0xff]  }
 0x2f5   : > { %6967 = vmatprep.subr.bf16.mxu0 %v9511_v8  ;;  %7500 = vmatprep.subr.bf16.mxu1 %v9514_v9  ;;  %v9595_v8 = vld [vmem:[%s11867_s5 + $0xc64] ss:$16 sps:$4 sm:$0xff]   ;;  %v9598_v9 = vld [vmem:[%s11867_s5 + $0xc6c] ss:$16 sps:$4 sm:$0xff]  }
 0x2f8   : > { %6968 = vmatpush1.bf16.msra.mxu0 %v9509_v10  ;;  %7501 = vmatpush1.bf16.msra.mxu1 %v9512_v11  ;;  %v9593_v10 = vld [vmem:[%s11867_s5 + $0xc60] ss:$16 sps:$4 sm:$0xff]   ;;  %v9596_v11 = vld [vmem:[%s11867_s5 + $0xc68] ss:$16 sps:$4 sm:$0xff]  }
 0x2f9   : > { %6969 = vmatprep.subr.bf16.mxu0 %v9517_v12  ;;  %7502 = vmatprep.subr.bf16.mxu1 %v9520_v13  ;;  %v9601_v12 = vld [vmem:[%s11867_s5 + $0xc84] ss:$16 sps:$4 sm:$0xff]   ;;  %v9604_v13 = vld [vmem:[%s11867_s5 + $0xc8c] ss:$16 sps:$4 sm:$0xff]  }
 0x2fc   : > { %6970 = vmatpush1.bf16.msra.mxu0 %v9515_v14  ;;  %7503 = vmatpush1.bf16.msra.mxu1 %v9518_v15  ;;  %v9599_v14 = vld [vmem:[%s11867_s5 + $0xc80] ss:$16 sps:$4 sm:$0xff]   ;;  %v9602_v15 = vld [vmem:[%s11867_s5 + $0xc88] ss:$16 sps:$4 sm:$0xff]  }
 0x2fd   : > { %6971 = vmatprep.subr.bf16.mxu0 %v9523_v16  ;;  %7504 = vmatprep.subr.bf16.mxu1 %v9526_v17  ;;  %v9607_v16 = vld [vmem:[%s11867_s5 + $0xca4] ss:$16 sps:$4 sm:$0xff]   ;;  %v9610_v17 = vld [vmem:[%s11867_s5 + $0xcac] ss:$16 sps:$4 sm:$0xff]  }
 0x300   : > { %6972 = vmatpush1.bf16.msra.mxu0 %v9521_v18  ;;  %7505 = vmatpush1.bf16.msra.mxu1 %v9524_v21  ;;  %v9605_v18 = vld [vmem:[%s11867_s5 + $0xca0] ss:$16 sps:$4 sm:$0xff]   ;;  %v9608_v21 = vld [vmem:[%s11867_s5 + $0xca8] ss:$16 sps:$4 sm:$0xff]  }
 0x301   : > { %6973 = vmatprep.subr.bf16.mxu0 %v9529_v22  ;;  %7506 = vmatprep.subr.bf16.mxu1 %v9532_v23  ;;  %v9613_v22 = vld [vmem:[%s11867_s5 + $0xcc4] ss:$16 sps:$4 sm:$0xff]   ;;  %v9616_v23 = vld [vmem:[%s11867_s5 + $0xccc] ss:$16 sps:$4 sm:$0xff]  }
 0x304   : > { %6974 = vmatpush1.bf16.msra.mxu0 %v9527_v25  ;;  %7507 = vmatpush1.bf16.msra.mxu1 %v9530_v26  ;;  %v9611_v25 = vld [vmem:[%s11867_s5 + $0xcc0] ss:$16 sps:$4 sm:$0xff]   ;;  %v9614_v26 = vld [vmem:[%s11867_s5 + $0xcc8] ss:$16 sps:$4 sm:$0xff]  }
 0x305   : > { %6975 = vmatprep.subr.bf16.mxu0 %v9535_v27  ;;  %7508 = vmatprep.subr.bf16.mxu1 %v9538_v29  ;;  %v9619_v27 = vld [vmem:[%s11867_s5 + $0xce4] ss:$16 sps:$4 sm:$0xff]   ;;  %v9622_v29 = vld [vmem:[%s11867_s5 + $0xcec] ss:$16 sps:$4 sm:$0xff]  }
 0x308   : > { %6976 = vmatpush1.bf16.msra.mxu0 %v9533_v30  ;;  %7509 = vmatpush1.bf16.msra.mxu1 %v9536_v31  ;;  %v9617_v30 = vld [vmem:[%s11867_s5 + $0xce0] ss:$16 sps:$4 sm:$0xff]   ;;  %v9620_v31 = vld [vmem:[%s11867_s5 + $0xce8] ss:$16 sps:$4 sm:$0xff]  }
 0x309   : > { %6977 = vmatprep.subr.bf16.mxu0 %v9541_v32  ;;  %7510 = vmatprep.subr.bf16.mxu1 %v9544_v33  ;;  %v9625_v32 = vld [vmem:[%s11867_s5 + $0xd04] ss:$16 sps:$4 sm:$0xff]   ;;  %v9628_v33 = vld [vmem:[%s11867_s5 + $0xd0c] ss:$16 sps:$4 sm:$0xff]  }
 0x30c   : > { %6978 = vmatpush1.bf16.msra.mxu0 %v9539_v36  ;;  %7511 = vmatpush1.bf16.msra.mxu1 %v9542_v38  ;;  %v9623_v36 = vld [vmem:[%s11867_s5 + $0xd00] ss:$16 sps:$4 sm:$0xff]   ;;  %v9626_v38 = vld [vmem:[%s11867_s5 + $0xd08] ss:$16 sps:$4 sm:$0xff]  }
 0x30d   : > { %6979 = vmatprep.subr.bf16.mxu0 %v9547_v20  ;;  %7512 = vmatprep.subr.bf16.mxu1 %v9550_v39  ;;  %v9631_v20 = vld [vmem:[%s11867_s5 + $0xd24] ss:$16 sps:$4 sm:$0xff]   ;;  %v9634_v39 = vld [vmem:[%s11867_s5 + $0xd2c] ss:$16 sps:$4 sm:$0xff]  }
 0x310   : > { %6980 = vmatpush1.bf16.msra.mxu0 %v9545_v28  ;;  %7513 = vmatpush1.bf16.msra.mxu1 %v9548_v40  ;;  %v9629_v28 = vld [vmem:[%s11867_s5 + $0xd20] ss:$16 sps:$4 sm:$0xff]   ;;  %v9632_v40 = vld [vmem:[%s11867_s5 + $0xd28] ss:$16 sps:$4 sm:$0xff]  }
 0x311   : > { %6981 = vmatprep.subr.bf16.mxu0 %v9553_v41  ;;  %7514 = vmatprep.subr.bf16.mxu1 %v9556_v42  ;;  %v9637_v41 = vld [vmem:[%s11867_s5 + $0xd44] ss:$16 sps:$4 sm:$0xff]   ;;  %v9640_v42 = vld [vmem:[%s11867_s5 + $0xd4c] ss:$16 sps:$4 sm:$0xff]  }
 0x314   : > { %6982 = vmatpush1.bf16.msra.mxu0 %v9551_v43  ;;  %7515 = vmatpush1.bf16.msra.mxu1 %v9554_v45  ;;  %v9635_v43 = vld [vmem:[%s11867_s5 + $0xd40] ss:$16 sps:$4 sm:$0xff]   ;;  %v9638_v45 = vld [vmem:[%s11867_s5 + $0xd48] ss:$16 sps:$4 sm:$0xff]  }
 0x315   : > { %6983 = vmatprep.subr.bf16.mxu0 %v9559_v46  ;;  %7516 = vmatprep.subr.bf16.mxu1 %v9562_v47  ;;  %v9643_v46 = vld [vmem:[%s11867_s5 + $0xd64] ss:$16 sps:$4 sm:$0xff]   ;;  %v9646_v47 = vld [vmem:[%s11867_s5 + $0xd6c] ss:$16 sps:$4 sm:$0xff]  }
 0x318   : > { %6984 = vmatpush1.bf16.msra.mxu0 %v9557_v48  ;;  %7517 = vmatpush1.bf16.msra.mxu1 %v9560_v49  ;;  %v9641_v48 = vld [vmem:[%s11867_s5 + $0xd60] ss:$16 sps:$4 sm:$0xff]   ;;  %v9644_v49 = vld [vmem:[%s11867_s5 + $0xd68] ss:$16 sps:$4 sm:$0xff]  }
 0x319   : > { %6985 = vmatprep.subr.bf16.mxu0 %v9565_v50  ;;  %7518 = vmatprep.subr.bf16.mxu1 %v9568_v35  ;;  %v9649_v50 = vld [vmem:[%s11867_s5 + $0xd84] ss:$16 sps:$4 sm:$0xff]   ;;  %v9652_v35 = vld [vmem:[%s11867_s5 + $0xd8c] ss:$16 sps:$4 sm:$0xff]  }
 0x31c   : > { %6986 = vmatpush1.bf16.msra.mxu0 %v9563_v44  ;;  %7519 = vmatpush1.bf16.msra.mxu1 %v9566_v53  ;;  %v9655_v44 = vld [vmem:[%s11867_s5 + $0xda4] ss:$16 sps:$4 sm:$0xff]   ;;  %v9658_v53 = vld [vmem:[%s11867_s5 + $0xdac] ss:$16 sps:$4 sm:$0xff]  }
 0x31d   : > { %6987 = vmatprep.subr.bf16.mxu0 %v9571_v55  ;;  %7520 = vmatprep.subr.bf16.mxu1 %v9574_v56  ;;  %v9653_v55 = vld [vmem:[%s11867_s5 + $0xda0] ss:$16 sps:$4 sm:$0xff]   ;;  %v9656_v56 = vld [vmem:[%s11867_s5 + $0xda8] ss:$16 sps:$4 sm:$0xff]  }
 0x320   : > { %6988 = vmatpush1.bf16.msra.mxu0 %v9569_v58  ;;  %7521 = vmatpush1.bf16.msra.mxu1 %v9572_v59  ;;  %v9661_v58 = vld [vmem:[%s11867_s5 + $0xdc4] ss:$16 sps:$4 sm:$0xff]   ;;  %v9664_v59 = vld [vmem:[%s11867_s5 + $0xdcc] ss:$16 sps:$4 sm:$0xff]  }
 0x321   : > { %6998 = vmatprep.subr.bf16.mxu0 %v9577_v37  ;;  %7531 = vmatprep.subr.bf16.mxu1 %v9580_v60  ;;  %v9659_v37 = vld [vmem:[%s11867_s5 + $0xdc0] ss:$16 sps:$4 sm:$0xff]   ;;  %v9662_v60 = vld [vmem:[%s11867_s5 + $0xdc8] ss:$16 sps:$4 sm:$0xff]  }
 0x323   : > { %6990 = vmatmul.mubr.bf16.vlgmr.msra.gmra.mrb[0].mxu0 %v2737_v62  ;;  %7523 = vmatmul.mubr.bf16.vlgmr.msra.gmra.mrb[0].mxu1 %v2737_v62  ;;  %v9670_v62 = vld [vmem:[%s11867_s5 + $0xdec] ss:$16 sps:$4 sm:$0xff]  }
 0x324   : > { %6999 = vmatpush1.bf16.msra.mxu0 %v9575_v54  ;;  %7532 = vmatpush1.bf16.msra.mxu1 %v9578_v63  ;;  %v9665_v54 = vld [vmem:[%s11867_s5 + $0xde0] ss:$16 sps:$4 sm:$0xff]   ;;  %v9668_v63 = vld [vmem:[%s11867_s5 + $0xde8] ss:$16 sps:$4 sm:$0xff]  }
 0x325   : > { %7000 = vmatprep.subr.bf16.mxu0 %v9583_v0  ;;  %7533 = vmatprep.subr.bf16.mxu1 %v9586_v1  ;;  %v9674_v0 = vld [vmem:[%s11867_s5 + $0xe04] ss:$16 sps:$4 sm:$0xff]   ;;  %v9677_v1 = vld [vmem:[%s11867_s5 + $0xe0c] ss:$16 sps:$4 sm:$0xff]  }
 0x326   : > { %7030 = vmatprep.mubr.bf16.mxu0 %v12336_v2  ;;  %7563 = vmatprep.mubr.bf16.mxu1 %v12336_v2 }
 0x328   : > { %7001 = vmatpush1.bf16.msra.mxu0 %v9581_v34  ;;  %7534 = vmatpush1.bf16.msra.mxu1 %v9584_v3  ;;  %v12402_v34 = vrot.slane %v12321_v57, %v11872_v24  ;;  %v9672_v3 = vld [vmem:[%s11867_s5 + $0xe00] ss:$16 sps:$4 sm:$0xff]  }
 0x329   : > { %7002 = vmatprep.subr.bf16.mxu0 %v9589_v4  ;;  %7535 = vmatprep.subr.bf16.mxu1 %v9592_v5  ;;  %v9675_v4 = vld [vmem:[%s11867_s5 + $0xe08] ss:$16 sps:$4 sm:$0xff]   ;;  %v9680_v5 = vld [vmem:[%s11867_s5 + $0xe24] ss:$16 sps:$4 sm:$0xff]   ;;  %v9678_v57 = vld [vmem:[%s11867_s5 + $0xe20] ss:$16 sps:$4 sm:$0xff]  }
 0x32c   : > { %7003 = vmatpush1.bf16.msra.mxu0 %v9587_v6  ;;  %7536 = vmatpush1.bf16.msra.mxu1 %v9590_v7  ;;  %v9683_v6 = vld [vmem:[%s11867_s5 + $0xe2c] ss:$16 sps:$4 sm:$0xff]   ;;  %v2740_v7 = vcombine.high %v12336_v2, %v12336_v2  ;;  %v9684_v2 = vld [vmem:[%s11867_s5 + $0xe40] ss:$16 sps:$4 sm:$0xff]  }
 0x32d   : > { %7004 = vmatprep.subr.bf16.mxu0 %v9595_v8  ;;  %7537 = vmatprep.subr.bf16.mxu1 %v9598_v9  ;;  %v9681_v8 = vld [vmem:[%s11867_s5 + $0xe28] ss:$16 sps:$4 sm:$0xff]   ;;  %v9686_v9 = vld [vmem:[%s11867_s5 + $0xe44] ss:$16 sps:$4 sm:$0xff]  }
 0x330   : > { %7005 = vmatpush1.bf16.msra.mxu0 %v9593_v10  ;;  %7538 = vmatpush1.bf16.msra.mxu1 %v9596_v11  ;;  %v9689_v10 = vld [vmem:[%s11867_s5 + $0xe4c] ss:$16 sps:$4 sm:$0xff]   ;;  %v9687_v11 = vld [vmem:[%s11867_s5 + $0xe48] ss:$16 sps:$4 sm:$0xff]  }
 0x331   : > { %7006 = vmatprep.subr.bf16.mxu0 %v9601_v12  ;;  %7539 = vmatprep.subr.bf16.mxu1 %v9604_v13  ;;  %v9692_v12 = vld [vmem:[%s11867_s5 + $0xe64] ss:$16 sps:$4 sm:$0xff]   ;;  %v9695_v13 = vld [vmem:[%s11867_s5 + $0xe6c] ss:$16 sps:$4 sm:$0xff]  }
 0x334   : > { %7007 = vmatpush1.bf16.msra.mxu0 %v9599_v14  ;;  %7540 = vmatpush1.bf16.msra.mxu1 %v9602_v15  ;;  %v9690_v14 = vld [vmem:[%s11867_s5 + $0xe60] ss:$16 sps:$4 sm:$0xff]   ;;  %v9693_v15 = vld [vmem:[%s11867_s5 + $0xe68] ss:$16 sps:$4 sm:$0xff]  }
 0x335   : > { %7008 = vmatprep.subr.bf16.mxu0 %v9607_v16  ;;  %7541 = vmatprep.subr.bf16.mxu1 %v9610_v17  ;;  %v9698_v16 = vld [vmem:[%s11867_s5 + $0xe84] ss:$16 sps:$4 sm:$0xff]   ;;  %v9701_v17 = vld [vmem:[%s11867_s5 + $0xe8c] ss:$16 sps:$4 sm:$0xff]  }
 0x338   : > { %7009 = vmatpush1.bf16.msra.mxu0 %v9605_v18  ;;  %7542 = vmatpush1.bf16.msra.mxu1 %v9608_v21  ;;  %v9696_v18 = vld [vmem:[%s11867_s5 + $0xe80] ss:$16 sps:$4 sm:$0xff]   ;;  %v9699_v21 = vld [vmem:[%s11867_s5 + $0xe88] ss:$16 sps:$4 sm:$0xff]  }
 0x339   : > { %7010 = vmatprep.subr.bf16.mxu0 %v9613_v22  ;;  %7543 = vmatprep.subr.bf16.mxu1 %v9616_v23  ;;  %v9704_v22 = vld [vmem:[%s11867_s5 + $0xea4] ss:$16 sps:$4 sm:$0xff]   ;;  %v9707_v23 = vld [vmem:[%s11867_s5 + $0xeac] ss:$16 sps:$4 sm:$0xff]  }
 0x33c   : > { %7011 = vmatpush1.bf16.msra.mxu0 %v9611_v25  ;;  %7544 = vmatpush1.bf16.msra.mxu1 %v9614_v26  ;;  %v9702_v25 = vld [vmem:[%s11867_s5 + $0xea0] ss:$16 sps:$4 sm:$0xff]   ;;  %v9705_v26 = vld [vmem:[%s11867_s5 + $0xea8] ss:$16 sps:$4 sm:$0xff]  }
 0x33d   : > { %7012 = vmatprep.subr.bf16.mxu0 %v9619_v27  ;;  %7545 = vmatprep.subr.bf16.mxu1 %v9622_v29  ;;  %v9710_v27 = vld [vmem:[%s11867_s5 + $0xec4] ss:$16 sps:$4 sm:$0xff]   ;;  %v9713_v29 = vld [vmem:[%s11867_s5 + $0xecc] ss:$16 sps:$4 sm:$0xff]  }
 0x340   : > { %7013 = vmatpush1.bf16.msra.mxu0 %v9617_v30  ;;  %7546 = vmatpush1.bf16.msra.mxu1 %v9620_v31  ;;  %v9708_v30 = vld [vmem:[%s11867_s5 + $0xec0] ss:$16 sps:$4 sm:$0xff]   ;;  %v9711_v31 = vld [vmem:[%s11867_s5 + $0xec8] ss:$16 sps:$4 sm:$0xff]  }
 0x341   : > { %7014 = vmatprep.subr.bf16.mxu0 %v9625_v32  ;;  %7547 = vmatprep.subr.bf16.mxu1 %v9628_v33  ;;  %v9716_v32 = vld [vmem:[%s11867_s5 + $0xee4] ss:$16 sps:$4 sm:$0xff]   ;;  %v9719_v33 = vld [vmem:[%s11867_s5 + $0xeec] ss:$16 sps:$4 sm:$0xff]  }
 0x344   : > { %7015 = vmatpush1.bf16.msra.mxu0 %v9623_v36  ;;  %7548 = vmatpush1.bf16.msra.mxu1 %v9626_v38  ;;  %v9714_v36 = vld [vmem:[%s11867_s5 + $0xee0] ss:$16 sps:$4 sm:$0xff]   ;;  %v9717_v38 = vld [vmem:[%s11867_s5 + $0xee8] ss:$16 sps:$4 sm:$0xff]  }
 0x345   : > { %7016 = vmatprep.subr.bf16.mxu0 %v9631_v20  ;;  %7549 = vmatprep.subr.bf16.mxu1 %v9634_v39  ;;  %v9722_v20 = vld [vmem:[%s11867_s5 + $0xf04] ss:$16 sps:$4 sm:$0xff]   ;;  %v9725_v39 = vld [vmem:[%s11867_s5 + $0xf0c] ss:$16 sps:$4 sm:$0xff]  }
 0x348   : > { %7017 = vmatpush1.bf16.msra.mxu0 %v9629_v28  ;;  %7550 = vmatpush1.bf16.msra.mxu1 %v9632_v40  ;;  %v9720_v28 = vld [vmem:[%s11867_s5 + $0xf00] ss:$16 sps:$4 sm:$0xff]   ;;  %v9723_v40 = vld [vmem:[%s11867_s5 + $0xf08] ss:$16 sps:$4 sm:$0xff]  }
 0x349   : > { %7018 = vmatprep.subr.bf16.mxu0 %v9637_v41  ;;  %7551 = vmatprep.subr.bf16.mxu1 %v9640_v42  ;;  %v9728_v41 = vld [vmem:[%s11867_s5 + $0xf24] ss:$16 sps:$4 sm:$0xff]   ;;  %v9731_v42 = vld [vmem:[%s11867_s5 + $0xf2c] ss:$16 sps:$4 sm:$0xff]  }
 0x34c   : > { %7019 = vmatpush1.bf16.msra.mxu0 %v9635_v43  ;;  %7552 = vmatpush1.bf16.msra.mxu1 %v9638_v45  ;;  %v9726_v43 = vld [vmem:[%s11867_s5 + $0xf20] ss:$16 sps:$4 sm:$0xff]   ;;  %v9729_v45 = vld [vmem:[%s11867_s5 + $0xf28] ss:$16 sps:$4 sm:$0xff]  }
 0x34d   : > { %7020 = vmatprep.subr.bf16.mxu0 %v9643_v46  ;;  %7553 = vmatprep.subr.bf16.mxu1 %v9646_v47  ;;  %v9734_v46 = vld [vmem:[%s11867_s5 + $0xf44] ss:$16 sps:$4 sm:$0xff]   ;;  %v9737_v47 = vld [vmem:[%s11867_s5 + $0xf4c] ss:$16 sps:$4 sm:$0xff]  }
 0x350   : > { %7021 = vmatpush1.bf16.msra.mxu0 %v9641_v48  ;;  %7554 = vmatpush1.bf16.msra.mxu1 %v9644_v49  ;;  %v9732_v48 = vld [vmem:[%s11867_s5 + $0xf40] ss:$16 sps:$4 sm:$0xff]   ;;  %v9735_v49 = vld [vmem:[%s11867_s5 + $0xf48] ss:$16 sps:$4 sm:$0xff]  }
 0x351   : > { %7022 = vmatprep.subr.bf16.mxu0 %v9649_v50  ;;  %7555 = vmatprep.subr.bf16.mxu1 %v9652_v35  ;;  %v9740_v50 = vld [vmem:[%s11867_s5 + $0xf64] ss:$16 sps:$4 sm:$0xff]   ;;  %v9743_v35 = vld [vmem:[%s11867_s5 + $0xf6c] ss:$16 sps:$4 sm:$0xff]  }
 0x354   : > { %7023 = vmatpush1.bf16.msra.mxu0 %v9647_v51  ;;  %7556 = vmatpush1.bf16.msra.mxu1 %v9650_v52  ;;  %v9738_v51 = vld [vmem:[%s11867_s5 + $0xf60] ss:$16 sps:$4 sm:$0xff]   ;;  %v9741_v52 = vld [vmem:[%s11867_s5 + $0xf68] ss:$16 sps:$4 sm:$0xff]  }
 0x355   : > { %7024 = vmatprep.subr.bf16.mxu0 %v9655_v44  ;;  %7557 = vmatprep.subr.bf16.mxu1 %v9658_v53  ;;  %v9746_v44 = vld [vmem:[%s11867_s5 + $0xf84] ss:$16 sps:$4 sm:$0xff]   ;;  %v9749_v53 = vld [vmem:[%s11867_s5 + $0xf8c] ss:$16 sps:$4 sm:$0xff]  }
 0x358   : > { %7025 = vmatpush1.bf16.msra.mxu0 %v9653_v55  ;;  %7558 = vmatpush1.bf16.msra.mxu1 %v9656_v56  ;;  %v9744_v55 = vld [vmem:[%s11867_s5 + $0xf80] ss:$16 sps:$4 sm:$0xff]   ;;  %v9747_v56 = vld [vmem:[%s11867_s5 + $0xf88] ss:$16 sps:$4 sm:$0xff]  }
 0x359   : > { %7026 = vmatprep.subr.bf16.mxu0 %v9661_v58  ;;  %7559 = vmatprep.subr.bf16.mxu1 %v9664_v59  ;;  %v9752_v58 = vld [vmem:[%s11867_s5 + $0xfa4] ss:$16 sps:$4 sm:$0xff]   ;;  %v9755_v59 = vld [vmem:[%s11867_s5 + $0xfac] ss:$16 sps:$4 sm:$0xff]  }
 0x35c   : > { %7027 = vmatpush1.bf16.msra.mxu0 %v9659_v37  ;;  %7560 = vmatpush1.bf16.msra.mxu1 %v9662_v60  ;;  %v9750_v37 = vld [vmem:[%s11867_s5 + $0xfa0] ss:$16 sps:$4 sm:$0xff]   ;;  %v9753_v60 = vld [vmem:[%s11867_s5 + $0xfa8] ss:$16 sps:$4 sm:$0xff]  }
 0x35d   : > { %7028 = vmatprep.subr.bf16.mxu0 %v9667_v61  ;;  %7561 = vmatprep.subr.bf16.mxu1 %v9670_v62  ;;  %v9758_v61 = vld [vmem:[%s11867_s5 + $0xfc4] ss:$16 sps:$4 sm:$0xff]   ;;  %v9761_v62 = vld [vmem:[%s11867_s5 + $0xfcc] ss:$16 sps:$4 sm:$0xff]  }
 0x360   : > { %7029 = vmatpush1.bf16.msra.mxu0 %v9665_v54  ;;  %7562 = vmatpush1.bf16.msra.mxu1 %v9668_v63  ;;  %v12467_v54 = vld [vmem:[%s12829_s0 + $0x10] sm:$0xff] }
 0x361   : > { %7039 = vmatprep.subr.bf16.mxu0 %v9674_v0  ;;  %7572 = vmatprep.subr.bf16.mxu1 %v9677_v1  ;;  %v9756_v63 = vld [vmem:[%s11867_s5 + $0xfc0] ss:$16 sps:$4 sm:$0xff]   ;;  %v9759_v0 = vld [vmem:[%s11867_s5 + $0xfc8] ss:$16 sps:$4 sm:$0xff]   ;;  %v9764_v1 = vld [vmem:[%s11867_s5 + $0xfe4] ss:$16 sps:$4 sm:$0xff]  }
 0x363   : > { %7031 = vmatmul.mubr.bf16.vlgmr.msra.gmra.mrb[0].mxu0 %v12402_v34  ;;  %7564 = vmatmul.mubr.bf16.vlgmr.msra.gmra.mrb[0].mxu1 %v12402_v34 }
 0x364   : > { %7040 = vmatpush1.bf16.msra.mxu0 %v9672_v3  ;;  %7573 = vmatpush1.bf16.msra.mxu1 %v9675_v4  ;;  %v9767_v3 = vld [vmem:[%s11867_s5 + $0xfec] ss:$16 sps:$4 sm:$0xff]   ;;  %v12475_v4 = vrot.slane %v12467_v54, %v11872_v24 }
 0x365   : > { %7041 = vmatprep.subr.bf16.mxu0 %v9680_v5  ;;  %7574 = vmatprep.subr.bf16.mxu1 %v9683_v6  ;;  %v9762_v5 = vld [vmem:[%s11867_s5 + $0xfe0] ss:$16 sps:$4 sm:$0xff]   ;;  %v9765_v6 = vld [vmem:[%s11867_s5 + $0xfe8] ss:$16 sps:$4 sm:$0xff]  }
 0x366   : > { %7071 = vmatprep.mubr.bf16.mxu0 %v2740_v7  ;;  %7604 = vmatprep.mubr.bf16.mxu1 %v2740_v7  ;;  %v9770_v7 = vld [vmem:[%s11867_s5 + $0x1004] ss:$16 sps:$4 sm:$0xff]  }
 0x368   : > { %7042 = vmatpush1.bf16.msra.mxu0 %v9678_v57  ;;  %7575 = vmatpush1.bf16.msra.mxu1 %v9681_v8  ;;  %v9773_v57 = vld [vmem:[%s11867_s5 + $0x100c] ss:$16 sps:$4 sm:$0xff]   ;;  %v2756_v8 = vcombine.high %v12475_v4, %v12475_v4 }
 0x369   : > { %7043 = vmatprep.subr.bf16.mxu0 %v9686_v9  ;;  %7576 = vmatprep.subr.bf16.mxu1 %v9689_v10  ;;  %v2738_v9 = vcombine.high %v12402_v34, %v12402_v34  ;;  %v9768_v10 = vld [vmem:[%s11867_s5 + $0x1000] ss:$16 sps:$4 sm:$0xff]  }
 0x36a   : > { %v9774_v34 = vld [vmem:[%s11867_s5 + $0x1020] ss:$16 sps:$4 sm:$0xff]  }
 0x36c   : > { %7044 = vmatpush1.bf16.msra.mxu0 %v9684_v2  ;;  %7577 = vmatpush1.bf16.msra.mxu1 %v9687_v11  ;;  %v9771_v2 = vld [vmem:[%s11867_s5 + $0x1008] ss:$16 sps:$4 sm:$0xff]   ;;  %v9776_v11 = vld [vmem:[%s11867_s5 + $0x1024] ss:$16 sps:$4 sm:$0xff]  }
 0x36d   : > { %7045 = vmatprep.subr.bf16.mxu0 %v9692_v12  ;;  %7578 = vmatprep.subr.bf16.mxu1 %v9695_v13  ;;  %v9779_v12 = vld [vmem:[%s11867_s5 + $0x102c] ss:$16 sps:$4 sm:$0xff]   ;;  %v12490_v13 = vrot.slane %v2756_v8, %v11872_v24  ;;  %v9855_v8 = vld [vmem:[%s11867_s5 + $0x11c8] ss:$16 sps:$4 sm:$0xff]  }
 0x370   : > { %7046 = vmatpush1.bf16.msra.mxu0 %v9690_v14  ;;  %7579 = vmatpush1.bf16.msra.mxu1 %v9693_v15  ;;  %v9777_v14 = vld [vmem:[%s11867_s5 + $0x1028] ss:$16 sps:$4 sm:$0xff]   ;;  %v9782_v15 = vld [vmem:[%s11867_s5 + $0x1044] ss:$16 sps:$4 sm:$0xff]  }
 0x371   : > { %7047 = vmatprep.subr.bf16.mxu0 %v9698_v16  ;;  %7580 = vmatprep.subr.bf16.mxu1 %v9701_v17  ;;  %v9785_v16 = vld [vmem:[%s11867_s5 + $0x104c] ss:$16 sps:$4 sm:$0xff]   ;;  %v9780_v17 = vld [vmem:[%s11867_s5 + $0x1040] ss:$16 sps:$4 sm:$0xff]  }
 0x374   : > { %7048 = vmatpush1.bf16.msra.mxu0 %v9696_v18  ;;  %7581 = vmatpush1.bf16.msra.mxu1 %v9699_v21  ;;  %v9783_v18 = vld [vmem:[%s11867_s5 + $0x1048] ss:$16 sps:$4 sm:$0xff]   ;;  %v9788_v21 = vld [vmem:[%s11867_s5 + $0x1064] ss:$16 sps:$4 sm:$0xff]  }
 0x375   : > { %7049 = vmatprep.subr.bf16.mxu0 %v9704_v22  ;;  %7582 = vmatprep.subr.bf16.mxu1 %v9707_v23  ;;  %v9791_v22 = vld [vmem:[%s11867_s5 + $0x106c] ss:$16 sps:$4 sm:$0xff]   ;;  %v9786_v23 = vld [vmem:[%s11867_s5 + $0x1060] ss:$16 sps:$4 sm:$0xff]  }
 0x378   : > { %7050 = vmatpush1.bf16.msra.mxu0 %v9702_v25  ;;  %7583 = vmatpush1.bf16.msra.mxu1 %v9705_v26  ;;  %v9789_v25 = vld [vmem:[%s11867_s5 + $0x1068] ss:$16 sps:$4 sm:$0xff]   ;;  %v9794_v26 = vld [vmem:[%s11867_s5 + $0x1084] ss:$16 sps:$4 sm:$0xff]  }
 0x379   : > { %7051 = vmatprep.subr.bf16.mxu0 %v9710_v27  ;;  %7584 = vmatprep.subr.bf16.mxu1 %v9713_v29  ;;  %v9797_v27 = vld [vmem:[%s11867_s5 + $0x108c] ss:$16 sps:$4 sm:$0xff]   ;;  %v9792_v29 = vld [vmem:[%s11867_s5 + $0x1080] ss:$16 sps:$4 sm:$0xff]  }
 0x37c   : > { %7052 = vmatpush1.bf16.msra.mxu0 %v9708_v30  ;;  %7585 = vmatpush1.bf16.msra.mxu1 %v9711_v31  ;;  %v9795_v30 = vld [vmem:[%s11867_s5 + $0x1088] ss:$16 sps:$4 sm:$0xff]   ;;  %v9800_v31 = vld [vmem:[%s11867_s5 + $0x10a4] ss:$16 sps:$4 sm:$0xff]  }
 0x37d   : > { %7053 = vmatprep.subr.bf16.mxu0 %v9716_v32  ;;  %7586 = vmatprep.subr.bf16.mxu1 %v9719_v33  ;;  %v9803_v32 = vld [vmem:[%s11867_s5 + $0x10ac] ss:$16 sps:$4 sm:$0xff]   ;;  %v9798_v33 = vld [vmem:[%s11867_s5 + $0x10a0] ss:$16 sps:$4 sm:$0xff]  }
 0x380   : > { %7054 = vmatpush1.bf16.msra.mxu0 %v9714_v36  ;;  %7587 = vmatpush1.bf16.msra.mxu1 %v9717_v38  ;;  %v9801_v36 = vld [vmem:[%s11867_s5 + $0x10a8] ss:$16 sps:$4 sm:$0xff]   ;;  %v9806_v38 = vld [vmem:[%s11867_s5 + $0x10c4] ss:$16 sps:$4 sm:$0xff]  }
 0x381   : > { %7055 = vmatprep.subr.bf16.mxu0 %v9722_v20  ;;  %7588 = vmatprep.subr.bf16.mxu1 %v9725_v39  ;;  %v9809_v20 = vld [vmem:[%s11867_s5 + $0x10cc] ss:$16 sps:$4 sm:$0xff]   ;;  %v9804_v39 = vld [vmem:[%s11867_s5 + $0x10c0] ss:$16 sps:$4 sm:$0xff]  }
 0x384   : > { %7056 = vmatpush1.bf16.msra.mxu0 %v9720_v28  ;;  %7589 = vmatpush1.bf16.msra.mxu1 %v9723_v40  ;;  %v9807_v28 = vld [vmem:[%s11867_s5 + $0x10c8] ss:$16 sps:$4 sm:$0xff]   ;;  %v9812_v40 = vld [vmem:[%s11867_s5 + $0x10e4] ss:$16 sps:$4 sm:$0xff]  }
 0x385   : > { %7057 = vmatprep.subr.bf16.mxu0 %v9728_v41  ;;  %7590 = vmatprep.subr.bf16.mxu1 %v9731_v42  ;;  %v9815_v41 = vld [vmem:[%s11867_s5 + $0x10ec] ss:$16 sps:$4 sm:$0xff]   ;;  %v9810_v42 = vld [vmem:[%s11867_s5 + $0x10e0] ss:$16 sps:$4 sm:$0xff]  }
 0x388   : > { %7058 = vmatpush1.bf16.msra.mxu0 %v9726_v43  ;;  %7591 = vmatpush1.bf16.msra.mxu1 %v9729_v45  ;;  %v9813_v43 = vld [vmem:[%s11867_s5 + $0x10e8] ss:$16 sps:$4 sm:$0xff]   ;;  %v9818_v45 = vld [vmem:[%s11867_s5 + $0x1104] ss:$16 sps:$4 sm:$0xff]  }
 0x389   : > { %7059 = vmatprep.subr.bf16.mxu0 %v9734_v46  ;;  %7592 = vmatprep.subr.bf16.mxu1 %v9737_v47  ;;  %v9821_v46 = vld [vmem:[%s11867_s5 + $0x110c] ss:$16 sps:$4 sm:$0xff]   ;;  %v9816_v47 = vld [vmem:[%s11867_s5 + $0x1100] ss:$16 sps:$4 sm:$0xff]  }
 0x38c   : > { %7060 = vmatpush1.bf16.msra.mxu0 %v9732_v48  ;;  %7593 = vmatpush1.bf16.msra.mxu1 %v9735_v49  ;;  %v9819_v48 = vld [vmem:[%s11867_s5 + $0x1108] ss:$16 sps:$4 sm:$0xff]   ;;  %v9824_v49 = vld [vmem:[%s11867_s5 + $0x1124] ss:$16 sps:$4 sm:$0xff]  }
 0x38d   : > { %7061 = vmatprep.subr.bf16.mxu0 %v9740_v50  ;;  %7594 = vmatprep.subr.bf16.mxu1 %v9743_v35  ;;  %v9827_v50 = vld [vmem:[%s11867_s5 + $0x112c] ss:$16 sps:$4 sm:$0xff]   ;;  %v9822_v35 = vld [vmem:[%s11867_s5 + $0x1120] ss:$16 sps:$4 sm:$0xff]  }
 0x390   : > { %7062 = vmatpush1.bf16.msra.mxu0 %v9738_v51  ;;  %7595 = vmatpush1.bf16.msra.mxu1 %v9741_v52  ;;  %v9825_v51 = vld [vmem:[%s11867_s5 + $0x1128] ss:$16 sps:$4 sm:$0xff]   ;;  %v9830_v52 = vld [vmem:[%s11867_s5 + $0x1144] ss:$16 sps:$4 sm:$0xff]  }
 0x391   : > { %7063 = vmatprep.subr.bf16.mxu0 %v9746_v44  ;;  %7596 = vmatprep.subr.bf16.mxu1 %v9749_v53  ;;  %v9833_v44 = vld [vmem:[%s11867_s5 + $0x114c] ss:$16 sps:$4 sm:$0xff]   ;;  %v9828_v53 = vld [vmem:[%s11867_s5 + $0x1140] ss:$16 sps:$4 sm:$0xff]  }
 0x394   : > { %7064 = vmatpush1.bf16.msra.mxu0 %v9744_v55  ;;  %7597 = vmatpush1.bf16.msra.mxu1 %v9747_v56  ;;  %v9831_v55 = vld [vmem:[%s11867_s5 + $0x1148] ss:$16 sps:$4 sm:$0xff]   ;;  %v9836_v56 = vld [vmem:[%s11867_s5 + $0x1164] ss:$16 sps:$4 sm:$0xff]  }
 0x395   : > { %7065 = vmatprep.subr.bf16.mxu0 %v9752_v58  ;;  %7598 = vmatprep.subr.bf16.mxu1 %v9755_v59  ;;  %v9839_v58 = vld [vmem:[%s11867_s5 + $0x116c] ss:$16 sps:$4 sm:$0xff]   ;;  %v9834_v59 = vld [vmem:[%s11867_s5 + $0x1160] ss:$16 sps:$4 sm:$0xff]  }
 0x398   : > { %7066 = vmatpush1.bf16.msra.mxu0 %v9750_v37  ;;  %7599 = vmatpush1.bf16.msra.mxu1 %v9753_v60  ;;  %v9837_v37 = vld [vmem:[%s11867_s5 + $0x1168] ss:$16 sps:$4 sm:$0xff]   ;;  %v9842_v60 = vld [vmem:[%s11867_s5 + $0x1184] ss:$16 sps:$4 sm:$0xff]  }
 0x399   : > { %7067 = vmatprep.subr.bf16.mxu0 %v9758_v61  ;;  %7600 = vmatprep.subr.bf16.mxu1 %v9761_v62  ;;  %v9845_v61 = vld [vmem:[%s11867_s5 + $0x118c] ss:$16 sps:$4 sm:$0xff]   ;;  %v9840_v62 = vld [vmem:[%s11867_s5 + $0x1180] ss:$16 sps:$4 sm:$0xff]  }
 0x39c   : > { %7068 = vmatpush1.bf16.msra.mxu0 %v9756_v63  ;;  %7601 = vmatpush1.bf16.msra.mxu1 %v9759_v0  ;;  %v9843_v63 = vld [vmem:[%s11867_s5 + $0x1188] ss:$16 sps:$4 sm:$0xff]   ;;  %v9848_v0 = vld [vmem:[%s11867_s5 + $0x11a4] ss:$16 sps:$4 sm:$0xff]  }
 0x39d   : > { %7069 = vmatprep.subr.bf16.mxu0 %v9764_v1  ;;  %7602 = vmatprep.subr.bf16.mxu1 %v9767_v3  ;;  %v9851_v1 = vld [vmem:[%s11867_s5 + $0x11ac] ss:$16 sps:$4 sm:$0xff]   ;;  %v9846_v3 = vld [vmem:[%s11867_s5 + $0x11a0] ss:$16 sps:$4 sm:$0xff]  }
 0x3a0   : > { %7070 = vmatpush1.bf16.msra.mxu0 %v9762_v5  ;;  %7603 = vmatpush1.bf16.msra.mxu1 %v9765_v6  ;;  %v9849_v5 = vld [vmem:[%s11867_s5 + $0x11a8] ss:$16 sps:$4 sm:$0xff]   ;;  %v9854_v6 = vld [vmem:[%s11867_s5 + $0x11c4] ss:$16 sps:$4 sm:$0xff]  }
 0x3a1   : > { %7080 = vmatprep.subr.bf16.mxu0 %v9770_v7  ;;  %7613 = vmatprep.subr.bf16.mxu1 %v9773_v57  ;;  %v9857_v7 = vld [vmem:[%s11867_s5 + $0x11cc] ss:$16 sps:$4 sm:$0xff]   ;;  %v9852_v57 = vld [vmem:[%s11867_s5 + $0x11c0] ss:$16 sps:$4 sm:$0xff]  }
 0x3a3   : > { %7072 = vmatmul.mubr.bf16.vlgmr.msra.gmra.mrb[0].mxu0 %v2738_v9  ;;  %7605 = vmatmul.mubr.bf16.vlgmr.msra.gmra.mrb[0].mxu1 %v2738_v9  ;;  %v9860_v9 = vld [vmem:[%s11867_s5 + $0x11e4] ss:$16 sps:$4 sm:$0xff]  }
 0x3a4   : > { %7081 = vmatpush1.bf16.msra.mxu0 %v9768_v10  ;;  %7614 = vmatpush1.bf16.msra.mxu1 %v9771_v2  ;;  %v9863_v10 = vld [vmem:[%s11867_s5 + $0x11ec] ss:$16 sps:$4 sm:$0xff]   ;;  %v9858_v2 = vld [vmem:[%s11867_s5 + $0x11e0] ss:$16 sps:$4 sm:$0xff]  }
 0x3a5   : > { %7082 = vmatprep.subr.bf16.mxu0 %v9776_v11  ;;  %7615 = vmatprep.subr.bf16.mxu1 %v9779_v12  ;;  %v9861_v11 = vld [vmem:[%s11867_s5 + $0x11e8] ss:$16 sps:$4 sm:$0xff]   ;;  %v9866_v12 = vld [vmem:[%s11867_s5 + $0x1204] ss:$16 sps:$4 sm:$0xff]  }
 0x3a6   : > { %7112 = vmatprep.mubr.bf16.mxu0 %v12490_v13  ;;  %7645 = vmatprep.mubr.bf16.mxu1 %v12490_v13 }
 0x3a8   : > { %7083 = vmatpush1.bf16.msra.mxu0 %v9774_v34  ;;  %7616 = vmatpush1.bf16.msra.mxu1 %v9777_v14  ;;  %v9869_v34 = vld [vmem:[%s11867_s5 + $0x120c] ss:$16 sps:$4 sm:$0xff]   ;;  %v12556_v14 = vrot.slane %v12475_v4, %v11872_v24  ;;  %v9870_v4 = vld [vmem:[%s11867_s5 + $0x1220] ss:$16 sps:$4 sm:$0xff]  }
 0x3a9   : > { %7084 = vmatprep.subr.bf16.mxu0 %v9782_v15  ;;  %7617 = vmatprep.subr.bf16.mxu1 %v9785_v16  ;;  %v9864_v15 = vld [vmem:[%s11867_s5 + $0x1200] ss:$16 sps:$4 sm:$0xff]   ;;  %v9867_v16 = vld [vmem:[%s11867_s5 + $0x1208] ss:$16 sps:$4 sm:$0xff]  }
 0x3ac   : > { %7085 = vmatpush1.bf16.msra.mxu0 %v9780_v17  ;;  %7618 = vmatpush1.bf16.msra.mxu1 %v9783_v18  ;;  %v9872_v17 = vld [vmem:[%s11867_s5 + $0x1224] ss:$16 sps:$4 sm:$0xff]   ;;  %v9875_v18 = vld [vmem:[%s11867_s5 + $0x122c] ss:$16 sps:$4 sm:$0xff]  }
 0x3ad   : > { %7086 = vmatprep.subr.bf16.mxu0 %v9788_v21  ;;  %7619 = vmatprep.subr.bf16.mxu1 %v9791_v22  ;;  %v2788_v21 = vcombine.high %v12490_v13, %v12490_v13  ;;  %v9873_v22 = vld [vmem:[%s11867_s5 + $0x1228] ss:$16 sps:$4 sm:$0xff]   ;;  %v9876_v13 = vld [vmem:[%s11867_s5 + $0x1240] ss:$16 sps:$4 sm:$0xff]  }
 0x3b0   : > { %7087 = vmatpush1.bf16.msra.mxu0 %v9786_v23  ;;  %7620 = vmatpush1.bf16.msra.mxu1 %v9789_v25  ;;  %v9878_v23 = vld [vmem:[%s11867_s5 + $0x1244] ss:$16 sps:$4 sm:$0xff]   ;;  %v9881_v25 = vld [vmem:[%s11867_s5 + $0x124c] ss:$16 sps:$4 sm:$0xff]  }
 0x3b1   : > { %7088 = vmatprep.subr.bf16.mxu0 %v9794_v26  ;;  %7621 = vmatprep.subr.bf16.mxu1 %v9797_v27  ;;  %v9879_v26 = vld [vmem:[%s11867_s5 + $0x1248] ss:$16 sps:$4 sm:$0xff]   ;;  %v9884_v27 = vld [vmem:[%s11867_s5 + $0x1264] ss:$16 sps:$4 sm:$0xff]  }
 0x3b4   : > { %7089 = vmatpush1.bf16.msra.mxu0 %v9792_v29  ;;  %7622 = vmatpush1.bf16.msra.mxu1 %v9795_v30  ;;  %v9887_v29 = vld [vmem:[%s11867_s5 + $0x126c] ss:$16 sps:$4 sm:$0xff]   ;;  %v9882_v30 = vld [vmem:[%s11867_s5 + $0x1260] ss:$16 sps:$4 sm:$0xff]  }
 0x3b5   : > { %7090 = vmatprep.subr.bf16.mxu0 %v9800_v31  ;;  %7623 = vmatprep.subr.bf16.mxu1 %v9803_v32  ;;  %v9885_v31 = vld [vmem:[%s11867_s5 + $0x1268] ss:$16 sps:$4 sm:$0xff]   ;;  %v9890_v32 = vld [vmem:[%s11867_s5 + $0x1284] ss:$16 sps:$4 sm:$0xff]  }
 0x3b8   : > { %7091 = vmatpush1.bf16.msra.mxu0 %v9798_v33  ;;  %7624 = vmatpush1.bf16.msra.mxu1 %v9801_v36  ;;  %v9893_v33 = vld [vmem:[%s11867_s5 + $0x128c] ss:$16 sps:$4 sm:$0xff]   ;;  %v9888_v36 = vld [vmem:[%s11867_s5 + $0x1280] ss:$16 sps:$4 sm:$0xff]  }
 0x3b9   : > { %7092 = vmatprep.subr.bf16.mxu0 %v9806_v38  ;;  %7625 = vmatprep.subr.bf16.mxu1 %v9809_v20  ;;  %v9891_v38 = vld [vmem:[%s11867_s5 + $0x1288] ss:$16 sps:$4 sm:$0xff]   ;;  %v9896_v20 = vld [vmem:[%s11867_s5 + $0x12a4] ss:$16 sps:$4 sm:$0xff]  }
 0x3bc   : > { %7093 = vmatpush1.bf16.msra.mxu0 %v9804_v39  ;;  %7626 = vmatpush1.bf16.msra.mxu1 %v9807_v28  ;;  %v9899_v39 = vld [vmem:[%s11867_s5 + $0x12ac] ss:$16 sps:$4 sm:$0xff]   ;;  %v9894_v28 = vld [vmem:[%s11867_s5 + $0x12a0] ss:$16 sps:$4 sm:$0xff]  }
 0x3bd   : > { %7094 = vmatprep.subr.bf16.mxu0 %v9812_v40  ;;  %7627 = vmatprep.subr.bf16.mxu1 %v9815_v41  ;;  %v9897_v40 = vld [vmem:[%s11867_s5 + $0x12a8] ss:$16 sps:$4 sm:$0xff]   ;;  %v9902_v41 = vld [vmem:[%s11867_s5 + $0x12c4] ss:$16 sps:$4 sm:$0xff]  }
 0x3c0   : > { %7095 = vmatpush1.bf16.msra.mxu0 %v9810_v42  ;;  %7628 = vmatpush1.bf16.msra.mxu1 %v9813_v43  ;;  %v9905_v42 = vld [vmem:[%s11867_s5 + $0x12cc] ss:$16 sps:$4 sm:$0xff]   ;;  %v9900_v43 = vld [vmem:[%s11867_s5 + $0x12c0] ss:$16 sps:$4 sm:$0xff]  }
 0x3c1   : > { %7096 = vmatprep.subr.bf16.mxu0 %v9818_v45  ;;  %7629 = vmatprep.subr.bf16.mxu1 %v9821_v46  ;;  %v9903_v45 = vld [vmem:[%s11867_s5 + $0x12c8] ss:$16 sps:$4 sm:$0xff]   ;;  %v9908_v46 = vld [vmem:[%s11867_s5 + $0x12e4] ss:$16 sps:$4 sm:$0xff]  }
 0x3c4   : > { %7097 = vmatpush1.bf16.msra.mxu0 %v9816_v47  ;;  %7630 = vmatpush1.bf16.msra.mxu1 %v9819_v48  ;;  %v9911_v47 = vld [vmem:[%s11867_s5 + $0x12ec] ss:$16 sps:$4 sm:$0xff]   ;;  %v9906_v48 = vld [vmem:[%s11867_s5 + $0x12e0] ss:$16 sps:$4 sm:$0xff]  }
 0x3c5   : > { %7098 = vmatprep.subr.bf16.mxu0 %v9824_v49  ;;  %7631 = vmatprep.subr.bf16.mxu1 %v9827_v50  ;;  %v9909_v49 = vld [vmem:[%s11867_s5 + $0x12e8] ss:$16 sps:$4 sm:$0xff]   ;;  %v9914_v50 = vld [vmem:[%s11867_s5 + $0x1304] ss:$16 sps:$4 sm:$0xff]  }
 0x3c8   : > { %7099 = vmatpush1.bf16.msra.mxu0 %v9822_v35  ;;  %7632 = vmatpush1.bf16.msra.mxu1 %v9825_v51  ;;  %v9917_v35 = vld [vmem:[%s11867_s5 + $0x130c] ss:$16 sps:$4 sm:$0xff]   ;;  %v9912_v51 = vld [vmem:[%s11867_s5 + $0x1300] ss:$16 sps:$4 sm:$0xff]  }
 0x3c9   : > { %7100 = vmatprep.subr.bf16.mxu0 %v9830_v52  ;;  %7633 = vmatprep.subr.bf16.mxu1 %v9833_v44  ;;  %v9915_v52 = vld [vmem:[%s11867_s5 + $0x1308] ss:$16 sps:$4 sm:$0xff]   ;;  %v9920_v44 = vld [vmem:[%s11867_s5 + $0x1324] ss:$16 sps:$4 sm:$0xff]  }
 0x3cc   : > { %7101 = vmatpush1.bf16.msra.mxu0 %v9828_v53  ;;  %7634 = vmatpush1.bf16.msra.mxu1 %v9831_v55  ;;  %v9923_v53 = vld [vmem:[%s11867_s5 + $0x132c] ss:$16 sps:$4 sm:$0xff]   ;;  %v9918_v55 = vld [vmem:[%s11867_s5 + $0x1320] ss:$16 sps:$4 sm:$0xff]  }
 0x3cd   : > { %7102 = vmatprep.subr.bf16.mxu0 %v9836_v56  ;;  %7635 = vmatprep.subr.bf16.mxu1 %v9839_v58  ;;  %v9921_v56 = vld [vmem:[%s11867_s5 + $0x1328] ss:$16 sps:$4 sm:$0xff]   ;;  %v9926_v58 = vld [vmem:[%s11867_s5 + $0x1344] ss:$16 sps:$4 sm:$0xff]  }
 0x3d0   : > { %7103 = vmatpush1.bf16.msra.mxu0 %v9834_v59  ;;  %7636 = vmatpush1.bf16.msra.mxu1 %v9837_v37  ;;  %v9929_v59 = vld [vmem:[%s11867_s5 + $0x134c] ss:$16 sps:$4 sm:$0xff]   ;;  %v9924_v37 = vld [vmem:[%s11867_s5 + $0x1340] ss:$16 sps:$4 sm:$0xff]  }
 0x3d1   : > { %7104 = vmatprep.subr.bf16.mxu0 %v9842_v60  ;;  %7637 = vmatprep.subr.bf16.mxu1 %v9845_v61  ;;  %v9927_v60 = vld [vmem:[%s11867_s5 + $0x1348] ss:$16 sps:$4 sm:$0xff]   ;;  %v9932_v61 = vld [vmem:[%s11867_s5 + $0x1364] ss:$16 sps:$4 sm:$0xff]  }
 0x3d4   : > { %7105 = vmatpush1.bf16.msra.mxu0 %v9840_v62  ;;  %7638 = vmatpush1.bf16.msra.mxu1 %v9843_v63  ;;  %v9935_v62 = vld [vmem:[%s11867_s5 + $0x136c] ss:$16 sps:$4 sm:$0xff]   ;;  %v9930_v63 = vld [vmem:[%s11867_s5 + $0x1360] ss:$16 sps:$4 sm:$0xff]  }
 0x3d5   : > { %7106 = vmatprep.subr.bf16.mxu0 %v9848_v0  ;;  %7639 = vmatprep.subr.bf16.mxu1 %v9851_v1  ;;  %v9933_v0 = vld [vmem:[%s11867_s5 + $0x1368] ss:$16 sps:$4 sm:$0xff]   ;;  %v9938_v1 = vld [vmem:[%s11867_s5 + $0x1384] ss:$16 sps:$4 sm:$0xff]  }
 0x3d8   : > { %7107 = vmatpush1.bf16.msra.mxu0 %v9846_v3  ;;  %7640 = vmatpush1.bf16.msra.mxu1 %v9849_v5  ;;  %v9941_v3 = vld [vmem:[%s11867_s5 + $0x138c] ss:$16 sps:$4 sm:$0xff]   ;;  %v9936_v5 = vld [vmem:[%s11867_s5 + $0x1380] ss:$16 sps:$4 sm:$0xff]  }
 0x3d9   : > { %7108 = vmatprep.subr.bf16.mxu0 %v9854_v6  ;;  %7641 = vmatprep.subr.bf16.mxu1 %v9857_v7  ;;  %v9939_v6 = vld [vmem:[%s11867_s5 + $0x1388] ss:$16 sps:$4 sm:$0xff]   ;;  %v9944_v7 = vld [vmem:[%s11867_s5 + $0x13a4] ss:$16 sps:$4 sm:$0xff]  }
 0x3dc   : > { %7109 = vmatpush1.bf16.msra.mxu0 %v9852_v57  ;;  %7642 = vmatpush1.bf16.msra.mxu1 %v9855_v8  ;;  %v9947_v57 = vld [vmem:[%s11867_s5 + $0x13ac] ss:$16 sps:$4 sm:$0xff]   ;;  %v9942_v8 = vld [vmem:[%s11867_s5 + $0x13a0] ss:$16 sps:$4 sm:$0xff]  }
 0x3dd   : > { %7110 = vmatprep.subr.bf16.mxu0 %v9860_v9  ;;  %7643 = vmatprep.subr.bf16.mxu1 %v9863_v10  ;;  %v9945_v9 = vld [vmem:[%s11867_s5 + $0x13a8] ss:$16 sps:$4 sm:$0xff]   ;;  %v9950_v10 = vld [vmem:[%s11867_s5 + $0x13c4] ss:$16 sps:$4 sm:$0xff]  }
 0x3e0   : > { %7111 = vmatpush1.bf16.msra.mxu0 %v9858_v2  ;;  %7644 = vmatpush1.bf16.msra.mxu1 %v9861_v11  ;;  %v9953_v2 = vld [vmem:[%s11867_s5 + $0x13cc] ss:$16 sps:$4 sm:$0xff]   ;;  %v2741_v11 = vcombine.high %v12467_v54, %v12467_v54  ;;  %v9954_v54 = vld [vmem:[%s11867_s5 + $0x13e0] ss:$16 sps:$4 sm:$0xff]  }
 0x3e1   : > { %7121 = vmatprep.subr.bf16.mxu0 %v9866_v12  ;;  %7654 = vmatprep.subr.bf16.mxu1 %v9869_v34  ;;  %v9948_v12 = vld [vmem:[%s11867_s5 + $0x13c0] ss:$16 sps:$4 sm:$0xff]   ;;  %v9951_v34 = vld [vmem:[%s11867_s5 + $0x13c8] ss:$16 sps:$4 sm:$0xff]  }
 0x3e3   : > { %7113 = vmatmul.mubr.bf16.vlgmr.msra.gmra.mrb[0].mxu0 %v12556_v14  ;;  %7646 = vmatmul.mubr.bf16.vlgmr.msra.gmra.mrb[0].mxu1 %v12556_v14 }
 0x3e4   : > { %7122 = vmatpush1.bf16.msra.mxu0 %v9864_v15  ;;  %7655 = vmatpush1.bf16.msra.mxu1 %v9867_v16  ;;  %v9956_v15 = vld [vmem:[%s11867_s5 + $0x13e4] ss:$16 sps:$4 sm:$0xff]   ;;  %v9959_v16 = vld [vmem:[%s11867_s5 + $0x13ec] ss:$16 sps:$4 sm:$0xff]  }
 0x3e5   : > { %7123 = vmatprep.subr.bf16.mxu0 %v9872_v17  ;;  %7656 = vmatprep.subr.bf16.mxu1 %v9875_v18  ;;  %v12625_v17 = vrot.slane %v2741_v11, %v11872_v24  ;;  %v9957_v18 = vld [vmem:[%s11867_s5 + $0x13e8] ss:$16 sps:$4 sm:$0xff]  }
 0x3e6   : > { %7153 = vmatprep.mubr.bf16.mxu0 %v2788_v21  ;;  %7686 = vmatprep.mubr.bf16.mxu1 %v2788_v21  ;;  %v9962_v21 = vld [vmem:[%s11867_s5 + $0x1404] ss:$16 sps:$4 sm:$0xff]   ;;  %v10035_v11 = vld [vmem:[%s11867_s5 + $0x1588] ss:$16 sps:$4 sm:$0xff]  }
 0x3e8   : > { %7124 = vmatpush1.bf16.msra.mxu0 %v9870_v4  ;;  %7657 = vmatpush1.bf16.msra.mxu1 %v9873_v22  ;;  %v9965_v4 = vld [vmem:[%s11867_s5 + $0x140c] ss:$16 sps:$4 sm:$0xff]   ;;  %v2757_v22 = vcombine.high %v12625_v17, %v12625_v17 }
 0x3e9   : > { %7125 = vmatprep.subr.bf16.mxu0 %v9878_v23  ;;  %7658 = vmatprep.subr.bf16.mxu1 %v9881_v25  ;;  %v2786_v23 = vcombine.high %v12556_v14, %v12556_v14  ;;  %v9960_v25 = vld [vmem:[%s11867_s5 + $0x1400] ss:$16 sps:$4 sm:$0xff]  }
 0x3ea   : > { %v9966_v14 = vld [vmem:[%s11867_s5 + $0x1420] ss:$16 sps:$4 sm:$0xff]  }
 0x3ec   : > { %7126 = vmatpush1.bf16.msra.mxu0 %v9876_v13  ;;  %7659 = vmatpush1.bf16.msra.mxu1 %v9879_v26  ;;  %v9963_v13 = vld [vmem:[%s11867_s5 + $0x1408] ss:$16 sps:$4 sm:$0xff]   ;;  %v9968_v26 = vld [vmem:[%s11867_s5 + $0x1424] ss:$16 sps:$4 sm:$0xff]  }
 0x3ed   : > { %7127 = vmatprep.subr.bf16.mxu0 %v9884_v27  ;;  %7660 = vmatprep.subr.bf16.mxu1 %v9887_v29  ;;  %v9971_v27 = vld [vmem:[%s11867_s5 + $0x142c] ss:$16 sps:$4 sm:$0xff]   ;;  %v12640_v29 = vrot.slane %v2757_v22, %v11872_v24  ;;  %v10052_v22 = vld [vmem:[%s11867_s5 + $0x15e4] ss:$16 sps:$4 sm:$0xff]  }
 0x3f0   : > { %7128 = vmatpush1.bf16.msra.mxu0 %v9882_v30  ;;  %7661 = vmatpush1.bf16.msra.mxu1 %v9885_v31  ;;  %v9969_v30 = vld [vmem:[%s11867_s5 + $0x1428] ss:$16 sps:$4 sm:$0xff]   ;;  %v9974_v31 = vld [vmem:[%s11867_s5 + $0x1444] ss:$16 sps:$4 sm:$0xff]  }
 0x3f1   : > { %7129 = vmatprep.subr.bf16.mxu0 %v9890_v32  ;;  %7662 = vmatprep.subr.bf16.mxu1 %v9893_v33  ;;  %v9977_v32 = vld [vmem:[%s11867_s5 + $0x144c] ss:$16 sps:$4 sm:$0xff]   ;;  %v9972_v33 = vld [vmem:[%s11867_s5 + $0x1440] ss:$16 sps:$4 sm:$0xff]  }
 0x3f4   : > { %7130 = vmatpush1.bf16.msra.mxu0 %v9888_v36  ;;  %7663 = vmatpush1.bf16.msra.mxu1 %v9891_v38  ;;  %v9975_v36 = vld [vmem:[%s11867_s5 + $0x1448] ss:$16 sps:$4 sm:$0xff]   ;;  %v9980_v38 = vld [vmem:[%s11867_s5 + $0x1464] ss:$16 sps:$4 sm:$0xff]  }
 0x3f5   : > { %7131 = vmatprep.subr.bf16.mxu0 %v9896_v20  ;;  %7664 = vmatprep.subr.bf16.mxu1 %v9899_v39  ;;  %v9983_v20 = vld [vmem:[%s11867_s5 + $0x146c] ss:$16 sps:$4 sm:$0xff]   ;;  %v9978_v39 = vld [vmem:[%s11867_s5 + $0x1460] ss:$16 sps:$4 sm:$0xff]  }
 0x3f8   : > { %7132 = vmatpush1.bf16.msra.mxu0 %v9894_v28  ;;  %7665 = vmatpush1.bf16.msra.mxu1 %v9897_v40  ;;  %v9981_v28 = vld [vmem:[%s11867_s5 + $0x1468] ss:$16 sps:$4 sm:$0xff]   ;;  %v9986_v40 = vld [vmem:[%s11867_s5 + $0x1484] ss:$16 sps:$4 sm:$0xff]  }
 0x3f9   : > { %7133 = vmatprep.subr.bf16.mxu0 %v9902_v41  ;;  %7666 = vmatprep.subr.bf16.mxu1 %v9905_v42  ;;  %v9989_v41 = vld [vmem:[%s11867_s5 + $0x148c] ss:$16 sps:$4 sm:$0xff]   ;;  %v9984_v42 = vld [vmem:[%s11867_s5 + $0x1480] ss:$16 sps:$4 sm:$0xff]  }
 0x3fc   : > { %7134 = vmatpush1.bf16.msra.mxu0 %v9900_v43  ;;  %7667 = vmatpush1.bf16.msra.mxu1 %v9903_v45  ;;  %v9987_v43 = vld [vmem:[%s11867_s5 + $0x1488] ss:$16 sps:$4 sm:$0xff]   ;;  %v9992_v45 = vld [vmem:[%s11867_s5 + $0x14a4] ss:$16 sps:$4 sm:$0xff]  }
 0x3fd   : > { %7135 = vmatprep.subr.bf16.mxu0 %v9908_v46  ;;  %7668 = vmatprep.subr.bf16.mxu1 %v9911_v47  ;;  %v9995_v46 = vld [vmem:[%s11867_s5 + $0x14ac] ss:$16 sps:$4 sm:$0xff]   ;;  %v9990_v47 = vld [vmem:[%s11867_s5 + $0x14a0] ss:$16 sps:$4 sm:$0xff]  }
 0x400   : > { %7136 = vmatpush1.bf16.msra.mxu0 %v9906_v48  ;;  %7669 = vmatpush1.bf16.msra.mxu1 %v9909_v49  ;;  %v9993_v48 = vld [vmem:[%s11867_s5 + $0x14a8] ss:$16 sps:$4 sm:$0xff]   ;;  %v9998_v49 = vld [vmem:[%s11867_s5 + $0x14c4] ss:$16 sps:$4 sm:$0xff]  }
 0x401   : > { %7137 = vmatprep.subr.bf16.mxu0 %v9914_v50  ;;  %7670 = vmatprep.subr.bf16.mxu1 %v9917_v35  ;;  %v10001_v50 = vld [vmem:[%s11867_s5 + $0x14cc] ss:$16 sps:$4 sm:$0xff]   ;;  %v9996_v35 = vld [vmem:[%s11867_s5 + $0x14c0] ss:$16 sps:$4 sm:$0xff]  }
 0x404   : > { %7138 = vmatpush1.bf16.msra.mxu0 %v9912_v51  ;;  %7671 = vmatpush1.bf16.msra.mxu1 %v9915_v52  ;;  %v9999_v51 = vld [vmem:[%s11867_s5 + $0x14c8] ss:$16 sps:$4 sm:$0xff]   ;;  %v10004_v52 = vld [vmem:[%s11867_s5 + $0x14e4] ss:$16 sps:$4 sm:$0xff]  }
 0x405   : > { %7139 = vmatprep.subr.bf16.mxu0 %v9920_v44  ;;  %7672 = vmatprep.subr.bf16.mxu1 %v9923_v53  ;;  %v10007_v44 = vld [vmem:[%s11867_s5 + $0x14ec] ss:$16 sps:$4 sm:$0xff]   ;;  %v10002_v53 = vld [vmem:[%s11867_s5 + $0x14e0] ss:$16 sps:$4 sm:$0xff]  }
 0x408   : > { %7140 = vmatpush1.bf16.msra.mxu0 %v9918_v55  ;;  %7673 = vmatpush1.bf16.msra.mxu1 %v9921_v56  ;;  %v10005_v55 = vld [vmem:[%s11867_s5 + $0x14e8] ss:$16 sps:$4 sm:$0xff]   ;;  %v10010_v56 = vld [vmem:[%s11867_s5 + $0x1504] ss:$16 sps:$4 sm:$0xff]  }
 0x409   : > { %7141 = vmatprep.subr.bf16.mxu0 %v9926_v58  ;;  %7674 = vmatprep.subr.bf16.mxu1 %v9929_v59  ;;  %v10013_v58 = vld [vmem:[%s11867_s5 + $0x150c] ss:$16 sps:$4 sm:$0xff]   ;;  %v10008_v59 = vld [vmem:[%s11867_s5 + $0x1500] ss:$16 sps:$4 sm:$0xff]  }
 0x40c   : > { %7142 = vmatpush1.bf16.msra.mxu0 %v9924_v37  ;;  %7675 = vmatpush1.bf16.msra.mxu1 %v9927_v60  ;;  %v10011_v37 = vld [vmem:[%s11867_s5 + $0x1508] ss:$16 sps:$4 sm:$0xff]   ;;  %v10016_v60 = vld [vmem:[%s11867_s5 + $0x1524] ss:$16 sps:$4 sm:$0xff]  }
 0x40d   : > { %7143 = vmatprep.subr.bf16.mxu0 %v9932_v61  ;;  %7676 = vmatprep.subr.bf16.mxu1 %v9935_v62  ;;  %v10019_v61 = vld [vmem:[%s11867_s5 + $0x152c] ss:$16 sps:$4 sm:$0xff]   ;;  %v10014_v62 = vld [vmem:[%s11867_s5 + $0x1520] ss:$16 sps:$4 sm:$0xff]  }
 0x410   : > { %7144 = vmatpush1.bf16.msra.mxu0 %v9930_v63  ;;  %7677 = vmatpush1.bf16.msra.mxu1 %v9933_v0  ;;  %v10017_v63 = vld [vmem:[%s11867_s5 + $0x1528] ss:$16 sps:$4 sm:$0xff]   ;;  %v10022_v0 = vld [vmem:[%s11867_s5 + $0x1544] ss:$16 sps:$4 sm:$0xff]  }
 0x411   : > { %7145 = vmatprep.subr.bf16.mxu0 %v9938_v1  ;;  %7678 = vmatprep.subr.bf16.mxu1 %v9941_v3  ;;  %v10025_v1 = vld [vmem:[%s11867_s5 + $0x154c] ss:$16 sps:$4 sm:$0xff]   ;;  %v10020_v3 = vld [vmem:[%s11867_s5 + $0x1540] ss:$16 sps:$4 sm:$0xff]  }
 0x414   : > { %7146 = vmatpush1.bf16.msra.mxu0 %v9936_v5  ;;  %7679 = vmatpush1.bf16.msra.mxu1 %v9939_v6  ;;  %v10023_v5 = vld [vmem:[%s11867_s5 + $0x1548] ss:$16 sps:$4 sm:$0xff]   ;;  %v10028_v6 = vld [vmem:[%s11867_s5 + $0x1564] ss:$16 sps:$4 sm:$0xff]  }
 0x415   : > { %7147 = vmatprep.subr.bf16.mxu0 %v9944_v7  ;;  %7680 = vmatprep.subr.bf16.mxu1 %v9947_v57  ;;  %v10031_v7 = vld [vmem:[%s11867_s5 + $0x156c] ss:$16 sps:$4 sm:$0xff]   ;;  %v10026_v57 = vld [vmem:[%s11867_s5 + $0x1560] ss:$16 sps:$4 sm:$0xff]  }
 0x418   : > { %7148 = vmatpush1.bf16.msra.mxu0 %v9942_v8  ;;  %7681 = vmatpush1.bf16.msra.mxu1 %v9945_v9  ;;  %v10029_v8 = vld [vmem:[%s11867_s5 + $0x1568] ss:$16 sps:$4 sm:$0xff]   ;;  %v10034_v9 = vld [vmem:[%s11867_s5 + $0x1584] ss:$16 sps:$4 sm:$0xff]  }
 0x419   : > { %7149 = vmatprep.subr.bf16.mxu0 %v9950_v10  ;;  %7682 = vmatprep.subr.bf16.mxu1 %v9953_v2  ;;  %v10037_v10 = vld [vmem:[%s11867_s5 + $0x158c] ss:$16 sps:$4 sm:$0xff]   ;;  %v10032_v2 = vld [vmem:[%s11867_s5 + $0x1580] ss:$16 sps:$4 sm:$0xff]  }
 0x41c   : > { %7150 = vmatpush1.bf16.msra.mxu0 %v9948_v12  ;;  %7683 = vmatpush1.bf16.msra.mxu1 %v9951_v34  ;;  %v10040_v12 = vld [vmem:[%s11867_s5 + $0x15a4] ss:$16 sps:$4 sm:$0xff]   ;;  %v10043_v34 = vld [vmem:[%s11867_s5 + $0x15ac] ss:$16 sps:$4 sm:$0xff]  }
 0x41d   : > { %7151 = vmatprep.subr.bf16.mxu0 %v9956_v15  ;;  %7684 = vmatprep.subr.bf16.mxu1 %v9959_v16  ;;  %v10038_v15 = vld [vmem:[%s11867_s5 + $0x15a0] ss:$16 sps:$4 sm:$0xff]   ;;  %v10041_v16 = vld [vmem:[%s11867_s5 + $0x15a8] ss:$16 sps:$4 sm:$0xff]  }
 0x420   : > { %7152 = vmatpush1.bf16.msra.mxu0 %v9954_v54  ;;  %7685 = vmatpush1.bf16.msra.mxu1 %v9957_v18  ;;  %v10046_v54 = vld [vmem:[%s11867_s5 + $0x15c4] ss:$16 sps:$4 sm:$0xff]   ;;  %v10049_v18 = vld [vmem:[%s11867_s5 + $0x15cc] ss:$16 sps:$4 sm:$0xff]  }
 0x421   : > { %7162 = vmatprep.subr.bf16.mxu0 %v9962_v21  ;;  %7695 = vmatprep.subr.bf16.mxu1 %v9965_v4  ;;  %v10044_v21 = vld [vmem:[%s11867_s5 + $0x15c0] ss:$16 sps:$4 sm:$0xff]   ;;  %v10047_v4 = vld [vmem:[%s11867_s5 + $0x15c8] ss:$16 sps:$4 sm:$0xff]  }
 0x423   : > { %7154 = vmatmul.mubr.bf16.vlgmr.msra.gmra.mrb[0].mxu0 %v2786_v23  ;;  %7687 = vmatmul.mubr.bf16.vlgmr.msra.gmra.mrb[0].mxu1 %v2786_v23  ;;  %v10055_v23 = vld [vmem:[%s11867_s5 + $0x15ec] ss:$16 sps:$4 sm:$0xff]  }
 0x424   : > { %7163 = vmatpush1.bf16.msra.mxu0 %v9960_v25  ;;  %7696 = vmatpush1.bf16.msra.mxu1 %v9963_v13  ;;  %v10050_v25 = vld [vmem:[%s11867_s5 + $0x15e0] ss:$16 sps:$4 sm:$0xff]   ;;  %v10053_v13 = vld [vmem:[%s11867_s5 + $0x15e8] ss:$16 sps:$4 sm:$0xff]  }
 0x425   : > { %7164 = vmatprep.subr.bf16.mxu0 %v9968_v26  ;;  %7697 = vmatprep.subr.bf16.mxu1 %v9971_v27  ;;  %v10059_v26 = vld [vmem:[%s11867_s5 + $0x1604] ss:$16 sps:$4 sm:$0xff]   ;;  %v10062_v27 = vld [vmem:[%s11867_s5 + $0x160c] ss:$16 sps:$4 sm:$0xff]  }
 0x426   : > { %7194 = vmatprep.mubr.bf16.mxu0 %v12640_v29  ;;  %7727 = vmatprep.mubr.bf16.mxu1 %v12640_v29 }
 0x428   : > { %7165 = vmatpush1.bf16.msra.mxu0 %v9966_v14  ;;  %7698 = vmatpush1.bf16.msra.mxu1 %v9969_v30  ;;  %v12706_v14 = vrot.slane %v12625_v17, %v11872_v24  ;;  %v10057_v30 = vld [vmem:[%s11867_s5 + $0x1600] ss:$16 sps:$4 sm:$0xff]  }
 0x429   : > { %7166 = vmatprep.subr.bf16.mxu0 %v9974_v31  ;;  %7699 = vmatprep.subr.bf16.mxu1 %v9977_v32  ;;  %v10060_v31 = vld [vmem:[%s11867_s5 + $0x1608] ss:$16 sps:$4 sm:$0xff]   ;;  %v10065_v32 = vld [vmem:[%s11867_s5 + $0x1624] ss:$16 sps:$4 sm:$0xff]   ;;  %v10063_v17 = vld [vmem:[%s11867_s5 + $0x1620] ss:$16 sps:$4 sm:$0xff]  }
 0x42c   : > { %7167 = vmatpush1.bf16.msra.mxu0 %v9972_v33  ;;  %7700 = vmatpush1.bf16.msra.mxu1 %v9975_v36  ;;  %v10068_v33 = vld [vmem:[%s11867_s5 + $0x162c] ss:$16 sps:$4 sm:$0xff]   ;;  %v2789_v36 = vcombine.high %v12640_v29, %v12640_v29  ;;  %v10069_v29 = vld [vmem:[%s11867_s5 + $0x1640] ss:$16 sps:$4 sm:$0xff]  }
 0x42d   : > { %7168 = vmatprep.subr.bf16.mxu0 %v9980_v38  ;;  %7701 = vmatprep.subr.bf16.mxu1 %v9983_v20  ;;  %v10066_v38 = vld [vmem:[%s11867_s5 + $0x1628] ss:$16 sps:$4 sm:$0xff]   ;;  %v10071_v20 = vld [vmem:[%s11867_s5 + $0x1644] ss:$16 sps:$4 sm:$0xff]  }
 0x430   : > { %7169 = vmatpush1.bf16.msra.mxu0 %v9978_v39  ;;  %7702 = vmatpush1.bf16.msra.mxu1 %v9981_v28  ;;  %v10074_v39 = vld [vmem:[%s11867_s5 + $0x164c] ss:$16 sps:$4 sm:$0xff]   ;;  %v10072_v28 = vld [vmem:[%s11867_s5 + $0x1648] ss:$16 sps:$4 sm:$0xff]  }
 0x431   : > { %7170 = vmatprep.subr.bf16.mxu0 %v9986_v40  ;;  %7703 = vmatprep.subr.bf16.mxu1 %v9989_v41  ;;  %v10077_v40 = vld [vmem:[%s11867_s5 + $0x1664] ss:$16 sps:$4 sm:$0xff]   ;;  %v10080_v41 = vld [vmem:[%s11867_s5 + $0x166c] ss:$16 sps:$4 sm:$0xff]  }
 0x434   : > { %7171 = vmatpush1.bf16.msra.mxu0 %v9984_v42  ;;  %7704 = vmatpush1.bf16.msra.mxu1 %v9987_v43  ;;  %v10075_v42 = vld [vmem:[%s11867_s5 + $0x1660] ss:$16 sps:$4 sm:$0xff]   ;;  %v10078_v43 = vld [vmem:[%s11867_s5 + $0x1668] ss:$16 sps:$4 sm:$0xff]  }
 0x435   : > { %7172 = vmatprep.subr.bf16.mxu0 %v9992_v45  ;;  %7705 = vmatprep.subr.bf16.mxu1 %v9995_v46  ;;  %v10083_v45 = vld [vmem:[%s11867_s5 + $0x1684] ss:$16 sps:$4 sm:$0xff]   ;;  %v10086_v46 = vld [vmem:[%s11867_s5 + $0x168c] ss:$16 sps:$4 sm:$0xff]  }
 0x438   : > { %7173 = vmatpush1.bf16.msra.mxu0 %v9990_v47  ;;  %7706 = vmatpush1.bf16.msra.mxu1 %v9993_v48  ;;  %v10081_v47 = vld [vmem:[%s11867_s5 + $0x1680] ss:$16 sps:$4 sm:$0xff]   ;;  %v10084_v48 = vld [vmem:[%s11867_s5 + $0x1688] ss:$16 sps:$4 sm:$0xff]  }
 0x439   : > { %7174 = vmatprep.subr.bf16.mxu0 %v9998_v49  ;;  %7707 = vmatprep.subr.bf16.mxu1 %v10001_v50  ;;  %v10089_v49 = vld [vmem:[%s11867_s5 + $0x16a4] ss:$16 sps:$4 sm:$0xff]   ;;  %v10092_v50 = vld [vmem:[%s11867_s5 + $0x16ac] ss:$16 sps:$4 sm:$0xff]  }
 0x43c   : > { %7175 = vmatpush1.bf16.msra.mxu0 %v9996_v35  ;;  %7708 = vmatpush1.bf16.msra.mxu1 %v9999_v51  ;;  %v10087_v35 = vld [vmem:[%s11867_s5 + $0x16a0] ss:$16 sps:$4 sm:$0xff]   ;;  %v10090_v51 = vld [vmem:[%s11867_s5 + $0x16a8] ss:$16 sps:$4 sm:$0xff]  }
 0x43d   : > { %7176 = vmatprep.subr.bf16.mxu0 %v10004_v52  ;;  %7709 = vmatprep.subr.bf16.mxu1 %v10007_v44  ;;  %v10095_v52 = vld [vmem:[%s11867_s5 + $0x16c4] ss:$16 sps:$4 sm:$0xff]   ;;  %v10098_v44 = vld [vmem:[%s11867_s5 + $0x16cc] ss:$16 sps:$4 sm:$0xff]  }
 0x440   : > { %7177 = vmatpush1.bf16.msra.mxu0 %v10002_v53  ;;  %7710 = vmatpush1.bf16.msra.mxu1 %v10005_v55  ;;  %v10093_v53 = vld [vmem:[%s11867_s5 + $0x16c0] ss:$16 sps:$4 sm:$0xff]   ;;  %v10096_v55 = vld [vmem:[%s11867_s5 + $0x16c8] ss:$16 sps:$4 sm:$0xff]  }
 0x441   : > { %7178 = vmatprep.subr.bf16.mxu0 %v10010_v56  ;;  %7711 = vmatprep.subr.bf16.mxu1 %v10013_v58  ;;  %v10101_v56 = vld [vmem:[%s11867_s5 + $0x16e4] ss:$16 sps:$4 sm:$0xff]   ;;  %v10104_v58 = vld [vmem:[%s11867_s5 + $0x16ec] ss:$16 sps:$4 sm:$0xff]  }
 0x444   : > { %7179 = vmatpush1.bf16.msra.mxu0 %v10008_v59  ;;  %7712 = vmatpush1.bf16.msra.mxu1 %v10011_v37  ;;  %v10099_v59 = vld [vmem:[%s11867_s5 + $0x16e0] ss:$16 sps:$4 sm:$0xff]   ;;  %v10102_v37 = vld [vmem:[%s11867_s5 + $0x16e8] ss:$16 sps:$4 sm:$0xff]  }
 0x445   : > { %7180 = vmatprep.subr.bf16.mxu0 %v10016_v60  ;;  %7713 = vmatprep.subr.bf16.mxu1 %v10019_v61  ;;  %v10107_v60 = vld [vmem:[%s11867_s5 + $0x1704] ss:$16 sps:$4 sm:$0xff]   ;;  %v10110_v61 = vld [vmem:[%s11867_s5 + $0x170c] ss:$16 sps:$4 sm:$0xff]  }
 0x448   : > { %7181 = vmatpush1.bf16.msra.mxu0 %v10014_v62  ;;  %7714 = vmatpush1.bf16.msra.mxu1 %v10017_v63  ;;  %v10105_v62 = vld [vmem:[%s11867_s5 + $0x1700] ss:$16 sps:$4 sm:$0xff]   ;;  %v10108_v63 = vld [vmem:[%s11867_s5 + $0x1708] ss:$16 sps:$4 sm:$0xff]  }
 0x449   : > { %7182 = vmatprep.subr.bf16.mxu0 %v10022_v0  ;;  %7715 = vmatprep.subr.bf16.mxu1 %v10025_v1  ;;  %v10113_v0 = vld [vmem:[%s11867_s5 + $0x1724] ss:$16 sps:$4 sm:$0xff]   ;;  %v10116_v1 = vld [vmem:[%s11867_s5 + $0x172c] ss:$16 sps:$4 sm:$0xff]  }
 0x44c   : > { %7183 = vmatpush1.bf16.msra.mxu0 %v10020_v3  ;;  %7716 = vmatpush1.bf16.msra.mxu1 %v10023_v5  ;;  %v10111_v3 = vld [vmem:[%s11867_s5 + $0x1720] ss:$16 sps:$4 sm:$0xff]   ;;  %v10114_v5 = vld [vmem:[%s11867_s5 + $0x1728] ss:$16 sps:$4 sm:$0xff]  }
 0x44d   : > { %7184 = vmatprep.subr.bf16.mxu0 %v10028_v6  ;;  %7717 = vmatprep.subr.bf16.mxu1 %v10031_v7  ;;  %v10119_v6 = vld [vmem:[%s11867_s5 + $0x1744] ss:$16 sps:$4 sm:$0xff]   ;;  %v10122_v7 = vld [vmem:[%s11867_s5 + $0x174c] ss:$16 sps:$4 sm:$0xff]  }
 0x450   : > { %7185 = vmatpush1.bf16.msra.mxu0 %v10026_v57  ;;  %7718 = vmatpush1.bf16.msra.mxu1 %v10029_v8  ;;  %v10117_v57 = vld [vmem:[%s11867_s5 + $0x1740] ss:$16 sps:$4 sm:$0xff]   ;;  %v10120_v8 = vld [vmem:[%s11867_s5 + $0x1748] ss:$16 sps:$4 sm:$0xff]  }
 0x451   : > { %7186 = vmatprep.subr.bf16.mxu0 %v10034_v9  ;;  %7719 = vmatprep.subr.bf16.mxu1 %v10037_v10  ;;  %v10125_v9 = vld [vmem:[%s11867_s5 + $0x1764] ss:$16 sps:$4 sm:$0xff]   ;;  %v10128_v10 = vld [vmem:[%s11867_s5 + $0x176c] ss:$16 sps:$4 sm:$0xff]  }
 0x454   : > { %7187 = vmatpush1.bf16.msra.mxu0 %v10032_v2  ;;  %7720 = vmatpush1.bf16.msra.mxu1 %v10035_v11  ;;  %v10123_v2 = vld [vmem:[%s11867_s5 + $0x1760] ss:$16 sps:$4 sm:$0xff]   ;;  %v10126_v11 = vld [vmem:[%s11867_s5 + $0x1768] ss:$16 sps:$4 sm:$0xff]  }
 0x455   : > { %7188 = vmatprep.subr.bf16.mxu0 %v10040_v12  ;;  %7721 = vmatprep.subr.bf16.mxu1 %v10043_v34  ;;  %v10131_v12 = vld [vmem:[%s11867_s5 + $0x1784] ss:$16 sps:$4 sm:$0xff]   ;;  %v10134_v34 = vld [vmem:[%s11867_s5 + $0x178c] ss:$16 sps:$4 sm:$0xff]  }
 0x458   : > { %7189 = vmatpush1.bf16.msra.mxu0 %v10038_v15  ;;  %7722 = vmatpush1.bf16.msra.mxu1 %v10041_v16  ;;  %v10129_v15 = vld [vmem:[%s11867_s5 + $0x1780] ss:$16 sps:$4 sm:$0xff]   ;;  %v10132_v16 = vld [vmem:[%s11867_s5 + $0x1788] ss:$16 sps:$4 sm:$0xff]  }
 0x459   : > { %7190 = vmatprep.subr.bf16.mxu0 %v10046_v54  ;;  %7723 = vmatprep.subr.bf16.mxu1 %v10049_v18  ;;  %v10137_v54 = vld [vmem:[%s11867_s5 + $0x17a4] ss:$16 sps:$4 sm:$0xff]   ;;  %v10140_v18 = vld [vmem:[%s11867_s5 + $0x17ac] ss:$16 sps:$4 sm:$0xff]  }
 0x45c   : > { %7191 = vmatpush1.bf16.msra.mxu0 %v10044_v21  ;;  %7724 = vmatpush1.bf16.msra.mxu1 %v10047_v4  ;;  %v10135_v21 = vld [vmem:[%s11867_s5 + $0x17a0] ss:$16 sps:$4 sm:$0xff]   ;;  %v10138_v4 = vld [vmem:[%s11867_s5 + $0x17a8] ss:$16 sps:$4 sm:$0xff]  }
 0x45d   : > { %7192 = vmatprep.subr.bf16.mxu0 %v10052_v22  ;;  %7725 = vmatprep.subr.bf16.mxu1 %v10055_v23  ;;  %v10143_v22 = vld [vmem:[%s11867_s5 + $0x17c4] ss:$16 sps:$4 sm:$0xff]   ;;  %v10146_v23 = vld [vmem:[%s11867_s5 + $0x17cc] ss:$16 sps:$4 sm:$0xff]  }
 0x460   : > { %7193 = vmatpush1.bf16.msra.mxu0 %v10050_v25  ;;  %7726 = vmatpush1.bf16.msra.mxu1 %v10053_v13  ;;  %v10141_v25 = vld [vmem:[%s11867_s5 + $0x17c0] ss:$16 sps:$4 sm:$0xff]   ;;  %v10144_v13 = vld [vmem:[%s11867_s5 + $0x17c8] ss:$16 sps:$4 sm:$0xff]  }
 0x461   : > { %7203 = vmatprep.subr.bf16.mxu0 %v10059_v26  ;;  %7736 = vmatprep.subr.bf16.mxu1 %v10062_v27  ;;  %v10149_v26 = vld [vmem:[%s11867_s5 + $0x17e4] ss:$16 sps:$4 sm:$0xff]   ;;  %v10152_v27 = vld [vmem:[%s11867_s5 + $0x17ec] ss:$16 sps:$4 sm:$0xff]  }
 0x463   : > { %7195 = vmatmul.mubr.bf16.vlgmr.msra.gmra.mrb[0].mxu0 %v12706_v14  ;;  %7728 = vmatmul.mubr.bf16.vlgmr.msra.gmra.mrb[0].mxu1 %v12706_v14 }
 0x464   : > { %7204 = vmatpush1.bf16.msra.mxu0 %v10057_v30  ;;  %7737 = vmatpush1.bf16.msra.mxu1 %v10060_v31  ;;  %v10147_v30 = vld [vmem:[%s11867_s5 + $0x17e0] ss:$16 sps:$4 sm:$0xff]   ;;  %v10150_v31 = vld [vmem:[%s11867_s5 + $0x17e8] ss:$16 sps:$4 sm:$0xff]  }
 0x465   : > { %7205 = vmatprep.subr.bf16.mxu0 %v10065_v32  ;;  %7738 = vmatprep.subr.bf16.mxu1 %v10068_v33  ;;  %v10155_v32 = vld [vmem:[%s11867_s5 + $0x1804] ss:$16 sps:$4 sm:$0xff]   ;;  %v10158_v33 = vld [vmem:[%s11867_s5 + $0x180c] ss:$16 sps:$4 sm:$0xff]  }
 0x466   : > { %7235 = vmatprep.mubr.bf16.mxu0 %v2789_v36  ;;  %7768 = vmatprep.mubr.bf16.mxu1 %v2789_v36  ;;  %v2787_v36 = vcombine.high %v12706_v14, %v12706_v14  ;;  %v10162_v14 = vld [vmem:[%s11867_s5 + $0x1828] ss:$16 sps:$4 sm:$0xff]  }
 0x468   : > { %7206 = vmatpush1.bf16.msra.mxu0 %v10063_v17  ;;  %7739 = vmatpush1.bf16.msra.mxu1 %v10066_v38  ;;  %v10153_v17 = vld [vmem:[%s11867_s5 + $0x1800] ss:$16 sps:$4 sm:$0xff]   ;;  %v10156_v38 = vld [vmem:[%s11867_s5 + $0x1808] ss:$16 sps:$4 sm:$0xff]  }
 0x469   : > { %7207 = vmatprep.subr.bf16.mxu0 %v10071_v20  ;;  %7740 = vmatprep.subr.bf16.mxu1 %v10074_v39  ;;  %v10161_v20 = vld [vmem:[%s11867_s5 + $0x1824] ss:$16 sps:$4 sm:$0xff]   ;;  %v10164_v39 = vld [vmem:[%s11867_s5 + $0x182c] ss:$16 sps:$4 sm:$0xff]  }
 0x46c   : > { %7208 = vmatpush1.bf16.msra.mxu0 %v10069_v29  ;;  %7741 = vmatpush1.bf16.msra.mxu1 %v10072_v28  ;;  %v10159_v29 = vld [vmem:[%s11867_s5 + $0x1820] ss:$16 sps:$4 sm:$0xff]   ;;  %v10167_v28 = vld [vmem:[%s11867_s5 + $0x1844] ss:$16 sps:$4 sm:$0xff]  }
 0x46d   : > { %7209 = vmatprep.subr.bf16.mxu0 %v10077_v40  ;;  %7742 = vmatprep.subr.bf16.mxu1 %v10080_v41  ;;  %v10170_v40 = vld [vmem:[%s11867_s5 + $0x184c] ss:$16 sps:$4 sm:$0xff]   ;;  %v10220_v41 = vmov 0  }
 0x470   : > { %7210 = vmatpush1.bf16.msra.mxu0 %v10075_v42  ;;  %7743 = vmatpush1.bf16.msra.mxu1 %v10078_v43  ;;  %v10165_v42 = vld [vmem:[%s11867_s5 + $0x1840] ss:$16 sps:$4 sm:$0xff]   ;;  %v10168_v43 = vld [vmem:[%s11867_s5 + $0x1848] ss:$16 sps:$4 sm:$0xff]  }
 0x471   : > { %7211 = vmatprep.subr.bf16.mxu0 %v10083_v45  ;;  %7744 = vmatprep.subr.bf16.mxu1 %v10086_v46  ;;  %v10173_v45 = vld [vmem:[%s11867_s5 + $0x1864] ss:$16 sps:$4 sm:$0xff]   ;;  %v10176_v46 = vld [vmem:[%s11867_s5 + $0x186c] ss:$16 sps:$4 sm:$0xff]  }
 0x474   : > { %7212 = vmatpush1.bf16.msra.mxu0 %v10081_v47  ;;  %7745 = vmatpush1.bf16.msra.mxu1 %v10084_v48  ;;  %v10171_v47 = vld [vmem:[%s11867_s5 + $0x1860] ss:$16 sps:$4 sm:$0xff]   ;;  %v10174_v48 = vld [vmem:[%s11867_s5 + $0x1868] ss:$16 sps:$4 sm:$0xff]  }
 0x475   : > { %7213 = vmatprep.subr.bf16.mxu0 %v10089_v49  ;;  %7746 = vmatprep.subr.bf16.mxu1 %v10092_v50  ;;  %v8064_v49 = vld.sshfl [vmem:[%s12829_s0 + $0x18] sm:$0x1 pattern:$0x75316420] }
 0x476   : > { %v2803_v50 = vrot.slane %v8064_v49, %v11872_v24 }
 0x478   : > { %7214 = vmatpush1.bf16.msra.mxu0 %v10087_v35  ;;  %7747 = vmatpush1.bf16.msra.mxu1 %v10090_v51  ;;  %v10221_v35 = vmov 1983009808  }
 0x479   : > { %7215 = vmatprep.subr.bf16.mxu0 %v10095_v52  ;;  %7748 = vmatprep.subr.bf16.mxu1 %v10098_v44  ;;  %v7825_v51 = vunpack.c.l.s4 %v10221_v35  ;;  %v7850_v52 = vsub.s32 0, %v11860_v19  ;;  %v7854_v44 = vsub.s32 1, %v11860_v19 }
 0x47c   : > { %7216 = vmatpush1.bf16.msra.mxu0 %v10093_v53  ;;  %7749 = vmatpush1.bf16.msra.mxu1 %v10096_v55  ;;  %v7858_v53 = vsub.s32 2, %v11860_v19  ;;  %v7862_v55 = vsub.s32 3, %v11860_v19 }
 0x47d   : > { %7217 = vmatprep.subr.bf16.mxu0 %v10101_v56  ;;  %7750 = vmatprep.subr.bf16.mxu1 %v10104_v58  ;;  %v7846_v56 = vld [vmem:[%s1833_s23] sm:$0xf]  ;;  %v7826_v58 = vunpack.c.0.s8 %v7825_v51 }
 0x480   : > { %7218 = vmatpush1.bf16.msra.mxu0 %v10099_v59  ;;  %7751 = vmatpush1.bf16.msra.mxu1 %v10102_v37  ;;  %v7851_v59 = vrot.slane %v7846_v56, %v7850_v52  ;;  %v7855_v37 = vrot.slane %v7846_v56, %v7854_v44 }
 0x481   : > { %7219 = vmatprep.subr.bf16.mxu0 %v10107_v60  ;;  %7752 = vmatprep.subr.bf16.mxu1 %v10110_v61  ;;  %v7859_v60 = vrot.slane %v7846_v56, %v7858_v53  ;;  %v7863_v61 = vrot.slane %v7846_v56, %v7862_v55 }
 0x484   : > { %7220 = vmatpush1.bf16.msra.mxu0 %v10105_v62  ;;  %7753 = vmatpush1.bf16.msra.mxu1 %v10108_v63  ;;  %v7829_v62 = vsub.s32 %v7826_v58, %v11860_v19  ;;  %v7864_v63 = vcombine.low %v7851_v59, %v7855_v37 }
 0x485   : > { %7221 = vmatprep.subr.bf16.mxu0 %v10113_v0  ;;  %7754 = vmatprep.subr.bf16.mxu1 %v10116_v1  ;;  %v7865_v0 = vcombine.low %v7859_v60, %v7863_v61 }
 0x488   : > { %7222 = vmatpush1.bf16.msra.mxu0 %v10111_v3  ;;  %7755 = vmatpush1.bf16.msra.mxu1 %v10114_v5  ;;  %v7872_v5 = vrot.slane %v7864_v63, %v7829_v62 }
 0x489   : > { %7223 = vmatprep.subr.bf16.mxu0 %v10119_v6  ;;  %7756 = vmatprep.subr.bf16.mxu1 %v10122_v7  ;;  %v7879_v6 = vrot.slane %v7865_v0, %v7829_v62 }
 0x48c   : > { %7224 = vmatpush1.bf16.msra.mxu0 %v10117_v57  ;;  %7757 = vmatpush1.bf16.msra.mxu1 %v10120_v8 }
 0x48d   : > { %7225 = vmatprep.subr.bf16.mxu0 %v10125_v9  ;;  %7758 = vmatprep.subr.bf16.mxu1 %v10128_v10 }
 0x490   : > { %7226 = vmatpush1.bf16.msra.mxu0 %v10123_v2  ;;  %7759 = vmatpush1.bf16.msra.mxu1 %v10126_v11 }
 0x491   : > { %7227 = vmatprep.subr.bf16.mxu0 %v10131_v12  ;;  %7760 = vmatprep.subr.bf16.mxu1 %v10134_v34 }
 0x494   : > { %7228 = vmatpush1.bf16.msra.mxu0 %v10129_v15  ;;  %7761 = vmatpush1.bf16.msra.mxu1 %v10132_v16  ;;  %v7880_v16 = vcombine.low %v7872_v5, %v7879_v6 }
 0x495   : > { %7229 = vmatprep.subr.bf16.mxu0 %v10137_v54  ;;  %7762 = vmatprep.subr.bf16.mxu1 %v10140_v18 }
 0x498   : > { %7230 = vmatpush1.bf16.msra.mxu0 %v10135_v21  ;;  %7763 = vmatpush1.bf16.msra.mxu1 %v10138_v4 }
 0x499   : > { %7231 = vmatprep.subr.bf16.mxu0 %v10143_v22  ;;  %7764 = vmatprep.subr.bf16.mxu1 %v10146_v23 }
 0x49c   : > { %7232 = vmatpush1.bf16.msra.mxu0 %v10141_v25  ;;  %7765 = vmatpush1.bf16.msra.mxu1 %v10144_v13 }
 0x49d   : > { %7233 = vmatprep.subr.bf16.mxu0 %v10149_v26  ;;  %7766 = vmatprep.subr.bf16.mxu1 %v10152_v27 }
 0x4a0   : > { %7234 = vmatpush1.bf16.msra.mxu0 %v10147_v30  ;;  %7767 = vmatpush1.bf16.msra.mxu1 %v10150_v31 }
 0x4a1   : > { %7244 = vmatprep.subr.bf16.mxu0 %v10155_v32  ;;  %7777 = vmatprep.subr.bf16.mxu1 %v10158_v33 }
 0x4a3   : > { %7236 = vmatmul.mubr.bf16.vlgmr.msra.gmra.mrb[0].mxu0 %v2787_v36  ;;  %7769 = vmatmul.mubr.bf16.vlgmr.msra.gmra.mrb[0].mxu1 %v2787_v36 }
 0x4a4   : > { %7245 = vmatpush1.bf16.msra.mxu0 %v10153_v17  ;;  %7778 = vmatpush1.bf16.msra.mxu1 %v10156_v38 }
 0x4a5   : > { %7246 = vmatprep.subr.bf16.mxu0 %v10161_v20  ;;  %7779 = vmatprep.subr.bf16.mxu1 %v10164_v39 }
 0x4a6   : > { %7276 = vmatprep.mubr.bf16.mxu0 %v10220_v41  ;;  %7809 = vmatprep.mubr.bf16.mxu1 %v10220_v41 }
 0x4a8   : > { %7247 = vmatpush1.bf16.msra.mxu0 %v10159_v29  ;;  %7780 = vmatpush1.bf16.msra.mxu1 %v10162_v14 }
 0x4a9   : > { %7248 = vmatprep.subr.bf16.mxu0 %v10167_v28  ;;  %7781 = vmatprep.subr.bf16.mxu1 %v10170_v40 }
 0x4ac   : > { %7249 = vmatpush1.bf16.msra.mxu0 %v10165_v42  ;;  %7782 = vmatpush1.bf16.msra.mxu1 %v10168_v43 }
 0x4ad   : > { %7250 = vmatprep.subr.bf16.mxu0 %v10173_v45  ;;  %7783 = vmatprep.subr.bf16.mxu1 %v10176_v46 }
 0x4b0   : > { %7251 = vmatpush1.bf16.msra.mxu0 %v10171_v47  ;;  %7784 = vmatpush1.bf16.msra.mxu1 %v10174_v48 }
 0x4b3   : > { %8849 = vmatmul.mubr.msk.bf16.vlgmr.msra.gmra.mrb[0].mxu0 %vm6748_vm0, %v2803_v50  ;;  %8850 = vmatmul.mubr.msk.bf16.vlgmr.msra.gmra.mrb[0].mxu1 %vm6748_vm0, %v2803_v50 }
 0x586   : > { %v7278_v1 = vpop.f32.mrb[0].mxu0  ;;  %v7811_v3 = vpop.f32.mrb[0].mxu1 }
 0x587   : > { %v7280_v7 = vpop.f32.mrb[1].mxu0  ;;  %v7813_v57 = vpop.f32.mrb[1].mxu1 }
 0x588   : > { %v7822_v8 = vcombine.low %v7278_v1, %v7280_v7  ;;  %v7823_v9 = vcombine.low %v7811_v3, %v7813_v57  ;;  %v7282_v10 = vpop.f32.mrb[2].mxu0  ;;  %v7815_v2 = vpop.f32.mrb[2].mxu1 }
 0x589   : > { %v7283_v11 = vpop.f32.mrb[3].mxu0  ;;  %v7816_v12 = vpop.f32.mrb[3].mxu1 }
 0x58a   : > { %v7830_v34 = vrot.slane %v7822_v8, %v7829_v62  ;;  %v7837_v15 = vrot.slane %v7823_v9, %v7829_v62 }
 0x58c   : > { %v7838_v54 = vcombine.low %v7830_v34, %v7837_v15 }
 0x58e   : > { %v7882_v19 = vadd.f32 %v7880_v16, %v7838_v54 }
 0x590   : > { %v7883_v18 = vmax.f32 %v7882_v19, 0.0 }
 0x592   : > { %v7885_v21 = vcombine.high %v7883_v18, %v7883_v18  ;;  %v7892_v4 = vrot.slane %v7883_v18, %v7829_v62 }
 0x594   : > { %v7899_v22 = vrot.slane %v7885_v21, %v7829_v62  ;;  %v7900_v23 = vcombine.high %v7892_v4, %v7892_v4 }
 0x596   : > { %v7901_v25 = vcombine.high %v7899_v22, %v7899_v22  ;;  %v8851_v13 = vpack.c.bf16 %v7900_v23, %v7892_v4 }
 0x598   : > { %v8852_v26 = vpack.c.bf16 %v7901_v25, %v7899_v22  ;;  %v7922_v27 = vrot.slane %v8851_v13, %v11872_v24 }
 0x59a   : > { %v7929_v30 = vrot.slane %v8852_v26, %v11872_v24 }
 0x59c   : > { %v7930_v31 = vcombine.low %v7922_v27, %v7929_v30 }
 0x59e   : > { %8853 = vst.sshfl [vmem:[%s1842_s25] sm:$0x55 pattern:$0x73625140] %v7930_v31 }
 0x59f PF: > { %s13_s16 = sadd.s32 1, %s10217_s16   ;;  %s12833_s12 = smov %s10205_s13 }
 0x5a0   : > { %p10_p10 = scmp.ge.s32.totalorder %s13_s16, 4   ;;  %s12834_s13 = smov %s10277_s20 }
 0x5a1   : > { %s12835_s14 = smov %s10213_s15  ;;  %s12836_s15 = smov %s12838_s17 }
 0x5a2   :  { %12 = sbr.rel (!%p10_p10) target bundleno = 3 (0x3), region = 104 }

</bundles_post_ra>
